<compile_context>
chip_gen: v6e
topology: v6e:2x2x1
jax: 0.10.0
libtpu: 0.0.40
codegen_flags: <defaults>
</compile_context>

<pallas_src>
import functools

import jax
import jax.numpy as jnp
from jax.experimental import pallas as pl
from jax.experimental.pallas import tpu as pltpu


# ----------------------------------------------------------------------------
# Fused kernel: both branches for one (batch, window-tile) grid step.
# ----------------------------------------------------------------------------
def _fused_kernel(xw_ref, kv_ref, wqkv_ref, wq_ref, wph_ref, wpl_ref, bias_ref,
                  out_ref, oh_ref, ol_ref, *, h_heads, l_heads, head_dim):
    f32, bf16 = jnp.float32, jnp.bfloat16
    hd = head_dim
    h_dim = h_heads * hd
    l_dim = l_heads * hd

    xw = xw_ref[0]                          # (P, TG, C) bf16, windows dense on TG
    P = xw.shape[0]

    # ----------------- high-frequency branch --------------------------------
    # Window-mean removal: P is the leading axis -> pure VPU adds, f32 math.
    xf = xw.astype(f32)
    xc = (xf - jnp.mean(xf, axis=0, keepdims=True)).astype(bf16)

    # Dense-M qkv projection (second-minor dim is TG, full-K contraction over C).
    qkv = jnp.einsum("ptc,cd->ptd", xc, wqkv_ref[...],
                     preferred_element_type=f32)            # (P, TG, 3*h_dim) f32

    # P x P attention per window: P = ws*ws is tiny, so keep the window index
    # dense on sublanes/lanes and do scores / softmax / weighted sum as unrolled
    # VPU multiply-adds + lane reductions instead of batched PxP MXU matmuls.
    for h in range(h_heads):
        qh = qkv[:, :, h * hd:(h + 1) * hd]                 # scale folded into W
        kh = qkv[:, :, h_dim + h * hd:h_dim + (h + 1) * hd]
        vh = qkv[:, :, 2 * h_dim + h * hd:2 * h_dim + (h + 1) * hd]
        s = [[jnp.sum(qh[p] * kh[q], axis=-1, keepdims=True)  # (TG, 1) f32
              for q in range(P)] for p in range(P)]
        for p in range(P):
            m = s[p][0]
            for q in range(1, P):
                m = jnp.maximum(m, s[p][q])
            e = [jnp.exp(s[p][q] - m) for q in range(P)]
            den = e[0]
            for q in range(1, P):
                den = den + e[q]
            inv = pl.reciprocal(den, approx=True)
            o_p = (e[0] * inv) * vh[0]
            for q in range(1, P):
                o_p = o_p + (e[q] * inv) * vh[q]
            oh_ref[p, :, h * hd:(h + 1) * hd] = o_p.astype(bf16)

    # ----------------- low-frequency branch ---------------------------------
    q = jnp.einsum("ptc,cd->ptd", xw, wq_ref[...],
                   preferred_element_type=f32)              # (P, TG, l_dim) f32
    kv = kv_ref[0]                                          # (G, 2*l_dim) bf16
    for h in range(l_heads):
        qh = q[:, :, h * hd:(h + 1) * hd].astype(bf16)
        kh = kv[:, h * hd:(h + 1) * hd]
        vh = kv[:, l_dim + h * hd:l_dim + (h + 1) * hd]
        # TODO(synk): tile over G with an online (flash-style) softmax when G is
        # large enough that the (P*TG, G) f32 scores stress VMEM.
        s = jnp.einsum("ptd,kd->ptk", qh, kh,
                       preferred_element_type=f32)          # (P, TG, G) f32
        s = s - jnp.max(s, axis=-1, keepdims=True)
        e = jnp.exp(s)
        a = (e * pl.reciprocal(jnp.sum(e, axis=-1, keepdims=True),
                               approx=True)).astype(bf16)
        o = jnp.einsum("ptk,kd->ptd", a, vh,
                       preferred_element_type=f32)          # (P, TG, hd) f32
        ol_ref[:, :, h * hd:(h + 1) * hd] = o.astype(bf16)

    # --- fused, lane-dense C-wide output projection (channel concat folded) ---
    y = jnp.einsum("ptd,dc->ptc", oh_ref[...], wph_ref[...],
                   preferred_element_type=f32)
    y = y + jnp.einsum("ptd,dc->ptc", ol_ref[...], wpl_ref[...],
                       preferred_element_type=f32)
    y = y + bias_ref[...]                                   # (1, C) f32 broadcast
    out_ref[...] = y[None].astype(out_ref.dtype)            # (1, P, TG, C) bf16


# ----------------------------------------------------------------------------
# Generation-aware tiling helpers
# ----------------------------------------------------------------------------
def _vmem_capacity_bytes():
    try:
        info = pltpu.get_tpu_info()
        cap = getattr(info, "vmem_capacity_bytes", None)
        if cap:
            return int(cap)
    except Exception:
        pass
    return 128 * 1024 * 1024


def _pick_window_tile(G, P, C, h_dim, l_dim, budget, batch):
    """Largest window tile TG (divisor of G, layout-friendly) fitting `budget`."""
    def est(tg):
        m = tg * P
        io = 2 * 2 * m * C * 2                        # double-buffered bf16 in/out
        inter = m * (3 * h_dim + l_dim + C) * 4       # f32 qkv / l_q / y temps
        low = m * G * 10                              # one head's f32 scores + exp
        scr = m * (h_dim + l_dim) * 2                 # bf16 per-branch output scratch
        return io + inter + low + scr

    divs = [d for d in range(1, G + 1) if G % d == 0]
    aligned = [d for d in divs if d % 8 == 0 or d == G]   # sublane-friendly blocks
    fits = [d for d in aligned if est(d) <= budget]
    if not fits:
        # conservative estimate may be over budget; fall back to smallest aligned.
        # TODO(synk): non-divisor tiles (pl.cdiv grid + masking) for prime / huge G.
        fits = [min(aligned)]
    best = max(fits)
    if batch * (G // best) < 2:                       # keep both v7x cores busy
        multi = [d for d in fits if G // d >= 2]
        if multi:
            best = max(multi)
    return best


# ----------------------------------------------------------------------------
# Full forward (glue: pad, window partition/reverse; concat fused in-kernel)
# ----------------------------------------------------------------------------
def low_high_fre_attention(x, H, W, params, *, num_heads=8, window_size=2,
                           alpha=0.5, qk_scale=None):
    B, N, C = x.shape
    ws = window_size
    assert C % num_heads == 0
    l_heads = int(num_heads * alpha)
    h_heads = num_heads - l_heads
    head_dim = C // num_heads
    l_dim = l_heads * head_dim
    h_dim = h_heads * head_dim
    scale = qk_scale if qk_scale is not None else head_dim ** (-0.5)
    # TODO(synk): alpha == 0 / alpha == 1 single-branch variants not implemented.
    assert l_heads > 0 and h_heads > 0

    f32, bf16 = jnp.float32, jnp.bfloat16

    xs = x.reshape(B, H, W, C)
    pad_r = (ws - W % ws) % ws
    pad_b = (ws - H % ws) % ws
    if pad_r or pad_b:
        xs = jnp.pad(xs, ((0, 0), (0, pad_b), (0, pad_r), (0, 0)))
    Hp, Wp = H + pad_b, W + pad_r
    hg, wg = Hp // ws, Wp // ws
    G, P = hg * wg, ws * ws

    x6 = xs.reshape(B, hg, ws, wg, ws, C)
    # Per-window means == AvgPool2d(ws, ws) (count_include_pad).  kv for the low
    # branch is precomputed ONCE (f32 mean + matmul, then bf16) instead of per
    # window tile inside the kernel.
    pooled = x6.mean(axis=(2, 4)).reshape(B, G, C)                    # (B, G, C) f32
    kv = (pooled @ params["l_kv_w"]).astype(bf16)                     # (B, G, 2*l_dim)

    # Window partition with the token axis LEADING: (B, P, G, C); bf16 activations.
    # TODO(synk): fold this transpose (and the reverse one below) into the kernel
    # via a (1, ws, tile*ws, C) spatial block + in-VMEM rearrangement to drop the
    # extra HBM round trips of the partition / reverse partition.
    xw = x6.transpose(0, 2, 4, 1, 3, 5).reshape(B, P, G, C).astype(bf16)

    # Weights: softmax scale folded into q; channel concat (high | low) folded into
    # zero-padded projection weights -> one lane-dense C-wide store.
    wqkv = jnp.concatenate([params["h_qkv_w"][:, :h_dim] * scale,
                            params["h_qkv_w"][:, h_dim:]], axis=1).astype(bf16)
    wq = (params["l_q_w"] * scale).astype(bf16)
    wph = jnp.concatenate([params["h_proj_w"],
                           jnp.zeros((h_dim, l_dim), f32)], axis=1).astype(bf16)
    wpl = jnp.concatenate([jnp.zeros((l_dim, h_dim), f32),
                           params["l_proj_w"]], axis=1).astype(bf16)
    bias = jnp.concatenate([params["h_proj_b"], params["l_proj_b"]],
                           axis=1).astype(f32)                        # (1, C)

    # Generation-aware VMEM budget / tile size (64 MiB v7x vs 128 MiB v5e/v6e).
    vmem_cap = _vmem_capacity_bytes()
    vmem_limit = max(32 << 20, min(int(vmem_cap * 0.75), 110 << 20))
    resident = (2 * 2 * (C * 3 * h_dim + C * l_dim + h_dim * C + l_dim * C)
                + 2 * 2 * G * 2 * l_dim + 2 * 4 * C)
    budget = max(1 << 20, int(vmem_limit * 0.55) - resident)
    TG = _pick_window_tile(G, P, C, h_dim, l_dim, budget, B)

    kernel = functools.partial(_fused_kernel, h_heads=h_heads, l_heads=l_heads,
                               head_dim=head_dim)
    out_w = pl.pallas_call(
        kernel,
        out_shape=jax.ShapeDtypeStruct((B, P, G, C), bf16),
        grid=(B, G // TG),
        in_specs=[
            pl.BlockSpec((1, P, TG, C), lambda b, g: (b, 0, g, 0)),
            # TODO(synk): pipeline_mode=pl.Buffered(1) on the constant-index blocks
            # below would reclaim their second VMEM buffer.
            pl.BlockSpec((1, G, 2 * l_dim), lambda b, g: (b, 0, 0)),
            pl.BlockSpec((C, 3 * h_dim), lambda b, g: (0, 0)),
            pl.BlockSpec((C, l_dim), lambda b, g: (0, 0)),
            pl.BlockSpec((h_dim, C), lambda b, g: (0, 0)),
            pl.BlockSpec((l_dim, C), lambda b, g: (0, 0)),
            pl.BlockSpec((1, C), lambda b, g: (0, 0)),
        ],
        out_specs=pl.BlockSpec((1, P, TG, C), lambda b, g: (b, 0, g, 0)),
        scratch_shapes=[pltpu.VMEM((P, TG, h_dim), bf16),
                        pltpu.VMEM((P, TG, l_dim), bf16)],
        compiler_params=pltpu.CompilerParams(
            dimension_semantics=("parallel", "parallel"),
            vmem_limit_bytes=vmem_limit),
    )(xw, kv, wqkv, wq, wph, wpl, bias)

    # Reverse window partition (channel concat already fused in-kernel), crop pad.
    out = out_w.reshape(B, ws, ws, hg, wg, C).transpose(0, 3, 1, 4, 2, 5)
    out = out.reshape(B, Hp, Wp, C)
    return out[:, :H, :W, :].reshape(B, N, C).astype(x.dtype)


# ----------------------------------------------------------------------------
# Pure-JAX reference (mirrors the PyTorch forward) for a correctness check.
# ----------------------------------------------------------------------------
def _reference(x, H, W, p, *, num_heads, window_size, alpha):
    B, N, C = x.shape
    ws = window_size
    l_heads = int(num_heads * alpha)
    h_heads = num_heads - l_heads
    hd = C // num_heads
    l_dim, h_dim = l_heads * hd, h_heads * hd
    scale = hd ** (-0.5)

    xs = x.reshape(B, H, W, C)
    pad_r = (ws - W % ws) % ws
    pad_b = (ws - H % ws) % ws
    xs = jnp.pad(xs, ((0, 0), (0, pad_b), (0, pad_r), (0, 0)))
    Hp, Wp = H + pad_b, W + pad_r
    hg, wg = Hp // ws, Wp // ws
    G, P = hg * wg, ws * ws

    # high
    xw = xs.reshape(B, hg, ws, wg, ws, C).transpose(0, 1, 3, 2, 4, 5).reshape(B, G, P, C)
    xc = xw - xw.mean(axis=2, keepdims=True)
    qkv = (xc @ p["h_qkv_w"]).reshape(B, G, P, 3, h_heads, hd).transpose(3, 0, 1, 4, 2, 5)
    q, k, v = qkv[0], qkv[1], qkv[2]
    a = jax.nn.softmax(jnp.einsum("bghpd,bghqd->bghpq", q, k) * scale, axis=-1)
    o = jnp.einsum("bghpq,bghqd->bghpd", a, v).transpose(0, 1, 3, 2, 4).reshape(B, G, P, h_dim)
    o = o @ p["h_proj_w"] + p["h_proj_b"][0]
    high = o.reshape(B, hg, wg, ws, ws, h_dim).transpose(0, 1, 3, 2, 4, 5).reshape(B, Hp, Wp, h_dim)

    # low
    q = (xs.reshape(B, Hp * Wp, C) @ p["l_q_w"]).reshape(B, Hp * Wp, l_heads, hd).transpose(0, 2, 1, 3)
    pooled = xw.mean(axis=2)                                      # AvgPool2d(ws)
    kv = (pooled @ p["l_kv_w"]).reshape(B, G, 2, l_heads, hd).transpose(2, 0, 3, 1, 4)
    k, v = kv[0], kv[1]
    a = jax.nn.softmax(jnp.einsum("bhnd,bhgd->bhng", q, k) * scale, axis=-1)
    o = jnp.einsum("bhng,bhgd->bhnd", a, v).transpose(0, 2, 1, 3).reshape(B, Hp * Wp, l_dim)
    o = o @ p["l_proj_w"] + p["l_proj_b"][0]
    low = o.reshape(B, Hp, Wp, l_dim)

    out = jnp.concatenate([high[:, :H, :W, :], low[:, :H, :W, :]], axis=-1)
    return out.reshape(B, N, C)


def init_params(key, dim, num_heads, alpha):
    hd = dim // num_heads
    l_heads = int(num_heads * alpha)
    h_heads = num_heads - l_heads
    l_dim, h_dim = l_heads * hd, h_heads * hd
    ks = jax.random.split(key, 7)
    s = 0.05
    return dict(
        h_qkv_w=s * jax.random.normal(ks[0], (dim, 3 * h_dim), jnp.float32),
        h_proj_w=s * jax.random.normal(ks[1], (h_dim, h_dim), jnp.float32),
        h_proj_b=s * jax.random.normal(ks[2], (1, h_dim), jnp.float32),
        l_q_w=s * jax.random.normal(ks[3], (dim, l_dim), jnp.float32),
        l_kv_w=s * jax.random.normal(ks[4], (dim, 2 * l_dim), jnp.float32),
        l_proj_w=s * jax.random.normal(ks[5], (l_dim, l_dim), jnp.float32),
        l_proj_b=s * jax.random.normal(ks[6], (1, l_dim), jnp.float32),
    )


if __name__ == "__main__":
    B, H, W = 2, 8, 8
    dim, num_heads, window_size, alpha = 32, 8, 2, 0.5
    N = H * W

    key = jax.random.PRNGKey(0)
    kx, kp = jax.random.split(key)
    x = jax.random.normal(kx, (B, N, dim), jnp.float32)
    params = init_params(kp, dim, num_heads, alpha)

    out = low_high_fre_attention(x, H, W, params, num_heads=num_heads,
                                 window_size=window_size, alpha=alpha)
    out = jax.block_until_ready(out)
    assert out.shape == (B, N, dim)

    # High-precision f32 reference (kernel uses bf16 activations / MXU operands
    # with f32 accumulation -> looser tolerance).
    with jax.default_matmul_precision("highest"):
        ref = _reference(x, H, W, params, num_heads=num_heads,
                         window_size=window_size, alpha=alpha)
        ref = jax.block_until_ready(ref)
    max_err = float(jnp.max(jnp.abs(out - ref)))
    assert max_err < 3e-2, f"mismatch vs reference, max abs err = {max_err}"

    print("KERNEL_OK")
</pallas_src>

<mosaic_0001>
module attributes {stable_mosaic.version = 11 : i64} {
  func.func @_fused_kernel(%arg0: i32, %arg1: i32, %arg2: memref<1x4x16x32xbf16, #tpu.memory_space<vmem>>, %arg3: memref<1x16x32xbf16, #tpu.memory_space<vmem>>, %arg4: memref<32x48xbf16, #tpu.memory_space<vmem>>, %arg5: memref<32x16xbf16, #tpu.memory_space<vmem>>, %arg6: memref<16x32xbf16, #tpu.memory_space<vmem>>, %arg7: memref<16x32xbf16, #tpu.memory_space<vmem>>, %arg8: memref<1x32xf32, #tpu.memory_space<vmem>>, %arg9: memref<1x4x16x32xbf16, #tpu.memory_space<vmem>>, %arg10: memref<4x16x16xbf16, #tpu.memory_space<vmem>>, %arg11: memref<4x16x16xbf16, #tpu.memory_space<vmem>>) attributes {dimension_semantics = [#tpu.dimension_semantics<parallel>, #tpu.dimension_semantics<parallel>], iteration_bounds = array<i64: 2, 1>, scalar_prefetch = 0 : i64, scratch_operands = 2 : i64, tpu.core_type = #tpu.core_type<tc>, window_params = [{transform_indices = @transform_0, window_bounds = array<i64: 1, 4, 16, 32>}, {transform_indices = @transform_1, window_bounds = array<i64: 1, 16, 32>}, {pipeline_mode = #tpu.pipeline_mode<synchronous>, transform_indices = @transform_2, window_bounds = array<i64: 32, 48>}, {pipeline_mode = #tpu.pipeline_mode<synchronous>, transform_indices = @transform_3, window_bounds = array<i64: 32, 16>}, {pipeline_mode = #tpu.pipeline_mode<synchronous>, transform_indices = @transform_4, window_bounds = array<i64: 16, 32>}, {pipeline_mode = #tpu.pipeline_mode<synchronous>, transform_indices = @transform_5, window_bounds = array<i64: 16, 32>}, {pipeline_mode = #tpu.pipeline_mode<synchronous>, transform_indices = @transform_6, window_bounds = array<i64: 1, 32>}, {transform_indices = @transform_7, window_bounds = array<i64: 1, 4, 16, 32>}]} {
    %c0 = arith.constant 0 : index
    %c0_0 = arith.constant 0 : index
    %c0_1 = arith.constant 0 : index
    %c0_2 = arith.constant 0 : index
    %0 = vector.load %arg2[%c0, %c0_0, %c0_1, %c0_2] : memref<1x4x16x32xbf16, #tpu.memory_space<vmem>>, vector<1x4x16x32xbf16>
    %1 = vector.shape_cast %0 : vector<1x4x16x32xbf16> to vector<4x16x32xbf16>
    %2 = arith.extf %1 : vector<4x16x32xbf16> to vector<4x16x32xf32>
    %cst = arith.constant dense<0.000000e+00> : vector<16x32xf32>
    %3 = vector.multi_reduction <add>, %2, %cst [0] : vector<4x16x32xf32> to vector<16x32xf32>
    %4 = vector.shape_cast %3 : vector<16x32xf32> to vector<1x16x32xf32>
    %cst_3 = arith.constant 4.000000e+00 : f32
    %5 = vector.broadcast %cst_3 : f32 to vector<1x16x32xf32>
    %6 = arith.divf %4, %5 : vector<1x16x32xf32>
    %7 = vector.broadcast %6 : vector<1x16x32xf32> to vector<4x16x32xf32>
    %8 = arith.subf %2, %7 : vector<4x16x32xf32>
    %9 = arith.truncf %8 : vector<4x16x32xf32> to vector<4x16x32xbf16>
    %c0_4 = arith.constant 0 : index
    %c0_5 = arith.constant 0 : index
    %10 = vector.load %arg4[%c0_4, %c0_5] : memref<32x48xbf16, #tpu.memory_space<vmem>>, vector<32x48xbf16>
    "tpu.trace_start"() <{level = 10 : i32, message = "ptc,cd->ptd"}> : () -> ()
    %cst_6 = arith.constant dense<0.000000e+00> : vector<4x16x48xf32>
    %11 = tpu.matmul %9, %10, %cst_6 {dimension_numbers = #tpu.dot_dimension_numbers<[2], [0], [0, 1], [1], [0, 0, 0, 1, 1, 1], [], []>} : vector<4x16x32xbf16>, vector<32x48xbf16>, vector<4x16x48xf32> -> vector<4x16x48xf32>
    "tpu.trace_stop"() : () -> ()
    %12 = vector.extract_strided_slice %11 {offsets = [0, 0, 0], sizes = [4, 16, 4], strides = [1, 1, 1]} : vector<4x16x48xf32> to vector<4x16x4xf32>
    %13 = vector.extract_strided_slice %11 {offsets = [0, 0, 16], sizes = [4, 16, 4], strides = [1, 1, 1]} : vector<4x16x48xf32> to vector<4x16x4xf32>
    %14 = vector.extract_strided_slice %11 {offsets = [0, 0, 32], sizes = [4, 16, 4], strides = [1, 1, 1]} : vector<4x16x48xf32> to vector<4x16x4xf32>
    %15 = vector.extract_strided_slice %12 {offsets = [0, 0, 0], sizes = [1, 16, 4], strides = [1, 1, 1]} : vector<4x16x4xf32> to vector<1x16x4xf32>
    %16 = vector.shape_cast %15 : vector<1x16x4xf32> to vector<16x4xf32>
    %17 = vector.extract_strided_slice %13 {offsets = [0, 0, 0], sizes = [1, 16, 4], strides = [1, 1, 1]} : vector<4x16x4xf32> to vector<1x16x4xf32>
    %18 = vector.shape_cast %17 : vector<1x16x4xf32> to vector<16x4xf32>
    %19 = arith.mulf %16, %18 : vector<16x4xf32>
    %cst_7 = arith.constant dense<0.000000e+00> : vector<16xf32>
    %20 = vector.multi_reduction <add>, %19, %cst_7 [1] : vector<16x4xf32> to vector<16xf32>
    %21 = vector.shape_cast %20 : vector<16xf32> to vector<16x1xf32>
    %22 = vector.extract_strided_slice %12 {offsets = [0, 0, 0], sizes = [1, 16, 4], strides = [1, 1, 1]} : vector<4x16x4xf32> to vector<1x16x4xf32>
    %23 = vector.shape_cast %22 : vector<1x16x4xf32> to vector<16x4xf32>
    %24 = vector.extract_strided_slice %13 {offsets = [1, 0, 0], sizes = [1, 16, 4], strides = [1, 1, 1]} : vector<4x16x4xf32> to vector<1x16x4xf32>
    %25 = vector.shape_cast %24 : vector<1x16x4xf32> to vector<16x4xf32>
    %26 = arith.mulf %23, %25 : vector<16x4xf32>
    %cst_8 = arith.constant dense<0.000000e+00> : vector<16xf32>
    %27 = vector.multi_reduction <add>, %26, %cst_8 [1] : vector<16x4xf32> to vector<16xf32>
    %28 = vector.shape_cast %27 : vector<16xf32> to vector<16x1xf32>
    %29 = vector.extract_strided_slice %12 {offsets = [0, 0, 0], sizes = [1, 16, 4], strides = [1, 1, 1]} : vector<4x16x4xf32> to vector<1x16x4xf32>
    %30 = vector.shape_cast %29 : vector<1x16x4xf32> to vector<16x4xf32>
    %31 = vector.extract_strided_slice %13 {offsets = [2, 0, 0], sizes = [1, 16, 4], strides = [1, 1, 1]} : vector<4x16x4xf32> to vector<1x16x4xf32>
    %32 = vector.shape_cast %31 : vector<1x16x4xf32> to vector<16x4xf32>
    %33 = arith.mulf %30, %32 : vector<16x4xf32>
    %cst_9 = arith.constant dense<0.000000e+00> : vector<16xf32>
    %34 = vector.multi_reduction <add>, %33, %cst_9 [1] : vector<16x4xf32> to vector<16xf32>
    %35 = vector.shape_cast %34 : vector<16xf32> to vector<16x1xf32>
    %36 = vector.extract_strided_slice %12 {offsets = [0, 0, 0], sizes = [1, 16, 4], strides = [1, 1, 1]} : vector<4x16x4xf32> to vector<1x16x4xf32>
    %37 = vector.shape_cast %36 : vector<1x16x4xf32> to vector<16x4xf32>
    %38 = vector.extract_strided_slice %13 {offsets = [3, 0, 0], sizes = [1, 16, 4], strides = [1, 1, 1]} : vector<4x16x4xf32> to vector<1x16x4xf32>
    %39 = vector.shape_cast %38 : vector<1x16x4xf32> to vector<16x4xf32>
    %40 = arith.mulf %37, %39 : vector<16x4xf32>
    %cst_10 = arith.constant dense<0.000000e+00> : vector<16xf32>
    %41 = vector.multi_reduction <add>, %40, %cst_10 [1] : vector<16x4xf32> to vector<16xf32>
    %42 = vector.shape_cast %41 : vector<16xf32> to vector<16x1xf32>
    %43 = vector.extract_strided_slice %12 {offsets = [1, 0, 0], sizes = [1, 16, 4], strides = [1, 1, 1]} : vector<4x16x4xf32> to vector<1x16x4xf32>
    %44 = vector.shape_cast %43 : vector<1x16x4xf32> to vector<16x4xf32>
    %45 = vector.extract_strided_slice %13 {offsets = [0, 0, 0], sizes = [1, 16, 4], strides = [1, 1, 1]} : vector<4x16x4xf32> to vector<1x16x4xf32>
    %46 = vector.shape_cast %45 : vector<1x16x4xf32> to vector<16x4xf32>
    %47 = arith.mulf %44, %46 : vector<16x4xf32>
    %cst_11 = arith.constant dense<0.000000e+00> : vector<16xf32>
    %48 = vector.multi_reduction <add>, %47, %cst_11 [1] : vector<16x4xf32> to vector<16xf32>
    %49 = vector.shape_cast %48 : vector<16xf32> to vector<16x1xf32>
    %50 = vector.extract_strided_slice %12 {offsets = [1, 0, 0], sizes = [1, 16, 4], strides = [1, 1, 1]} : vector<4x16x4xf32> to vector<1x16x4xf32>
    %51 = vector.shape_cast %50 : vector<1x16x4xf32> to vector<16x4xf32>
    %52 = vector.extract_strided_slice %13 {offsets = [1, 0, 0], sizes = [1, 16, 4], strides = [1, 1, 1]} : vector<4x16x4xf32> to vector<1x16x4xf32>
    %53 = vector.shape_cast %52 : vector<1x16x4xf32> to vector<16x4xf32>
    %54 = arith.mulf %51, %53 : vector<16x4xf32>
    %cst_12 = arith.constant dense<0.000000e+00> : vector<16xf32>
    %55 = vector.multi_reduction <add>, %54, %cst_12 [1] : vector<16x4xf32> to vector<16xf32>
    %56 = vector.shape_cast %55 : vector<16xf32> to vector<16x1xf32>
    %57 = vector.extract_strided_slice %12 {offsets = [1, 0, 0], sizes = [1, 16, 4], strides = [1, 1, 1]} : vector<4x16x4xf32> to vector<1x16x4xf32>
    %58 = vector.shape_cast %57 : vector<1x16x4xf32> to vector<16x4xf32>
    %59 = vector.extract_strided_slice %13 {offsets = [2, 0, 0], sizes = [1, 16, 4], strides = [1, 1, 1]} : vector<4x16x4xf32> to vector<1x16x4xf32>
    %60 = vector.shape_cast %59 : vector<1x16x4xf32> to vector<16x4xf32>
    %61 = arith.mulf %58, %60 : vector<16x4xf32>
    %cst_13 = arith.constant dense<0.000000e+00> : vector<16xf32>
    %62 = vector.multi_reduction <add>, %61, %cst_13 [1] : vector<16x4xf32> to vector<16xf32>
    %63 = vector.shape_cast %62 : vector<16xf32> to vector<16x1xf32>
    %64 = vector.extract_strided_slice %12 {offsets = [1, 0, 0], sizes = [1, 16, 4], strides = [1, 1, 1]} : vector<4x16x4xf32> to vector<1x16x4xf32>
    %65 = vector.shape_cast %64 : vector<1x16x4xf32> to vector<16x4xf32>
    %66 = vector.extract_strided_slice %13 {offsets = [3, 0, 0], sizes = [1, 16, 4], strides = [1, 1, 1]} : vector<4x16x4xf32> to vector<1x16x4xf32>
    %67 = vector.shape_cast %66 : vector<1x16x4xf32> to vector<16x4xf32>
    %68 = arith.mulf %65, %67 : vector<16x4xf32>
    %cst_14 = arith.constant dense<0.000000e+00> : vector<16xf32>
    %69 = vector.multi_reduction <add>, %68, %cst_14 [1] : vector<16x4xf32> to vector<16xf32>
    %70 = vector.shape_cast %69 : vector<16xf32> to vector<16x1xf32>
    %71 = vector.extract_strided_slice %12 {offsets = [2, 0, 0], sizes = [1, 16, 4], strides = [1, 1, 1]} : vector<4x16x4xf32> to vector<1x16x4xf32>
    %72 = vector.shape_cast %71 : vector<1x16x4xf32> to vector<16x4xf32>
    %73 = vector.extract_strided_slice %13 {offsets = [0, 0, 0], sizes = [1, 16, 4], strides = [1, 1, 1]} : vector<4x16x4xf32> to vector<1x16x4xf32>
    %74 = vector.shape_cast %73 : vector<1x16x4xf32> to vector<16x4xf32>
    %75 = arith.mulf %72, %74 : vector<16x4xf32>
    %cst_15 = arith.constant dense<0.000000e+00> : vector<16xf32>
    %76 = vector.multi_reduction <add>, %75, %cst_15 [1] : vector<16x4xf32> to vector<16xf32>
    %77 = vector.shape_cast %76 : vector<16xf32> to vector<16x1xf32>
    %78 = vector.extract_strided_slice %12 {offsets = [2, 0, 0], sizes = [1, 16, 4], strides = [1, 1, 1]} : vector<4x16x4xf32> to vector<1x16x4xf32>
    %79 = vector.shape_cast %78 : vector<1x16x4xf32> to vector<16x4xf32>
    %80 = vector.extract_strided_slice %13 {offsets = [1, 0, 0], sizes = [1, 16, 4], strides = [1, 1, 1]} : vector<4x16x4xf32> to vector<1x16x4xf32>
    %81 = vector.shape_cast %80 : vector<1x16x4xf32> to vector<16x4xf32>
    %82 = arith.mulf %79, %81 : vector<16x4xf32>
    %cst_16 = arith.constant dense<0.000000e+00> : vector<16xf32>
    %83 = vector.multi_reduction <add>, %82, %cst_16 [1] : vector<16x4xf32> to vector<16xf32>
    %84 = vector.shape_cast %83 : vector<16xf32> to vector<16x1xf32>
    %85 = vector.extract_strided_slice %12 {offsets = [2, 0, 0], sizes = [1, 16, 4], strides = [1, 1, 1]} : vector<4x16x4xf32> to vector<1x16x4xf32>
    %86 = vector.shape_cast %85 : vector<1x16x4xf32> to vector<16x4xf32>
    %87 = vector.extract_strided_slice %13 {offsets = [2, 0, 0], sizes = [1, 16, 4], strides = [1, 1, 1]} : vector<4x16x4xf32> to vector<1x16x4xf32>
    %88 = vector.shape_cast %87 : vector<1x16x4xf32> to vector<16x4xf32>
    %89 = arith.mulf %86, %88 : vector<16x4xf32>
    %cst_17 = arith.constant dense<0.000000e+00> : vector<16xf32>
    %90 = vector.multi_reduction <add>, %89, %cst_17 [1] : vector<16x4xf32> to vector<16xf32>
    %91 = vector.shape_cast %90 : vector<16xf32> to vector<16x1xf32>
    %92 = vector.extract_strided_slice %12 {offsets = [2, 0, 0], sizes = [1, 16, 4], strides = [1, 1, 1]} : vector<4x16x4xf32> to vector<1x16x4xf32>
    %93 = vector.shape_cast %92 : vector<1x16x4xf32> to vector<16x4xf32>
    %94 = vector.extract_strided_slice %13 {offsets = [3, 0, 0], sizes = [1, 16, 4], strides = [1, 1, 1]} : vector<4x16x4xf32> to vector<1x16x4xf32>
    %95 = vector.shape_cast %94 : vector<1x16x4xf32> to vector<16x4xf32>
    %96 = arith.mulf %93, %95 : vector<16x4xf32>
    %cst_18 = arith.constant dense<0.000000e+00> : vector<16xf32>
    %97 = vector.multi_reduction <add>, %96, %cst_18 [1] : vector<16x4xf32> to vector<16xf32>
    %98 = vector.shape_cast %97 : vector<16xf32> to vector<16x1xf32>
    %99 = vector.extract_strided_slice %12 {offsets = [3, 0, 0], sizes = [1, 16, 4], strides = [1, 1, 1]} : vector<4x16x4xf32> to vector<1x16x4xf32>
    %100 = vector.shape_cast %99 : vector<1x16x4xf32> to vector<16x4xf32>
    %101 = vector.extract_strided_slice %13 {offsets = [0, 0, 0], sizes = [1, 16, 4], strides = [1, 1, 1]} : vector<4x16x4xf32> to vector<1x16x4xf32>
    %102 = vector.shape_cast %101 : vector<1x16x4xf32> to vector<16x4xf32>
    %103 = arith.mulf %100, %102 : vector<16x4xf32>
    %cst_19 = arith.constant dense<0.000000e+00> : vector<16xf32>
    %104 = vector.multi_reduction <add>, %103, %cst_19 [1] : vector<16x4xf32> to vector<16xf32>
    %105 = vector.shape_cast %104 : vector<16xf32> to vector<16x1xf32>
    %106 = vector.extract_strided_slice %12 {offsets = [3, 0, 0], sizes = [1, 16, 4], strides = [1, 1, 1]} : vector<4x16x4xf32> to vector<1x16x4xf32>
    %107 = vector.shape_cast %106 : vector<1x16x4xf32> to vector<16x4xf32>
    %108 = vector.extract_strided_slice %13 {offsets = [1, 0, 0], sizes = [1, 16, 4], strides = [1, 1, 1]} : vector<4x16x4xf32> to vector<1x16x4xf32>
    %109 = vector.shape_cast %108 : vector<1x16x4xf32> to vector<16x4xf32>
    %110 = arith.mulf %107, %109 : vector<16x4xf32>
    %cst_20 = arith.constant dense<0.000000e+00> : vector<16xf32>
    %111 = vector.multi_reduction <add>, %110, %cst_20 [1] : vector<16x4xf32> to vector<16xf32>
    %112 = vector.shape_cast %111 : vector<16xf32> to vector<16x1xf32>
    %113 = vector.extract_strided_slice %12 {offsets = [3, 0, 0], sizes = [1, 16, 4], strides = [1, 1, 1]} : vector<4x16x4xf32> to vector<1x16x4xf32>
    %114 = vector.shape_cast %113 : vector<1x16x4xf32> to vector<16x4xf32>
    %115 = vector.extract_strided_slice %13 {offsets = [2, 0, 0], sizes = [1, 16, 4], strides = [1, 1, 1]} : vector<4x16x4xf32> to vector<1x16x4xf32>
    %116 = vector.shape_cast %115 : vector<1x16x4xf32> to vector<16x4xf32>
    %117 = arith.mulf %114, %116 : vector<16x4xf32>
    %cst_21 = arith.constant dense<0.000000e+00> : vector<16xf32>
    %118 = vector.multi_reduction <add>, %117, %cst_21 [1] : vector<16x4xf32> to vector<16xf32>
    %119 = vector.shape_cast %118 : vector<16xf32> to vector<16x1xf32>
    %120 = vector.extract_strided_slice %12 {offsets = [3, 0, 0], sizes = [1, 16, 4], strides = [1, 1, 1]} : vector<4x16x4xf32> to vector<1x16x4xf32>
    %121 = vector.shape_cast %120 : vector<1x16x4xf32> to vector<16x4xf32>
    %122 = vector.extract_strided_slice %13 {offsets = [3, 0, 0], sizes = [1, 16, 4], strides = [1, 1, 1]} : vector<4x16x4xf32> to vector<1x16x4xf32>
    %123 = vector.shape_cast %122 : vector<1x16x4xf32> to vector<16x4xf32>
    %124 = arith.mulf %121, %123 : vector<16x4xf32>
    %cst_22 = arith.constant dense<0.000000e+00> : vector<16xf32>
    %125 = vector.multi_reduction <add>, %124, %cst_22 [1] : vector<16x4xf32> to vector<16xf32>
    %126 = vector.shape_cast %125 : vector<16xf32> to vector<16x1xf32>
    %127 = arith.maximumf %21, %28 : vector<16x1xf32>
    %128 = arith.maximumf %127, %35 : vector<16x1xf32>
    %129 = arith.maximumf %128, %42 : vector<16x1xf32>
    %130 = arith.subf %21, %129 : vector<16x1xf32>
    %131 = math.exp %130 : vector<16x1xf32>
    %132 = arith.subf %28, %129 : vector<16x1xf32>
    %133 = math.exp %132 : vector<16x1xf32>
    %134 = arith.subf %35, %129 : vector<16x1xf32>
    %135 = math.exp %134 : vector<16x1xf32>
    %136 = arith.subf %42, %129 : vector<16x1xf32>
    %137 = math.exp %136 : vector<16x1xf32>
    %138 = arith.addf %131, %133 : vector<16x1xf32>
    %139 = arith.addf %138, %135 : vector<16x1xf32>
    %140 = arith.addf %139, %137 : vector<16x1xf32>
    %141 = tpu.reciprocal %140 {approx = true} : vector<16x1xf32> -> vector<16x1xf32>
    %142 = arith.mulf %131, %141 : vector<16x1xf32>
    %143 = vector.extract_strided_slice %14 {offsets = [0, 0, 0], sizes = [1, 16, 4], strides = [1, 1, 1]} : vector<4x16x4xf32> to vector<1x16x4xf32>
    %144 = vector.shape_cast %143 : vector<1x16x4xf32> to vector<16x4xf32>
    %145 = vector.broadcast %142 : vector<16x1xf32> to vector<16x4xf32>
    %146 = arith.mulf %145, %144 : vector<16x4xf32>
    %147 = arith.mulf %133, %141 : vector<16x1xf32>
    %148 = vector.extract_strided_slice %14 {offsets = [1, 0, 0], sizes = [1, 16, 4], strides = [1, 1, 1]} : vector<4x16x4xf32> to vector<1x16x4xf32>
    %149 = vector.shape_cast %148 : vector<1x16x4xf32> to vector<16x4xf32>
    %150 = vector.broadcast %147 : vector<16x1xf32> to vector<16x4xf32>
    %151 = arith.mulf %150, %149 : vector<16x4xf32>
    %152 = arith.addf %146, %151 : vector<16x4xf32>
    %153 = arith.mulf %135, %141 : vector<16x1xf32>
    %154 = vector.extract_strided_slice %14 {offsets = [2, 0, 0], sizes = [1, 16, 4], strides = [1, 1, 1]} : vector<4x16x4xf32> to vector<1x16x4xf32>
    %155 = vector.shape_cast %154 : vector<1x16x4xf32> to vector<16x4xf32>
    %156 = vector.broadcast %153 : vector<16x1xf32> to vector<16x4xf32>
    %157 = arith.mulf %156, %155 : vector<16x4xf32>
    %158 = arith.addf %152, %157 : vector<16x4xf32>
    %159 = arith.mulf %137, %141 : vector<16x1xf32>
    %160 = vector.extract_strided_slice %14 {offsets = [3, 0, 0], sizes = [1, 16, 4], strides = [1, 1, 1]} : vector<4x16x4xf32> to vector<1x16x4xf32>
    %161 = vector.shape_cast %160 : vector<1x16x4xf32> to vector<16x4xf32>
    %162 = vector.broadcast %159 : vector<16x1xf32> to vector<16x4xf32>
    %163 = arith.mulf %162, %161 : vector<16x4xf32>
    %164 = arith.addf %158, %163 : vector<16x4xf32>
    %165 = arith.truncf %164 : vector<16x4xf32> to vector<16x4xbf16>
    %c0_23 = arith.constant 0 : index
    %c0_24 = arith.constant 0 : index
    %c0_25 = arith.constant 0 : index
    %166 = vector.load %arg10[%c0_23, %c0_24, %c0_25] : memref<4x16x16xbf16, #tpu.memory_space<vmem>>, vector<1x16x4xbf16>
    %167 = vector.shape_cast %166 : vector<1x16x4xbf16> to vector<16x4xbf16>
    %168 = vector.shape_cast %165 : vector<16x4xbf16> to vector<1x16x4xbf16>
    tpu.vector_store %arg10[%c0_23, %c0_24, %c0_25], %168 {strides = array<i32>} : memref<4x16x16xbf16, #tpu.memory_space<vmem>>, vector<1x16x4xbf16>,
    %169 = arith.maximumf %49, %56 : vector<16x1xf32>
    %170 = arith.maximumf %169, %63 : vector<16x1xf32>
    %171 = arith.maximumf %170, %70 : vector<16x1xf32>
    %172 = arith.subf %49, %171 : vector<16x1xf32>
    %173 = math.exp %172 : vector<16x1xf32>
    %174 = arith.subf %56, %171 : vector<16x1xf32>
    %175 = math.exp %174 : vector<16x1xf32>
    %176 = arith.subf %63, %171 : vector<16x1xf32>
    %177 = math.exp %176 : vector<16x1xf32>
    %178 = arith.subf %70, %171 : vector<16x1xf32>
    %179 = math.exp %178 : vector<16x1xf32>
    %180 = arith.addf %173, %175 : vector<16x1xf32>
    %181 = arith.addf %180, %177 : vector<16x1xf32>
    %182 = arith.addf %181, %179 : vector<16x1xf32>
    %183 = tpu.reciprocal %182 {approx = true} : vector<16x1xf32> -> vector<16x1xf32>
    %184 = arith.mulf %173, %183 : vector<16x1xf32>
    %185 = vector.extract_strided_slice %14 {offsets = [0, 0, 0], sizes = [1, 16, 4], strides = [1, 1, 1]} : vector<4x16x4xf32> to vector<1x16x4xf32>
    %186 = vector.shape_cast %185 : vector<1x16x4xf32> to vector<16x4xf32>
    %187 = vector.broadcast %184 : vector<16x1xf32> to vector<16x4xf32>
    %188 = arith.mulf %187, %186 : vector<16x4xf32>
    %189 = arith.mulf %175, %183 : vector<16x1xf32>
    %190 = vector.extract_strided_slice %14 {offsets = [1, 0, 0], sizes = [1, 16, 4], strides = [1, 1, 1]} : vector<4x16x4xf32> to vector<1x16x4xf32>
    %191 = vector.shape_cast %190 : vector<1x16x4xf32> to vector<16x4xf32>
    %192 = vector.broadcast %189 : vector<16x1xf32> to vector<16x4xf32>
    %193 = arith.mulf %192, %191 : vector<16x4xf32>
    %194 = arith.addf %188, %193 : vector<16x4xf32>
    %195 = arith.mulf %177, %183 : vector<16x1xf32>
    %196 = vector.extract_strided_slice %14 {offsets = [2, 0, 0], sizes = [1, 16, 4], strides = [1, 1, 1]} : vector<4x16x4xf32> to vector<1x16x4xf32>
    %197 = vector.shape_cast %196 : vector<1x16x4xf32> to vector<16x4xf32>
    %198 = vector.broadcast %195 : vector<16x1xf32> to vector<16x4xf32>
    %199 = arith.mulf %198, %197 : vector<16x4xf32>
    %200 = arith.addf %194, %199 : vector<16x4xf32>
    %201 = arith.mulf %179, %183 : vector<16x1xf32>
    %202 = vector.extract_strided_slice %14 {offsets = [3, 0, 0], sizes = [1, 16, 4], strides = [1, 1, 1]} : vector<4x16x4xf32> to vector<1x16x4xf32>
    %203 = vector.shape_cast %202 : vector<1x16x4xf32> to vector<16x4xf32>
    %204 = vector.broadcast %201 : vector<16x1xf32> to vector<16x4xf32>
    %205 = arith.mulf %204, %203 : vector<16x4xf32>
    %206 = arith.addf %200, %205 : vector<16x4xf32>
    %207 = arith.truncf %206 : vector<16x4xf32> to vector<16x4xbf16>
    %c1 = arith.constant 1 : index
    %c0_26 = arith.constant 0 : index
    %c0_27 = arith.constant 0 : index
    %208 = vector.load %arg10[%c1, %c0_26, %c0_27] : memref<4x16x16xbf16, #tpu.memory_space<vmem>>, vector<1x16x4xbf16>
    %209 = vector.shape_cast %208 : vector<1x16x4xbf16> to vector<16x4xbf16>
    %210 = vector.shape_cast %207 : vector<16x4xbf16> to vector<1x16x4xbf16>
    tpu.vector_store %arg10[%c1, %c0_26, %c0_27], %210 {strides = array<i32>} : memref<4x16x16xbf16, #tpu.memory_space<vmem>>, vector<1x16x4xbf16>,
    %211 = arith.maximumf %77, %84 : vector<16x1xf32>
    %212 = arith.maximumf %211, %91 : vector<16x1xf32>
    %213 = arith.maximumf %212, %98 : vector<16x1xf32>
    %214 = arith.subf %77, %213 : vector<16x1xf32>
    %215 = math.exp %214 : vector<16x1xf32>
    %216 = arith.subf %84, %213 : vector<16x1xf32>
    %217 = math.exp %216 : vector<16x1xf32>
    %218 = arith.subf %91, %213 : vector<16x1xf32>
    %219 = math.exp %218 : vector<16x1xf32>
    %220 = arith.subf %98, %213 : vector<16x1xf32>
    %221 = math.exp %220 : vector<16x1xf32>
    %222 = arith.addf %215, %217 : vector<16x1xf32>
    %223 = arith.addf %222, %219 : vector<16x1xf32>
    %224 = arith.addf %223, %221 : vector<16x1xf32>
    %225 = tpu.reciprocal %224 {approx = true} : vector<16x1xf32> -> vector<16x1xf32>
    %226 = arith.mulf %215, %225 : vector<16x1xf32>
    %227 = vector.extract_strided_slice %14 {offsets = [0, 0, 0], sizes = [1, 16, 4], strides = [1, 1, 1]} : vector<4x16x4xf32> to vector<1x16x4xf32>
    %228 = vector.shape_cast %227 : vector<1x16x4xf32> to vector<16x4xf32>
    %229 = vector.broadcast %226 : vector<16x1xf32> to vector<16x4xf32>
    %230 = arith.mulf %229, %228 : vector<16x4xf32>
    %231 = arith.mulf %217, %225 : vector<16x1xf32>
    %232 = vector.extract_strided_slice %14 {offsets = [1, 0, 0], sizes = [1, 16, 4], strides = [1, 1, 1]} : vector<4x16x4xf32> to vector<1x16x4xf32>
    %233 = vector.shape_cast %232 : vector<1x16x4xf32> to vector<16x4xf32>
    %234 = vector.broadcast %231 : vector<16x1xf32> to vector<16x4xf32>
    %235 = arith.mulf %234, %233 : vector<16x4xf32>
    %236 = arith.addf %230, %235 : vector<16x4xf32>
    %237 = arith.mulf %219, %225 : vector<16x1xf32>
    %238 = vector.extract_strided_slice %14 {offsets = [2, 0, 0], sizes = [1, 16, 4], strides = [1, 1, 1]} : vector<4x16x4xf32> to vector<1x16x4xf32>
    %239 = vector.shape_cast %238 : vector<1x16x4xf32> to vector<16x4xf32>
    %240 = vector.broadcast %237 : vector<16x1xf32> to vector<16x4xf32>
    %241 = arith.mulf %240, %239 : vector<16x4xf32>
    %242 = arith.addf %236, %241 : vector<16x4xf32>
    %243 = arith.mulf %221, %225 : vector<16x1xf32>
    %244 = vector.extract_strided_slice %14 {offsets = [3, 0, 0], sizes = [1, 16, 4], strides = [1, 1, 1]} : vector<4x16x4xf32> to vector<1x16x4xf32>
    %245 = vector.shape_cast %244 : vector<1x16x4xf32> to vector<16x4xf32>
    %246 = vector.broadcast %243 : vector<16x1xf32> to vector<16x4xf32>
    %247 = arith.mulf %246, %245 : vector<16x4xf32>
    %248 = arith.addf %242, %247 : vector<16x4xf32>
    %249 = arith.truncf %248 : vector<16x4xf32> to vector<16x4xbf16>
    %c2 = arith.constant 2 : index
    %c0_28 = arith.constant 0 : index
    %c0_29 = arith.constant 0 : index
    %250 = vector.load %arg10[%c2, %c0_28, %c0_29] : memref<4x16x16xbf16, #tpu.memory_space<vmem>>, vector<1x16x4xbf16>
    %251 = vector.shape_cast %250 : vector<1x16x4xbf16> to vector<16x4xbf16>
    %252 = vector.shape_cast %249 : vector<16x4xbf16> to vector<1x16x4xbf16>
    tpu.vector_store %arg10[%c2, %c0_28, %c0_29], %252 {strides = array<i32>} : memref<4x16x16xbf16, #tpu.memory_space<vmem>>, vector<1x16x4xbf16>,
    %253 = arith.maximumf %105, %112 : vector<16x1xf32>
    %254 = arith.maximumf %253, %119 : vector<16x1xf32>
    %255 = arith.maximumf %254, %126 : vector<16x1xf32>
    %256 = arith.subf %105, %255 : vector<16x1xf32>
    %257 = math.exp %256 : vector<16x1xf32>
    %258 = arith.subf %112, %255 : vector<16x1xf32>
    %259 = math.exp %258 : vector<16x1xf32>
    %260 = arith.subf %119, %255 : vector<16x1xf32>
    %261 = math.exp %260 : vector<16x1xf32>
    %262 = arith.subf %126, %255 : vector<16x1xf32>
    %263 = math.exp %262 : vector<16x1xf32>
    %264 = arith.addf %257, %259 : vector<16x1xf32>
    %265 = arith.addf %264, %261 : vector<16x1xf32>
    %266 = arith.addf %265, %263 : vector<16x1xf32>
    %267 = tpu.reciprocal %266 {approx = true} : vector<16x1xf32> -> vector<16x1xf32>
    %268 = arith.mulf %257, %267 : vector<16x1xf32>
    %269 = vector.extract_strided_slice %14 {offsets = [0, 0, 0], sizes = [1, 16, 4], strides = [1, 1, 1]} : vector<4x16x4xf32> to vector<1x16x4xf32>
    %270 = vector.shape_cast %269 : vector<1x16x4xf32> to vector<16x4xf32>
    %271 = vector.broadcast %268 : vector<16x1xf32> to vector<16x4xf32>
    %272 = arith.mulf %271, %270 : vector<16x4xf32>
    %273 = arith.mulf %259, %267 : vector<16x1xf32>
    %274 = vector.extract_strided_slice %14 {offsets = [1, 0, 0], sizes = [1, 16, 4], strides = [1, 1, 1]} : vector<4x16x4xf32> to vector<1x16x4xf32>
    %275 = vector.shape_cast %274 : vector<1x16x4xf32> to vector<16x4xf32>
    %276 = vector.broadcast %273 : vector<16x1xf32> to vector<16x4xf32>
    %277 = arith.mulf %276, %275 : vector<16x4xf32>
    %278 = arith.addf %272, %277 : vector<16x4xf32>
    %279 = arith.mulf %261, %267 : vector<16x1xf32>
    %280 = vector.extract_strided_slice %14 {offsets = [2, 0, 0], sizes = [1, 16, 4], strides = [1, 1, 1]} : vector<4x16x4xf32> to vector<1x16x4xf32>
    %281 = vector.shape_cast %280 : vector<1x16x4xf32> to vector<16x4xf32>
    %282 = vector.broadcast %279 : vector<16x1xf32> to vector<16x4xf32>
    %283 = arith.mulf %282, %281 : vector<16x4xf32>
    %284 = arith.addf %278, %283 : vector<16x4xf32>
    %285 = arith.mulf %263, %267 : vector<16x1xf32>
    %286 = vector.extract_strided_slice %14 {offsets = [3, 0, 0], sizes = [1, 16, 4], strides = [1, 1, 1]} : vector<4x16x4xf32> to vector<1x16x4xf32>
    %287 = vector.shape_cast %286 : vector<1x16x4xf32> to vector<16x4xf32>
    %288 = vector.broadcast %285 : vector<16x1xf32> to vector<16x4xf32>
    %289 = arith.mulf %288, %287 : vector<16x4xf32>
    %290 = arith.addf %284, %289 : vector<16x4xf32>
    %291 = arith.truncf %290 : vector<16x4xf32> to vector<16x4xbf16>
    %c3 = arith.constant 3 : index
    %c0_30 = arith.constant 0 : index
    %c0_31 = arith.constant 0 : index
    %292 = vector.load %arg10[%c3, %c0_30, %c0_31] : memref<4x16x16xbf16, #tpu.memory_space<vmem>>, vector<1x16x4xbf16>
    %293 = vector.shape_cast %292 : vector<1x16x4xbf16> to vector<16x4xbf16>
    %294 = vector.shape_cast %291 : vector<16x4xbf16> to vector<1x16x4xbf16>
    tpu.vector_store %arg10[%c3, %c0_30, %c0_31], %294 {strides = array<i32>} : memref<4x16x16xbf16, #tpu.memory_space<vmem>>, vector<1x16x4xbf16>,
    %295 = vector.extract_strided_slice %11 {offsets = [0, 0, 4], sizes = [4, 16, 4], strides = [1, 1, 1]} : vector<4x16x48xf32> to vector<4x16x4xf32>
    %296 = vector.extract_strided_slice %11 {offsets = [0, 0, 20], sizes = [4, 16, 4], strides = [1, 1, 1]} : vector<4x16x48xf32> to vector<4x16x4xf32>
    %297 = vector.extract_strided_slice %11 {offsets = [0, 0, 36], sizes = [4, 16, 4], strides = [1, 1, 1]} : vector<4x16x48xf32> to vector<4x16x4xf32>
    %298 = vector.extract_strided_slice %295 {offsets = [0, 0, 0], sizes = [1, 16, 4], strides = [1, 1, 1]} : vector<4x16x4xf32> to vector<1x16x4xf32>
    %299 = vector.shape_cast %298 : vector<1x16x4xf32> to vector<16x4xf32>
    %300 = vector.extract_strided_slice %296 {offsets = [0, 0, 0], sizes = [1, 16, 4], strides = [1, 1, 1]} : vector<4x16x4xf32> to vector<1x16x4xf32>
    %301 = vector.shape_cast %300 : vector<1x16x4xf32> to vector<16x4xf32>
    %302 = arith.mulf %299, %301 : vector<16x4xf32>
    %cst_32 = arith.constant dense<0.000000e+00> : vector<16xf32>
    %303 = vector.multi_reduction <add>, %302, %cst_32 [1] : vector<16x4xf32> to vector<16xf32>
    %304 = vector.shape_cast %303 : vector<16xf32> to vector<16x1xf32>
    %305 = vector.extract_strided_slice %295 {offsets = [0, 0, 0], sizes = [1, 16, 4], strides = [1, 1, 1]} : vector<4x16x4xf32> to vector<1x16x4xf32>
    %306 = vector.shape_cast %305 : vector<1x16x4xf32> to vector<16x4xf32>
    %307 = vector.extract_strided_slice %296 {offsets = [1, 0, 0], sizes = [1, 16, 4], strides = [1, 1, 1]} : vector<4x16x4xf32> to vector<1x16x4xf32>
    %308 = vector.shape_cast %307 : vector<1x16x4xf32> to vector<16x4xf32>
    %309 = arith.mulf %306, %308 : vector<16x4xf32>
    %cst_33 = arith.constant dense<0.000000e+00> : vector<16xf32>
    %310 = vector.multi_reduction <add>, %309, %cst_33 [1] : vector<16x4xf32> to vector<16xf32>
    %311 = vector.shape_cast %310 : vector<16xf32> to vector<16x1xf32>
    %312 = vector.extract_strided_slice %295 {offsets = [0, 0, 0], sizes = [1, 16, 4], strides = [1, 1, 1]} : vector<4x16x4xf32> to vector<1x16x4xf32>
    %313 = vector.shape_cast %312 : vector<1x16x4xf32> to vector<16x4xf32>
    %314 = vector.extract_strided_slice %296 {offsets = [2, 0, 0], sizes = [1, 16, 4], strides = [1, 1, 1]} : vector<4x16x4xf32> to vector<1x16x4xf32>
    %315 = vector.shape_cast %314 : vector<1x16x4xf32> to vector<16x4xf32>
    %316 = arith.mulf %313, %315 : vector<16x4xf32>
    %cst_34 = arith.constant dense<0.000000e+00> : vector<16xf32>
    %317 = vector.multi_reduction <add>, %316, %cst_34 [1] : vector<16x4xf32> to vector<16xf32>
    %318 = vector.shape_cast %317 : vector<16xf32> to vector<16x1xf32>
    %319 = vector.extract_strided_slice %295 {offsets = [0, 0, 0], sizes = [1, 16, 4], strides = [1, 1, 1]} : vector<4x16x4xf32> to vector<1x16x4xf32>
    %320 = vector.shape_cast %319 : vector<1x16x4xf32> to vector<16x4xf32>
    %321 = vector.extract_strided_slice %296 {offsets = [3, 0, 0], sizes = [1, 16, 4], strides = [1, 1, 1]} : vector<4x16x4xf32> to vector<1x16x4xf32>
    %322 = vector.shape_cast %321 : vector<1x16x4xf32> to vector<16x4xf32>
    %323 = arith.mulf %320, %322 : vector<16x4xf32>
    %cst_35 = arith.constant dense<0.000000e+00> : vector<16xf32>
    %324 = vector.multi_reduction <add>, %323, %cst_35 [1] : vector<16x4xf32> to vector<16xf32>
    %325 = vector.shape_cast %324 : vector<16xf32> to vector<16x1xf32>
    %326 = vector.extract_strided_slice %295 {offsets = [1, 0, 0], sizes = [1, 16, 4], strides = [1, 1, 1]} : vector<4x16x4xf32> to vector<1x16x4xf32>
    %327 = vector.shape_cast %326 : vector<1x16x4xf32> to vector<16x4xf32>
    %328 = vector.extract_strided_slice %296 {offsets = [0, 0, 0], sizes = [1, 16, 4], strides = [1, 1, 1]} : vector<4x16x4xf32> to vector<1x16x4xf32>
    %329 = vector.shape_cast %328 : vector<1x16x4xf32> to vector<16x4xf32>
    %330 = arith.mulf %327, %329 : vector<16x4xf32>
    %cst_36 = arith.constant dense<0.000000e+00> : vector<16xf32>
    %331 = vector.multi_reduction <add>, %330, %cst_36 [1] : vector<16x4xf32> to vector<16xf32>
    %332 = vector.shape_cast %331 : vector<16xf32> to vector<16x1xf32>
    %333 = vector.extract_strided_slice %295 {offsets = [1, 0, 0], sizes = [1, 16, 4], strides = [1, 1, 1]} : vector<4x16x4xf32> to vector<1x16x4xf32>
    %334 = vector.shape_cast %333 : vector<1x16x4xf32> to vector<16x4xf32>
    %335 = vector.extract_strided_slice %296 {offsets = [1, 0, 0], sizes = [1, 16, 4], strides = [1, 1, 1]} : vector<4x16x4xf32> to vector<1x16x4xf32>
    %336 = vector.shape_cast %335 : vector<1x16x4xf32> to vector<16x4xf32>
    %337 = arith.mulf %334, %336 : vector<16x4xf32>
    %cst_37 = arith.constant dense<0.000000e+00> : vector<16xf32>
    %338 = vector.multi_reduction <add>, %337, %cst_37 [1] : vector<16x4xf32> to vector<16xf32>
    %339 = vector.shape_cast %338 : vector<16xf32> to vector<16x1xf32>
    %340 = vector.extract_strided_slice %295 {offsets = [1, 0, 0], sizes = [1, 16, 4], strides = [1, 1, 1]} : vector<4x16x4xf32> to vector<1x16x4xf32>
    %341 = vector.shape_cast %340 : vector<1x16x4xf32> to vector<16x4xf32>
    %342 = vector.extract_strided_slice %296 {offsets = [2, 0, 0], sizes = [1, 16, 4], strides = [1, 1, 1]} : vector<4x16x4xf32> to vector<1x16x4xf32>
    %343 = vector.shape_cast %342 : vector<1x16x4xf32> to vector<16x4xf32>
    %344 = arith.mulf %341, %343 : vector<16x4xf32>
    %cst_38 = arith.constant dense<0.000000e+00> : vector<16xf32>
    %345 = vector.multi_reduction <add>, %344, %cst_38 [1] : vector<16x4xf32> to vector<16xf32>
    %346 = vector.shape_cast %345 : vector<16xf32> to vector<16x1xf32>
    %347 = vector.extract_strided_slice %295 {offsets = [1, 0, 0], sizes = [1, 16, 4], strides = [1, 1, 1]} : vector<4x16x4xf32> to vector<1x16x4xf32>
    %348 = vector.shape_cast %347 : vector<1x16x4xf32> to vector<16x4xf32>
    %349 = vector.extract_strided_slice %296 {offsets = [3, 0, 0], sizes = [1, 16, 4], strides = [1, 1, 1]} : vector<4x16x4xf32> to vector<1x16x4xf32>
    %350 = vector.shape_cast %349 : vector<1x16x4xf32> to vector<16x4xf32>
    %351 = arith.mulf %348, %350 : vector<16x4xf32>
    %cst_39 = arith.constant dense<0.000000e+00> : vector<16xf32>
    %352 = vector.multi_reduction <add>, %351, %cst_39 [1] : vector<16x4xf32> to vector<16xf32>
    %353 = vector.shape_cast %352 : vector<16xf32> to vector<16x1xf32>
    %354 = vector.extract_strided_slice %295 {offsets = [2, 0, 0], sizes = [1, 16, 4], strides = [1, 1, 1]} : vector<4x16x4xf32> to vector<1x16x4xf32>
    %355 = vector.shape_cast %354 : vector<1x16x4xf32> to vector<16x4xf32>
    %356 = vector.extract_strided_slice %296 {offsets = [0, 0, 0], sizes = [1, 16, 4], strides = [1, 1, 1]} : vector<4x16x4xf32> to vector<1x16x4xf32>
    %357 = vector.shape_cast %356 : vector<1x16x4xf32> to vector<16x4xf32>
    %358 = arith.mulf %355, %357 : vector<16x4xf32>
    %cst_40 = arith.constant dense<0.000000e+00> : vector<16xf32>
    %359 = vector.multi_reduction <add>, %358, %cst_40 [1] : vector<16x4xf32> to vector<16xf32>
    %360 = vector.shape_cast %359 : vector<16xf32> to vector<16x1xf32>
    %361 = vector.extract_strided_slice %295 {offsets = [2, 0, 0], sizes = [1, 16, 4], strides = [1, 1, 1]} : vector<4x16x4xf32> to vector<1x16x4xf32>
    %362 = vector.shape_cast %361 : vector<1x16x4xf32> to vector<16x4xf32>
    %363 = vector.extract_strided_slice %296 {offsets = [1, 0, 0], sizes = [1, 16, 4], strides = [1, 1, 1]} : vector<4x16x4xf32> to vector<1x16x4xf32>
    %364 = vector.shape_cast %363 : vector<1x16x4xf32> to vector<16x4xf32>
    %365 = arith.mulf %362, %364 : vector<16x4xf32>
    %cst_41 = arith.constant dense<0.000000e+00> : vector<16xf32>
    %366 = vector.multi_reduction <add>, %365, %cst_41 [1] : vector<16x4xf32> to vector<16xf32>
    %367 = vector.shape_cast %366 : vector<16xf32> to vector<16x1xf32>
    %368 = vector.extract_strided_slice %295 {offsets = [2, 0, 0], sizes = [1, 16, 4], strides = [1, 1, 1]} : vector<4x16x4xf32> to vector<1x16x4xf32>
    %369 = vector.shape_cast %368 : vector<1x16x4xf32> to vector<16x4xf32>
    %370 = vector.extract_strided_slice %296 {offsets = [2, 0, 0], sizes = [1, 16, 4], strides = [1, 1, 1]} : vector<4x16x4xf32> to vector<1x16x4xf32>
    %371 = vector.shape_cast %370 : vector<1x16x4xf32> to vector<16x4xf32>
    %372 = arith.mulf %369, %371 : vector<16x4xf32>
    %cst_42 = arith.constant dense<0.000000e+00> : vector<16xf32>
    %373 = vector.multi_reduction <add>, %372, %cst_42 [1] : vector<16x4xf32> to vector<16xf32>
    %374 = vector.shape_cast %373 : vector<16xf32> to vector<16x1xf32>
    %375 = vector.extract_strided_slice %295 {offsets = [2, 0, 0], sizes = [1, 16, 4], strides = [1, 1, 1]} : vector<4x16x4xf32> to vector<1x16x4xf32>
    %376 = vector.shape_cast %375 : vector<1x16x4xf32> to vector<16x4xf32>
    %377 = vector.extract_strided_slice %296 {offsets = [3, 0, 0], sizes = [1, 16, 4], strides = [1, 1, 1]} : vector<4x16x4xf32> to vector<1x16x4xf32>
    %378 = vector.shape_cast %377 : vector<1x16x4xf32> to vector<16x4xf32>
    %379 = arith.mulf %376, %378 : vector<16x4xf32>
    %cst_43 = arith.constant dense<0.000000e+00> : vector<16xf32>
    %380 = vector.multi_reduction <add>, %379, %cst_43 [1] : vector<16x4xf32> to vector<16xf32>
    %381 = vector.shape_cast %380 : vector<16xf32> to vector<16x1xf32>
    %382 = vector.extract_strided_slice %295 {offsets = [3, 0, 0], sizes = [1, 16, 4], strides = [1, 1, 1]} : vector<4x16x4xf32> to vector<1x16x4xf32>
    %383 = vector.shape_cast %382 : vector<1x16x4xf32> to vector<16x4xf32>
    %384 = vector.extract_strided_slice %296 {offsets = [0, 0, 0], sizes = [1, 16, 4], strides = [1, 1, 1]} : vector<4x16x4xf32> to vector<1x16x4xf32>
    %385 = vector.shape_cast %384 : vector<1x16x4xf32> to vector<16x4xf32>
    %386 = arith.mulf %383, %385 : vector<16x4xf32>
    %cst_44 = arith.constant dense<0.000000e+00> : vector<16xf32>
    %387 = vector.multi_reduction <add>, %386, %cst_44 [1] : vector<16x4xf32> to vector<16xf32>
    %388 = vector.shape_cast %387 : vector<16xf32> to vector<16x1xf32>
    %389 = vector.extract_strided_slice %295 {offsets = [3, 0, 0], sizes = [1, 16, 4], strides = [1, 1, 1]} : vector<4x16x4xf32> to vector<1x16x4xf32>
    %390 = vector.shape_cast %389 : vector<1x16x4xf32> to vector<16x4xf32>
    %391 = vector.extract_strided_slice %296 {offsets = [1, 0, 0], sizes = [1, 16, 4], strides = [1, 1, 1]} : vector<4x16x4xf32> to vector<1x16x4xf32>
    %392 = vector.shape_cast %391 : vector<1x16x4xf32> to vector<16x4xf32>
    %393 = arith.mulf %390, %392 : vector<16x4xf32>
    %cst_45 = arith.constant dense<0.000000e+00> : vector<16xf32>
    %394 = vector.multi_reduction <add>, %393, %cst_45 [1] : vector<16x4xf32> to vector<16xf32>
    %395 = vector.shape_cast %394 : vector<16xf32> to vector<16x1xf32>
    %396 = vector.extract_strided_slice %295 {offsets = [3, 0, 0], sizes = [1, 16, 4], strides = [1, 1, 1]} : vector<4x16x4xf32> to vector<1x16x4xf32>
    %397 = vector.shape_cast %396 : vector<1x16x4xf32> to vector<16x4xf32>
    %398 = vector.extract_strided_slice %296 {offsets = [2, 0, 0], sizes = [1, 16, 4], strides = [1, 1, 1]} : vector<4x16x4xf32> to vector<1x16x4xf32>
    %399 = vector.shape_cast %398 : vector<1x16x4xf32> to vector<16x4xf32>
    %400 = arith.mulf %397, %399 : vector<16x4xf32>
    %cst_46 = arith.constant dense<0.000000e+00> : vector<16xf32>
    %401 = vector.multi_reduction <add>, %400, %cst_46 [1] : vector<16x4xf32> to vector<16xf32>
    %402 = vector.shape_cast %401 : vector<16xf32> to vector<16x1xf32>
    %403 = vector.extract_strided_slice %295 {offsets = [3, 0, 0], sizes = [1, 16, 4], strides = [1, 1, 1]} : vector<4x16x4xf32> to vector<1x16x4xf32>
    %404 = vector.shape_cast %403 : vector<1x16x4xf32> to vector<16x4xf32>
    %405 = vector.extract_strided_slice %296 {offsets = [3, 0, 0], sizes = [1, 16, 4], strides = [1, 1, 1]} : vector<4x16x4xf32> to vector<1x16x4xf32>
    %406 = vector.shape_cast %405 : vector<1x16x4xf32> to vector<16x4xf32>
    %407 = arith.mulf %404, %406 : vector<16x4xf32>
    %cst_47 = arith.constant dense<0.000000e+00> : vector<16xf32>
    %408 = vector.multi_reduction <add>, %407, %cst_47 [1] : vector<16x4xf32> to vector<16xf32>
    %409 = vector.shape_cast %408 : vector<16xf32> to vector<16x1xf32>
    %410 = arith.maximumf %304, %311 : vector<16x1xf32>
    %411 = arith.maximumf %410, %318 : vector<16x1xf32>
    %412 = arith.maximumf %411, %325 : vector<16x1xf32>
    %413 = arith.subf %304, %412 : vector<16x1xf32>
    %414 = math.exp %413 : vector<16x1xf32>
    %415 = arith.subf %311, %412 : vector<16x1xf32>
    %416 = math.exp %415 : vector<16x1xf32>
    %417 = arith.subf %318, %412 : vector<16x1xf32>
    %418 = math.exp %417 : vector<16x1xf32>
    %419 = arith.subf %325, %412 : vector<16x1xf32>
    %420 = math.exp %419 : vector<16x1xf32>
    %421 = arith.addf %414, %416 : vector<16x1xf32>
    %422 = arith.addf %421, %418 : vector<16x1xf32>
    %423 = arith.addf %422, %420 : vector<16x1xf32>
    %424 = tpu.reciprocal %423 {approx = true} : vector<16x1xf32> -> vector<16x1xf32>
    %425 = arith.mulf %414, %424 : vector<16x1xf32>
    %426 = vector.extract_strided_slice %297 {offsets = [0, 0, 0], sizes = [1, 16, 4], strides = [1, 1, 1]} : vector<4x16x4xf32> to vector<1x16x4xf32>
    %427 = vector.shape_cast %426 : vector<1x16x4xf32> to vector<16x4xf32>
    %428 = vector.broadcast %425 : vector<16x1xf32> to vector<16x4xf32>
    %429 = arith.mulf %428, %427 : vector<16x4xf32>
    %430 = arith.mulf %416, %424 : vector<16x1xf32>
    %431 = vector.extract_strided_slice %297 {offsets = [1, 0, 0], sizes = [1, 16, 4], strides = [1, 1, 1]} : vector<4x16x4xf32> to vector<1x16x4xf32>
    %432 = vector.shape_cast %431 : vector<1x16x4xf32> to vector<16x4xf32>
    %433 = vector.broadcast %430 : vector<16x1xf32> to vector<16x4xf32>
    %434 = arith.mulf %433, %432 : vector<16x4xf32>
    %435 = arith.addf %429, %434 : vector<16x4xf32>
    %436 = arith.mulf %418, %424 : vector<16x1xf32>
    %437 = vector.extract_strided_slice %297 {offsets = [2, 0, 0], sizes = [1, 16, 4], strides = [1, 1, 1]} : vector<4x16x4xf32> to vector<1x16x4xf32>
    %438 = vector.shape_cast %437 : vector<1x16x4xf32> to vector<16x4xf32>
    %439 = vector.broadcast %436 : vector<16x1xf32> to vector<16x4xf32>
    %440 = arith.mulf %439, %438 : vector<16x4xf32>
    %441 = arith.addf %435, %440 : vector<16x4xf32>
    %442 = arith.mulf %420, %424 : vector<16x1xf32>
    %443 = vector.extract_strided_slice %297 {offsets = [3, 0, 0], sizes = [1, 16, 4], strides = [1, 1, 1]} : vector<4x16x4xf32> to vector<1x16x4xf32>
    %444 = vector.shape_cast %443 : vector<1x16x4xf32> to vector<16x4xf32>
    %445 = vector.broadcast %442 : vector<16x1xf32> to vector<16x4xf32>
    %446 = arith.mulf %445, %444 : vector<16x4xf32>
    %447 = arith.addf %441, %446 : vector<16x4xf32>
    %448 = arith.truncf %447 : vector<16x4xf32> to vector<16x4xbf16>
    %c0_48 = arith.constant 0 : index
    %c0_49 = arith.constant 0 : index
    %c4 = arith.constant 4 : index
    %449 = vector.load %arg10[%c0_48, %c0_49, %c4] : memref<4x16x16xbf16, #tpu.memory_space<vmem>>, vector<1x16x4xbf16>
    %450 = vector.shape_cast %449 : vector<1x16x4xbf16> to vector<16x4xbf16>
    %451 = vector.shape_cast %448 : vector<16x4xbf16> to vector<1x16x4xbf16>
    tpu.vector_store %arg10[%c0_48, %c0_49, %c4], %451 {strides = array<i32>} : memref<4x16x16xbf16, #tpu.memory_space<vmem>>, vector<1x16x4xbf16>,
    %452 = arith.maximumf %332, %339 : vector<16x1xf32>
    %453 = arith.maximumf %452, %346 : vector<16x1xf32>
    %454 = arith.maximumf %453, %353 : vector<16x1xf32>
    %455 = arith.subf %332, %454 : vector<16x1xf32>
    %456 = math.exp %455 : vector<16x1xf32>
    %457 = arith.subf %339, %454 : vector<16x1xf32>
    %458 = math.exp %457 : vector<16x1xf32>
    %459 = arith.subf %346, %454 : vector<16x1xf32>
    %460 = math.exp %459 : vector<16x1xf32>
    %461 = arith.subf %353, %454 : vector<16x1xf32>
    %462 = math.exp %461 : vector<16x1xf32>
    %463 = arith.addf %456, %458 : vector<16x1xf32>
    %464 = arith.addf %463, %460 : vector<16x1xf32>
    %465 = arith.addf %464, %462 : vector<16x1xf32>
    %466 = tpu.reciprocal %465 {approx = true} : vector<16x1xf32> -> vector<16x1xf32>
    %467 = arith.mulf %456, %466 : vector<16x1xf32>
    %468 = vector.extract_strided_slice %297 {offsets = [0, 0, 0], sizes = [1, 16, 4], strides = [1, 1, 1]} : vector<4x16x4xf32> to vector<1x16x4xf32>
    %469 = vector.shape_cast %468 : vector<1x16x4xf32> to vector<16x4xf32>
    %470 = vector.broadcast %467 : vector<16x1xf32> to vector<16x4xf32>
    %471 = arith.mulf %470, %469 : vector<16x4xf32>
    %472 = arith.mulf %458, %466 : vector<16x1xf32>
    %473 = vector.extract_strided_slice %297 {offsets = [1, 0, 0], sizes = [1, 16, 4], strides = [1, 1, 1]} : vector<4x16x4xf32> to vector<1x16x4xf32>
    %474 = vector.shape_cast %473 : vector<1x16x4xf32> to vector<16x4xf32>
    %475 = vector.broadcast %472 : vector<16x1xf32> to vector<16x4xf32>
    %476 = arith.mulf %475, %474 : vector<16x4xf32>
    %477 = arith.addf %471, %476 : vector<16x4xf32>
    %478 = arith.mulf %460, %466 : vector<16x1xf32>
    %479 = vector.extract_strided_slice %297 {offsets = [2, 0, 0], sizes = [1, 16, 4], strides = [1, 1, 1]} : vector<4x16x4xf32> to vector<1x16x4xf32>
    %480 = vector.shape_cast %479 : vector<1x16x4xf32> to vector<16x4xf32>
    %481 = vector.broadcast %478 : vector<16x1xf32> to vector<16x4xf32>
    %482 = arith.mulf %481, %480 : vector<16x4xf32>
    %483 = arith.addf %477, %482 : vector<16x4xf32>
    %484 = arith.mulf %462, %466 : vector<16x1xf32>
    %485 = vector.extract_strided_slice %297 {offsets = [3, 0, 0], sizes = [1, 16, 4], strides = [1, 1, 1]} : vector<4x16x4xf32> to vector<1x16x4xf32>
    %486 = vector.shape_cast %485 : vector<1x16x4xf32> to vector<16x4xf32>
    %487 = vector.broadcast %484 : vector<16x1xf32> to vector<16x4xf32>
    %488 = arith.mulf %487, %486 : vector<16x4xf32>
    %489 = arith.addf %483, %488 : vector<16x4xf32>
    %490 = arith.truncf %489 : vector<16x4xf32> to vector<16x4xbf16>
    %c1_50 = arith.constant 1 : index
    %c0_51 = arith.constant 0 : index
    %c4_52 = arith.constant 4 : index
    %491 = vector.load %arg10[%c1_50, %c0_51, %c4_52] : memref<4x16x16xbf16, #tpu.memory_space<vmem>>, vector<1x16x4xbf16>
    %492 = vector.shape_cast %491 : vector<1x16x4xbf16> to vector<16x4xbf16>
    %493 = vector.shape_cast %490 : vector<16x4xbf16> to vector<1x16x4xbf16>
    tpu.vector_store %arg10[%c1_50, %c0_51, %c4_52], %493 {strides = array<i32>} : memref<4x16x16xbf16, #tpu.memory_space<vmem>>, vector<1x16x4xbf16>,
    %494 = arith.maximumf %360, %367 : vector<16x1xf32>
    %495 = arith.maximumf %494, %374 : vector<16x1xf32>
    %496 = arith.maximumf %495, %381 : vector<16x1xf32>
    %497 = arith.subf %360, %496 : vector<16x1xf32>
    %498 = math.exp %497 : vector<16x1xf32>
    %499 = arith.subf %367, %496 : vector<16x1xf32>
    %500 = math.exp %499 : vector<16x1xf32>
    %501 = arith.subf %374, %496 : vector<16x1xf32>
    %502 = math.exp %501 : vector<16x1xf32>
    %503 = arith.subf %381, %496 : vector<16x1xf32>
    %504 = math.exp %503 : vector<16x1xf32>
    %505 = arith.addf %498, %500 : vector<16x1xf32>
    %506 = arith.addf %505, %502 : vector<16x1xf32>
    %507 = arith.addf %506, %504 : vector<16x1xf32>
    %508 = tpu.reciprocal %507 {approx = true} : vector<16x1xf32> -> vector<16x1xf32>
    %509 = arith.mulf %498, %508 : vector<16x1xf32>
    %510 = vector.extract_strided_slice %297 {offsets = [0, 0, 0], sizes = [1, 16, 4], strides = [1, 1, 1]} : vector<4x16x4xf32> to vector<1x16x4xf32>
    %511 = vector.shape_cast %510 : vector<1x16x4xf32> to vector<16x4xf32>
    %512 = vector.broadcast %509 : vector<16x1xf32> to vector<16x4xf32>
    %513 = arith.mulf %512, %511 : vector<16x4xf32>
    %514 = arith.mulf %500, %508 : vector<16x1xf32>
    %515 = vector.extract_strided_slice %297 {offsets = [1, 0, 0], sizes = [1, 16, 4], strides = [1, 1, 1]} : vector<4x16x4xf32> to vector<1x16x4xf32>
    %516 = vector.shape_cast %515 : vector<1x16x4xf32> to vector<16x4xf32>
    %517 = vector.broadcast %514 : vector<16x1xf32> to vector<16x4xf32>
    %518 = arith.mulf %517, %516 : vector<16x4xf32>
    %519 = arith.addf %513, %518 : vector<16x4xf32>
    %520 = arith.mulf %502, %508 : vector<16x1xf32>
    %521 = vector.extract_strided_slice %297 {offsets = [2, 0, 0], sizes = [1, 16, 4], strides = [1, 1, 1]} : vector<4x16x4xf32> to vector<1x16x4xf32>
    %522 = vector.shape_cast %521 : vector<1x16x4xf32> to vector<16x4xf32>
    %523 = vector.broadcast %520 : vector<16x1xf32> to vector<16x4xf32>
    %524 = arith.mulf %523, %522 : vector<16x4xf32>
    %525 = arith.addf %519, %524 : vector<16x4xf32>
    %526 = arith.mulf %504, %508 : vector<16x1xf32>
    %527 = vector.extract_strided_slice %297 {offsets = [3, 0, 0], sizes = [1, 16, 4], strides = [1, 1, 1]} : vector<4x16x4xf32> to vector<1x16x4xf32>
    %528 = vector.shape_cast %527 : vector<1x16x4xf32> to vector<16x4xf32>
    %529 = vector.broadcast %526 : vector<16x1xf32> to vector<16x4xf32>
    %530 = arith.mulf %529, %528 : vector<16x4xf32>
    %531 = arith.addf %525, %530 : vector<16x4xf32>
    %532 = arith.truncf %531 : vector<16x4xf32> to vector<16x4xbf16>
    %c2_53 = arith.constant 2 : index
    %c0_54 = arith.constant 0 : index
    %c4_55 = arith.constant 4 : index
    %533 = vector.load %arg10[%c2_53, %c0_54, %c4_55] : memref<4x16x16xbf16, #tpu.memory_space<vmem>>, vector<1x16x4xbf16>
    %534 = vector.shape_cast %533 : vector<1x16x4xbf16> to vector<16x4xbf16>
    %535 = vector.shape_cast %532 : vector<16x4xbf16> to vector<1x16x4xbf16>
    tpu.vector_store %arg10[%c2_53, %c0_54, %c4_55], %535 {strides = array<i32>} : memref<4x16x16xbf16, #tpu.memory_space<vmem>>, vector<1x16x4xbf16>,
    %536 = arith.maximumf %388, %395 : vector<16x1xf32>
    %537 = arith.maximumf %536, %402 : vector<16x1xf32>
    %538 = arith.maximumf %537, %409 : vector<16x1xf32>
    %539 = arith.subf %388, %538 : vector<16x1xf32>
    %540 = math.exp %539 : vector<16x1xf32>
    %541 = arith.subf %395, %538 : vector<16x1xf32>
    %542 = math.exp %541 : vector<16x1xf32>
    %543 = arith.subf %402, %538 : vector<16x1xf32>
    %544 = math.exp %543 : vector<16x1xf32>
    %545 = arith.subf %409, %538 : vector<16x1xf32>
    %546 = math.exp %545 : vector<16x1xf32>
    %547 = arith.addf %540, %542 : vector<16x1xf32>
    %548 = arith.addf %547, %544 : vector<16x1xf32>
    %549 = arith.addf %548, %546 : vector<16x1xf32>
    %550 = tpu.reciprocal %549 {approx = true} : vector<16x1xf32> -> vector<16x1xf32>
    %551 = arith.mulf %540, %550 : vector<16x1xf32>
    %552 = vector.extract_strided_slice %297 {offsets = [0, 0, 0], sizes = [1, 16, 4], strides = [1, 1, 1]} : vector<4x16x4xf32> to vector<1x16x4xf32>
    %553 = vector.shape_cast %552 : vector<1x16x4xf32> to vector<16x4xf32>
    %554 = vector.broadcast %551 : vector<16x1xf32> to vector<16x4xf32>
    %555 = arith.mulf %554, %553 : vector<16x4xf32>
    %556 = arith.mulf %542, %550 : vector<16x1xf32>
    %557 = vector.extract_strided_slice %297 {offsets = [1, 0, 0], sizes = [1, 16, 4], strides = [1, 1, 1]} : vector<4x16x4xf32> to vector<1x16x4xf32>
    %558 = vector.shape_cast %557 : vector<1x16x4xf32> to vector<16x4xf32>
    %559 = vector.broadcast %556 : vector<16x1xf32> to vector<16x4xf32>
    %560 = arith.mulf %559, %558 : vector<16x4xf32>
    %561 = arith.addf %555, %560 : vector<16x4xf32>
    %562 = arith.mulf %544, %550 : vector<16x1xf32>
    %563 = vector.extract_strided_slice %297 {offsets = [2, 0, 0], sizes = [1, 16, 4], strides = [1, 1, 1]} : vector<4x16x4xf32> to vector<1x16x4xf32>
    %564 = vector.shape_cast %563 : vector<1x16x4xf32> to vector<16x4xf32>
    %565 = vector.broadcast %562 : vector<16x1xf32> to vector<16x4xf32>
    %566 = arith.mulf %565, %564 : vector<16x4xf32>
    %567 = arith.addf %561, %566 : vector<16x4xf32>
    %568 = arith.mulf %546, %550 : vector<16x1xf32>
    %569 = vector.extract_strided_slice %297 {offsets = [3, 0, 0], sizes = [1, 16, 4], strides = [1, 1, 1]} : vector<4x16x4xf32> to vector<1x16x4xf32>
    %570 = vector.shape_cast %569 : vector<1x16x4xf32> to vector<16x4xf32>
    %571 = vector.broadcast %568 : vector<16x1xf32> to vector<16x4xf32>
    %572 = arith.mulf %571, %570 : vector<16x4xf32>
    %573 = arith.addf %567, %572 : vector<16x4xf32>
    %574 = arith.truncf %573 : vector<16x4xf32> to vector<16x4xbf16>
    %c3_56 = arith.constant 3 : index
    %c0_57 = arith.constant 0 : index
    %c4_58 = arith.constant 4 : index
    %575 = vector.load %arg10[%c3_56, %c0_57, %c4_58] : memref<4x16x16xbf16, #tpu.memory_space<vmem>>, vector<1x16x4xbf16>
    %576 = vector.shape_cast %575 : vector<1x16x4xbf16> to vector<16x4xbf16>
    %577 = vector.shape_cast %574 : vector<16x4xbf16> to vector<1x16x4xbf16>
    tpu.vector_store %arg10[%c3_56, %c0_57, %c4_58], %577 {strides = array<i32>} : memref<4x16x16xbf16, #tpu.memory_space<vmem>>, vector<1x16x4xbf16>,
    %578 = vector.extract_strided_slice %11 {offsets = [0, 0, 8], sizes = [4, 16, 4], strides = [1, 1, 1]} : vector<4x16x48xf32> to vector<4x16x4xf32>
    %579 = vector.extract_strided_slice %11 {offsets = [0, 0, 24], sizes = [4, 16, 4], strides = [1, 1, 1]} : vector<4x16x48xf32> to vector<4x16x4xf32>
    %580 = vector.extract_strided_slice %11 {offsets = [0, 0, 40], sizes = [4, 16, 4], strides = [1, 1, 1]} : vector<4x16x48xf32> to vector<4x16x4xf32>
    %581 = vector.extract_strided_slice %578 {offsets = [0, 0, 0], sizes = [1, 16, 4], strides = [1, 1, 1]} : vector<4x16x4xf32> to vector<1x16x4xf32>
    %582 = vector.shape_cast %581 : vector<1x16x4xf32> to vector<16x4xf32>
    %583 = vector.extract_strided_slice %579 {offsets = [0, 0, 0], sizes = [1, 16, 4], strides = [1, 1, 1]} : vector<4x16x4xf32> to vector<1x16x4xf32>
    %584 = vector.shape_cast %583 : vector<1x16x4xf32> to vector<16x4xf32>
    %585 = arith.mulf %582, %584 : vector<16x4xf32>
    %cst_59 = arith.constant dense<0.000000e+00> : vector<16xf32>
    %586 = vector.multi_reduction <add>, %585, %cst_59 [1] : vector<16x4xf32> to vector<16xf32>
    %587 = vector.shape_cast %586 : vector<16xf32> to vector<16x1xf32>
    %588 = vector.extract_strided_slice %578 {offsets = [0, 0, 0], sizes = [1, 16, 4], strides = [1, 1, 1]} : vector<4x16x4xf32> to vector<1x16x4xf32>
    %589 = vector.shape_cast %588 : vector<1x16x4xf32> to vector<16x4xf32>
    %590 = vector.extract_strided_slice %579 {offsets = [1, 0, 0], sizes = [1, 16, 4], strides = [1, 1, 1]} : vector<4x16x4xf32> to vector<1x16x4xf32>
    %591 = vector.shape_cast %590 : vector<1x16x4xf32> to vector<16x4xf32>
    %592 = arith.mulf %589, %591 : vector<16x4xf32>
    %cst_60 = arith.constant dense<0.000000e+00> : vector<16xf32>
    %593 = vector.multi_reduction <add>, %592, %cst_60 [1] : vector<16x4xf32> to vector<16xf32>
    %594 = vector.shape_cast %593 : vector<16xf32> to vector<16x1xf32>
    %595 = vector.extract_strided_slice %578 {offsets = [0, 0, 0], sizes = [1, 16, 4], strides = [1, 1, 1]} : vector<4x16x4xf32> to vector<1x16x4xf32>
    %596 = vector.shape_cast %595 : vector<1x16x4xf32> to vector<16x4xf32>
    %597 = vector.extract_strided_slice %579 {offsets = [2, 0, 0], sizes = [1, 16, 4], strides = [1, 1, 1]} : vector<4x16x4xf32> to vector<1x16x4xf32>
    %598 = vector.shape_cast %597 : vector<1x16x4xf32> to vector<16x4xf32>
    %599 = arith.mulf %596, %598 : vector<16x4xf32>
    %cst_61 = arith.constant dense<0.000000e+00> : vector<16xf32>
    %600 = vector.multi_reduction <add>, %599, %cst_61 [1] : vector<16x4xf32> to vector<16xf32>
    %601 = vector.shape_cast %600 : vector<16xf32> to vector<16x1xf32>
    %602 = vector.extract_strided_slice %578 {offsets = [0, 0, 0], sizes = [1, 16, 4], strides = [1, 1, 1]} : vector<4x16x4xf32> to vector<1x16x4xf32>
    %603 = vector.shape_cast %602 : vector<1x16x4xf32> to vector<16x4xf32>
    %604 = vector.extract_strided_slice %579 {offsets = [3, 0, 0], sizes = [1, 16, 4], strides = [1, 1, 1]} : vector<4x16x4xf32> to vector<1x16x4xf32>
    %605 = vector.shape_cast %604 : vector<1x16x4xf32> to vector<16x4xf32>
    %606 = arith.mulf %603, %605 : vector<16x4xf32>
    %cst_62 = arith.constant dense<0.000000e+00> : vector<16xf32>
    %607 = vector.multi_reduction <add>, %606, %cst_62 [1] : vector<16x4xf32> to vector<16xf32>
    %608 = vector.shape_cast %607 : vector<16xf32> to vector<16x1xf32>
    %609 = vector.extract_strided_slice %578 {offsets = [1, 0, 0], sizes = [1, 16, 4], strides = [1, 1, 1]} : vector<4x16x4xf32> to vector<1x16x4xf32>
    %610 = vector.shape_cast %609 : vector<1x16x4xf32> to vector<16x4xf32>
    %611 = vector.extract_strided_slice %579 {offsets = [0, 0, 0], sizes = [1, 16, 4], strides = [1, 1, 1]} : vector<4x16x4xf32> to vector<1x16x4xf32>
    %612 = vector.shape_cast %611 : vector<1x16x4xf32> to vector<16x4xf32>
    %613 = arith.mulf %610, %612 : vector<16x4xf32>
    %cst_63 = arith.constant dense<0.000000e+00> : vector<16xf32>
    %614 = vector.multi_reduction <add>, %613, %cst_63 [1] : vector<16x4xf32> to vector<16xf32>
    %615 = vector.shape_cast %614 : vector<16xf32> to vector<16x1xf32>
    %616 = vector.extract_strided_slice %578 {offsets = [1, 0, 0], sizes = [1, 16, 4], strides = [1, 1, 1]} : vector<4x16x4xf32> to vector<1x16x4xf32>
    %617 = vector.shape_cast %616 : vector<1x16x4xf32> to vector<16x4xf32>
    %618 = vector.extract_strided_slice %579 {offsets = [1, 0, 0], sizes = [1, 16, 4], strides = [1, 1, 1]} : vector<4x16x4xf32> to vector<1x16x4xf32>
    %619 = vector.shape_cast %618 : vector<1x16x4xf32> to vector<16x4xf32>
    %620 = arith.mulf %617, %619 : vector<16x4xf32>
    %cst_64 = arith.constant dense<0.000000e+00> : vector<16xf32>
    %621 = vector.multi_reduction <add>, %620, %cst_64 [1] : vector<16x4xf32> to vector<16xf32>
    %622 = vector.shape_cast %621 : vector<16xf32> to vector<16x1xf32>
    %623 = vector.extract_strided_slice %578 {offsets = [1, 0, 0], sizes = [1, 16, 4], strides = [1, 1, 1]} : vector<4x16x4xf32> to vector<1x16x4xf32>
    %624 = vector.shape_cast %623 : vector<1x16x4xf32> to vector<16x4xf32>
    %625 = vector.extract_strided_slice %579 {offsets = [2, 0, 0], sizes = [1, 16, 4], strides = [1, 1, 1]} : vector<4x16x4xf32> to vector<1x16x4xf32>
    %626 = vector.shape_cast %625 : vector<1x16x4xf32> to vector<16x4xf32>
    %627 = arith.mulf %624, %626 : vector<16x4xf32>
    %cst_65 = arith.constant dense<0.000000e+00> : vector<16xf32>
    %628 = vector.multi_reduction <add>, %627, %cst_65 [1] : vector<16x4xf32> to vector<16xf32>
    %629 = vector.shape_cast %628 : vector<16xf32> to vector<16x1xf32>
    %630 = vector.extract_strided_slice %578 {offsets = [1, 0, 0], sizes = [1, 16, 4], strides = [1, 1, 1]} : vector<4x16x4xf32> to vector<1x16x4xf32>
    %631 = vector.shape_cast %630 : vector<1x16x4xf32> to vector<16x4xf32>
    %632 = vector.extract_strided_slice %579 {offsets = [3, 0, 0], sizes = [1, 16, 4], strides = [1, 1, 1]} : vector<4x16x4xf32> to vector<1x16x4xf32>
    %633 = vector.shape_cast %632 : vector<1x16x4xf32> to vector<16x4xf32>
    %634 = arith.mulf %631, %633 : vector<16x4xf32>
    %cst_66 = arith.constant dense<0.000000e+00> : vector<16xf32>
    %635 = vector.multi_reduction <add>, %634, %cst_66 [1] : vector<16x4xf32> to vector<16xf32>
    %636 = vector.shape_cast %635 : vector<16xf32> to vector<16x1xf32>
    %637 = vector.extract_strided_slice %578 {offsets = [2, 0, 0], sizes = [1, 16, 4], strides = [1, 1, 1]} : vector<4x16x4xf32> to vector<1x16x4xf32>
    %638 = vector.shape_cast %637 : vector<1x16x4xf32> to vector<16x4xf32>
    %639 = vector.extract_strided_slice %579 {offsets = [0, 0, 0], sizes = [1, 16, 4], strides = [1, 1, 1]} : vector<4x16x4xf32> to vector<1x16x4xf32>
    %640 = vector.shape_cast %639 : vector<1x16x4xf32> to vector<16x4xf32>
    %641 = arith.mulf %638, %640 : vector<16x4xf32>
    %cst_67 = arith.constant dense<0.000000e+00> : vector<16xf32>
    %642 = vector.multi_reduction <add>, %641, %cst_67 [1] : vector<16x4xf32> to vector<16xf32>
    %643 = vector.shape_cast %642 : vector<16xf32> to vector<16x1xf32>
    %644 = vector.extract_strided_slice %578 {offsets = [2, 0, 0], sizes = [1, 16, 4], strides = [1, 1, 1]} : vector<4x16x4xf32> to vector<1x16x4xf32>
    %645 = vector.shape_cast %644 : vector<1x16x4xf32> to vector<16x4xf32>
    %646 = vector.extract_strided_slice %579 {offsets = [1, 0, 0], sizes = [1, 16, 4], strides = [1, 1, 1]} : vector<4x16x4xf32> to vector<1x16x4xf32>
    %647 = vector.shape_cast %646 : vector<1x16x4xf32> to vector<16x4xf32>
    %648 = arith.mulf %645, %647 : vector<16x4xf32>
    %cst_68 = arith.constant dense<0.000000e+00> : vector<16xf32>
    %649 = vector.multi_reduction <add>, %648, %cst_68 [1] : vector<16x4xf32> to vector<16xf32>
    %650 = vector.shape_cast %649 : vector<16xf32> to vector<16x1xf32>
    %651 = vector.extract_strided_slice %578 {offsets = [2, 0, 0], sizes = [1, 16, 4], strides = [1, 1, 1]} : vector<4x16x4xf32> to vector<1x16x4xf32>
    %652 = vector.shape_cast %651 : vector<1x16x4xf32> to vector<16x4xf32>
    %653 = vector.extract_strided_slice %579 {offsets = [2, 0, 0], sizes = [1, 16, 4], strides = [1, 1, 1]} : vector<4x16x4xf32> to vector<1x16x4xf32>
    %654 = vector.shape_cast %653 : vector<1x16x4xf32> to vector<16x4xf32>
    %655 = arith.mulf %652, %654 : vector<16x4xf32>
    %cst_69 = arith.constant dense<0.000000e+00> : vector<16xf32>
    %656 = vector.multi_reduction <add>, %655, %cst_69 [1] : vector<16x4xf32> to vector<16xf32>
    %657 = vector.shape_cast %656 : vector<16xf32> to vector<16x1xf32>
    %658 = vector.extract_strided_slice %578 {offsets = [2, 0, 0], sizes = [1, 16, 4], strides = [1, 1, 1]} : vector<4x16x4xf32> to vector<1x16x4xf32>
    %659 = vector.shape_cast %658 : vector<1x16x4xf32> to vector<16x4xf32>
    %660 = vector.extract_strided_slice %579 {offsets = [3, 0, 0], sizes = [1, 16, 4], strides = [1, 1, 1]} : vector<4x16x4xf32> to vector<1x16x4xf32>
    %661 = vector.shape_cast %660 : vector<1x16x4xf32> to vector<16x4xf32>
    %662 = arith.mulf %659, %661 : vector<16x4xf32>
    %cst_70 = arith.constant dense<0.000000e+00> : vector<16xf32>
    %663 = vector.multi_reduction <add>, %662, %cst_70 [1] : vector<16x4xf32> to vector<16xf32>
    %664 = vector.shape_cast %663 : vector<16xf32> to vector<16x1xf32>
    %665 = vector.extract_strided_slice %578 {offsets = [3, 0, 0], sizes = [1, 16, 4], strides = [1, 1, 1]} : vector<4x16x4xf32> to vector<1x16x4xf32>
    %666 = vector.shape_cast %665 : vector<1x16x4xf32> to vector<16x4xf32>
    %667 = vector.extract_strided_slice %579 {offsets = [0, 0, 0], sizes = [1, 16, 4], strides = [1, 1, 1]} : vector<4x16x4xf32> to vector<1x16x4xf32>
    %668 = vector.shape_cast %667 : vector<1x16x4xf32> to vector<16x4xf32>
    %669 = arith.mulf %666, %668 : vector<16x4xf32>
    %cst_71 = arith.constant dense<0.000000e+00> : vector<16xf32>
    %670 = vector.multi_reduction <add>, %669, %cst_71 [1] : vector<16x4xf32> to vector<16xf32>
    %671 = vector.shape_cast %670 : vector<16xf32> to vector<16x1xf32>
    %672 = vector.extract_strided_slice %578 {offsets = [3, 0, 0], sizes = [1, 16, 4], strides = [1, 1, 1]} : vector<4x16x4xf32> to vector<1x16x4xf32>
    %673 = vector.shape_cast %672 : vector<1x16x4xf32> to vector<16x4xf32>
    %674 = vector.extract_strided_slice %579 {offsets = [1, 0, 0], sizes = [1, 16, 4], strides = [1, 1, 1]} : vector<4x16x4xf32> to vector<1x16x4xf32>
    %675 = vector.shape_cast %674 : vector<1x16x4xf32> to vector<16x4xf32>
    %676 = arith.mulf %673, %675 : vector<16x4xf32>
    %cst_72 = arith.constant dense<0.000000e+00> : vector<16xf32>
    %677 = vector.multi_reduction <add>, %676, %cst_72 [1] : vector<16x4xf32> to vector<16xf32>
    %678 = vector.shape_cast %677 : vector<16xf32> to vector<16x1xf32>
    %679 = vector.extract_strided_slice %578 {offsets = [3, 0, 0], sizes = [1, 16, 4], strides = [1, 1, 1]} : vector<4x16x4xf32> to vector<1x16x4xf32>
    %680 = vector.shape_cast %679 : vector<1x16x4xf32> to vector<16x4xf32>
    %681 = vector.extract_strided_slice %579 {offsets = [2, 0, 0], sizes = [1, 16, 4], strides = [1, 1, 1]} : vector<4x16x4xf32> to vector<1x16x4xf32>
    %682 = vector.shape_cast %681 : vector<1x16x4xf32> to vector<16x4xf32>
    %683 = arith.mulf %680, %682 : vector<16x4xf32>
    %cst_73 = arith.constant dense<0.000000e+00> : vector<16xf32>
    %684 = vector.multi_reduction <add>, %683, %cst_73 [1] : vector<16x4xf32> to vector<16xf32>
    %685 = vector.shape_cast %684 : vector<16xf32> to vector<16x1xf32>
    %686 = vector.extract_strided_slice %578 {offsets = [3, 0, 0], sizes = [1, 16, 4], strides = [1, 1, 1]} : vector<4x16x4xf32> to vector<1x16x4xf32>
    %687 = vector.shape_cast %686 : vector<1x16x4xf32> to vector<16x4xf32>
    %688 = vector.extract_strided_slice %579 {offsets = [3, 0, 0], sizes = [1, 16, 4], strides = [1, 1, 1]} : vector<4x16x4xf32> to vector<1x16x4xf32>
    %689 = vector.shape_cast %688 : vector<1x16x4xf32> to vector<16x4xf32>
    %690 = arith.mulf %687, %689 : vector<16x4xf32>
    %cst_74 = arith.constant dense<0.000000e+00> : vector<16xf32>
    %691 = vector.multi_reduction <add>, %690, %cst_74 [1] : vector<16x4xf32> to vector<16xf32>
    %692 = vector.shape_cast %691 : vector<16xf32> to vector<16x1xf32>
    %693 = arith.maximumf %587, %594 : vector<16x1xf32>
    %694 = arith.maximumf %693, %601 : vector<16x1xf32>
    %695 = arith.maximumf %694, %608 : vector<16x1xf32>
    %696 = arith.subf %587, %695 : vector<16x1xf32>
    %697 = math.exp %696 : vector<16x1xf32>
    %698 = arith.subf %594, %695 : vector<16x1xf32>
    %699 = math.exp %698 : vector<16x1xf32>
    %700 = arith.subf %601, %695 : vector<16x1xf32>
    %701 = math.exp %700 : vector<16x1xf32>
    %702 = arith.subf %608, %695 : vector<16x1xf32>
    %703 = math.exp %702 : vector<16x1xf32>
    %704 = arith.addf %697, %699 : vector<16x1xf32>
    %705 = arith.addf %704, %701 : vector<16x1xf32>
    %706 = arith.addf %705, %703 : vector<16x1xf32>
    %707 = tpu.reciprocal %706 {approx = true} : vector<16x1xf32> -> vector<16x1xf32>
    %708 = arith.mulf %697, %707 : vector<16x1xf32>
    %709 = vector.extract_strided_slice %580 {offsets = [0, 0, 0], sizes = [1, 16, 4], strides = [1, 1, 1]} : vector<4x16x4xf32> to vector<1x16x4xf32>
    %710 = vector.shape_cast %709 : vector<1x16x4xf32> to vector<16x4xf32>
    %711 = vector.broadcast %708 : vector<16x1xf32> to vector<16x4xf32>
    %712 = arith.mulf %711, %710 : vector<16x4xf32>
    %713 = arith.mulf %699, %707 : vector<16x1xf32>
    %714 = vector.extract_strided_slice %580 {offsets = [1, 0, 0], sizes = [1, 16, 4], strides = [1, 1, 1]} : vector<4x16x4xf32> to vector<1x16x4xf32>
    %715 = vector.shape_cast %714 : vector<1x16x4xf32> to vector<16x4xf32>
    %716 = vector.broadcast %713 : vector<16x1xf32> to vector<16x4xf32>
    %717 = arith.mulf %716, %715 : vector<16x4xf32>
    %718 = arith.addf %712, %717 : vector<16x4xf32>
    %719 = arith.mulf %701, %707 : vector<16x1xf32>
    %720 = vector.extract_strided_slice %580 {offsets = [2, 0, 0], sizes = [1, 16, 4], strides = [1, 1, 1]} : vector<4x16x4xf32> to vector<1x16x4xf32>
    %721 = vector.shape_cast %720 : vector<1x16x4xf32> to vector<16x4xf32>
    %722 = vector.broadcast %719 : vector<16x1xf32> to vector<16x4xf32>
    %723 = arith.mulf %722, %721 : vector<16x4xf32>
    %724 = arith.addf %718, %723 : vector<16x4xf32>
    %725 = arith.mulf %703, %707 : vector<16x1xf32>
    %726 = vector.extract_strided_slice %580 {offsets = [3, 0, 0], sizes = [1, 16, 4], strides = [1, 1, 1]} : vector<4x16x4xf32> to vector<1x16x4xf32>
    %727 = vector.shape_cast %726 : vector<1x16x4xf32> to vector<16x4xf32>
    %728 = vector.broadcast %725 : vector<16x1xf32> to vector<16x4xf32>
    %729 = arith.mulf %728, %727 : vector<16x4xf32>
    %730 = arith.addf %724, %729 : vector<16x4xf32>
    %731 = arith.truncf %730 : vector<16x4xf32> to vector<16x4xbf16>
    %c0_75 = arith.constant 0 : index
    %c0_76 = arith.constant 0 : index
    %c8 = arith.constant 8 : index
    %732 = vector.load %arg10[%c0_75, %c0_76, %c8] : memref<4x16x16xbf16, #tpu.memory_space<vmem>>, vector<1x16x4xbf16>
    %733 = vector.shape_cast %732 : vector<1x16x4xbf16> to vector<16x4xbf16>
    %734 = vector.shape_cast %731 : vector<16x4xbf16> to vector<1x16x4xbf16>
    tpu.vector_store %arg10[%c0_75, %c0_76, %c8], %734 {strides = array<i32>} : memref<4x16x16xbf16, #tpu.memory_space<vmem>>, vector<1x16x4xbf16>,
    %735 = arith.maximumf %615, %622 : vector<16x1xf32>
    %736 = arith.maximumf %735, %629 : vector<16x1xf32>
    %737 = arith.maximumf %736, %636 : vector<16x1xf32>
    %738 = arith.subf %615, %737 : vector<16x1xf32>
    %739 = math.exp %738 : vector<16x1xf32>
    %740 = arith.subf %622, %737 : vector<16x1xf32>
    %741 = math.exp %740 : vector<16x1xf32>
    %742 = arith.subf %629, %737 : vector<16x1xf32>
    %743 = math.exp %742 : vector<16x1xf32>
    %744 = arith.subf %636, %737 : vector<16x1xf32>
    %745 = math.exp %744 : vector<16x1xf32>
    %746 = arith.addf %739, %741 : vector<16x1xf32>
    %747 = arith.addf %746, %743 : vector<16x1xf32>
    %748 = arith.addf %747, %745 : vector<16x1xf32>
    %749 = tpu.reciprocal %748 {approx = true} : vector<16x1xf32> -> vector<16x1xf32>
    %750 = arith.mulf %739, %749 : vector<16x1xf32>
    %751 = vector.extract_strided_slice %580 {offsets = [0, 0, 0], sizes = [1, 16, 4], strides = [1, 1, 1]} : vector<4x16x4xf32> to vector<1x16x4xf32>
    %752 = vector.shape_cast %751 : vector<1x16x4xf32> to vector<16x4xf32>
    %753 = vector.broadcast %750 : vector<16x1xf32> to vector<16x4xf32>
    %754 = arith.mulf %753, %752 : vector<16x4xf32>
    %755 = arith.mulf %741, %749 : vector<16x1xf32>
    %756 = vector.extract_strided_slice %580 {offsets = [1, 0, 0], sizes = [1, 16, 4], strides = [1, 1, 1]} : vector<4x16x4xf32> to vector<1x16x4xf32>
    %757 = vector.shape_cast %756 : vector<1x16x4xf32> to vector<16x4xf32>
    %758 = vector.broadcast %755 : vector<16x1xf32> to vector<16x4xf32>
    %759 = arith.mulf %758, %757 : vector<16x4xf32>
    %760 = arith.addf %754, %759 : vector<16x4xf32>
    %761 = arith.mulf %743, %749 : vector<16x1xf32>
    %762 = vector.extract_strided_slice %580 {offsets = [2, 0, 0], sizes = [1, 16, 4], strides = [1, 1, 1]} : vector<4x16x4xf32> to vector<1x16x4xf32>
    %763 = vector.shape_cast %762 : vector<1x16x4xf32> to vector<16x4xf32>
    %764 = vector.broadcast %761 : vector<16x1xf32> to vector<16x4xf32>
    %765 = arith.mulf %764, %763 : vector<16x4xf32>
    %766 = arith.addf %760, %765 : vector<16x4xf32>
    %767 = arith.mulf %745, %749 : vector<16x1xf32>
    %768 = vector.extract_strided_slice %580 {offsets = [3, 0, 0], sizes = [1, 16, 4], strides = [1, 1, 1]} : vector<4x16x4xf32> to vector<1x16x4xf32>
    %769 = vector.shape_cast %768 : vector<1x16x4xf32> to vector<16x4xf32>
    %770 = vector.broadcast %767 : vector<16x1xf32> to vector<16x4xf32>
    %771 = arith.mulf %770, %769 : vector<16x4xf32>
    %772 = arith.addf %766, %771 : vector<16x4xf32>
    %773 = arith.truncf %772 : vector<16x4xf32> to vector<16x4xbf16>
    %c1_77 = arith.constant 1 : index
    %c0_78 = arith.constant 0 : index
    %c8_79 = arith.constant 8 : index
    %774 = vector.load %arg10[%c1_77, %c0_78, %c8_79] : memref<4x16x16xbf16, #tpu.memory_space<vmem>>, vector<1x16x4xbf16>
    %775 = vector.shape_cast %774 : vector<1x16x4xbf16> to vector<16x4xbf16>
    %776 = vector.shape_cast %773 : vector<16x4xbf16> to vector<1x16x4xbf16>
    tpu.vector_store %arg10[%c1_77, %c0_78, %c8_79], %776 {strides = array<i32>} : memref<4x16x16xbf16, #tpu.memory_space<vmem>>, vector<1x16x4xbf16>,
    %777 = arith.maximumf %643, %650 : vector<16x1xf32>
    %778 = arith.maximumf %777, %657 : vector<16x1xf32>
    %779 = arith.maximumf %778, %664 : vector<16x1xf32>
    %780 = arith.subf %643, %779 : vector<16x1xf32>
    %781 = math.exp %780 : vector<16x1xf32>
    %782 = arith.subf %650, %779 : vector<16x1xf32>
    %783 = math.exp %782 : vector<16x1xf32>
    %784 = arith.subf %657, %779 : vector<16x1xf32>
    %785 = math.exp %784 : vector<16x1xf32>
    %786 = arith.subf %664, %779 : vector<16x1xf32>
    %787 = math.exp %786 : vector<16x1xf32>
    %788 = arith.addf %781, %783 : vector<16x1xf32>
    %789 = arith.addf %788, %785 : vector<16x1xf32>
    %790 = arith.addf %789, %787 : vector<16x1xf32>
    %791 = tpu.reciprocal %790 {approx = true} : vector<16x1xf32> -> vector<16x1xf32>
    %792 = arith.mulf %781, %791 : vector<16x1xf32>
    %793 = vector.extract_strided_slice %580 {offsets = [0, 0, 0], sizes = [1, 16, 4], strides = [1, 1, 1]} : vector<4x16x4xf32> to vector<1x16x4xf32>
    %794 = vector.shape_cast %793 : vector<1x16x4xf32> to vector<16x4xf32>
    %795 = vector.broadcast %792 : vector<16x1xf32> to vector<16x4xf32>
    %796 = arith.mulf %795, %794 : vector<16x4xf32>
    %797 = arith.mulf %783, %791 : vector<16x1xf32>
    %798 = vector.extract_strided_slice %580 {offsets = [1, 0, 0], sizes = [1, 16, 4], strides = [1, 1, 1]} : vector<4x16x4xf32> to vector<1x16x4xf32>
    %799 = vector.shape_cast %798 : vector<1x16x4xf32> to vector<16x4xf32>
    %800 = vector.broadcast %797 : vector<16x1xf32> to vector<16x4xf32>
    %801 = arith.mulf %800, %799 : vector<16x4xf32>
    %802 = arith.addf %796, %801 : vector<16x4xf32>
    %803 = arith.mulf %785, %791 : vector<16x1xf32>
    %804 = vector.extract_strided_slice %580 {offsets = [2, 0, 0], sizes = [1, 16, 4], strides = [1, 1, 1]} : vector<4x16x4xf32> to vector<1x16x4xf32>
    %805 = vector.shape_cast %804 : vector<1x16x4xf32> to vector<16x4xf32>
    %806 = vector.broadcast %803 : vector<16x1xf32> to vector<16x4xf32>
    %807 = arith.mulf %806, %805 : vector<16x4xf32>
    %808 = arith.addf %802, %807 : vector<16x4xf32>
    %809 = arith.mulf %787, %791 : vector<16x1xf32>
    %810 = vector.extract_strided_slice %580 {offsets = [3, 0, 0], sizes = [1, 16, 4], strides = [1, 1, 1]} : vector<4x16x4xf32> to vector<1x16x4xf32>
    %811 = vector.shape_cast %810 : vector<1x16x4xf32> to vector<16x4xf32>
    %812 = vector.broadcast %809 : vector<16x1xf32> to vector<16x4xf32>
    %813 = arith.mulf %812, %811 : vector<16x4xf32>
    %814 = arith.addf %808, %813 : vector<16x4xf32>
    %815 = arith.truncf %814 : vector<16x4xf32> to vector<16x4xbf16>
    %c2_80 = arith.constant 2 : index
    %c0_81 = arith.constant 0 : index
    %c8_82 = arith.constant 8 : index
    %816 = vector.load %arg10[%c2_80, %c0_81, %c8_82] : memref<4x16x16xbf16, #tpu.memory_space<vmem>>, vector<1x16x4xbf16>
    %817 = vector.shape_cast %816 : vector<1x16x4xbf16> to vector<16x4xbf16>
    %818 = vector.shape_cast %815 : vector<16x4xbf16> to vector<1x16x4xbf16>
    tpu.vector_store %arg10[%c2_80, %c0_81, %c8_82], %818 {strides = array<i32>} : memref<4x16x16xbf16, #tpu.memory_space<vmem>>, vector<1x16x4xbf16>,
    %819 = arith.maximumf %671, %678 : vector<16x1xf32>
    %820 = arith.maximumf %819, %685 : vector<16x1xf32>
    %821 = arith.maximumf %820, %692 : vector<16x1xf32>
    %822 = arith.subf %671, %821 : vector<16x1xf32>
    %823 = math.exp %822 : vector<16x1xf32>
    %824 = arith.subf %678, %821 : vector<16x1xf32>
    %825 = math.exp %824 : vector<16x1xf32>
    %826 = arith.subf %685, %821 : vector<16x1xf32>
    %827 = math.exp %826 : vector<16x1xf32>
    %828 = arith.subf %692, %821 : vector<16x1xf32>
    %829 = math.exp %828 : vector<16x1xf32>
    %830 = arith.addf %823, %825 : vector<16x1xf32>
    %831 = arith.addf %830, %827 : vector<16x1xf32>
    %832 = arith.addf %831, %829 : vector<16x1xf32>
    %833 = tpu.reciprocal %832 {approx = true} : vector<16x1xf32> -> vector<16x1xf32>
    %834 = arith.mulf %823, %833 : vector<16x1xf32>
    %835 = vector.extract_strided_slice %580 {offsets = [0, 0, 0], sizes = [1, 16, 4], strides = [1, 1, 1]} : vector<4x16x4xf32> to vector<1x16x4xf32>
    %836 = vector.shape_cast %835 : vector<1x16x4xf32> to vector<16x4xf32>
    %837 = vector.broadcast %834 : vector<16x1xf32> to vector<16x4xf32>
    %838 = arith.mulf %837, %836 : vector<16x4xf32>
    %839 = arith.mulf %825, %833 : vector<16x1xf32>
    %840 = vector.extract_strided_slice %580 {offsets = [1, 0, 0], sizes = [1, 16, 4], strides = [1, 1, 1]} : vector<4x16x4xf32> to vector<1x16x4xf32>
    %841 = vector.shape_cast %840 : vector<1x16x4xf32> to vector<16x4xf32>
    %842 = vector.broadcast %839 : vector<16x1xf32> to vector<16x4xf32>
    %843 = arith.mulf %842, %841 : vector<16x4xf32>
    %844 = arith.addf %838, %843 : vector<16x4xf32>
    %845 = arith.mulf %827, %833 : vector<16x1xf32>
    %846 = vector.extract_strided_slice %580 {offsets = [2, 0, 0], sizes = [1, 16, 4], strides = [1, 1, 1]} : vector<4x16x4xf32> to vector<1x16x4xf32>
    %847 = vector.shape_cast %846 : vector<1x16x4xf32> to vector<16x4xf32>
    %848 = vector.broadcast %845 : vector<16x1xf32> to vector<16x4xf32>
    %849 = arith.mulf %848, %847 : vector<16x4xf32>
    %850 = arith.addf %844, %849 : vector<16x4xf32>
    %851 = arith.mulf %829, %833 : vector<16x1xf32>
    %852 = vector.extract_strided_slice %580 {offsets = [3, 0, 0], sizes = [1, 16, 4], strides = [1, 1, 1]} : vector<4x16x4xf32> to vector<1x16x4xf32>
    %853 = vector.shape_cast %852 : vector<1x16x4xf32> to vector<16x4xf32>
    %854 = vector.broadcast %851 : vector<16x1xf32> to vector<16x4xf32>
    %855 = arith.mulf %854, %853 : vector<16x4xf32>
    %856 = arith.addf %850, %855 : vector<16x4xf32>
    %857 = arith.truncf %856 : vector<16x4xf32> to vector<16x4xbf16>
    %c3_83 = arith.constant 3 : index
    %c0_84 = arith.constant 0 : index
    %c8_85 = arith.constant 8 : index
    %858 = vector.load %arg10[%c3_83, %c0_84, %c8_85] : memref<4x16x16xbf16, #tpu.memory_space<vmem>>, vector<1x16x4xbf16>
    %859 = vector.shape_cast %858 : vector<1x16x4xbf16> to vector<16x4xbf16>
    %860 = vector.shape_cast %857 : vector<16x4xbf16> to vector<1x16x4xbf16>
    tpu.vector_store %arg10[%c3_83, %c0_84, %c8_85], %860 {strides = array<i32>} : memref<4x16x16xbf16, #tpu.memory_space<vmem>>, vector<1x16x4xbf16>,
    %861 = vector.extract_strided_slice %11 {offsets = [0, 0, 12], sizes = [4, 16, 4], strides = [1, 1, 1]} : vector<4x16x48xf32> to vector<4x16x4xf32>
    %862 = vector.extract_strided_slice %11 {offsets = [0, 0, 28], sizes = [4, 16, 4], strides = [1, 1, 1]} : vector<4x16x48xf32> to vector<4x16x4xf32>
    %863 = vector.extract_strided_slice %11 {offsets = [0, 0, 44], sizes = [4, 16, 4], strides = [1, 1, 1]} : vector<4x16x48xf32> to vector<4x16x4xf32>
    %864 = vector.extract_strided_slice %861 {offsets = [0, 0, 0], sizes = [1, 16, 4], strides = [1, 1, 1]} : vector<4x16x4xf32> to vector<1x16x4xf32>
    %865 = vector.shape_cast %864 : vector<1x16x4xf32> to vector<16x4xf32>
    %866 = vector.extract_strided_slice %862 {offsets = [0, 0, 0], sizes = [1, 16, 4], strides = [1, 1, 1]} : vector<4x16x4xf32> to vector<1x16x4xf32>
    %867 = vector.shape_cast %866 : vector<1x16x4xf32> to vector<16x4xf32>
    %868 = arith.mulf %865, %867 : vector<16x4xf32>
    %cst_86 = arith.constant dense<0.000000e+00> : vector<16xf32>
    %869 = vector.multi_reduction <add>, %868, %cst_86 [1] : vector<16x4xf32> to vector<16xf32>
    %870 = vector.shape_cast %869 : vector<16xf32> to vector<16x1xf32>
    %871 = vector.extract_strided_slice %861 {offsets = [0, 0, 0], sizes = [1, 16, 4], strides = [1, 1, 1]} : vector<4x16x4xf32> to vector<1x16x4xf32>
    %872 = vector.shape_cast %871 : vector<1x16x4xf32> to vector<16x4xf32>
    %873 = vector.extract_strided_slice %862 {offsets = [1, 0, 0], sizes = [1, 16, 4], strides = [1, 1, 1]} : vector<4x16x4xf32> to vector<1x16x4xf32>
    %874 = vector.shape_cast %873 : vector<1x16x4xf32> to vector<16x4xf32>
    %875 = arith.mulf %872, %874 : vector<16x4xf32>
    %cst_87 = arith.constant dense<0.000000e+00> : vector<16xf32>
    %876 = vector.multi_reduction <add>, %875, %cst_87 [1] : vector<16x4xf32> to vector<16xf32>
    %877 = vector.shape_cast %876 : vector<16xf32> to vector<16x1xf32>
    %878 = vector.extract_strided_slice %861 {offsets = [0, 0, 0], sizes = [1, 16, 4], strides = [1, 1, 1]} : vector<4x16x4xf32> to vector<1x16x4xf32>
    %879 = vector.shape_cast %878 : vector<1x16x4xf32> to vector<16x4xf32>
    %880 = vector.extract_strided_slice %862 {offsets = [2, 0, 0], sizes = [1, 16, 4], strides = [1, 1, 1]} : vector<4x16x4xf32> to vector<1x16x4xf32>
    %881 = vector.shape_cast %880 : vector<1x16x4xf32> to vector<16x4xf32>
    %882 = arith.mulf %879, %881 : vector<16x4xf32>
    %cst_88 = arith.constant dense<0.000000e+00> : vector<16xf32>
    %883 = vector.multi_reduction <add>, %882, %cst_88 [1] : vector<16x4xf32> to vector<16xf32>
    %884 = vector.shape_cast %883 : vector<16xf32> to vector<16x1xf32>
    %885 = vector.extract_strided_slice %861 {offsets = [0, 0, 0], sizes = [1, 16, 4], strides = [1, 1, 1]} : vector<4x16x4xf32> to vector<1x16x4xf32>
    %886 = vector.shape_cast %885 : vector<1x16x4xf32> to vector<16x4xf32>
    %887 = vector.extract_strided_slice %862 {offsets = [3, 0, 0], sizes = [1, 16, 4], strides = [1, 1, 1]} : vector<4x16x4xf32> to vector<1x16x4xf32>
    %888 = vector.shape_cast %887 : vector<1x16x4xf32> to vector<16x4xf32>
    %889 = arith.mulf %886, %888 : vector<16x4xf32>
    %cst_89 = arith.constant dense<0.000000e+00> : vector<16xf32>
    %890 = vector.multi_reduction <add>, %889, %cst_89 [1] : vector<16x4xf32> to vector<16xf32>
    %891 = vector.shape_cast %890 : vector<16xf32> to vector<16x1xf32>
    %892 = vector.extract_strided_slice %861 {offsets = [1, 0, 0], sizes = [1, 16, 4], strides = [1, 1, 1]} : vector<4x16x4xf32> to vector<1x16x4xf32>
    %893 = vector.shape_cast %892 : vector<1x16x4xf32> to vector<16x4xf32>
    %894 = vector.extract_strided_slice %862 {offsets = [0, 0, 0], sizes = [1, 16, 4], strides = [1, 1, 1]} : vector<4x16x4xf32> to vector<1x16x4xf32>
    %895 = vector.shape_cast %894 : vector<1x16x4xf32> to vector<16x4xf32>
    %896 = arith.mulf %893, %895 : vector<16x4xf32>
    %cst_90 = arith.constant dense<0.000000e+00> : vector<16xf32>
    %897 = vector.multi_reduction <add>, %896, %cst_90 [1] : vector<16x4xf32> to vector<16xf32>
    %898 = vector.shape_cast %897 : vector<16xf32> to vector<16x1xf32>
    %899 = vector.extract_strided_slice %861 {offsets = [1, 0, 0], sizes = [1, 16, 4], strides = [1, 1, 1]} : vector<4x16x4xf32> to vector<1x16x4xf32>
    %900 = vector.shape_cast %899 : vector<1x16x4xf32> to vector<16x4xf32>
    %901 = vector.extract_strided_slice %862 {offsets = [1, 0, 0], sizes = [1, 16, 4], strides = [1, 1, 1]} : vector<4x16x4xf32> to vector<1x16x4xf32>
    %902 = vector.shape_cast %901 : vector<1x16x4xf32> to vector<16x4xf32>
    %903 = arith.mulf %900, %902 : vector<16x4xf32>
    %cst_91 = arith.constant dense<0.000000e+00> : vector<16xf32>
    %904 = vector.multi_reduction <add>, %903, %cst_91 [1] : vector<16x4xf32> to vector<16xf32>
    %905 = vector.shape_cast %904 : vector<16xf32> to vector<16x1xf32>
    %906 = vector.extract_strided_slice %861 {offsets = [1, 0, 0], sizes = [1, 16, 4], strides = [1, 1, 1]} : vector<4x16x4xf32> to vector<1x16x4xf32>
    %907 = vector.shape_cast %906 : vector<1x16x4xf32> to vector<16x4xf32>
    %908 = vector.extract_strided_slice %862 {offsets = [2, 0, 0], sizes = [1, 16, 4], strides = [1, 1, 1]} : vector<4x16x4xf32> to vector<1x16x4xf32>
    %909 = vector.shape_cast %908 : vector<1x16x4xf32> to vector<16x4xf32>
    %910 = arith.mulf %907, %909 : vector<16x4xf32>
    %cst_92 = arith.constant dense<0.000000e+00> : vector<16xf32>
    %911 = vector.multi_reduction <add>, %910, %cst_92 [1] : vector<16x4xf32> to vector<16xf32>
    %912 = vector.shape_cast %911 : vector<16xf32> to vector<16x1xf32>
    %913 = vector.extract_strided_slice %861 {offsets = [1, 0, 0], sizes = [1, 16, 4], strides = [1, 1, 1]} : vector<4x16x4xf32> to vector<1x16x4xf32>
    %914 = vector.shape_cast %913 : vector<1x16x4xf32> to vector<16x4xf32>
    %915 = vector.extract_strided_slice %862 {offsets = [3, 0, 0], sizes = [1, 16, 4], strides = [1, 1, 1]} : vector<4x16x4xf32> to vector<1x16x4xf32>
    %916 = vector.shape_cast %915 : vector<1x16x4xf32> to vector<16x4xf32>
    %917 = arith.mulf %914, %916 : vector<16x4xf32>
    %cst_93 = arith.constant dense<0.000000e+00> : vector<16xf32>
    %918 = vector.multi_reduction <add>, %917, %cst_93 [1] : vector<16x4xf32> to vector<16xf32>
    %919 = vector.shape_cast %918 : vector<16xf32> to vector<16x1xf32>
    %920 = vector.extract_strided_slice %861 {offsets = [2, 0, 0], sizes = [1, 16, 4], strides = [1, 1, 1]} : vector<4x16x4xf32> to vector<1x16x4xf32>
    %921 = vector.shape_cast %920 : vector<1x16x4xf32> to vector<16x4xf32>
    %922 = vector.extract_strided_slice %862 {offsets = [0, 0, 0], sizes = [1, 16, 4], strides = [1, 1, 1]} : vector<4x16x4xf32> to vector<1x16x4xf32>
    %923 = vector.shape_cast %922 : vector<1x16x4xf32> to vector<16x4xf32>
    %924 = arith.mulf %921, %923 : vector<16x4xf32>
    %cst_94 = arith.constant dense<0.000000e+00> : vector<16xf32>
    %925 = vector.multi_reduction <add>, %924, %cst_94 [1] : vector<16x4xf32> to vector<16xf32>
    %926 = vector.shape_cast %925 : vector<16xf32> to vector<16x1xf32>
    %927 = vector.extract_strided_slice %861 {offsets = [2, 0, 0], sizes = [1, 16, 4], strides = [1, 1, 1]} : vector<4x16x4xf32> to vector<1x16x4xf32>
    %928 = vector.shape_cast %927 : vector<1x16x4xf32> to vector<16x4xf32>
    %929 = vector.extract_strided_slice %862 {offsets = [1, 0, 0], sizes = [1, 16, 4], strides = [1, 1, 1]} : vector<4x16x4xf32> to vector<1x16x4xf32>
    %930 = vector.shape_cast %929 : vector<1x16x4xf32> to vector<16x4xf32>
    %931 = arith.mulf %928, %930 : vector<16x4xf32>
    %cst_95 = arith.constant dense<0.000000e+00> : vector<16xf32>
    %932 = vector.multi_reduction <add>, %931, %cst_95 [1] : vector<16x4xf32> to vector<16xf32>
    %933 = vector.shape_cast %932 : vector<16xf32> to vector<16x1xf32>
    %934 = vector.extract_strided_slice %861 {offsets = [2, 0, 0], sizes = [1, 16, 4], strides = [1, 1, 1]} : vector<4x16x4xf32> to vector<1x16x4xf32>
    %935 = vector.shape_cast %934 : vector<1x16x4xf32> to vector<16x4xf32>
    %936 = vector.extract_strided_slice %862 {offsets = [2, 0, 0], sizes = [1, 16, 4], strides = [1, 1, 1]} : vector<4x16x4xf32> to vector<1x16x4xf32>
    %937 = vector.shape_cast %936 : vector<1x16x4xf32> to vector<16x4xf32>
    %938 = arith.mulf %935, %937 : vector<16x4xf32>
    %cst_96 = arith.constant dense<0.000000e+00> : vector<16xf32>
    %939 = vector.multi_reduction <add>, %938, %cst_96 [1] : vector<16x4xf32> to vector<16xf32>
    %940 = vector.shape_cast %939 : vector<16xf32> to vector<16x1xf32>
    %941 = vector.extract_strided_slice %861 {offsets = [2, 0, 0], sizes = [1, 16, 4], strides = [1, 1, 1]} : vector<4x16x4xf32> to vector<1x16x4xf32>
    %942 = vector.shape_cast %941 : vector<1x16x4xf32> to vector<16x4xf32>
    %943 = vector.extract_strided_slice %862 {offsets = [3, 0, 0], sizes = [1, 16, 4], strides = [1, 1, 1]} : vector<4x16x4xf32> to vector<1x16x4xf32>
    %944 = vector.shape_cast %943 : vector<1x16x4xf32> to vector<16x4xf32>
    %945 = arith.mulf %942, %944 : vector<16x4xf32>
    %cst_97 = arith.constant dense<0.000000e+00> : vector<16xf32>
    %946 = vector.multi_reduction <add>, %945, %cst_97 [1] : vector<16x4xf32> to vector<16xf32>
    %947 = vector.shape_cast %946 : vector<16xf32> to vector<16x1xf32>
    %948 = vector.extract_strided_slice %861 {offsets = [3, 0, 0], sizes = [1, 16, 4], strides = [1, 1, 1]} : vector<4x16x4xf32> to vector<1x16x4xf32>
    %949 = vector.shape_cast %948 : vector<1x16x4xf32> to vector<16x4xf32>
    %950 = vector.extract_strided_slice %862 {offsets = [0, 0, 0], sizes = [1, 16, 4], strides = [1, 1, 1]} : vector<4x16x4xf32> to vector<1x16x4xf32>
    %951 = vector.shape_cast %950 : vector<1x16x4xf32> to vector<16x4xf32>
    %952 = arith.mulf %949, %951 : vector<16x4xf32>
    %cst_98 = arith.constant dense<0.000000e+00> : vector<16xf32>
    %953 = vector.multi_reduction <add>, %952, %cst_98 [1] : vector<16x4xf32> to vector<16xf32>
    %954 = vector.shape_cast %953 : vector<16xf32> to vector<16x1xf32>
    %955 = vector.extract_strided_slice %861 {offsets = [3, 0, 0], sizes = [1, 16, 4], strides = [1, 1, 1]} : vector<4x16x4xf32> to vector<1x16x4xf32>
    %956 = vector.shape_cast %955 : vector<1x16x4xf32> to vector<16x4xf32>
    %957 = vector.extract_strided_slice %862 {offsets = [1, 0, 0], sizes = [1, 16, 4], strides = [1, 1, 1]} : vector<4x16x4xf32> to vector<1x16x4xf32>
    %958 = vector.shape_cast %957 : vector<1x16x4xf32> to vector<16x4xf32>
    %959 = arith.mulf %956, %958 : vector<16x4xf32>
    %cst_99 = arith.constant dense<0.000000e+00> : vector<16xf32>
    %960 = vector.multi_reduction <add>, %959, %cst_99 [1] : vector<16x4xf32> to vector<16xf32>
    %961 = vector.shape_cast %960 : vector<16xf32> to vector<16x1xf32>
    %962 = vector.extract_strided_slice %861 {offsets = [3, 0, 0], sizes = [1, 16, 4], strides = [1, 1, 1]} : vector<4x16x4xf32> to vector<1x16x4xf32>
    %963 = vector.shape_cast %962 : vector<1x16x4xf32> to vector<16x4xf32>
    %964 = vector.extract_strided_slice %862 {offsets = [2, 0, 0], sizes = [1, 16, 4], strides = [1, 1, 1]} : vector<4x16x4xf32> to vector<1x16x4xf32>
    %965 = vector.shape_cast %964 : vector<1x16x4xf32> to vector<16x4xf32>
    %966 = arith.mulf %963, %965 : vector<16x4xf32>
    %cst_100 = arith.constant dense<0.000000e+00> : vector<16xf32>
    %967 = vector.multi_reduction <add>, %966, %cst_100 [1] : vector<16x4xf32> to vector<16xf32>
    %968 = vector.shape_cast %967 : vector<16xf32> to vector<16x1xf32>
    %969 = vector.extract_strided_slice %861 {offsets = [3, 0, 0], sizes = [1, 16, 4], strides = [1, 1, 1]} : vector<4x16x4xf32> to vector<1x16x4xf32>
    %970 = vector.shape_cast %969 : vector<1x16x4xf32> to vector<16x4xf32>
    %971 = vector.extract_strided_slice %862 {offsets = [3, 0, 0], sizes = [1, 16, 4], strides = [1, 1, 1]} : vector<4x16x4xf32> to vector<1x16x4xf32>
    %972 = vector.shape_cast %971 : vector<1x16x4xf32> to vector<16x4xf32>
    %973 = arith.mulf %970, %972 : vector<16x4xf32>
    %cst_101 = arith.constant dense<0.000000e+00> : vector<16xf32>
    %974 = vector.multi_reduction <add>, %973, %cst_101 [1] : vector<16x4xf32> to vector<16xf32>
    %975 = vector.shape_cast %974 : vector<16xf32> to vector<16x1xf32>
    %976 = arith.maximumf %870, %877 : vector<16x1xf32>
    %977 = arith.maximumf %976, %884 : vector<16x1xf32>
    %978 = arith.maximumf %977, %891 : vector<16x1xf32>
    %979 = arith.subf %870, %978 : vector<16x1xf32>
    %980 = math.exp %979 : vector<16x1xf32>
    %981 = arith.subf %877, %978 : vector<16x1xf32>
    %982 = math.exp %981 : vector<16x1xf32>
    %983 = arith.subf %884, %978 : vector<16x1xf32>
    %984 = math.exp %983 : vector<16x1xf32>
    %985 = arith.subf %891, %978 : vector<16x1xf32>
    %986 = math.exp %985 : vector<16x1xf32>
    %987 = arith.addf %980, %982 : vector<16x1xf32>
    %988 = arith.addf %987, %984 : vector<16x1xf32>
    %989 = arith.addf %988, %986 : vector<16x1xf32>
    %990 = tpu.reciprocal %989 {approx = true} : vector<16x1xf32> -> vector<16x1xf32>
    %991 = arith.mulf %980, %990 : vector<16x1xf32>
    %992 = vector.extract_strided_slice %863 {offsets = [0, 0, 0], sizes = [1, 16, 4], strides = [1, 1, 1]} : vector<4x16x4xf32> to vector<1x16x4xf32>
    %993 = vector.shape_cast %992 : vector<1x16x4xf32> to vector<16x4xf32>
    %994 = vector.broadcast %991 : vector<16x1xf32> to vector<16x4xf32>
    %995 = arith.mulf %994, %993 : vector<16x4xf32>
    %996 = arith.mulf %982, %990 : vector<16x1xf32>
    %997 = vector.extract_strided_slice %863 {offsets = [1, 0, 0], sizes = [1, 16, 4], strides = [1, 1, 1]} : vector<4x16x4xf32> to vector<1x16x4xf32>
    %998 = vector.shape_cast %997 : vector<1x16x4xf32> to vector<16x4xf32>
    %999 = vector.broadcast %996 : vector<16x1xf32> to vector<16x4xf32>
    %1000 = arith.mulf %999, %998 : vector<16x4xf32>
    %1001 = arith.addf %995, %1000 : vector<16x4xf32>
    %1002 = arith.mulf %984, %990 : vector<16x1xf32>
    %1003 = vector.extract_strided_slice %863 {offsets = [2, 0, 0], sizes = [1, 16, 4], strides = [1, 1, 1]} : vector<4x16x4xf32> to vector<1x16x4xf32>
    %1004 = vector.shape_cast %1003 : vector<1x16x4xf32> to vector<16x4xf32>
    %1005 = vector.broadcast %1002 : vector<16x1xf32> to vector<16x4xf32>
    %1006 = arith.mulf %1005, %1004 : vector<16x4xf32>
    %1007 = arith.addf %1001, %1006 : vector<16x4xf32>
    %1008 = arith.mulf %986, %990 : vector<16x1xf32>
    %1009 = vector.extract_strided_slice %863 {offsets = [3, 0, 0], sizes = [1, 16, 4], strides = [1, 1, 1]} : vector<4x16x4xf32> to vector<1x16x4xf32>
    %1010 = vector.shape_cast %1009 : vector<1x16x4xf32> to vector<16x4xf32>
    %1011 = vector.broadcast %1008 : vector<16x1xf32> to vector<16x4xf32>
    %1012 = arith.mulf %1011, %1010 : vector<16x4xf32>
    %1013 = arith.addf %1007, %1012 : vector<16x4xf32>
    %1014 = arith.truncf %1013 : vector<16x4xf32> to vector<16x4xbf16>
    %c0_102 = arith.constant 0 : index
    %c0_103 = arith.constant 0 : index
    %c12 = arith.constant 12 : index
    %1015 = vector.load %arg10[%c0_102, %c0_103, %c12] : memref<4x16x16xbf16, #tpu.memory_space<vmem>>, vector<1x16x4xbf16>
    %1016 = vector.shape_cast %1015 : vector<1x16x4xbf16> to vector<16x4xbf16>
    %1017 = vector.shape_cast %1014 : vector<16x4xbf16> to vector<1x16x4xbf16>
    tpu.vector_store %arg10[%c0_102, %c0_103, %c12], %1017 {strides = array<i32>} : memref<4x16x16xbf16, #tpu.memory_space<vmem>>, vector<1x16x4xbf16>,
    %1018 = arith.maximumf %898, %905 : vector<16x1xf32>
    %1019 = arith.maximumf %1018, %912 : vector<16x1xf32>
    %1020 = arith.maximumf %1019, %919 : vector<16x1xf32>
    %1021 = arith.subf %898, %1020 : vector<16x1xf32>
    %1022 = math.exp %1021 : vector<16x1xf32>
    %1023 = arith.subf %905, %1020 : vector<16x1xf32>
    %1024 = math.exp %1023 : vector<16x1xf32>
    %1025 = arith.subf %912, %1020 : vector<16x1xf32>
    %1026 = math.exp %1025 : vector<16x1xf32>
    %1027 = arith.subf %919, %1020 : vector<16x1xf32>
    %1028 = math.exp %1027 : vector<16x1xf32>
    %1029 = arith.addf %1022, %1024 : vector<16x1xf32>
    %1030 = arith.addf %1029, %1026 : vector<16x1xf32>
    %1031 = arith.addf %1030, %1028 : vector<16x1xf32>
    %1032 = tpu.reciprocal %1031 {approx = true} : vector<16x1xf32> -> vector<16x1xf32>
    %1033 = arith.mulf %1022, %1032 : vector<16x1xf32>
    %1034 = vector.extract_strided_slice %863 {offsets = [0, 0, 0], sizes = [1, 16, 4], strides = [1, 1, 1]} : vector<4x16x4xf32> to vector<1x16x4xf32>
    %1035 = vector.shape_cast %1034 : vector<1x16x4xf32> to vector<16x4xf32>
    %1036 = vector.broadcast %1033 : vector<16x1xf32> to vector<16x4xf32>
    %1037 = arith.mulf %1036, %1035 : vector<16x4xf32>
    %1038 = arith.mulf %1024, %1032 : vector<16x1xf32>
    %1039 = vector.extract_strided_slice %863 {offsets = [1, 0, 0], sizes = [1, 16, 4], strides = [1, 1, 1]} : vector<4x16x4xf32> to vector<1x16x4xf32>
    %1040 = vector.shape_cast %1039 : vector<1x16x4xf32> to vector<16x4xf32>
    %1041 = vector.broadcast %1038 : vector<16x1xf32> to vector<16x4xf32>
    %1042 = arith.mulf %1041, %1040 : vector<16x4xf32>
    %1043 = arith.addf %1037, %1042 : vector<16x4xf32>
    %1044 = arith.mulf %1026, %1032 : vector<16x1xf32>
    %1045 = vector.extract_strided_slice %863 {offsets = [2, 0, 0], sizes = [1, 16, 4], strides = [1, 1, 1]} : vector<4x16x4xf32> to vector<1x16x4xf32>
    %1046 = vector.shape_cast %1045 : vector<1x16x4xf32> to vector<16x4xf32>
    %1047 = vector.broadcast %1044 : vector<16x1xf32> to vector<16x4xf32>
    %1048 = arith.mulf %1047, %1046 : vector<16x4xf32>
    %1049 = arith.addf %1043, %1048 : vector<16x4xf32>
    %1050 = arith.mulf %1028, %1032 : vector<16x1xf32>
    %1051 = vector.extract_strided_slice %863 {offsets = [3, 0, 0], sizes = [1, 16, 4], strides = [1, 1, 1]} : vector<4x16x4xf32> to vector<1x16x4xf32>
    %1052 = vector.shape_cast %1051 : vector<1x16x4xf32> to vector<16x4xf32>
    %1053 = vector.broadcast %1050 : vector<16x1xf32> to vector<16x4xf32>
    %1054 = arith.mulf %1053, %1052 : vector<16x4xf32>
    %1055 = arith.addf %1049, %1054 : vector<16x4xf32>
    %1056 = arith.truncf %1055 : vector<16x4xf32> to vector<16x4xbf16>
    %c1_104 = arith.constant 1 : index
    %c0_105 = arith.constant 0 : index
    %c12_106 = arith.constant 12 : index
    %1057 = vector.load %arg10[%c1_104, %c0_105, %c12_106] : memref<4x16x16xbf16, #tpu.memory_space<vmem>>, vector<1x16x4xbf16>
    %1058 = vector.shape_cast %1057 : vector<1x16x4xbf16> to vector<16x4xbf16>
    %1059 = vector.shape_cast %1056 : vector<16x4xbf16> to vector<1x16x4xbf16>
    tpu.vector_store %arg10[%c1_104, %c0_105, %c12_106], %1059 {strides = array<i32>} : memref<4x16x16xbf16, #tpu.memory_space<vmem>>, vector<1x16x4xbf16>,
    %1060 = arith.maximumf %926, %933 : vector<16x1xf32>
    %1061 = arith.maximumf %1060, %940 : vector<16x1xf32>
    %1062 = arith.maximumf %1061, %947 : vector<16x1xf32>
    %1063 = arith.subf %926, %1062 : vector<16x1xf32>
    %1064 = math.exp %1063 : vector<16x1xf32>
    %1065 = arith.subf %933, %1062 : vector<16x1xf32>
    %1066 = math.exp %1065 : vector<16x1xf32>
    %1067 = arith.subf %940, %1062 : vector<16x1xf32>
    %1068 = math.exp %1067 : vector<16x1xf32>
    %1069 = arith.subf %947, %1062 : vector<16x1xf32>
    %1070 = math.exp %1069 : vector<16x1xf32>
    %1071 = arith.addf %1064, %1066 : vector<16x1xf32>
    %1072 = arith.addf %1071, %1068 : vector<16x1xf32>
    %1073 = arith.addf %1072, %1070 : vector<16x1xf32>
    %1074 = tpu.reciprocal %1073 {approx = true} : vector<16x1xf32> -> vector<16x1xf32>
    %1075 = arith.mulf %1064, %1074 : vector<16x1xf32>
    %1076 = vector.extract_strided_slice %863 {offsets = [0, 0, 0], sizes = [1, 16, 4], strides = [1, 1, 1]} : vector<4x16x4xf32> to vector<1x16x4xf32>
    %1077 = vector.shape_cast %1076 : vector<1x16x4xf32> to vector<16x4xf32>
    %1078 = vector.broadcast %1075 : vector<16x1xf32> to vector<16x4xf32>
    %1079 = arith.mulf %1078, %1077 : vector<16x4xf32>
    %1080 = arith.mulf %1066, %1074 : vector<16x1xf32>
    %1081 = vector.extract_strided_slice %863 {offsets = [1, 0, 0], sizes = [1, 16, 4], strides = [1, 1, 1]} : vector<4x16x4xf32> to vector<1x16x4xf32>
    %1082 = vector.shape_cast %1081 : vector<1x16x4xf32> to vector<16x4xf32>
    %1083 = vector.broadcast %1080 : vector<16x1xf32> to vector<16x4xf32>
    %1084 = arith.mulf %1083, %1082 : vector<16x4xf32>
    %1085 = arith.addf %1079, %1084 : vector<16x4xf32>
    %1086 = arith.mulf %1068, %1074 : vector<16x1xf32>
    %1087 = vector.extract_strided_slice %863 {offsets = [2, 0, 0], sizes = [1, 16, 4], strides = [1, 1, 1]} : vector<4x16x4xf32> to vector<1x16x4xf32>
    %1088 = vector.shape_cast %1087 : vector<1x16x4xf32> to vector<16x4xf32>
    %1089 = vector.broadcast %1086 : vector<16x1xf32> to vector<16x4xf32>
    %1090 = arith.mulf %1089, %1088 : vector<16x4xf32>
    %1091 = arith.addf %1085, %1090 : vector<16x4xf32>
    %1092 = arith.mulf %1070, %1074 : vector<16x1xf32>
    %1093 = vector.extract_strided_slice %863 {offsets = [3, 0, 0], sizes = [1, 16, 4], strides = [1, 1, 1]} : vector<4x16x4xf32> to vector<1x16x4xf32>
    %1094 = vector.shape_cast %1093 : vector<1x16x4xf32> to vector<16x4xf32>
    %1095 = vector.broadcast %1092 : vector<16x1xf32> to vector<16x4xf32>
    %1096 = arith.mulf %1095, %1094 : vector<16x4xf32>
    %1097 = arith.addf %1091, %1096 : vector<16x4xf32>
    %1098 = arith.truncf %1097 : vector<16x4xf32> to vector<16x4xbf16>
    %c2_107 = arith.constant 2 : index
    %c0_108 = arith.constant 0 : index
    %c12_109 = arith.constant 12 : index
    %1099 = vector.load %arg10[%c2_107, %c0_108, %c12_109] : memref<4x16x16xbf16, #tpu.memory_space<vmem>>, vector<1x16x4xbf16>
    %1100 = vector.shape_cast %1099 : vector<1x16x4xbf16> to vector<16x4xbf16>
    %1101 = vector.shape_cast %1098 : vector<16x4xbf16> to vector<1x16x4xbf16>
    tpu.vector_store %arg10[%c2_107, %c0_108, %c12_109], %1101 {strides = array<i32>} : memref<4x16x16xbf16, #tpu.memory_space<vmem>>, vector<1x16x4xbf16>,
    %1102 = arith.maximumf %954, %961 : vector<16x1xf32>
    %1103 = arith.maximumf %1102, %968 : vector<16x1xf32>
    %1104 = arith.maximumf %1103, %975 : vector<16x1xf32>
    %1105 = arith.subf %954, %1104 : vector<16x1xf32>
    %1106 = math.exp %1105 : vector<16x1xf32>
    %1107 = arith.subf %961, %1104 : vector<16x1xf32>
    %1108 = math.exp %1107 : vector<16x1xf32>
    %1109 = arith.subf %968, %1104 : vector<16x1xf32>
    %1110 = math.exp %1109 : vector<16x1xf32>
    %1111 = arith.subf %975, %1104 : vector<16x1xf32>
    %1112 = math.exp %1111 : vector<16x1xf32>
    %1113 = arith.addf %1106, %1108 : vector<16x1xf32>
    %1114 = arith.addf %1113, %1110 : vector<16x1xf32>
    %1115 = arith.addf %1114, %1112 : vector<16x1xf32>
    %1116 = tpu.reciprocal %1115 {approx = true} : vector<16x1xf32> -> vector<16x1xf32>
    %1117 = arith.mulf %1106, %1116 : vector<16x1xf32>
    %1118 = vector.extract_strided_slice %863 {offsets = [0, 0, 0], sizes = [1, 16, 4], strides = [1, 1, 1]} : vector<4x16x4xf32> to vector<1x16x4xf32>
    %1119 = vector.shape_cast %1118 : vector<1x16x4xf32> to vector<16x4xf32>
    %1120 = vector.broadcast %1117 : vector<16x1xf32> to vector<16x4xf32>
    %1121 = arith.mulf %1120, %1119 : vector<16x4xf32>
    %1122 = arith.mulf %1108, %1116 : vector<16x1xf32>
    %1123 = vector.extract_strided_slice %863 {offsets = [1, 0, 0], sizes = [1, 16, 4], strides = [1, 1, 1]} : vector<4x16x4xf32> to vector<1x16x4xf32>
    %1124 = vector.shape_cast %1123 : vector<1x16x4xf32> to vector<16x4xf32>
    %1125 = vector.broadcast %1122 : vector<16x1xf32> to vector<16x4xf32>
    %1126 = arith.mulf %1125, %1124 : vector<16x4xf32>
    %1127 = arith.addf %1121, %1126 : vector<16x4xf32>
    %1128 = arith.mulf %1110, %1116 : vector<16x1xf32>
    %1129 = vector.extract_strided_slice %863 {offsets = [2, 0, 0], sizes = [1, 16, 4], strides = [1, 1, 1]} : vector<4x16x4xf32> to vector<1x16x4xf32>
    %1130 = vector.shape_cast %1129 : vector<1x16x4xf32> to vector<16x4xf32>
    %1131 = vector.broadcast %1128 : vector<16x1xf32> to vector<16x4xf32>
    %1132 = arith.mulf %1131, %1130 : vector<16x4xf32>
    %1133 = arith.addf %1127, %1132 : vector<16x4xf32>
    %1134 = arith.mulf %1112, %1116 : vector<16x1xf32>
    %1135 = vector.extract_strided_slice %863 {offsets = [3, 0, 0], sizes = [1, 16, 4], strides = [1, 1, 1]} : vector<4x16x4xf32> to vector<1x16x4xf32>
    %1136 = vector.shape_cast %1135 : vector<1x16x4xf32> to vector<16x4xf32>
    %1137 = vector.broadcast %1134 : vector<16x1xf32> to vector<16x4xf32>
    %1138 = arith.mulf %1137, %1136 : vector<16x4xf32>
    %1139 = arith.addf %1133, %1138 : vector<16x4xf32>
    %1140 = arith.truncf %1139 : vector<16x4xf32> to vector<16x4xbf16>
    %c3_110 = arith.constant 3 : index
    %c0_111 = arith.constant 0 : index
    %c12_112 = arith.constant 12 : index
    %1141 = vector.load %arg10[%c3_110, %c0_111, %c12_112] : memref<4x16x16xbf16, #tpu.memory_space<vmem>>, vector<1x16x4xbf16>
    %1142 = vector.shape_cast %1141 : vector<1x16x4xbf16> to vector<16x4xbf16>
    %1143 = vector.shape_cast %1140 : vector<16x4xbf16> to vector<1x16x4xbf16>
    tpu.vector_store %arg10[%c3_110, %c0_111, %c12_112], %1143 {strides = array<i32>} : memref<4x16x16xbf16, #tpu.memory_space<vmem>>, vector<1x16x4xbf16>,
    %c0_113 = arith.constant 0 : index
    %c0_114 = arith.constant 0 : index
    %1144 = vector.load %arg5[%c0_113, %c0_114] : memref<32x16xbf16, #tpu.memory_space<vmem>>, vector<32x16xbf16>
    "tpu.trace_start"() <{level = 10 : i32, message = "ptc,cd->ptd"}> : () -> ()
    %cst_115 = arith.constant dense<0.000000e+00> : vector<4x16x16xf32>
    %1145 = tpu.matmul %1, %1144, %cst_115 {dimension_numbers = #tpu.dot_dimension_numbers<[2], [0], [0, 1], [1], [0, 0, 0, 1, 1, 1], [], []>} : vector<4x16x32xbf16>, vector<32x16xbf16>, vector<4x16x16xf32> -> vector<4x16x16xf32>
    "tpu.trace_stop"() : () -> ()
    %c0_116 = arith.constant 0 : index
    %c0_117 = arith.constant 0 : index
    %c0_118 = arith.constant 0 : index
    %1146 = vector.load %arg3[%c0_116, %c0_117, %c0_118] : memref<1x16x32xbf16, #tpu.memory_space<vmem>>, vector<1x16x32xbf16>
    %1147 = vector.shape_cast %1146 : vector<1x16x32xbf16> to vector<16x32xbf16>
    %1148 = vector.extract_strided_slice %1145 {offsets = [0, 0, 0], sizes = [4, 16, 4], strides = [1, 1, 1]} : vector<4x16x16xf32> to vector<4x16x4xf32>
    %1149 = arith.truncf %1148 : vector<4x16x4xf32> to vector<4x16x4xbf16>
    %1150 = vector.extract_strided_slice %1147 {offsets = [0, 0], sizes = [16, 4], strides = [1, 1]} : vector<16x32xbf16> to vector<16x4xbf16>
    %1151 = vector.extract_strided_slice %1147 {offsets = [0, 16], sizes = [16, 4], strides = [1, 1]} : vector<16x32xbf16> to vector<16x4xbf16>
    "tpu.trace_start"() <{level = 10 : i32, message = "ptd,kd->ptk"}> : () -> ()
    %cst_119 = arith.constant dense<0.000000e+00> : vector<4x16x16xf32>
    %1152 = tpu.matmul %1149, %1150, %cst_119 {dimension_numbers = #tpu.dot_dimension_numbers<[2], [1], [0, 1], [0], [0, 0, 0, 1, 1, 0], [], []>} : vector<4x16x4xbf16>, vector<16x4xbf16>, vector<4x16x16xf32> -> vector<4x16x16xf32>
    "tpu.trace_stop"() : () -> ()
    %cst_120 = arith.constant dense<0xFF800000> : vector<4x16xf32>
    %1153 = vector.multi_reduction <maximumf>, %1152, %cst_120 [2] : vector<4x16x16xf32> to vector<4x16xf32>
    %1154 = vector.shape_cast %1153 : vector<4x16xf32> to vector<4x16x1xf32>
    %1155 = vector.broadcast %1154 : vector<4x16x1xf32> to vector<4x16x16xf32>
    %1156 = arith.subf %1152, %1155 : vector<4x16x16xf32>
    %1157 = math.exp %1156 : vector<4x16x16xf32>
    %cst_121 = arith.constant dense<0.000000e+00> : vector<4x16xf32>
    %1158 = vector.multi_reduction <add>, %1157, %cst_121 [2] : vector<4x16x16xf32> to vector<4x16xf32>
    %1159 = vector.shape_cast %1158 : vector<4x16xf32> to vector<4x16x1xf32>
    %1160 = tpu.reciprocal %1159 {approx = true} : vector<4x16x1xf32> -> vector<4x16x1xf32>
    %1161 = vector.broadcast %1160 : vector<4x16x1xf32> to vector<4x16x16xf32>
    %1162 = arith.mulf %1157, %1161 : vector<4x16x16xf32>
    %1163 = arith.truncf %1162 : vector<4x16x16xf32> to vector<4x16x16xbf16>
    "tpu.trace_start"() <{level = 10 : i32, message = "ptk,kd->ptd"}> : () -> ()
    %cst_122 = arith.constant dense<0.000000e+00> : vector<4x16x4xf32>
    %1164 = tpu.matmul %1163, %1151, %cst_122 {dimension_numbers = #tpu.dot_dimension_numbers<[2], [0], [0, 1], [1], [0, 0, 0, 1, 1, 1], [], []>} : vector<4x16x16xbf16>, vector<16x4xbf16>, vector<4x16x4xf32> -> vector<4x16x4xf32>
    "tpu.trace_stop"() : () -> ()
    %1165 = arith.truncf %1164 : vector<4x16x4xf32> to vector<4x16x4xbf16>
    %c0_123 = arith.constant 0 : index
    %c0_124 = arith.constant 0 : index
    %c0_125 = arith.constant 0 : index
    %1166 = vector.load %arg11[%c0_123, %c0_124, %c0_125] : memref<4x16x16xbf16, #tpu.memory_space<vmem>>, vector<4x16x4xbf16>
    tpu.vector_store %arg11[%c0_123, %c0_124, %c0_125], %1165 {strides = array<i32>} : memref<4x16x16xbf16, #tpu.memory_space<vmem>>, vector<4x16x4xbf16>,
    %1167 = vector.extract_strided_slice %1145 {offsets = [0, 0, 4], sizes = [4, 16, 4], strides = [1, 1, 1]} : vector<4x16x16xf32> to vector<4x16x4xf32>
    %1168 = arith.truncf %1167 : vector<4x16x4xf32> to vector<4x16x4xbf16>
    %1169 = vector.extract_strided_slice %1147 {offsets = [0, 4], sizes = [16, 4], strides = [1, 1]} : vector<16x32xbf16> to vector<16x4xbf16>
    %1170 = vector.extract_strided_slice %1147 {offsets = [0, 20], sizes = [16, 4], strides = [1, 1]} : vector<16x32xbf16> to vector<16x4xbf16>
    "tpu.trace_start"() <{level = 10 : i32, message = "ptd,kd->ptk"}> : () -> ()
    %cst_126 = arith.constant dense<0.000000e+00> : vector<4x16x16xf32>
    %1171 = tpu.matmul %1168, %1169, %cst_126 {dimension_numbers = #tpu.dot_dimension_numbers<[2], [1], [0, 1], [0], [0, 0, 0, 1, 1, 0], [], []>} : vector<4x16x4xbf16>, vector<16x4xbf16>, vector<4x16x16xf32> -> vector<4x16x16xf32>
    "tpu.trace_stop"() : () -> ()
    %cst_127 = arith.constant dense<0xFF800000> : vector<4x16xf32>
    %1172 = vector.multi_reduction <maximumf>, %1171, %cst_127 [2] : vector<4x16x16xf32> to vector<4x16xf32>
    %1173 = vector.shape_cast %1172 : vector<4x16xf32> to vector<4x16x1xf32>
    %1174 = vector.broadcast %1173 : vector<4x16x1xf32> to vector<4x16x16xf32>
    %1175 = arith.subf %1171, %1174 : vector<4x16x16xf32>
    %1176 = math.exp %1175 : vector<4x16x16xf32>
    %cst_128 = arith.constant dense<0.000000e+00> : vector<4x16xf32>
    %1177 = vector.multi_reduction <add>, %1176, %cst_128 [2] : vector<4x16x16xf32> to vector<4x16xf32>
    %1178 = vector.shape_cast %1177 : vector<4x16xf32> to vector<4x16x1xf32>
    %1179 = tpu.reciprocal %1178 {approx = true} : vector<4x16x1xf32> -> vector<4x16x1xf32>
    %1180 = vector.broadcast %1179 : vector<4x16x1xf32> to vector<4x16x16xf32>
    %1181 = arith.mulf %1176, %1180 : vector<4x16x16xf32>
    %1182 = arith.truncf %1181 : vector<4x16x16xf32> to vector<4x16x16xbf16>
    "tpu.trace_start"() <{level = 10 : i32, message = "ptk,kd->ptd"}> : () -> ()
    %cst_129 = arith.constant dense<0.000000e+00> : vector<4x16x4xf32>
    %1183 = tpu.matmul %1182, %1170, %cst_129 {dimension_numbers = #tpu.dot_dimension_numbers<[2], [0], [0, 1], [1], [0, 0, 0, 1, 1, 1], [], []>} : vector<4x16x16xbf16>, vector<16x4xbf16>, vector<4x16x4xf32> -> vector<4x16x4xf32>
    "tpu.trace_stop"() : () -> ()
    %1184 = arith.truncf %1183 : vector<4x16x4xf32> to vector<4x16x4xbf16>
    %c0_130 = arith.constant 0 : index
    %c0_131 = arith.constant 0 : index
    %c4_132 = arith.constant 4 : index
    %1185 = vector.load %arg11[%c0_130, %c0_131, %c4_132] : memref<4x16x16xbf16, #tpu.memory_space<vmem>>, vector<4x16x4xbf16>
    tpu.vector_store %arg11[%c0_130, %c0_131, %c4_132], %1184 {strides = array<i32>} : memref<4x16x16xbf16, #tpu.memory_space<vmem>>, vector<4x16x4xbf16>,
    %1186 = vector.extract_strided_slice %1145 {offsets = [0, 0, 8], sizes = [4, 16, 4], strides = [1, 1, 1]} : vector<4x16x16xf32> to vector<4x16x4xf32>
    %1187 = arith.truncf %1186 : vector<4x16x4xf32> to vector<4x16x4xbf16>
    %1188 = vector.extract_strided_slice %1147 {offsets = [0, 8], sizes = [16, 4], strides = [1, 1]} : vector<16x32xbf16> to vector<16x4xbf16>
    %1189 = vector.extract_strided_slice %1147 {offsets = [0, 24], sizes = [16, 4], strides = [1, 1]} : vector<16x32xbf16> to vector<16x4xbf16>
    "tpu.trace_start"() <{level = 10 : i32, message = "ptd,kd->ptk"}> : () -> ()
    %cst_133 = arith.constant dense<0.000000e+00> : vector<4x16x16xf32>
    %1190 = tpu.matmul %1187, %1188, %cst_133 {dimension_numbers = #tpu.dot_dimension_numbers<[2], [1], [0, 1], [0], [0, 0, 0, 1, 1, 0], [], []>} : vector<4x16x4xbf16>, vector<16x4xbf16>, vector<4x16x16xf32> -> vector<4x16x16xf32>
    "tpu.trace_stop"() : () -> ()
    %cst_134 = arith.constant dense<0xFF800000> : vector<4x16xf32>
    %1191 = vector.multi_reduction <maximumf>, %1190, %cst_134 [2] : vector<4x16x16xf32> to vector<4x16xf32>
    %1192 = vector.shape_cast %1191 : vector<4x16xf32> to vector<4x16x1xf32>
    %1193 = vector.broadcast %1192 : vector<4x16x1xf32> to vector<4x16x16xf32>
    %1194 = arith.subf %1190, %1193 : vector<4x16x16xf32>
    %1195 = math.exp %1194 : vector<4x16x16xf32>
    %cst_135 = arith.constant dense<0.000000e+00> : vector<4x16xf32>
    %1196 = vector.multi_reduction <add>, %1195, %cst_135 [2] : vector<4x16x16xf32> to vector<4x16xf32>
    %1197 = vector.shape_cast %1196 : vector<4x16xf32> to vector<4x16x1xf32>
    %1198 = tpu.reciprocal %1197 {approx = true} : vector<4x16x1xf32> -> vector<4x16x1xf32>
    %1199 = vector.broadcast %1198 : vector<4x16x1xf32> to vector<4x16x16xf32>
    %1200 = arith.mulf %1195, %1199 : vector<4x16x16xf32>
    %1201 = arith.truncf %1200 : vector<4x16x16xf32> to vector<4x16x16xbf16>
    "tpu.trace_start"() <{level = 10 : i32, message = "ptk,kd->ptd"}> : () -> ()
    %cst_136 = arith.constant dense<0.000000e+00> : vector<4x16x4xf32>
    %1202 = tpu.matmul %1201, %1189, %cst_136 {dimension_numbers = #tpu.dot_dimension_numbers<[2], [0], [0, 1], [1], [0, 0, 0, 1, 1, 1], [], []>} : vector<4x16x16xbf16>, vector<16x4xbf16>, vector<4x16x4xf32> -> vector<4x16x4xf32>
    "tpu.trace_stop"() : () -> ()
    %1203 = arith.truncf %1202 : vector<4x16x4xf32> to vector<4x16x4xbf16>
    %c0_137 = arith.constant 0 : index
    %c0_138 = arith.constant 0 : index
    %c8_139 = arith.constant 8 : index
    %1204 = vector.load %arg11[%c0_137, %c0_138, %c8_139] : memref<4x16x16xbf16, #tpu.memory_space<vmem>>, vector<4x16x4xbf16>
    tpu.vector_store %arg11[%c0_137, %c0_138, %c8_139], %1203 {strides = array<i32>} : memref<4x16x16xbf16, #tpu.memory_space<vmem>>, vector<4x16x4xbf16>,
    %1205 = vector.extract_strided_slice %1145 {offsets = [0, 0, 12], sizes = [4, 16, 4], strides = [1, 1, 1]} : vector<4x16x16xf32> to vector<4x16x4xf32>
    %1206 = arith.truncf %1205 : vector<4x16x4xf32> to vector<4x16x4xbf16>
    %1207 = vector.extract_strided_slice %1147 {offsets = [0, 12], sizes = [16, 4], strides = [1, 1]} : vector<16x32xbf16> to vector<16x4xbf16>
    %1208 = vector.extract_strided_slice %1147 {offsets = [0, 28], sizes = [16, 4], strides = [1, 1]} : vector<16x32xbf16> to vector<16x4xbf16>
    "tpu.trace_start"() <{level = 10 : i32, message = "ptd,kd->ptk"}> : () -> ()
    %cst_140 = arith.constant dense<0.000000e+00> : vector<4x16x16xf32>
    %1209 = tpu.matmul %1206, %1207, %cst_140 {dimension_numbers = #tpu.dot_dimension_numbers<[2], [1], [0, 1], [0], [0, 0, 0, 1, 1, 0], [], []>} : vector<4x16x4xbf16>, vector<16x4xbf16>, vector<4x16x16xf32> -> vector<4x16x16xf32>
    "tpu.trace_stop"() : () -> ()
    %cst_141 = arith.constant dense<0xFF800000> : vector<4x16xf32>
    %1210 = vector.multi_reduction <maximumf>, %1209, %cst_141 [2] : vector<4x16x16xf32> to vector<4x16xf32>
    %1211 = vector.shape_cast %1210 : vector<4x16xf32> to vector<4x16x1xf32>
    %1212 = vector.broadcast %1211 : vector<4x16x1xf32> to vector<4x16x16xf32>
    %1213 = arith.subf %1209, %1212 : vector<4x16x16xf32>
    %1214 = math.exp %1213 : vector<4x16x16xf32>
    %cst_142 = arith.constant dense<0.000000e+00> : vector<4x16xf32>
    %1215 = vector.multi_reduction <add>, %1214, %cst_142 [2] : vector<4x16x16xf32> to vector<4x16xf32>
    %1216 = vector.shape_cast %1215 : vector<4x16xf32> to vector<4x16x1xf32>
    %1217 = tpu.reciprocal %1216 {approx = true} : vector<4x16x1xf32> -> vector<4x16x1xf32>
    %1218 = vector.broadcast %1217 : vector<4x16x1xf32> to vector<4x16x16xf32>
    %1219 = arith.mulf %1214, %1218 : vector<4x16x16xf32>
    %1220 = arith.truncf %1219 : vector<4x16x16xf32> to vector<4x16x16xbf16>
    "tpu.trace_start"() <{level = 10 : i32, message = "ptk,kd->ptd"}> : () -> ()
    %cst_143 = arith.constant dense<0.000000e+00> : vector<4x16x4xf32>
    %1221 = tpu.matmul %1220, %1208, %cst_143 {dimension_numbers = #tpu.dot_dimension_numbers<[2], [0], [0, 1], [1], [0, 0, 0, 1, 1, 1], [], []>} : vector<4x16x16xbf16>, vector<16x4xbf16>, vector<4x16x4xf32> -> vector<4x16x4xf32>
    "tpu.trace_stop"() : () -> ()
    %1222 = arith.truncf %1221 : vector<4x16x4xf32> to vector<4x16x4xbf16>
    %c0_144 = arith.constant 0 : index
    %c0_145 = arith.constant 0 : index
    %c12_146 = arith.constant 12 : index
    %1223 = vector.load %arg11[%c0_144, %c0_145, %c12_146] : memref<4x16x16xbf16, #tpu.memory_space<vmem>>, vector<4x16x4xbf16>
    tpu.vector_store %arg11[%c0_144, %c0_145, %c12_146], %1222 {strides = array<i32>} : memref<4x16x16xbf16, #tpu.memory_space<vmem>>, vector<4x16x4xbf16>,
    %c0_147 = arith.constant 0 : index
    %c0_148 = arith.constant 0 : index
    %c0_149 = arith.constant 0 : index
    %1224 = vector.load %arg10[%c0_147, %c0_148, %c0_149] : memref<4x16x16xbf16, #tpu.memory_space<vmem>>, vector<4x16x16xbf16>
    %c0_150 = arith.constant 0 : index
    %c0_151 = arith.constant 0 : index
    %1225 = vector.load %arg6[%c0_150, %c0_151] : memref<16x32xbf16, #tpu.memory_space<vmem>>, vector<16x32xbf16>
    "tpu.trace_start"() <{level = 10 : i32, message = "ptd,dc->ptc"}> : () -> ()
    %cst_152 = arith.constant dense<0.000000e+00> : vector<4x16x32xf32>
    %1226 = tpu.matmul %1224, %1225, %cst_152 {dimension_numbers = #tpu.dot_dimension_numbers<[2], [0], [0, 1], [1], [0, 0, 0, 1, 1, 1], [], []>} : vector<4x16x16xbf16>, vector<16x32xbf16>, vector<4x16x32xf32> -> vector<4x16x32xf32>
    "tpu.trace_stop"() : () -> ()
    %c0_153 = arith.constant 0 : index
    %c0_154 = arith.constant 0 : index
    %c0_155 = arith.constant 0 : index
    %1227 = vector.load %arg11[%c0_153, %c0_154, %c0_155] : memref<4x16x16xbf16, #tpu.memory_space<vmem>>, vector<4x16x16xbf16>
    %c0_156 = arith.constant 0 : index
    %c0_157 = arith.constant 0 : index
    %1228 = vector.load %arg7[%c0_156, %c0_157] : memref<16x32xbf16, #tpu.memory_space<vmem>>, vector<16x32xbf16>
    "tpu.trace_start"() <{level = 10 : i32, message = "ptd,dc->ptc"}> : () -> ()
    %cst_158 = arith.constant dense<0.000000e+00> : vector<4x16x32xf32>
    %1229 = tpu.matmul %1227, %1228, %cst_158 {dimension_numbers = #tpu.dot_dimension_numbers<[2], [0], [0, 1], [1], [0, 0, 0, 1, 1, 1], [], []>} : vector<4x16x16xbf16>, vector<16x32xbf16>, vector<4x16x32xf32> -> vector<4x16x32xf32>
    "tpu.trace_stop"() : () -> ()
    %1230 = arith.addf %1226, %1229 : vector<4x16x32xf32>
    %c0_159 = arith.constant 0 : index
    %c0_160 = arith.constant 0 : index
    %1231 = vector.load %arg8[%c0_159, %c0_160] : memref<1x32xf32, #tpu.memory_space<vmem>>, vector<1x32xf32>
    %1232 = vector.shape_cast %1231 : vector<1x32xf32> to vector<1x1x32xf32>
    %1233 = vector.broadcast %1232 : vector<1x1x32xf32> to vector<4x16x32xf32>
    %1234 = arith.addf %1230, %1233 : vector<4x16x32xf32>
    %1235 = vector.shape_cast %1234 : vector<4x16x32xf32> to vector<1x4x16x32xf32>
    %1236 = arith.truncf %1235 : vector<1x4x16x32xf32> to vector<1x4x16x32xbf16>
    %c0_161 = arith.constant 0 : index
    %c0_162 = arith.constant 0 : index
    %c0_163 = arith.constant 0 : index
    %c0_164 = arith.constant 0 : index
    %1237 = vector.load %arg9[%c0_161, %c0_162, %c0_163, %c0_164] : memref<1x4x16x32xbf16, #tpu.memory_space<vmem>>, vector<1x4x16x32xbf16>
    tpu.vector_store %arg9[%c0_161, %c0_162, %c0_163, %c0_164], %1236 {strides = array<i32>} : memref<1x4x16x32xbf16, #tpu.memory_space<vmem>>, vector<1x4x16x32xbf16>,
    return
  }
  func.func @transform_0(%arg0: i32, %arg1: i32) -> (i32, i32, i32, i32) {
    %c0_i32 = arith.constant 0 : i32
    %c0_i32_0 = arith.constant 0 : i32
    %c0_i32_1 = arith.constant 0 : i32
    return %arg0, %c0_i32, %arg1, %c0_i32_0 : i32, i32, i32, i32
  }
  func.func @transform_1(%arg0: i32, %arg1: i32) -> (i32, i32, i32) {
    %c0_i32 = arith.constant 0 : i32
    %c0_i32_0 = arith.constant 0 : i32
    %c0_i32_1 = arith.constant 0 : i32
    return %arg0, %c0_i32, %c0_i32_0 : i32, i32, i32
  }
  func.func @transform_2(%arg0: i32, %arg1: i32) -> (i32, i32) {
    %c0_i32 = arith.constant 0 : i32
    %c0_i32_0 = arith.constant 0 : i32
    %c0_i32_1 = arith.constant 0 : i32
    return %c0_i32, %c0_i32_0 : i32, i32
  }
  func.func @transform_3(%arg0: i32, %arg1: i32) -> (i32, i32) {
    %c0_i32 = arith.constant 0 : i32
    %c0_i32_0 = arith.constant 0 : i32
    %c0_i32_1 = arith.constant 0 : i32
    return %c0_i32, %c0_i32_0 : i32, i32
  }
  func.func @transform_4(%arg0: i32, %arg1: i32) -> (i32, i32) {
    %c0_i32 = arith.constant 0 : i32
    %c0_i32_0 = arith.constant 0 : i32
    %c0_i32_1 = arith.constant 0 : i32
    return %c0_i32, %c0_i32_0 : i32, i32
  }
  func.func @transform_5(%arg0: i32, %arg1: i32) -> (i32, i32) {
    %c0_i32 = arith.constant 0 : i32
    %c0_i32_0 = arith.constant 0 : i32
    %c0_i32_1 = arith.constant 0 : i32
    return %c0_i32, %c0_i32_0 : i32, i32
  }
  func.func @transform_6(%arg0: i32, %arg1: i32) -> (i32, i32) {
    %c0_i32 = arith.constant 0 : i32
    %c0_i32_0 = arith.constant 0 : i32
    %c0_i32_1 = arith.constant 0 : i32
    return %c0_i32, %c0_i32_0 : i32, i32
  }
  func.func @transform_7(%arg0: i32, %arg1: i32) -> (i32, i32, i32, i32) {
    %c0_i32 = arith.constant 0 : i32
    %c0_i32_0 = arith.constant 0 : i32
    %c0_i32_1 = arith.constant 0 : i32
    return %arg0, %c0_i32, %arg1, %c0_i32_0 : i32, i32, i32, i32
  }
}

</mosaic_0001>

<bundles_post_ra>
// kernel: tpu_custom_call.1
= control target key start
LH: loop header
LB: loop body
LE: loop exit
PB: predicated region body
PF: predicated region fallthrough
CT: control target
= control target key end

     0   :  { %s7644_s0 = inlined_call_operand.hbm [shape: bf16[2,4,16,32], index: 0, kind: input, shape index: {}]   ;;  %s7645_s1 = inlined_call_operand.vmem [shape: bf16[2,16,32], index: 1, kind: input, shape index: {}]   ;;  %s7646_s2 = inlined_call_operand.hbm [shape: bf16[32,48], index: 2, kind: input, shape index: {}]   ;;  %s7647_s3 = inlined_call_operand.vmem [shape: bf16[32,16], index: 3, kind: input, shape index: {}]   ;;  %s7648_s4 = inlined_call_operand.vmem [shape: bf16[16,32], index: 4, kind: input, shape index: {}]   ;;  %s7649_s5 = inlined_call_operand.vmem [shape: bf16[16,32], index: 5, kind: input, shape index: {}]   ;;  %s7650_s6 = inlined_call_operand.vmem [shape: f32[1,32], index: 6, kind: input, shape index: {}]   ;;  %s7651_s7 = inlined_call_operand.hbm [shape: bf16[2,4,16,32], index: 7, kind: output, shape index: {}]  }
   0x1   :  { %7731 = sst [smem:[#allocation59_spill]] %s7646_s2 }
   0x2   :  { %12 = vsyncpa [#allocation5], 0 }
   0x3   :  { %14 = vsyncpa [#allocation5 + $0x1], 0 }
   0x4   :  { %15 = vsyncpa [#allocation8], 0 }
   0x5   :  { %16 = vsyncpa [#allocation6], 0 }
   0x6   :  { %18 = vsyncpa [#allocation6 + $0x1], 0  ;;  %s5414_s24 = smov 0   ;;  %s5416_s25 = smov 0  }
   0x7   :  { %s5418_s26 = smov 0   ;;  %s5420_s27 = smov 0  }
   0x8   :  { %s5422_s28 = smov 0   ;;  %s5424_s29 = smov 0  }
   0x9 LB: > { %7732 = sst [smem:[#allocation13_spill]] %s5351_s28  ;;  %s4234_s30 = sadd.s32 4294967295, %s5355_s29   ;;  %s5355_s29 = sphi %s5424_s29, %s24_s29   ;;  %s5351_s28 = sphi %s5422_s28, %s7866_s28   ;;  %s5347_s27 = sphi %s5420_s27, %s7865_s27   ;;  %s5343_s26 = sphi %s5418_s26, %s7869_s26   ;;  %s5339_s25 = sphi %s5416_s25, %s7868_s25   ;;  %s5335_s24 = sphi %s5414_s24, %s7867_s24  }
   0xa   : > { %s4235_s8 = sadd.s32 4294967294, %s5355_s29   ;;  %p58_p0 = scmp.ne.s32.totalorder %s5339_s25, %s5335_s24 }
   0xb   : > { %p5448_p1 = scmp.eq.s32.totalorder %s4234_s30, 0  ;;  %p5452_p2 = scmp.eq.s32.totalorder %s4234_s30, 1 }
   0xc   : > { %p221_p3 = scmp.eq.s32.totalorder %s4235_s8, 1  ;;  %p4236_p5 = scmp.ge.s32.totalorder %s5355_s29, 1 }
   0xd   : > { %p5458_p4 = por %p5448_p1, %p58_p0  ;;  %p228_p7 = scmp.lt.s32.totalorder %s5355_s29, 3 }
   0xe   : > { %p5463_p6 = por %p221_p3, %p58_p0  ;;  %s5357_s14 = smov [#allocation7]  }
   0xf   : > { %s7735_s11 = scalar_select %p5458_p4, 1, 0 }
  0x10   : > { %s7736_s12 = scalar_select %p5463_p6, 1, 0 }
  0x11   : > { %p5468_p8 = pnand %p4236_p5, %p228_p7  ;;  %s240_s15 = sshll.u32 %s5357_s14, 4  ;;  %s241_s15 = int_to_ptr.vmem [resolvable:$true] %s240_s15 }
  0x12   : > { %7737 = sst [smem:[#allocation14_spill]] %s7736_s12  ;;  %s36_s17 = sadd.s32 1, %s5351_s28 }
  0x13   : > { %p4666_p9 = pneg %p5468_p8  ;;  %s5228_s18 = scalar_lea.vmem %s241_s15, 256 }
  0x14   : > { %p5229_p13 = scmp.ne.s32.totalorder %s241_s15, %s5228_s18  ;;  %p5236_p5 = scmp.lt.s32.totalorder %s241_s15, %s241_s15 }
  0x15   : > { %p5477_p11 = pnand %p4666_p9, %p5448_p1  ;;  %p5237_p7 = scmp.lt.s32.totalorder %s5228_s18, %s5228_s18 }
  0x17   : > { %p5219_p12 = pneg %p5477_p11  ;;  %p5238_p6 = por %p5237_p7, %p5236_p5 }
  0x19   : > { %p5231_p0 = pnand %p5229_p13, %p5219_p12 }
  0x1b   : > { %p5232_p3 = pneg %p5231_p0 }
  0x1d   : > { %p5239_p4 = pnand %p5238_p6, %p5232_p3 }
  0x1f   : > { %5242 = shalt.err (!%p5239_p4)
}
  0x20   : > { %s7653_s19 = smov 64   ;;  %s7654_s20 = smov 4  }
  0x21   : > { %s7740_s2 = sld [smem:[#allocation59_spill]]  ;;  %p38_p4 = scmp.ge.s32.totalorder %s36_s17, 2 }
  0x22   : > { %s45_s23 = sadd.s32 1, %s5343_s26  ;;  %p52_p6 = scmp.ne.s32.totalorder %s5343_s26, %s5339_s25 }
  0x23   : > { %p53_p9 = scmp.eq.s32.totalorder %s5355_s29, 0  ;;  %s7871_s17 = smov (%p38_p4, %s36_s17), 0 }
  0x24   : > { %7741 = sst [smem:[#allocation15_spill]] %s7871_s17  ;;  %p5504_p13 = por %p5452_p2, %p52_p6 }
  0x25   : > { %p5498_p12 = por %p53_p9, %p52_p6  ;;  %s40_s14 = ssub.s32 %s5351_s28, %s7871_s17 }
  0x26   : > { %p4679_p0 = scmp.lt.s32.totalorder %s5355_s29, 2  ;;  %s4393_s21 = sshll.u32 %s5351_s28, 9 }
  0x27   : > { %4669 = dma.hbm_to_vmem [thread:$0]  (!%p5477_p11), %s7740_s2, 256, %s241_s15, [#allocation8], %s7653_s19, %s7653_s19, %s7654_s20  }
  0x28   : > { %p43_p11 = scmp.eq.s32.totalorder %s40_s14, 0  ;;  %s266_s15 = sand.u32 1, %s5343_s26  }
  0x29   : > { %s4239_s16 = sshll.u32 %s266_s15, 5  ;;  %s278_s20 = scalar_lea.hbm %s7644_s0, %s4393_s21 }
  0x2a   : > { %s5513_s18 = scalar_select %p43_p11, %s5343_s26, %s45_s23  }
  0x2b   : > { %s270_s2 = scalar_lea.vmem [#allocation4], %s4239_s16  ;;  %p5521_p2 = pnand %p4679_p0, %p5498_p12 }
  0x2c   : > { %s279_s12 = sshll.u32 %s270_s2, 4  ;;  %s267_s17 = scalar_lea.sflag [#allocation5], %s266_s15  ;;  %s280_s12 = int_to_ptr.vmem [resolvable:$true] %s279_s12 }
  0x2d   : > { %p5245_p3 = pneg %p5521_p2  ;;  %s5256_s14 = scalar_lea.vmem %s280_s12, 512 }
  0x2e   : > { %p5257_p5 = scmp.ne.s32.totalorder %s280_s12, %s5256_s14  ;;  %s5360_s23 = smov [#allocation4]  }
  0x2f   : > { %s5261_s28 = sshll.u32 %s5360_s23, 4  ;;  %s5262_s28 = int_to_ptr.vmem [resolvable:$false] %s5261_s28 }
  0x30   : > { %p5259_p7 = pnand %p5257_p5, %p5245_p3  ;;  %s5263_s19 = scalar_lea.vmem %s5262_s28, 1024 }
  0x31   : > { %p5264_p6 = scmp.lt.s32.totalorder %s280_s12, %s5262_s28  ;;  %p5265_p9 = scmp.lt.s32.totalorder %s5263_s19, %s5256_s14 }
  0x32   : > { %p5260_p4 = pneg %p5259_p7 }
  0x33   : > { %p5266_p11 = por %p5265_p9, %p5264_p6 }
  0x35   : > { %p5267_p10 = pnand %p5266_p11, %p5260_p4 }
  0x37   : > { %5270 = shalt.err (!%p5267_p10)
}
  0x38   : > { %s7745_s2 = smov 4   ;;  %s7746_s30 = smov 64  }
  0x39   : > { %4673 = dma.hbm_to_vmem [thread:$0]  (!%p5521_p2), %s278_s20, 512, %s280_s12, %s267_s17, %s7746_s30, %s7746_s30, %s7745_s2  }
  0x3a   : > { %299 = sbr.rel (%p5468_p8) target bundleno = 6386 (0x18f2), region = 48 }
  0x3f   : > { %s5535_s15 = sand.u32 1, %s5339_s25   ;;  %p7747_p10 = scmp.ne.s32.totalorder %s7735_s11, 0 }
  0x40   : > { %s4243_s28 = sshll.u32 %s5535_s15, 5  ;;  %s302_s16 = scalar_lea.sflag [#allocation5], %s5535_s15 }
  0x41   : > { %s5541_s21 = scalar_lea.vmem [#allocation4], %s4243_s28 }
  0x42   : > { %5322 = dma.done.wait (%p7747_p10), %s302_s16, 512  }
  0x43   : > { %5324 = vsyncadd (%p7747_p10), %s302_s16, 4294966784 }
  0x44   : > { %5326 = dma.done.wait (%p5448_p1), [#allocation8], 256  }
  0x45   : > { %5328 = vsyncadd (%p5448_p1), [#allocation8], 4294967040  ;;  %v4745_v0 = vld [vmem:[#allocation7 + $0x8] sm:$0xff]   ;;  %v4746_v1 = vld [vmem:[#allocation7] sm:$0xff]   ;;  %vm369_vm0 = vcmask 261120   ;;  %s5361_s9 = smov 112  }
  0x46   : > { %4530 = vmatprep.subr.bf16.mxu0 %v4745_v0  ;;  %v353_v2 = vld [vmem:[%s5541_s21] sm:$0xff]   ;;  %v355_v3 = vld [vmem:[%s5541_s21 + $0x8] sm:$0xff]   ;;  %v357_v4 = vld [vmem:[%s5541_s21 + $0x10] sm:$0xff]   ;;  %s5362_s11 = smov 124   ;;  %vm502_vm1 = vcmask 31744   ;;  %s5363_s12 = smov 96  }
  0x47   : > { %4531 = vmatpush3.bf16.msra.mxu0 %v4745_v0  ;;  %v359_v5 = vld [vmem:[%s5541_s21 + $0x18] sm:$0xff]   ;;  %v361_v6 = vunpack.c.l.bf16 %v353_v2  ;;  %v362_v7 = vunpack.c.h.bf16 %v353_v2  ;;  %v363_v8 = vunpack.c.l.bf16 %v355_v3  ;;  %v364_v9 = vunpack.c.h.bf16 %v355_v3  ;;  %s5364_s13 = smov 120   ;;  %p346_p1 = scmp.lt.s32.totalorder %s5347_s27, 1 }
  0x48   : > { %4532 = vmatprep.subr.bf16.mxu0 %v4746_v1  ;;  %v365_v10 = vunpack.c.l.bf16 %v357_v4  ;;  %v366_v11 = vunpack.c.h.bf16 %v357_v4  ;;  %v367_v12 = vunpack.c.l.bf16 %v359_v5  ;;  %v368_v13 = vunpack.c.h.bf16 %v359_v5  ;;  %s5365_s16 = smov 116   ;;  %s5369_s20 = smov 4  }
  0x49   : > { %v370_v14 = vsel %vm369_vm0, %v361_v6, 0.0  ;;  %v371_v15 = vsel %vm369_vm0, %v363_v8, 0.0  ;;  %v377_v16 = vsel %vm369_vm0, %v362_v7, 0.0  ;;  %v378_v17 = vsel %vm369_vm0, %v364_v9, 0.0  ;;  %s347_s14 = scalar_select %p346_p1, %s5347_s27, 1 }
  0x4a   : > { %v372_v18 = vadd.f32 %v371_v15, %v370_v14  ;;  %v373_v19 = vsel %vm369_vm0, %v365_v10, 0.0  ;;  %v379_v20 = vadd.f32 %v378_v17, %v377_v16  ;;  %v375_v21 = vsel %vm369_vm0, %v367_v12, 0.0  ;;  %s7570_s2 = scalar_lea.vmem [#allocation9], %s4243_s28  ;;  %s4467_s28 = sshll.u32 %s5347_s27, 9 }
  0x4b   : > { %4533 = vmatpush3.bf16.msra.mxu0 %v4746_v1  ;;  %v380_v22 = vsel %vm369_vm0, %v366_v11, 0.0  ;;  %v382_v23 = vsel %vm369_vm0, %v368_v13, 0.0  ;;  %vm725_vm2 = vcmask 27648   ;;  %vm1249_vm3 = vcmask 60448   ;;  %s4394_s23 = sshll.u32 %s347_s14, 3  ;;  %s5371_s14 = smov 12  }
  0x4c   : > { %v374_v24 = vadd.f32 %v373_v19, %v372_v18  ;;  %v381_v25 = vadd.f32 %v380_v22, %v379_v20  ;;  %s6542_s30 = scalar_lea.vmem %s7645_s1, %s4394_s23  ;;  %vm1738_vm4 = vcmask 93248   ;;  %vm2656_vm5 = vcmask 130048   ;;  %s4110_s27 = scalar_lea.sflag [#allocation6], %s5535_s15 }
  0x4d   : > { %vm2227_vm6 = vcmask 126048   ;;  %vm4100_vm7 = vcmask 257024  }
  0x4e   : > { %v376_v26 = vadd.f32 %v375_v21, %v374_v24  ;;  %v383_v27 = vadd.f32 %v382_v23, %v381_v25 }
  0x50   : > { %v385_v28 = vmul.f32 0.25, %v376_v26  ;;  %v386_v29 = vmul.f32 0.25, %v383_v27 }
  0x52   : > { %v387_v30 = vsub.f32 %v361_v6, %v385_v28  ;;  %v388_v31 = vsub.f32 %v362_v7, %v386_v29  ;;  %v389_v32 = vsub.f32 %v363_v8, %v385_v28  ;;  %v390_v33 = vsub.f32 %v364_v9, %v386_v29 }
  0x53   : > { %v391_v34 = vsub.f32 %v365_v10, %v385_v28  ;;  %v392_v35 = vsub.f32 %v366_v11, %v386_v29  ;;  %v393_v39 = vsub.f32 %v367_v12, %v385_v28  ;;  %v394_v40 = vsub.f32 %v368_v13, %v386_v29 }
  0x54   : > { %v395_v36 = vpack.c.bf16 %v388_v31, %v387_v30  ;;  %v396_v37 = vpack.c.bf16 %v390_v33, %v389_v32 }
  0x55   : > { %v397_v38 = vpack.c.bf16 %v392_v35, %v391_v34  ;;  %v398_v41 = vpack.c.bf16 %v394_v40, %v393_v39 }
  0x56   : > { %4534 = vmatprep.mubr.msk.bf16.mxu0 %vm369_vm0, %v395_v36 }
  0x57   : > { %4535 = vmatmul.mubr.msk.bf16.vlgmr.msra.gmra.mxu0 %vm369_vm0, %v396_v37 }
  0x58   : > { %4538 = vmatprep.mubr.msk.bf16.mxu0 %vm369_vm0, %v397_v38 }
  0x5f   : > { %4539 = vmatmul.mubr.msk.bf16.gmra.mxu0 %vm369_vm0, %v398_v41 }
 0x117   : > { %v5567_v42 = vpop.f32.mrf.mxu0 }
 0x118   : > { %511 = vrot.lane.b32.xlu0 %v5567_v42, %s5361_s9 }
 0x119   : > { %v5571_v43 = vpop.f32.mrf.mxu0 }
 0x11b   : > { %v5573_v44 = vpop.f32.mrf.mxu0 }
 0x11c   : > { %494 = vrot.lane.b32.xlu0 %v5571_v43, %s5361_s9  ;;  %513 = vrot.lane.b32.xlu1 %v5573_v44, %s5361_s9 }
 0x11d   : > { %v5579_v45 = vpop.f32.mrf.mxu0 }
 0x11f   : > { %v5581_v46 = vpop.f32.mrf.mxu0 }
 0x120   : > { %496 = vrot.lane.b32.xlu0 %v5579_v45, %s5361_s9 }
 0x121   : > { %v5585_v47 = vpop.f32.mrf.mxu0 }
 0x123   : > { %v5587_v48 = vpop.f32.mrf.mxu0 }
 0x124   : > { %7748 = vst [vmem:[#allocation16_spill] sm:$0xff] %v5587_v48  ;;  %543 = vrot.lane.b32.xlu0 %v5581_v46, %s5361_s9  ;;  %545 = vrot.lane.b32.xlu1 %v5587_v48, %s5361_s9 }
 0x125   : > { %v5593_v49 = vpop.f32.mrf.mxu0 }
 0x128   : > { %527 = vrot.lane.b32.xlu0 %v5585_v47, %s5361_s9  ;;  %529 = vrot.lane.b32.xlu1 %v5593_v49, %s5361_s9 }
 0x18a   : > { %v512_v50 = vpop.permute.xlu0 %511 }
 0x18b   : > { %v5600_v51 = vmul.f32 %v512_v50, %v5571_v43  ;;  %v5612_v55 = vmul.f32 %v5567_v42, %v512_v50  ;;  %v5617_v57 = vmul.f32 %v512_v50, %v5585_v47  ;;  %v5622_v59 = vmul.f32 %v5581_v46, %v512_v50 }
 0x18d   : > { %7749 = vst [vmem:[#allocation17_spill] sm:$0xff] %v5600_v51  ;;  %969 = vrot.lane.b32.xlu0 %v5600_v51, %s5362_s11  ;;  %v519_v54 = vsel %vm502_vm1, %v5600_v51, 0.0  ;;  %7751 = vst [vmem:[#allocation19_spill] sm:$0xff] %v5612_v55  ;;  %v567_v56 = vsel %vm502_vm1, %v5612_v55, 0.0  ;;  %v599_v58 = vsel %vm502_vm1, %v5617_v57, 0.0  ;;  %v631_v61 = vsel %vm502_vm1, %v5622_v59, 0.0 }
 0x18e   : > { %v495_v52 = vpop.permute.xlu0 %494  ;;  %7752 = vst [vmem:[#allocation20_spill] sm:$0xff] %v5617_v57  ;;  %7753 = vst [vmem:[#allocation21_spill] sm:$0xff] %v5622_v59  ;;  %v514_v62 = vpop.permute.xlu1 %513 }
 0x18f   : > { %v5605_v53 = vmul.f32 %v495_v52, %v5571_v43  ;;  %v5629_v63 = vmul.f32 %v514_v62, %v5579_v45  ;;  %v5634_v0 = vmul.f32 %v5567_v42, %v495_v52  ;;  %v5641_v2 = vmul.f32 %v514_v62, %v5593_v49 }
 0x190   : > { %v5646_v4 = vmul.f32 %v495_v52, %v5585_v47  ;;  %v5651_v6 = vmul.f32 %v5587_v48, %v514_v62  ;;  %v5656_v8 = vmul.f32 %v5581_v46, %v495_v52  ;;  %v5663_v11 = vmul.f32 %v5573_v44, %v514_v62 }
 0x191   : > { %7750 = vst [vmem:[#allocation18_spill] sm:$0xff] %v5605_v53  ;;  %955 = vrot.lane.b32.xlu1 %v5605_v53, %s5362_s11  ;;  %v503_v60 = vsel %vm502_vm1, %v5605_v53, 0.0  ;;  %7754 = vst [vmem:[#allocation22_spill] sm:$0xff] %v5629_v63  ;;  %v522_v1 = vsel %vm502_vm1, %v5629_v63, 0.0  ;;  %v559_v3 = vsel %vm502_vm1, %v5634_v0, 0.0  ;;  %v602_v5 = vsel %vm502_vm1, %v5641_v2, 0.0 }
 0x192   : > { %7755 = vst [vmem:[#allocation23_spill] sm:$0xff] %v5634_v0  ;;  %7756 = vst [vmem:[#allocation24_spill] sm:$0xff] %v5641_v2  ;;  %v591_v7 = vsel %vm502_vm1, %v5646_v4, 0.0  ;;  %v634_v9 = vsel %vm502_vm1, %v5651_v6, 0.0  ;;  %v623_v10 = vsel %vm502_vm1, %v5656_v8, 0.0  ;;  %v570_v12 = vsel %vm502_vm1, %v5663_v11, 0.0  ;;  %v497_v13 = vpop.permute.xlu0 %496 }
 0x193   : > { %7757 = vst [vmem:[#allocation25_spill] sm:$0xff] %v5646_v4  ;;  %7758 = vst [vmem:[#allocation26_spill] sm:$0xff] %v5651_v6  ;;  %v5668_v14 = vmul.f32 %v5573_v44, %v497_v13  ;;  %v5673_v15 = vmul.f32 %v497_v13, %v5579_v45  ;;  %v5680_v17 = vmul.f32 %v497_v13, %v5593_v49 }
 0x194   : > { %7759 = vst [vmem:[#allocation27_spill] sm:$0xff] %v5656_v8  ;;  %7760 = vst [vmem:[#allocation28_spill] sm:$0xff] %v5663_v11  ;;  %v5685_v19 = vmul.f32 %v5587_v48, %v497_v13 }
 0x195   : > { %7761 = vst [vmem:[#allocation29_spill] sm:$0xff] %v5668_v14  ;;  %7762 = vst [vmem:[#allocation30_spill] sm:$0xff] %v5673_v15  ;;  %v506_v16 = vsel %vm502_vm1, %v5673_v15, 0.0  ;;  %v594_v18 = vsel %vm502_vm1, %v5680_v17, 0.0  ;;  %v562_v20 = vsel %vm502_vm1, %v5668_v14, 0.0 }
 0x196   : > { %7763 = vst [vmem:[#allocation31_spill] sm:$0xff] %v5680_v17  ;;  %7764 = vst [vmem:[#allocation32_spill] sm:$0xff] %v5685_v19  ;;  %v626_v21 = vsel %vm502_vm1, %v5685_v19, 0.0  ;;  %v546_v22 = vpop.permute.xlu1 %545  ;;  %v544_v24 = vpop.permute.xlu0 %543 }
 0x197   : > { %v5692_v23 = vmul.f32 %v546_v22, %v5579_v45  ;;  %v5697_v25 = vmul.f32 %v544_v24, %v5571_v43  ;;  %v5704_v27 = vmul.f32 %v5567_v42, %v544_v24  ;;  %v5709_v29 = vmul.f32 %v5573_v44, %v546_v22 }
 0x198   : > { %v5714_v31 = vmul.f32 %v544_v24, %v5585_v47  ;;  %v5719_v33 = vmul.f32 %v546_v22, %v5593_v49  ;;  %v5724_v35 = vmul.f32 %v5581_v46, %v544_v24  ;;  %v5729_v37 = vmul.f32 %v5587_v48, %v546_v22 }
 0x199   : > { %7765 = vst [vmem:[#allocation33_spill] sm:$0xff] %v5692_v23  ;;  %7766 = vst [vmem:[#allocation34_spill] sm:$0xff] %v5697_v25  ;;  %v551_v26 = vsel %vm502_vm1, %v5697_v25, 0.0  ;;  %v554_v28 = vsel %vm502_vm1, %v5692_v23, 0.0  ;;  %v583_v30 = vsel %vm502_vm1, %v5704_v27, 0.0  ;;  %v586_v32 = vsel %vm502_vm1, %v5709_v29, 0.0 }
 0x19a   : > { %7767 = vst [vmem:[#allocation35_spill] sm:$0xff] %v5704_v27  ;;  %7768 = vst [vmem:[#allocation36_spill] sm:$0xff] %v5709_v29  ;;  %v615_v34 = vsel %vm502_vm1, %v5714_v31, 0.0  ;;  %v618_v36 = vsel %vm502_vm1, %v5719_v33, 0.0  ;;  %v647_v38 = vsel %vm502_vm1, %v5724_v35, 0.0  ;;  %v650_v39 = vsel %vm502_vm1, %v5729_v37, 0.0  ;;  %v528_v40 = vpop.permute.xlu0 %527  ;;  %v530_v50 = vpop.permute.xlu1 %529 }
 0x19b   : > { %7769 = vst [vmem:[#allocation37_spill] sm:$0xff] %v5714_v31  ;;  %7770 = vst [vmem:[#allocation38_spill] sm:$0xff] %v5719_v33 }
 0x19c   : > { %7771 = vst [vmem:[#allocation39_spill] sm:$0xff] %v5724_v35  ;;  %7772 = vst [vmem:[#allocation40_spill] sm:$0xff] %v5729_v37 }
 0x1ac   : > { %520 = vadd.xlane.f32.xlu0 %v519_v54  ;;  %v5738_v54 = vmul.f32 %v530_v50, %v5579_v45 }
 0x1ae   : > { %7773 = vst [vmem:[#allocation41_spill] sm:$0xff] %v5738_v54 }
 0x1b0   : > { %568 = vadd.xlane.f32.xlu0 %v567_v56  ;;  %v5743_v56 = vmul.f32 %v528_v40, %v5571_v43 }
 0x1b2   : > { %7774 = vst [vmem:[#allocation42_spill] sm:$0xff] %v5743_v56  ;;  %v535_v13 = vsel %vm502_vm1, %v5743_v56, 0.0 }
 0x1b4   : > { %600 = vadd.xlane.f32.xlu0 %v599_v58 }
 0x1b5   : > { %504 = vadd.xlane.f32.xlu1 %v503_v60 }
 0x1b8   : > { %632 = vadd.xlane.f32.xlu0 %v631_v61 }
 0x1c6   : > { %971 = vrot.lane.b32.xlu1 %v5629_v63, %s5362_s11 }
 0x1ce   : > { %1011 = vrot.lane.b32.xlu0 %v5634_v0, %s5362_s11 }
 0x1ea   : > { %523 = vadd.xlane.f32.xlu1 %v522_v1 }
 0x1ed   : > { %560 = vadd.xlane.f32.xlu0 %v559_v3 }
 0x1ee   : > { %603 = vadd.xlane.f32.xlu1 %v602_v5 }
 0x1f1   : > { %592 = vadd.xlane.f32.xlu0 %v591_v7 }
 0x1f2   : > { %635 = vadd.xlane.f32.xlu1 %v634_v9 }
 0x1f5   : > { %624 = vadd.xlane.f32.xlu0 %v623_v10 }
 0x1f9   : > { %571 = vadd.xlane.f32.xlu0 %v570_v12 }
 0x1ff   : > { %v970_v41 = vpop.permute.xlu0 %969 }
 0x203   : > { %1013 = vrot.lane.b32.xlu1 %v5668_v14, %s5362_s11  ;;  %v956_v61 = vpop.permute.xlu1 %955 }
 0x20f   : > { %957 = vrot.lane.b32.xlu0 %v5673_v15, %s5362_s11 }
 0x227   : > { %507 = vadd.xlane.f32.xlu1 %v506_v16  ;;  %v5766_v16 = vmul.f32 %v5567_v42, %v528_v40 }
 0x229   : > { %7775 = vst [vmem:[#allocation43_spill] sm:$0xff] %v5766_v16  ;;  %v575_v24 = vsel %vm502_vm1, %v5766_v16, 0.0 }
 0x22b   : > { %595 = vadd.xlane.f32.xlu1 %v594_v18  ;;  %v538_v18 = vsel %vm502_vm1, %v5738_v54, 0.0 }
 0x22e   : > { %563 = vadd.xlane.f32.xlu0 %v562_v20  ;;  %v5771_v20 = vmul.f32 %v5573_v44, %v530_v50 }
 0x22f   : > { %627 = vadd.xlane.f32.xlu1 %v626_v21 }
 0x230   : > { %7776 = vst [vmem:[#allocation44_spill] sm:$0xff] %v5771_v20 }
 0x235   : > { %v5735_v52 = vpop.xlane.xlu0 %520 }
 0x239   : > { %v5745_v58 = vpop.xlane.xlu0 %568 }
 0x23d   : > { %v5749_v60 = vpop.xlane.xlu0 %600 }
 0x23e   : > { %v5751_v62 = vpop.xlane.xlu1 %504 }
 0x240   : > { %999 = vrot.lane.b32.xlu1 %v5692_v23, %s5362_s11 }
 0x241   : > { %v5753_v1 = vpop.xlane.xlu0 %632 }
 0x242   : > { %v972_v3 = vpop.permute.xlu1 %971 }
 0x244   : > { %997 = vrot.lane.b32.xlu0 %v5697_v25, %s5362_s11  ;;  %v961_v25 = vsel %vm502_vm1, %v956_v61, 0.0 }
 0x245   : > { %v1012_v5 = vpop.permute.xlu0 %1011 }
 0x263   : > { %552 = vadd.xlane.f32.xlu0 %v551_v26  ;;  %v5780_v26 = vmul.f32 %v528_v40, %v5585_v47 }
 0x264   : > { %555 = vadd.xlane.f32.xlu1 %v554_v28  ;;  %v578_v28 = vsel %vm502_vm1, %v5771_v20, 0.0 }
 0x265   : > { %7777 = vst [vmem:[#allocation45_spill] sm:$0xff] %v5780_v26 }
 0x267   : > { %584 = vadd.xlane.f32.xlu0 %v583_v30  ;;  %v5785_v30 = vmul.f32 %v530_v50, %v5593_v49 }
 0x268   : > { %587 = vadd.xlane.f32.xlu1 %v586_v32  ;;  %v607_v32 = vsel %vm502_vm1, %v5780_v26, 0.0 }
 0x269   : > { %7778 = vst [vmem:[#allocation46_spill] sm:$0xff] %v5785_v30 }
 0x26b   : > { %616 = vadd.xlane.f32.xlu0 %v615_v34  ;;  %v5790_v34 = vmul.f32 %v5581_v46, %v528_v40 }
 0x26c   : > { %619 = vadd.xlane.f32.xlu1 %v618_v36 }
 0x26d   : > { %7779 = vst [vmem:[#allocation47_spill] sm:$0xff] %v5790_v34 }
 0x26f   : > { %648 = vadd.xlane.f32.xlu0 %v647_v38  ;;  %v610_v38 = vsel %vm502_vm1, %v5785_v30, 0.0 }
 0x270   : > { %651 = vadd.xlane.f32.xlu1 %v650_v39  ;;  %v5795_v39 = vmul.f32 %v5587_v48, %v530_v50  ;;  %v975_v50 = vsel %vm502_vm1, %v970_v41, 0.0 }
 0x272   : > { %7780 = vst [vmem:[#allocation48_spill] sm:$0xff] %v5795_v39  ;;  %v642_v40 = vsel %vm502_vm1, %v5795_v39, 0.0 }
 0x273   : > { %v5755_v7 = vpop.xlane.xlu1 %523 }
 0x276   : > { %v5757_v9 = vpop.xlane.xlu0 %560 }
 0x277   : > { %v5759_v10 = vpop.xlane.xlu1 %603 }
 0x27a   : > { %v5761_v12 = vpop.xlane.xlu0 %592 }
 0x27b   : > { %v5773_v21 = vpop.xlane.xlu1 %635 }
 0x27e   : > { %v5775_v22 = vpop.xlane.xlu0 %624 }
 0x27f   : > { %v1014_v36 = vpop.permute.xlu1 %1013 }
 0x281   : > { %985 = vrot.lane.b32.xlu1 %v5738_v54, %s5362_s11  ;;  %v653_v54 = vmax.f32 %v5751_v62, %v5735_v52 }
 0x285   : > { %983 = vrot.lane.b32.xlu0 %v5743_v56, %s5362_s11 }
 0x2a4   : > { %536 = vadd.xlane.f32.xlu0 %v535_v13  ;;  %v5797_v13 = vpop.xlane.xlu0 %571 }
 0x2a5   : > { %539 = vadd.xlane.f32.xlu1 %v538_v18  ;;  %v639_v18 = vsel %vm502_vm1, %v5790_v34, 0.0 }
 0x2a8   : > { %576 = vadd.xlane.f32.xlu0 %v575_v24 }
 0x2a9   : > { %579 = vadd.xlane.f32.xlu1 %v578_v28  ;;  %v958_v28 = vpop.permute.xlu0 %957 }
 0x2aa   : > { %v964_v14 = vsel %vm502_vm1, %v958_v28, 0.0 }
 0x2ac   : > { %608 = vadd.xlane.f32.xlu0 %v607_v32  ;;  %v978_v32 = vsel %vm502_vm1, %v972_v3, 0.0 }
 0x2ad   : > { %611 = vadd.xlane.f32.xlu1 %v610_v38 }
 0x2b0   : > { %640 = vadd.xlane.f32.xlu0 %v639_v18  ;;  %v5801_v24 = vpop.xlane.xlu1 %507 }
 0x2b1   : > { %643 = vadd.xlane.f32.xlu1 %v642_v40  ;;  %v1020_v40 = vsel %vm502_vm1, %v1014_v36, 0.0 }
 0x2b4   : > { %979 = vadd.xlane.f32.xlu0 %v978_v32  ;;  %v5806_v0 = vpop.xlane.xlu1 %595  ;;  %v1017_v32 = vsel %vm502_vm1, %v1012_v5, 0.0 }
 0x2b5   : > { %976 = vadd.xlane.f32.xlu1 %v975_v50 }
 0x2b7   : > { %v5809_v38 = vpop.xlane.xlu0 %563 }
 0x2b8   : > { %965 = vadd.xlane.f32.xlu0 %v964_v14  ;;  %v5812_v18 = vpop.xlane.xlu1 %627 }
 0x2b9   : > { %962 = vadd.xlane.f32.xlu1 %v961_v25 }
 0x2bb   : > { %v998_v23 = vpop.permute.xlu0 %997 }
 0x2bc   : > { %1021 = vadd.xlane.f32.xlu0 %v1020_v40  ;;  %v1000_v3 = vpop.permute.xlu1 %999  ;;  %v1003_v50 = vsel %vm502_vm1, %v998_v23, 0.0 }
 0x2bd   : > { %1018 = vadd.xlane.f32.xlu1 %v1017_v32  ;;  %v1006_v41 = vsel %vm502_vm1, %v1000_v3, 0.0 }
 0x2c0   : > { %1007 = vadd.xlane.f32.xlu0 %v1006_v41 }
 0x2c1   : > { %1004 = vadd.xlane.f32.xlu1 %v1003_v50 }
 0x2ec   : > { %v553_v14 = vpop.xlane.xlu0 %552 }
 0x2ed   : > { %v5819_v28 = vpop.xlane.xlu1 %555 }
 0x2f0   : > { %v5821_v56 = vpop.xlane.xlu0 %584 }
 0x2f1   : > { %v5823_v25 = vpop.xlane.xlu1 %587 }
 0x2f4   : > { %v5825_v61 = vpop.xlane.xlu0 %616 }
 0x2f5   : > { %v5827_v36 = vpop.xlane.xlu1 %619 }
 0x2f8   : > { %v5829_v5 = vpop.xlane.xlu0 %648 }
 0x2f9   : > { %v5831_v40 = vpop.xlane.xlu1 %651 }
 0x2fc   : > { %v984_v3 = vpop.permute.xlu0 %983 }
 0x2fd   : > { %v986_v32 = vpop.permute.xlu1 %985  ;;  %v989_v23 = vsel %vm502_vm1, %v984_v3, 0.0  ;;  %v654_v3 = vmax.f32 %v5801_v24, %v5755_v7 }
 0x2fe   : > { %990 = vadd.xlane.f32.xlu1 %v989_v23  ;;  %v992_v41 = vsel %vm502_vm1, %v986_v32, 0.0  ;;  %v728_v32 = vmax.f32 %v5757_v9, %v5745_v58 }
 0x2ff   : > { %993 = vadd.xlane.f32.xlu0 %v992_v41 }
 0x30f   : > { %1027 = vrot.lane.b32.xlu1 %v5663_v11, %s5362_s11 }
 0x315   : > { %1025 = vrot.lane.b32.xlu0 %v5612_v55, %s5362_s11 }
 0x32d   : > { %v537_v50 = vpop.xlane.xlu0 %536 }
 0x32e   : > { %v655_v51 = vmax.f32 %v653_v54, %v537_v50  ;;  %v540_v63 = vpop.xlane.xlu1 %539  ;;  %v803_v54 = vmax.f32 %v5761_v12, %v5749_v60 }
 0x32f   : > { %v656_v41 = vmax.f32 %v654_v3, %v540_v63 }
 0x330   : > { %v657_v23 = vmax.f32 %v655_v51, %v553_v14  ;;  %v729_v51 = vmax.f32 %v5809_v38, %v5797_v13 }
 0x331   : > { %v577_v53 = vpop.xlane.xlu0 %576  ;;  %v5849_v35 = vmax.f32 %v656_v41, %v5819_v28 }
 0x332   : > { %v730_v15 = vmax.f32 %v728_v32, %v577_v53  ;;  %v659_v55 = vsub.f32 %v5751_v62, %v657_v23  ;;  %v665_v37 = vsub.f32 %v5735_v52, %v657_v23  ;;  %v580_v39 = vpop.xlane.xlu1 %579  ;;  %v671_v59 = vsub.f32 %v537_v50, %v657_v23 }
 0x333   : > { %v677_v3 = vsub.f32 %v553_v14, %v657_v23  ;;  %v660_v62 = vsub.f32 %v5801_v24, %v5849_v35  ;;  %v731_v19 = vmax.f32 %v729_v51, %v580_v39  ;;  %v804_v14 = vmax.f32 %v5806_v0, %v5759_v10 }
 0x334   : > { %v732_v34 = vmax.f32 %v730_v15, %v5821_v56  ;;  %v661_v6 = vmul.f32 1.442695, %v659_v55  ;;  %v667_v41 = vmul.f32 1.442695, %v665_v37  ;;  %v878_v15 = vmax.f32 %v5775_v22, %v5753_v1 }
 0x335   : > { %v5845_v11 = vpop.xlane.xlu0 %608  ;;  %v673_v52 = vmul.f32 1.442695, %v671_v59  ;;  %v679_v23 = vmul.f32 1.442695, %v677_v3  ;;  %v666_v55 = vsub.f32 %v5755_v7, %v5849_v35  ;;  %v663_v24 = vmul.f32 1.442695, %v660_v62 }
 0x336   : > { %v805_v32 = vmax.f32 %v803_v54, %v5845_v11  ;;  %v734_v8 = vsub.f32 %v5757_v9, %v732_v34  ;;  %v740_v50 = vsub.f32 %v5745_v58, %v732_v34  ;;  %v5873_v9 = vpop.xlane.xlu1 %611  ;;  %4764 = vpow2.f32 %v661_v6 }
 0x337   : > { %v672_v54 = vsub.f32 %v540_v63, %v5849_v35  ;;  %4766 = vpow2.f32 %v667_v41  ;;  %v746_v51 = vsub.f32 %v577_v53, %v732_v34  ;;  %v733_v33 = vmax.f32 %v731_v19, %v5823_v25 }
 0x338   : > { %v5871_v37 = vmax.f32 %v805_v32, %v5825_v61  ;;  %v736_v58 = vmul.f32 1.442695, %v734_v8  ;;  %4768 = vpow2.f32 %v673_v52  ;;  %v742_v3 = vmul.f32 1.442695, %v740_v50 }
 0x339   : > { %v5861_v31 = vpop.xlane.xlu0 %640  ;;  %v752_v7 = vsub.f32 %v5821_v56, %v732_v34  ;;  %4770 = vpow2.f32 %v679_v23  ;;  %v669_v32 = vmul.f32 1.442695, %v666_v55  ;;  %v806_v6 = vmax.f32 %v804_v14, %v5873_v9 }
 0x33a   : > { %v880_v59 = vmax.f32 %v878_v15, %v5861_v31  ;;  %v809_v26 = vsub.f32 %v5761_v12, %v5871_v37  ;;  %4772 = vpow2.f32 %v663_v24  ;;  %v675_v63 = vmul.f32 1.442695, %v672_v54  ;;  %v5888_v56 = vpop.xlane.xlu1 %643 }
 0x33b   : > { %v815_v62 = vsub.f32 %v5749_v60, %v5871_v37  ;;  %4774 = vpow2.f32 %v736_v58  ;;  %v748_v8 = vmul.f32 1.442695, %v746_v51  ;;  %v735_v19 = vsub.f32 %v5809_v38, %v733_v33 }
 0x33c   : > { %v5885_v53 = vmax.f32 %v880_v59, %v5829_v5  ;;  %v879_v34 = vmax.f32 %v5812_v18, %v5773_v21  ;;  %4776 = vpow2.f32 %v742_v3  ;;  %v754_v12 = vmul.f32 1.442695, %v752_v7 }
 0x33d   : > { %v741_v41 = vsub.f32 %v5797_v13, %v733_v33  ;;  %4778 = vpow2.f32 %v669_v32  ;;  %v747_v15 = vsub.f32 %v580_v39, %v733_v33  ;;  %v811_v52 = vmul.f32 1.442695, %v809_v26 }
 0x33e   : > { %v5894_v60 = vmax.f32 %v806_v6, %v5827_v36  ;;  %4780 = vpow2.f32 %v675_v63  ;;  %v817_v50 = vmul.f32 1.442695, %v815_v62  ;;  %v884_v38 = vsub.f32 %v5775_v22, %v5885_v53 }
 0x33f   : > { %v881_v14 = vmax.f32 %v879_v34, %v5888_v56  ;;  %4782 = vpow2.f32 %v748_v8  ;;  %v738_v23 = vmul.f32 1.442695, %v735_v19  ;;  %v890_v55 = vsub.f32 %v5753_v1, %v5885_v53 }
 0x340   : > { %4784 = vpow2.f32 %v754_v12  ;;  %v744_v13 = vmul.f32 1.442695, %v741_v41  ;;  %v821_v26 = vsub.f32 %v5845_v11, %v5871_v37  ;;  %v750_v39 = vmul.f32 1.442695, %v747_v15 }
 0x341   : > { %4786 = vpow2.f32 %v811_v52  ;;  %v810_v24 = vsub.f32 %v5806_v0, %v5894_v60  ;;  %v816_v22 = vsub.f32 %v5759_v10, %v5894_v60  ;;  %v886_v54 = vmul.f32 1.442695, %v884_v38 }
 0x342   : > { %4788 = vpow2.f32 %v817_v50  ;;  %v5908_v59 = vmax.f32 %v881_v14, %v5831_v40  ;;  %v753_v1 = vsub.f32 %v5823_v25, %v733_v33  ;;  %v892_v51 = vmul.f32 1.442695, %v890_v55 }
 0x343   : > { %v5910_v58 = vpop.eup %4764  ;;  %4790 = vpow2.f32 %v738_v23  ;;  %v823_v3 = vmul.f32 1.442695, %v821_v26  ;;  %v827_v0 = vsub.f32 %v5825_v61, %v5871_v37  ;;  %v813_v10 = vmul.f32 1.442695, %v810_v24 }
 0x344   : > { %v5913_v11 = vpop.eup %4766  ;;  %4792 = vpow2.f32 %v744_v13  ;;  %v896_v32 = vsub.f32 %v5861_v31, %v5885_v53  ;;  %v819_v63 = vmul.f32 1.442695, %v816_v22  ;;  %v885_v33 = vsub.f32 %v5812_v18, %v5908_v59  ;;  %v5957_v13 = vpop.xlane.xlu1 %976 }
 0x345   : > { %v5917_v7 = vpop.eup %4768  ;;  %4794 = vpow2.f32 %v750_v39  ;;  %v756_v62 = vmul.f32 1.442695, %v753_v1  ;;  %v891_v61 = vsub.f32 %v5773_v21, %v5908_v59  ;;  %v829_v8 = vmul.f32 1.442695, %v827_v0  ;;  %7781 = vst [vmem:[#allocation49_spill] sm:$0xff] %v5957_v13  ;;  %v5962_v39 = vpop.xlane.xlu0 %979 }
 0x346   : > { %v5921_v6 = vpop.eup %4770  ;;  %4796 = vpow2.f32 %v886_v54  ;;  %v822_v31 = vsub.f32 %v5873_v9, %v5894_v60  ;;  %v898_v34 = vmul.f32 1.442695, %v896_v32  ;;  %v902_v18 = vsub.f32 %v5829_v5, %v5885_v53  ;;  %7782 = vst [vmem:[#allocation50_spill] sm:$0xff] %v5962_v39 }
 0x347   : > { %v5925_v25 = vpop.eup %4772  ;;  %4798 = vpow2.f32 %v892_v51  ;;  %v888_v41 = vmul.f32 1.442695, %v885_v33  ;;  %v678_v21 = vsub.f32 %v5819_v28, %v5849_v35  ;;  %v894_v52 = vmul.f32 1.442695, %v891_v61 }
 0x348   : > { %v5929_v37 = vpop.eup %4774  ;;  %4800 = vpow2.f32 %v823_v3  ;;  %v825_v38 = vmul.f32 1.442695, %v822_v31  ;;  %v828_v5 = vsub.f32 %v5827_v36, %v5894_v60  ;;  %v904_v14 = vmul.f32 1.442695, %v902_v18 }
 0x349   : > { %v5933_v19 = vpop.eup %4776  ;;  %4802 = vpow2.f32 %v813_v10  ;;  %v897_v23 = vsub.f32 %v5888_v56, %v5908_v59  ;;  %v681_v55 = vmul.f32 1.442695, %v678_v21  ;;  %v683_v56 = vadd.f32 %v5913_v11, %v5910_v58 }
 0x34a   : > { %v5937_v12 = vpop.eup %4778  ;;  %4804 = vpow2.f32 %v819_v63  ;;  %v758_v9 = vadd.f32 %v5933_v19, %v5929_v37  ;;  %v831_v60 = vmul.f32 1.442695, %v828_v5  ;;  %v903_v54 = vsub.f32 %v5831_v40, %v5908_v59  ;;  %v5982_v40 = vpop.xlane.xlu1 %962 }
 0x34b   : > { %v5939_v15 = vpop.eup %4780  ;;  %4806 = vpow2.f32 %v756_v62  ;;  %v900_v22 = vmul.f32 1.442695, %v897_v23  ;;  %v685_v63 = vadd.f32 %v5917_v7, %v683_v56  ;;  %7783 = vst [vmem:[#allocation51_spill] sm:$0xff] %v5982_v40 }
 0x34c   : > { %v5943_v50 = vpop.eup %4782  ;;  %4808 = vpow2.f32 %v829_v8  ;;  %v906_v33 = vmul.f32 1.442695, %v903_v54  ;;  %v5989_v8 = vpop.xlane.xlu0 %965 }
 0x34d   : > { %v5949_v53 = vpop.eup %4784  ;;  %4810 = vpow2.f32 %v898_v34  ;;  %v760_v36 = vadd.f32 %v5943_v50, %v758_v9  ;;  %7784 = vst [vmem:[#allocation52_spill] sm:$0xff] %v5989_v8  ;;  %v687_v21 = vadd.f32 %v5921_v6, %v685_v63 }
 0x34e   : > { %v5953_v35 = vpop.eup %4786  ;;  %4812 = vpow2.f32 %v888_v41 }
 0x34f   : > { %v5955_v28 = vpop.eup %4788  ;;  %4814 = vpow2.f32 %v894_v52  ;;  %v762_v10 = vadd.f32 %v5949_v53, %v760_v36  ;;  %v684_v52 = vadd.f32 %v5937_v12, %v5925_v25  ;;  %v6011_v36 = vpop.xlane.xlu1 %1018 }
 0x350   : > { %v5959_v26 = vpop.eup %4790  ;;  %4816 = vpow2.f32 %v825_v38  ;;  %v833_v51 = vadd.f32 %v5955_v28, %v5953_v35  ;;  %7785 = vst [vmem:[#allocation53_spill] sm:$0xff] %v6011_v36  ;;  %v6015_v56 = vpop.xlane.xlu0 %1021 }
 0x351   : > { %v5964_v24 = vpop.eup %4792  ;;  %4818 = vpow2.f32 %v904_v14  ;;  %7786 = vst [vmem:[#allocation54_spill] sm:$0xff] %v6015_v56  ;;  %v686_v54 = vadd.f32 %v5939_v15, %v684_v52 }
 0x352   : > { %v5970_v1 = vpop.eup %4794  ;;  %4820 = vpow2.f32 %v681_v55  ;;  %v759_v62 = vadd.f32 %v5964_v24, %v5959_v26 }
 0x353   : > { %v5974_v3 = vpop.eup %4796  ;;  %4822 = vpow2.f32 %v831_v60  ;;  %v6032_v56 = vpop.xlane.xlu1 %1004 }
 0x354   : > { %v5976_v0 = vpop.eup %4798  ;;  %4824 = vpow2.f32 %v900_v22  ;;  %v761_v38 = vadd.f32 %v5970_v1, %v759_v62  ;;  %7787 = vst [vmem:[#allocation55_spill] sm:$0xff] %v6032_v56 }
 0x355   : > { %v5979_v32 = vpop.eup %4800  ;;  %v908_v34 = vadd.f32 %v5976_v0, %v5974_v3  ;;  %4826 = vrcp.f32 %v762_v10 }
 0x356   : > { %v5984_v59 = vpop.eup %4802  ;;  %v835_v61 = vadd.f32 %v5979_v32, %v833_v51  ;;  %4828 = vpow2.f32 %v906_v33 }
 0x357   : > { %v5991_v31 = vpop.eup %4804  ;;  %4830 = vrcp.f32 %v687_v21 }
 0x358   : > { %v5995_v18 = vpop.eup %4806  ;;  %v834_v14 = vadd.f32 %v5991_v31, %v5984_v59 }
 0x359   : > { %v5997_v41 = vpop.eup %4808  ;;  %v763_v10 = vadd.f32 %v5995_v18, %v761_v38 }
 0x35a   : > { %v6002_v9 = vpop.eup %4810  ;;  %v837_v5 = vadd.f32 %v5997_v41, %v835_v61 }
 0x35b   : > { %v6008_v23 = vpop.eup %4812  ;;  %v910_v55 = vadd.f32 %v6002_v9, %v908_v34 }
 0x35c   : > { %v6013_v60 = vpop.eup %4814  ;;  %4832 = vrcp.f32 %v837_v5  ;;  %v6037_v5 = vpop.xlane.xlu0 %1007 }
 0x35d   : > { %v6017_v22 = vpop.eup %4816  ;;  %v909_v62 = vadd.f32 %v6013_v60, %v6008_v23  ;;  %4834 = vrcp.f32 %v763_v10  ;;  %7788 = vst [vmem:[#allocation56_spill] sm:$0xff] %v6037_v5 }
 0x35e   : > { %v6020_v51 = vpop.eup %4818  ;;  %v836_v63 = vadd.f32 %v6017_v22, %v834_v14 }
 0x35f   : > { %v912_v33 = vadd.f32 %v6020_v51, %v910_v55  ;;  %v6027_v61 = vpop.eup %4820 }
 0x360   : > { %v6029_v34 = vpop.eup %4822  ;;  %v688_v21 = vadd.f32 %v6027_v61, %v686_v54 }
 0x361   : > { %v6034_v52 = vpop.eup %4824  ;;  %v838_v38 = vadd.f32 %v6029_v34, %v836_v63  ;;  %4836 = vrcp.f32 %v912_v33 }
 0x362   : > { %v911_v14 = vadd.f32 %v6034_v52, %v909_v62  ;;  %v4827_v55 = vpop.eup %4826  ;;  %4838 = vrcp.f32 %v688_v21 }
 0x363   : > { %v6042_v8 = vpop.eup %4828  ;;  %4840 = vrcp.f32 %v838_v38  ;;  %v766_v10 = vmul.f32 %v4827_v55, %v5929_v37  ;;  %v770_v63 = vmul.f32 %v4827_v55, %v5933_v19  ;;  %v776_v13 = vmul.f32 %v4827_v55, %v5943_v50 }
 0x364   : > { %v913_v56 = vadd.f32 %v6042_v8, %v911_v14  ;;  %v4831_v39 = vpop.eup %4830 }
 0x365   : > { %v768_v21 = vmul.f32 %v766_v10, %v5571_v43  ;;  %v691_v40 = vmul.f32 %v4831_v39, %v5910_v58  ;;  %v695_v38 = vmul.f32 %v4831_v39, %v5913_v11  ;;  %v701_v10 = vmul.f32 %v4831_v39, %v5917_v7 }
 0x366   : > { %4842 = vrcp.f32 %v913_v56  ;;  %v778_v50 = vmul.f32 %v776_v13, %v5585_v47 }
 0x367   : > { %v693_v58 = vmul.f32 %v691_v40, %v5571_v43  ;;  %v697_v11 = vmul.f32 %v5567_v42, %v695_v38  ;;  %v703_v38 = vmul.f32 %v701_v10, %v5585_v47 }
 0x369   : > { %v4833_v5 = vpop.eup %4832 }
 0x36a   : > { %v841_v14 = vmul.f32 %v4833_v5, %v5953_v35  ;;  %v845_v37 = vmul.f32 %v4833_v5, %v5955_v28  ;;  %v4835_v19 = vpop.eup %4834  ;;  %v857_v10 = vmul.f32 %v4833_v5, %v5997_v41 }
 0x36c   : > { %v843_v35 = vmul.f32 %v841_v14, %v5571_v43  ;;  %v847_v28 = vmul.f32 %v5567_v42, %v845_v37  ;;  %v699_v37 = vadd.f32 %v697_v11, %v693_v58 }
 0x36e   : > { %v4837_v30 = vpop.eup %4836  ;;  %v849_v2 = vadd.f32 %v847_v28, %v843_v35  ;;  %v705_v58 = vadd.f32 %v703_v38, %v699_v37 }
 0x36f   : > { %v916_v7 = vmul.f32 %v4837_v30, %v5974_v3  ;;  %v920_v40 = vmul.f32 %v4837_v30, %v5976_v0 }
 0x371   : > { %v922_v0 = vmul.f32 %v5567_v42, %v920_v40 }
 0x387   : > { %v6040_v36 = vpop.xlane.xlu1 %990 }
 0x388   : > { %7789 = vst [vmem:[#allocation57_spill] sm:$0xff] %v6040_v36  ;;  %v6044_v54 = vpop.xlane.xlu0 %993  ;;  %v772_v36 = vmul.f32 %v5567_v42, %v770_v63 }
 0x389   : > { %7790 = vst [vmem:[#allocation58_spill] sm:$0xff] %v6044_v54 }
 0x38a   : > { %v774_v63 = vadd.f32 %v772_v36, %v768_v21  ;;  %v782_v36 = vmul.f32 %v4827_v55, %v5949_v53  ;;  %v851_v21 = vmul.f32 %v4833_v5, %v5979_v32  ;;  %v918_v53 = vmul.f32 %v916_v7, %v5571_v43 }
 0x38b   : > { %v1028_v33 = vpop.permute.xlu1 %1027  ;;  %v783_v5 = vmul.f32 %v4835_v19, %v5995_v18 }
 0x38c   : > { %v1026_v62 = vpop.permute.xlu0 %1025  ;;  %v1034_v54 = vsel %vm502_vm1, %v1028_v33, 0.0  ;;  %v4839_v33 = vpop.eup %4838  ;;  %v780_v14 = vadd.f32 %v778_v50, %v774_v63  ;;  %v777_v63 = vmul.f32 %v4835_v19, %v5970_v1  ;;  %v924_v50 = vadd.f32 %v922_v0, %v918_v53 }
 0x38d   : > { %1035 = vadd.xlane.f32.xlu0 %v1034_v54  ;;  %v1031_v56 = vsel %vm502_vm1, %v1026_v62, 0.0  ;;  %v767_v54 = vmul.f32 %v4835_v19, %v5959_v26  ;;  %v771_v62 = vmul.f32 %v4835_v19, %v5964_v24  ;;  %v4841_v57 = vpop.eup %4840  ;;  %v692_v26 = vmul.f32 %v4839_v33, %v5925_v25 }
 0x38e   : > { %1032 = vadd.xlane.f32.xlu1 %v1031_v56  ;;  %v707_v56 = vmul.f32 %v4831_v39, %v5921_v6  ;;  %v696_v24 = vmul.f32 %v4839_v33, %v5937_v12  ;;  %v842_v39 = vmul.f32 %v4841_v57, %v5984_v59  ;;  %v846_v32 = vmul.f32 %v4841_v57, %v5991_v31  ;;  %v4843_v55 = vpop.eup %4842 }
 0x38f   : > { %v769_v13 = vmul.f32 %v767_v54, %v5579_v45  ;;  %v773_v6 = vmul.f32 %v5573_v44, %v771_v62  ;;  %v784_v25 = vmul.f32 %v5581_v46, %v782_v36  ;;  %v853_v12 = vmul.f32 %v851_v21, %v5585_v47 }
 0x390   : > { %v709_v3 = vmul.f32 %v5581_v46, %v707_v56  ;;  %v926_v59 = vmul.f32 %v4837_v30, %v6002_v9  ;;  %v694_v11 = vmul.f32 %v692_v26, %v5579_v45  ;;  %v698_v35 = vmul.f32 %v5573_v44, %v696_v24 }
 0x391   : > { %v786_v28 = vadd.f32 %v784_v25, %v780_v14  ;;  %v855_v54 = vadd.f32 %v853_v12, %v849_v2  ;;  %v775_v62 = vadd.f32 %v773_v6, %v769_v13  ;;  %v844_v31 = vmul.f32 %v842_v39, %v5579_v45 }
 0x392   : > { %v848_v56 = vmul.f32 %v5573_v44, %v846_v32  ;;  %v917_v7 = vmul.f32 %v4843_v55, %v6008_v23  ;;  %v921_v41 = vmul.f32 %v4843_v55, %v6013_v60  ;;  %v859_v1 = vmul.f32 %v5581_v46, %v857_v10 }
 0x393   : > { %v779_v9 = vmul.f32 %v777_v63, %v5593_v49  ;;  %v702_v40 = vmul.f32 %v4839_v33, %v5939_v15  ;;  %v711_v36 = vadd.f32 %v709_v3, %v705_v58  ;;  %v928_v2 = vmul.f32 %v926_v59, %v5585_v47 }
 0x394   : > { %v932_v21 = vmul.f32 %v4837_v30, %v6020_v51  ;;  %v852_v38 = vmul.f32 %v4841_v57, %v6017_v22  ;;  %v4397_v14 = vpack.c.bf16 %v786_v28, %v786_v28  ;;  %v861_v37 = vadd.f32 %v859_v1, %v855_v54 }
 0x395   : > { %v781_v23 = vadd.f32 %v779_v9, %v775_v62  ;;  %v700_v26 = vadd.f32 %v698_v35, %v694_v11  ;;  %v930_v60 = vadd.f32 %v928_v2, %v924_v50  ;;  %v850_v24 = vadd.f32 %v848_v56, %v844_v31 }
 0x396   : > { %v919_v13 = vmul.f32 %v917_v7, %v5579_v45  ;;  %v923_v6 = vmul.f32 %v5573_v44, %v921_v41  ;;  %v785_v18 = vmul.f32 %v5587_v48, %v783_v5  ;;  %v704_v15 = vmul.f32 %v702_v40, %v5593_v49 }
 0x397   : > { %v708_v19 = vmul.f32 %v4839_v33, %v6027_v61  ;;  %v934_v30 = vmul.f32 %v5581_v46, %v932_v21  ;;  %v854_v22 = vmul.f32 %v852_v38, %v5593_v49  ;;  %v858_v51 = vmul.f32 %v4841_v57, %v6029_v34 }
 0x398   : > { %v927_v39 = vmul.f32 %v4843_v55, %v6034_v52  ;;  %v4395_v3 = vpack.c.bf16 %v711_v36, %v711_v36  ;;  %v787_v53 = vadd.f32 %v785_v18, %v781_v23  ;;  %v706_v0 = vadd.f32 %v704_v15, %v700_v26 }
 0x399   : > { %v4399_v32 = vpack.c.bf16 %v861_v37, %v861_v37  ;;  %v936_v25 = vadd.f32 %v934_v30, %v930_v60  ;;  %v856_v12 = vadd.f32 %v854_v22, %v850_v24  ;;  %v925_v10 = vadd.f32 %v923_v6, %v919_v13  ;;  %v7791_v22 = vld [vmem:[#allocation24_spill] sm:$0xff] }
 0x39a   : > { %v710_v61 = vmul.f32 %v5587_v48, %v708_v19  ;;  %v860_v33 = vmul.f32 %v5587_v48, %v858_v51  ;;  %v929_v63 = vmul.f32 %v927_v39, %v5593_v49  ;;  %v933_v57 = vmul.f32 %v4843_v55, %v6042_v8  ;;  %v7792_v51 = vld [vmem:[#allocation20_spill] sm:$0xff] }
 0x39b   : > { %v4401_v52 = vpack.c.bf16 %v936_v25, %v936_v25  ;;  %v4398_v58 = vpack.c.bf16 %v787_v53, %v787_v53 }
 0x39c   : > { %v712_v34 = vadd.f32 %v710_v61, %v706_v0  ;;  %v862_v59 = vadd.f32 %v860_v33, %v856_v12  ;;  %v931_v11 = vadd.f32 %v929_v63, %v925_v10  ;;  %v935_v35 = vmul.f32 %v5587_v48, %v933_v57  ;;  %v7793_v12 = vld [vmem:[#allocation46_spill] sm:$0xff]  ;;  %v7794_v10 = vld [vmem:[#allocation45_spill] sm:$0xff] }
 0x39e   : > { %v4396_v28 = vpack.c.bf16 %v712_v34, %v712_v34  ;;  %v4400_v54 = vpack.c.bf16 %v862_v59, %v862_v59  ;;  %v937_v62 = vadd.f32 %v935_v35, %v931_v11  ;;  %v7796_v59 = vld [vmem:[#allocation37_spill] sm:$0xff] }
 0x39f   : > { %794 = vrot.lane.b32.xlu1 %v4397_v14, %s5363_s12 }
 0x3a0   : > { %v4402_v31 = vpack.c.bf16 %v937_v62, %v937_v62 }
 0x3a3   : > { %869 = vrot.lane.b32.xlu1 %v4399_v32, %s5363_s12  ;;  %719 = vrot.lane.b32.xlu0 %v4395_v3, %s5363_s12 }
 0x3a7   : > { %944 = vrot.lane.b32.xlu1 %v4401_v52, %s5363_s12  ;;  %796 = vrot.lane.b32.xlu0 %v4398_v58, %s5363_s12  ;;  %v7795_v58 = vld [vmem:[#allocation38_spill] sm:$0xff] }
 0x3ab   : > { %721 = vrot.lane.b32.xlu1 %v4396_v28, %s5363_s12  ;;  %871 = vrot.lane.b32.xlu0 %v4400_v54, %s5363_s12 }
 0x3af   : > { %1041 = vrot.lane.b32.xlu1 %v5771_v20, %s5362_s11  ;;  %946 = vrot.lane.b32.xlu0 %v4402_v31, %s5363_s12 }
 0x3b3   : > { %1039 = vrot.lane.b32.xlu0 %v5766_v16, %s5362_s11 }
 0x416   : > { %v6125_v8 = vpop.xlane.xlu0 %1035 }
 0x417   : > { %v6127_v55 = vpop.xlane.xlu1 %1032 }
 0x41a   : > { %v720_v50 = vpop.permute.xlu0 %719 }
 0x41b   : > { %726 = vst.msk [vmem:[#allocation2] sm:$0xf] %vm725_vm2, %v720_v50  ;;  %v795_v56 = vpop.permute.xlu1 %794  ;;  %v7797_v50 = vld [vmem:[#allocation32_spill] sm:$0xff] }
 0x41c   : > { %801 = vst.msk [vmem:[#allocation2 + $0x8] sm:$0xf] %vm725_vm2, %v795_v56  ;;  %v7798_v56 = vld [vmem:[#allocation27_spill] sm:$0xff] }
 0x41e   : > { %v797_v7 = vpop.permute.xlu0 %796 }
 0x41f   : > { %802 = vst.msk [vmem:[#allocation2 + $0xc] sm:$0xf] %vm725_vm2, %v797_v7  ;;  %v870_v41 = vpop.permute.xlu1 %869 }
 0x420   : > { %876 = vst.msk [vmem:[#allocation2 + $0x10] sm:$0xf] %vm725_vm2, %v870_v41 }
 0x422   : > { %v872_v1 = vpop.permute.xlu0 %871 }
 0x423   : > { %877 = vst.msk [vmem:[#allocation2 + $0x14] sm:$0xf] %vm725_vm2, %v872_v1  ;;  %v945_v9 = vpop.permute.xlu1 %944 }
 0x424   : > { %951 = vst.msk [vmem:[#allocation2 + $0x18] sm:$0xf] %vm725_vm2, %v945_v9 }
 0x426   : > { %v947_v5 = vpop.permute.xlu0 %946 }
 0x427   : > { %952 = vst.msk [vmem:[#allocation2 + $0x1c] sm:$0xf] %vm725_vm2, %v947_v5  ;;  %v722_v40 = vpop.permute.xlu1 %721 }
 0x428   : > { %727 = vst.msk [vmem:[#allocation2 + $0x4] sm:$0xf] %vm725_vm2, %v722_v40 }
 0x42a   : > { %v1040_v36 = vpop.permute.xlu0 %1039 }
 0x42b   : > { %v1042_v2 = vpop.permute.xlu1 %1041  ;;  %v1045_v21 = vsel %vm502_vm1, %v1040_v36, 0.0  ;;  %v7799_v36 = vld [vmem:[#allocation26_spill] sm:$0xff] }
 0x42c   : > { %1046 = vadd.xlane.f32.xlu1 %v1045_v21  ;;  %v1048_v38 = vsel %vm502_vm1, %v1042_v2, 0.0  ;;  %v7800_v2 = vld [vmem:[#allocation21_spill] sm:$0xff] }
 0x42d   : > { %1049 = vadd.xlane.f32.xlu0 %v1048_v38 }
 0x43d   : > { %1055 = vrot.lane.b32.xlu1 %v5709_v29, %s5362_s11 }
 0x443   : > { %1053 = vrot.lane.b32.xlu0 %v5704_v27, %s5362_s11 }
 0x4b5   : > { %v6143_v14 = vpop.xlane.xlu1 %1046 }
 0x4b6   : > { %v6145_v37 = vpop.xlane.xlu0 %1049 }
 0x4b9   : > { %v1056_v23 = vpop.permute.xlu1 %1055 }
 0x4ba   : > { %v1054_v26 = vpop.permute.xlu0 %1053  ;;  %v1062_v60 = vsel %vm502_vm1, %v1056_v23, 0.0 }
 0x4bb   : > { %1063 = vadd.xlane.f32.xlu0 %v1062_v60  ;;  %v1059_v24 = vsel %vm502_vm1, %v1054_v26, 0.0 }
 0x4bc   : > { %1060 = vadd.xlane.f32.xlu1 %v1059_v24 }
 0x4cd   : > { %1069 = vrot.lane.b32.xlu1 %v5680_v17, %s5362_s11 }
 0x4d1   : > { %1067 = vrot.lane.b32.xlu0 %v5646_v4, %s5362_s11 }
 0x544   : > { %v6153_v13 = vpop.xlane.xlu0 %1063 }
 0x545   : > { %v6155_v6 = vpop.xlane.xlu1 %1060 }
 0x548   : > { %v1068_v18 = vpop.permute.xlu0 %1067 }
 0x549   : > { %v1070_v15 = vpop.permute.xlu1 %1069  ;;  %v1073_v19 = vsel %vm502_vm1, %v1068_v18, 0.0  ;;  %v7801_v18 = vld [vmem:[#allocation48_spill] sm:$0xff] }
 0x54a   : > { %1074 = vadd.xlane.f32.xlu1 %v1073_v19  ;;  %v1076_v30 = vsel %vm502_vm1, %v1070_v15, 0.0  ;;  %v7802_v15 = vld [vmem:[#allocation47_spill] sm:$0xff] }
 0x54b   : > { %1077 = vadd.xlane.f32.xlu0 %v1076_v30 }
 0x55b   : > { %1083 = vrot.lane.b32.xlu1 %v7791_v22, %s5362_s11 }
 0x561   : > { %1081 = vrot.lane.b32.xlu0 %v7792_v51, %s5362_s11 }
 0x5d3   : > { %v6163_v39 = vpop.xlane.xlu1 %1074 }
 0x5d4   : > { %v6165_v3 = vpop.xlane.xlu0 %1077 }
 0x5d7   : > { %v1084_v53 = vpop.permute.xlu1 %1083 }
 0x5d8   : > { %v1082_v0 = vpop.permute.xlu0 %1081  ;;  %v1090_v32 = vsel %vm502_vm1, %v1084_v53, 0.0 }
 0x5d9   : > { %1091 = vadd.xlane.f32.xlu0 %v1090_v32  ;;  %v1087_v25 = vsel %vm502_vm1, %v1082_v0, 0.0 }
 0x5da   : > { %1088 = vadd.xlane.f32.xlu1 %v1087_v25 }
 0x5eb   : > { %1097 = vrot.lane.b32.xlu1 %v7793_v12, %s5362_s11 }
 0x5ef   : > { %1095 = vrot.lane.b32.xlu0 %v7794_v10, %s5362_s11 }
 0x662   : > { %v6173_v61 = vpop.xlane.xlu0 %1091 }
 0x663   : > { %v6175_v33 = vpop.xlane.xlu1 %1088 }
 0x666   : > { %v1096_v63 = vpop.permute.xlu0 %1095 }
 0x667   : > { %v1098_v57 = vpop.permute.xlu1 %1097  ;;  %v1101_v34 = vsel %vm502_vm1, %v1096_v63, 0.0  ;;  %v7803_v63 = vld [vmem:[#allocation40_spill] sm:$0xff] }
 0x668   : > { %1102 = vadd.xlane.f32.xlu1 %v1101_v34  ;;  %v1104_v52 = vsel %vm502_vm1, %v1098_v57, 0.0  ;;  %v7804_v57 = vld [vmem:[#allocation39_spill] sm:$0xff]  ;;  %v7805_v34 = vld [vmem:[#allocation49_spill] sm:$0xff] }
 0x669   : > { %1105 = vadd.xlane.f32.xlu0 %v1104_v52  ;;  %v7806_v52 = vld [vmem:[#allocation51_spill] sm:$0xff] }
 0x679   : > { %1111 = vrot.lane.b32.xlu1 %v7795_v58, %s5362_s11 }
 0x67f   : > { %1109 = vrot.lane.b32.xlu0 %v7796_v59, %s5362_s11 }
 0x6f1   : > { %v6183_v11 = vpop.xlane.xlu1 %1102 }
 0x6f2   : > { %v6185_v35 = vpop.xlane.xlu0 %1105 }
 0x6f5   : > { %v1112_v28 = vpop.permute.xlu1 %1111 }
 0x6f6   : > { %v1110_v54 = vpop.permute.xlu0 %1109  ;;  %v1118_v62 = vsel %vm502_vm1, %v1112_v28, 0.0  ;;  %v1177_v28 = vmax.f32 %v7806_v52, %v7805_v34 }
 0x6f7   : > { %1119 = vadd.xlane.f32.xlu0 %v1118_v62  ;;  %v1115_v31 = vsel %vm502_vm1, %v1110_v54, 0.0  ;;  %v7807_v54 = vld [vmem:[#allocation50_spill] sm:$0xff]  ;;  %v7808_v62 = vld [vmem:[#allocation52_spill] sm:$0xff] }
 0x6f8   : > { %1116 = vadd.xlane.f32.xlu1 %v1115_v31  ;;  %v1178_v31 = vmax.f32 %v7808_v62, %v7807_v54 }
 0x709   : > { %1125 = vrot.lane.b32.xlu1 %v7797_v50, %s5362_s11 }
 0x70d   : > { %1123 = vrot.lane.b32.xlu0 %v7798_v56, %s5362_s11 }
 0x780   : > { %v6193_v7 = vpop.xlane.xlu0 %1119 }
 0x781   : > { %v6195_v41 = vpop.xlane.xlu1 %1116 }
 0x784   : > { %v1124_v1 = vpop.permute.xlu0 %1123 }
 0x785   : > { %v1126_v9 = vpop.permute.xlu1 %1125  ;;  %v1129_v5 = vsel %vm502_vm1, %v1124_v1, 0.0  ;;  %v7809_v1 = vld [vmem:[#allocation57_spill] sm:$0xff] }
 0x786   : > { %1130 = vadd.xlane.f32.xlu1 %v1129_v5  ;;  %v1132_v40 = vsel %vm502_vm1, %v1126_v9, 0.0  ;;  %v1179_v9 = vmax.f32 %v1177_v28, %v7809_v1  ;;  %v7810_v5 = vld [vmem:[#allocation58_spill] sm:$0xff] }
 0x787   : > { %1133 = vadd.xlane.f32.xlu0 %v1132_v40  ;;  %v1180_v40 = vmax.f32 %v1178_v31, %v7810_v5 }
 0x797   : > { %1139 = vrot.lane.b32.xlu1 %v7799_v36, %s5362_s11 }
 0x79d   : > { %1137 = vrot.lane.b32.xlu0 %v7800_v2, %s5362_s11 }
 0x80f   : > { %v6203_v21 = vpop.xlane.xlu1 %1130 }
 0x810   : > { %v6205_v38 = vpop.xlane.xlu0 %1133 }
 0x813   : > { %v1140_v23 = vpop.permute.xlu1 %1139 }
 0x814   : > { %v1138_v26 = vpop.permute.xlu0 %1137  ;;  %v1146_v60 = vsel %vm502_vm1, %v1140_v23, 0.0  ;;  %v7811_v23 = vld [vmem:[#allocation55_spill] sm:$0xff] }
 0x815   : > { %1147 = vadd.xlane.f32.xlu0 %v1146_v60  ;;  %v1143_v24 = vsel %vm502_vm1, %v1138_v26, 0.0  ;;  %v1181_v26 = vmax.f32 %v1179_v9, %v7811_v23  ;;  %v7812_v60 = vld [vmem:[#allocation56_spill] sm:$0xff] }
 0x816   : > { %1144 = vadd.xlane.f32.xlu1 %v1143_v24  ;;  %v1182_v24 = vmax.f32 %v1180_v40, %v7812_v60 }
 0x817   : > { %v1195_v31 = vsub.f32 %v7809_v1, %v1181_v26 }
 0x818   : > { %v1190_v9 = vsub.f32 %v7807_v54, %v1182_v24 }
 0x819   : > { %v1197_v50 = vmul.f32 1.442695, %v1195_v31 }
 0x81a   : > { %v1193_v54 = vmul.f32 1.442695, %v1190_v9 }
 0x827   : > { %1153 = vrot.lane.b32.xlu1 %v7801_v18, %s5362_s11  ;;  %v7814_v18 = vld [vmem:[#allocation54_spill] sm:$0xff] }
 0x828   : > { %v1253_v28 = vmax.f32 %v7814_v18, %v6125_v8 }
 0x82a   : > { %v1255_v36 = vmax.f32 %v1253_v28, %v6145_v37  ;;  %v1327_v28 = vmax.f32 %v6165_v3, %v6173_v61 }
 0x82b   : > { %1151 = vrot.lane.b32.xlu0 %v7802_v15, %s5362_s11 }
 0x82c   : > { %v1257_v56 = vmax.f32 %v1255_v36, %v6153_v13 }
 0x89e   : > { %v6213_v19 = vpop.xlane.xlu0 %1147 }
 0x89f   : > { %v6215_v30 = vpop.xlane.xlu1 %1144 }
 0x8a2   : > { %v1152_v53 = vpop.permute.xlu0 %1151 }
 0x8a3   : > { %v1154_v0 = vpop.permute.xlu1 %1153  ;;  %v1157_v32 = vsel %vm502_vm1, %v1152_v53, 0.0  ;;  %v7813_v53 = vld [vmem:[#allocation53_spill] sm:$0xff] }
 0x8a4   : > { %1158 = vadd.xlane.f32.xlu1 %v1157_v32  ;;  %v1160_v25 = vsel %vm502_vm1, %v1154_v0, 0.0  ;;  %v1252_v0 = vmax.f32 %v7813_v53, %v6127_v55  ;;  %v1183_v32 = vsub.f32 %v7806_v52, %v1181_v26  ;;  %v1326_v52 = vmax.f32 %v6163_v39, %v6175_v33 }
 0x8a5   : > { %1161 = vadd.xlane.f32.xlu0 %v1160_v25  ;;  %v1189_v25 = vsub.f32 %v7805_v34, %v1181_v26 }
 0x8a6   : > { %v1185_v15 = vmul.f32 1.442695, %v1183_v32  ;;  %v1328_v1 = vmax.f32 %v1326_v52, %v6183_v11 }
 0x8a7   : > { %v1191_v34 = vmul.f32 1.442695, %v1189_v25 }
 0x8a8   : > { %4844 = vpow2.f32 %v1185_v15  ;;  %v1330_v25 = vmax.f32 %v1328_v1, %v6195_v41  ;;  %v1265_v15 = vsub.f32 %v6125_v8, %v1257_v56 }
 0x8a9   : > { %4846 = vpow2.f32 %v1191_v34  ;;  %v1271_v34 = vsub.f32 %v6145_v37, %v1257_v56 }
 0x8aa   : > { %v1332_v9 = vsub.f32 %v6163_v39, %v1330_v25 }
 0x8ab   : > { %v1274_v1 = vmul.f32 1.442695, %v1271_v34 }
 0x8b5   : > { %1167 = vrot.lane.b32.xlu1 %v7803_v63, %s5362_s11  ;;  %v1254_v63 = vmax.f32 %v1252_v0, %v6143_v14  ;;  %v1201_v0 = vsub.f32 %v7811_v23, %v1181_v26  ;;  %v1259_v23 = vsub.f32 %v7814_v18, %v1257_v56  ;;  %v1329_v26 = vmax.f32 %v1327_v28, %v6185_v35  ;;  %v6267_v37 = vpop.eup %4844 }
 0x8b7   : > { %v1256_v40 = vmax.f32 %v1254_v63, %v6155_v6  ;;  %v1331_v31 = vmax.f32 %v1329_v26, %v6193_v7 }
 0x8b9   : > { %v1258_v63 = vsub.f32 %v7813_v53, %v1256_v40  ;;  %v1264_v32 = vsub.f32 %v6127_v55, %v1256_v40  ;;  %v1270_v18 = vsub.f32 %v6143_v14, %v1256_v40  ;;  %v1333_v8 = vsub.f32 %v6165_v3, %v1331_v31 }
 0x8ba   : > { %v1344_v14 = vsub.f32 %v6183_v11, %v1330_v25  ;;  %v1345_v28 = vsub.f32 %v6185_v35, %v1331_v31  ;;  %v1350_v11 = vsub.f32 %v6195_v41, %v1330_v25  ;;  %v1351_v26 = vsub.f32 %v6193_v7, %v1331_v31 }
 0x8bb   : > { %1165 = vrot.lane.b32.xlu0 %v7804_v57, %s5362_s11  ;;  %v1184_v57 = vsub.f32 %v7808_v62, %v1182_v24  ;;  %v1196_v62 = vsub.f32 %v7810_v5, %v1182_v24  ;;  %v1202_v5 = vsub.f32 %v7812_v60, %v1182_v24  ;;  %v1260_v53 = vmul.f32 1.442695, %v1258_v63 }
 0x8bc   : > { %v1266_v55 = vmul.f32 1.442695, %v1264_v32  ;;  %v1338_v60 = vsub.f32 %v6175_v33, %v1330_v25  ;;  %v1268_v24 = vmul.f32 1.442695, %v1265_v15  ;;  %v1276_v33 = vsub.f32 %v6155_v6, %v1256_v40  ;;  %v6270_v32 = vpop.eup %4846 }
 0x8bd   : > { %v1187_v2 = vmul.f32 1.442695, %v1184_v57  ;;  %v1203_v57 = vmul.f32 1.442695, %v1201_v0  ;;  %v1199_v36 = vmul.f32 1.442695, %v1196_v62  ;;  %v1339_v0 = vsub.f32 %v6173_v61, %v1331_v31 }
 0x8be   : > { %v1205_v52 = vmul.f32 1.442695, %v1202_v5  ;;  %v1340_v39 = vmul.f32 1.442695, %v1338_v60  ;;  %v1272_v62 = vmul.f32 1.442695, %v1270_v18  ;;  %v1277_v63 = vsub.f32 %v6153_v13, %v1257_v56 }
 0x8bf   : > { %4848 = vpow2.f32 %v1187_v2  ;;  %v1262_v2 = vmul.f32 1.442695, %v1259_v23  ;;  %v1342_v3 = vmul.f32 1.442695, %v1339_v0  ;;  %v1278_v61 = vmul.f32 1.442695, %v1276_v33 }
 0x8c0   : > { %4850 = vpow2.f32 %v1193_v54  ;;  %v1336_v54 = vmul.f32 1.442695, %v1333_v8  ;;  %v1346_v6 = vmul.f32 1.442695, %v1344_v14  ;;  %v1348_v56 = vmul.f32 1.442695, %v1345_v28 }
 0x8c1   : > { %4852 = vpow2.f32 %v1197_v50  ;;  %v1334_v50 = vmul.f32 1.442695, %v1332_v9  ;;  %v1352_v15 = vmul.f32 1.442695, %v1350_v11  ;;  %v1207_v9 = vadd.f32 %v6270_v32, %v6267_v37 }
 0x8c2   : > { %4854 = vpow2.f32 %v1203_v57  ;;  %v1354_v60 = vmul.f32 1.442695, %v1351_v26 }
 0x8c3   : > { %4856 = vpow2.f32 %v1199_v36  ;;  %v1280_v36 = vmul.f32 1.442695, %v1277_v63 }
 0x8c4   : > { %4858 = vpow2.f32 %v1260_v53 }
 0x8c5   : > { %4860 = vpow2.f32 %v1266_v55 }
 0x8c6   : > { %4862 = vpow2.f32 %v1205_v52 }
 0x8c7   : > { %4864 = vpow2.f32 %v1262_v2 }
 0x8c8   : > { %4866 = vpow2.f32 %v1268_v24 }
 0x8c9   : > { %4868 = vpow2.f32 %v1334_v50 }
 0x8ca   : > { %4870 = vpow2.f32 %v1340_v39 }
 0x8cb   : > { %4872 = vpow2.f32 %v1272_v62 }
 0x8cc   : > { %v6273_v57 = vpop.eup %4848  ;;  %4874 = vpow2.f32 %v1274_v1 }
 0x8cd   : > { %v4851_v40 = vpop.eup %4850  ;;  %4876 = vpow2.f32 %v1336_v54 }
 0x8ce   : > { %v6276_v5 = vpop.eup %4852  ;;  %4878 = vpow2.f32 %v1342_v3  ;;  %v1208_v35 = vadd.f32 %v4851_v40, %v6273_v57 }
 0x8cf   : > { %v6278_v13 = vpop.eup %4854  ;;  %4880 = vpow2.f32 %v1278_v61  ;;  %v1209_v34 = vadd.f32 %v6276_v5, %v1207_v9 }
 0x8d0   : > { %v6280_v23 = vpop.eup %4856  ;;  %4882 = vpow2.f32 %v1346_v6 }
 0x8d1   : > { %v4859_v53 = vpop.eup %4858  ;;  %4884 = vpow2.f32 %v1280_v36  ;;  %v1210_v52 = vadd.f32 %v6280_v23, %v1208_v35  ;;  %v1211_v54 = vadd.f32 %v6278_v13, %v1209_v34 }
 0x8d2   : > { %v4861_v41 = vpop.eup %4860  ;;  %4886 = vpow2.f32 %v1348_v56 }
 0x8d3   : > { %v6284_v25 = vpop.eup %4862  ;;  %4888 = vpow2.f32 %v1352_v15  ;;  %v1282_v7 = vadd.f32 %v4861_v41, %v4859_v53 }
 0x8d4   : > { %v6286_v55 = vpop.eup %4864  ;;  %v1212_v8 = vadd.f32 %v6284_v25, %v1210_v52  ;;  %4890 = vpow2.f32 %v1354_v60 }
 0x8d5   : > { %v6291_v2 = vpop.eup %4866 }
 0x8d6   : > { %v4869_v31 = vpop.eup %4868  ;;  %v1283_v0 = vadd.f32 %v6291_v2, %v6286_v55  ;;  %4892 = vrcp.f32 %v1212_v8 }
 0x8d7   : > { %v4871_v18 = vpop.eup %4870  ;;  %4894 = vrcp.f32 %v1211_v54 }
 0x8d8   : > { %v6293_v24 = vpop.eup %4872  ;;  %v1356_v33 = vadd.f32 %v4871_v18, %v4869_v31 }
 0x8d9   : > { %v6297_v50 = vpop.eup %4874  ;;  %v1284_v39 = vadd.f32 %v6293_v24, %v1282_v7 }
 0x8da   : > { %v6302_v62 = vpop.eup %4876  ;;  %v1285_v3 = vadd.f32 %v6297_v50, %v1283_v0 }
 0x8db   : > { %v6304_v1 = vpop.eup %4878 }
 0x8dc   : > { %v6306_v14 = vpop.eup %4880  ;;  %v1357_v28 = vadd.f32 %v6304_v1, %v6302_v62 }
 0x8dd   : > { %v6309_v63 = vpop.eup %4882  ;;  %v1286_v61 = vadd.f32 %v6306_v14, %v1284_v39 }
 0x8de   : > { %v1358_v6 = vadd.f32 %v6309_v63, %v1356_v33  ;;  %v6316_v11 = vpop.eup %4884 }
 0x8df   : > { %v6318_v36 = vpop.eup %4886  ;;  %v1287_v35 = vadd.f32 %v6316_v11, %v1285_v3  ;;  %4896 = vrcp.f32 %v1286_v61 }
 0x8e0   : > { %v6320_v56 = vpop.eup %4888  ;;  %v1359_v26 = vadd.f32 %v6318_v36, %v1357_v28 }
 0x8e1   : > { %v1360_v15 = vadd.f32 %v6320_v56, %v1358_v6  ;;  %v6325_v9 = vpop.eup %4890  ;;  %4898 = vrcp.f32 %v1287_v35 }
 0x8e2   : > { %v1361_v52 = vadd.f32 %v6325_v9, %v1359_v26 }
 0x8e3   : > { %4900 = vrcp.f32 %v1360_v15  ;;  %v4893_v60 = vpop.eup %4892 }
 0x8e4   : > { %4902 = vrcp.f32 %v1361_v52  ;;  %v1216_v34 = vmul.f32 %v4893_v60, %v6273_v57  ;;  %v1220_v8 = vmul.f32 %v4893_v60, %v4851_v40  ;;  %v4895_v0 = vpop.eup %4894  ;;  %v1226_v58 = vmul.f32 %v4893_v60, %v6280_v23 }
 0x8e5   : > { %v1215_v28 = vmul.f32 %v4895_v0, %v6267_v37  ;;  %v1219_v6 = vmul.f32 %v4895_v0, %v6270_v32  ;;  %v1232_v23 = vmul.f32 %v4893_v60, %v6284_v25 }
 0x8e6   : > { %v1218_v3 = vmul.f32 %v1216_v34, %v5579_v45  ;;  %v1222_v61 = vmul.f32 %v5573_v44, %v1220_v8 }
 0x8e7   : > { %v1217_v8 = vmul.f32 %v1215_v28, %v5571_v43  ;;  %v1221_v37 = vmul.f32 %v5567_v42, %v1219_v6  ;;  %v1234_v25 = vmul.f32 %v5587_v48, %v1232_v23 }
 0x8e8   : > { %v1224_v34 = vadd.f32 %v1222_v61, %v1218_v3  ;;  %v1225_v3 = vmul.f32 %v4895_v0, %v6276_v5 }
 0x8e9   : > { %v1223_v28 = vadd.f32 %v1221_v37, %v1217_v8 }
 0x8ea   : > { %v1227_v5 = vmul.f32 %v1225_v3, %v5585_v47 }
 0x8ec   : > { %v4897_v33 = vpop.eup %4896 }
 0x8ed   : > { %v1290_v15 = vmul.f32 %v4897_v33, %v4859_v53  ;;  %v1294_v52 = vmul.f32 %v4897_v33, %v4861_v41  ;;  %v1300_v61 = vmul.f32 %v4897_v33, %v6293_v24  ;;  %v1231_v24 = vmul.f32 %v4895_v0, %v6278_v13 }
 0x8ee   : > { %v4899_v57 = vpop.eup %4898 }
 0x8ef   : > { %v1292_v32 = vmul.f32 %v1290_v15, %v5571_v43  ;;  %v1296_v10 = vmul.f32 %v5567_v42, %v1294_v52  ;;  %v1291_v53 = vmul.f32 %v4899_v57, %v6286_v55  ;;  %v1295_v41 = vmul.f32 %v4899_v57, %v6291_v2 }
 0x8f0   : > { %v4901_v59 = vpop.eup %4900  ;;  %v1302_v60 = vmul.f32 %v1300_v61, %v5585_v47 }
 0x8f1   : > { %v1298_v15 = vadd.f32 %v1296_v10, %v1292_v32  ;;  %v1293_v52 = vmul.f32 %v1291_v53, %v5579_v45  ;;  %v1297_v55 = vmul.f32 %v5573_v44, %v1295_v41  ;;  %v1301_v10 = vmul.f32 %v4899_v57, %v6297_v50 }
 0x8f2   : > { %v1374_v8 = vmul.f32 %v4901_v59, %v6309_v63  ;;  %v1229_v32 = vadd.f32 %v1227_v5, %v1223_v28  ;;  %v1307_v50 = vmul.f32 %v4899_v57, %v6316_v11  ;;  %v1380_v63 = vmul.f32 %v4901_v59, %v6320_v56 }
 0x8f3   : > { %v1299_v53 = vadd.f32 %v1297_v55, %v1293_v52  ;;  %v1303_v13 = vmul.f32 %v1301_v10, %v5593_v49 }
 0x8f4   : > { %v1309_v11 = vmul.f32 %v5587_v48, %v1307_v50 }
 0x8f5   : > { %v1305_v28 = vadd.f32 %v1303_v13, %v1299_v53 }
 0x92d   : > { %v6328_v7 = vpop.xlane.xlu1 %1158 }
 0x92e   : > { %v6331_v39 = vpop.xlane.xlu0 %1161 }
 0x931   : > { %v1168_v54 = vpop.permute.xlu1 %1167 }
 0x932   : > { %v1166_v35 = vpop.permute.xlu0 %1165  ;;  %v1174_v26 = vsel %vm502_vm1, %v1168_v54, 0.0  ;;  %v1364_v54 = vmul.f32 %v4901_v59, %v4869_v31 }
 0x933   : > { %1175 = vadd.xlane.f32.xlu0 %v1174_v26  ;;  %v1171_v40 = vsel %vm502_vm1, %v1166_v35, 0.0  ;;  %v1368_v26 = vmul.f32 %v4901_v59, %v4871_v18  ;;  %v4903_v35 = vpop.eup %4902 }
 0x934   : > { %1172 = vadd.xlane.f32.xlu1 %v1171_v40  ;;  %v1228_v40 = vmul.f32 %v1226_v58, %v5593_v49  ;;  %v1366_v2 = vmul.f32 %v1364_v54, %v5571_v43  ;;  %v1365_v18 = vmul.f32 %v4903_v35, %v6302_v62  ;;  %v1369_v58 = vmul.f32 %v4903_v35, %v6304_v1 }
 0x935   : > { %v1370_v31 = vmul.f32 %v5567_v42, %v1368_v26  ;;  %v1304_v62 = vadd.f32 %v1302_v60, %v1298_v15  ;;  %v1233_v26 = vmul.f32 %v5581_v46, %v1231_v24  ;;  %v1382_v15 = vmul.f32 %v5581_v46, %v1380_v63 }
 0x936   : > { %v1230_v6 = vadd.f32 %v1228_v40, %v1224_v34  ;;  %v1306_v34 = vmul.f32 %v4897_v33, %v6306_v14  ;;  %v1367_v1 = vmul.f32 %v1365_v18, %v5579_v45  ;;  %v1371_v54 = vmul.f32 %v5573_v44, %v1369_v58 }
 0x937   : > { %v1372_v41 = vadd.f32 %v1370_v31, %v1366_v2  ;;  %v1376_v14 = vmul.f32 %v1374_v8, %v5585_v47  ;;  %v1375_v33 = vmul.f32 %v4903_v35, %v6318_v36  ;;  %v1235_v23 = vadd.f32 %v1233_v26, %v1229_v32 }
 0x938   : > { %v1236_v37 = vadd.f32 %v1234_v25, %v1230_v6  ;;  %v1308_v0 = vmul.f32 %v5581_v46, %v1306_v34  ;;  %v1373_v6 = vadd.f32 %v1371_v54, %v1367_v1  ;;  %v1381_v52 = vmul.f32 %v4903_v35, %v6325_v9 }
 0x939   : > { %v1378_v61 = vadd.f32 %v1376_v14, %v1372_v41  ;;  %v1377_v57 = vmul.f32 %v1375_v33, %v5593_v49  ;;  %v4403_v55 = vpack.c.bf16 %v1235_v23, %v1235_v23  ;;  %v1311_v36 = vadd.f32 %v1309_v11, %v1305_v28 }
 0x93a   : > { %v4404_v40 = vpack.c.bf16 %v1236_v37, %v1236_v37  ;;  %v1310_v3 = vadd.f32 %v1308_v0, %v1304_v62  ;;  %v1383_v31 = vmul.f32 %v5587_v48, %v1381_v52  ;;  %v1401_v9 = vmax.f32 %v6205_v38, %v6213_v19 }
 0x93b   : > { %v1384_v56 = vadd.f32 %v1382_v15, %v1378_v61  ;;  %v1379_v2 = vadd.f32 %v1377_v57, %v1373_v6  ;;  %v4406_v58 = vpack.c.bf16 %v1311_v36, %v1311_v36  ;;  %v1400_v35 = vmax.f32 %v6203_v21, %v6215_v30 }
 0x93c   : > { %v4405_v59 = vpack.c.bf16 %v1310_v3, %v1310_v3  ;;  %v1403_v24 = vmax.f32 %v1401_v9, %v6331_v39 }
 0x93d   : > { %v4407_v18 = vpack.c.bf16 %v1384_v56, %v1384_v56  ;;  %v1385_v25 = vadd.f32 %v1383_v31, %v1379_v2  ;;  %v1402_v10 = vmax.f32 %v1400_v35, %v6328_v7 }
 0x93f   : > { %v4408_v5 = vpack.c.bf16 %v1385_v25, %v1385_v25 }
 0x945   : > { %1245 = vrot.lane.b32.xlu1 %v4404_v40, %s5363_s12 }
 0x949   : > { %1318 = vrot.lane.b32.xlu1 %v4405_v59, %s5363_s12  ;;  %1243 = vrot.lane.b32.xlu0 %v4403_v55, %s5363_s12 }
 0x94d   : > { %1392 = vrot.lane.b32.xlu1 %v4407_v18, %s5363_s12  ;;  %1320 = vrot.lane.b32.xlu0 %v4406_v58, %s5363_s12 }
 0x951   : > { %1394 = vrot.lane.b32.xlu0 %v4408_v5, %s5363_s12 }
 0x9bc   : > { %v1176_v60 = vpop.xlane.xlu0 %1175 }
 0x9bd   : > { %v1405_v34 = vmax.f32 %v1403_v24, %v1176_v60  ;;  %v1173_v8 = vpop.xlane.xlu1 %1172 }
 0x9be   : > { %v1404_v37 = vmax.f32 %v1402_v10, %v1173_v8 }
 0x9bf   : > { %v1407_v32 = vsub.f32 %v6205_v38, %v1405_v34  ;;  %v1413_v53 = vsub.f32 %v6213_v19, %v1405_v34  ;;  %v1419_v62 = vsub.f32 %v6331_v39, %v1405_v34  ;;  %v1425_v41 = vsub.f32 %v1176_v60, %v1405_v34 }
 0x9c0   : > { %v1406_v1 = vsub.f32 %v6203_v21, %v1404_v37  ;;  %v1412_v54 = vsub.f32 %v6215_v30, %v1404_v37  ;;  %v1244_v26 = vpop.permute.xlu0 %1243  ;;  %v1418_v33 = vsub.f32 %v6328_v7, %v1404_v37  ;;  %v1424_v39 = vsub.f32 %v1173_v8, %v1404_v37 }
 0x9c1   : > { %v1410_v13 = vmul.f32 1.442695, %v1407_v32  ;;  %v1416_v50 = vmul.f32 1.442695, %v1413_v53  ;;  %v1422_v0 = vmul.f32 1.442695, %v1419_v62  ;;  %v1246_v14 = vpop.permute.xlu1 %1245 }
 0x9c2   : > { %1250 = vst.msk [vmem:[#allocation2] sm:$0xf] %vm1249_vm3, %v1244_v26  ;;  %v1428_v63 = vmul.f32 1.442695, %v1425_v41  ;;  %1251 = vst.msk [vmem:[#allocation2 + $0x4] sm:$0xf] %vm1249_vm3, %v1246_v14 }
 0x9c3   : > { %4904 = vpow2.f32 %v1410_v13  ;;  %v1408_v38 = vmul.f32 1.442695, %v1406_v1  ;;  %v1414_v19 = vmul.f32 1.442695, %v1412_v54  ;;  %v1420_v40 = vmul.f32 1.442695, %v1418_v33 }
 0x9c4   : > { %4906 = vpow2.f32 %v1416_v50  ;;  %v1321_v21 = vpop.permute.xlu0 %1320  ;;  %v1426_v23 = vmul.f32 1.442695, %v1424_v39  ;;  %v7815_v39 = vld [vmem:[#allocation30_spill] sm:$0xff] }
 0x9c5   : > { %4908 = vpow2.f32 %v1422_v0  ;;  %1325 = vst.msk [vmem:[#allocation2 + $0xc] sm:$0xf] %vm1249_vm3, %v1321_v21  ;;  %v1319_v30 = vpop.permute.xlu1 %1318  ;;  %v7816_v21 = vld [vmem:[#allocation18_spill] sm:$0xff] }
 0x9c6   : > { %4910 = vpow2.f32 %v1428_v63  ;;  %1324 = vst.msk [vmem:[#allocation2 + $0x8] sm:$0xf] %vm1249_vm3, %v1319_v30 }
 0x9c7   : > { %4912 = vpow2.f32 %v1408_v38 }
 0x9c8   : > { %4914 = vpow2.f32 %v1414_v19  ;;  %v1395_v7 = vpop.permute.xlu0 %1394 }
 0x9c9   : > { %1399 = vst.msk [vmem:[#allocation2 + $0x14] sm:$0xf] %vm1249_vm3, %v1395_v7  ;;  %v1393_v3 = vpop.permute.xlu1 %1392  ;;  %4916 = vpow2.f32 %v1420_v40 }
 0x9ca   : > { %1398 = vst.msk [vmem:[#allocation2 + $0x10] sm:$0xf] %vm1249_vm3, %v1393_v3  ;;  %4918 = vpow2.f32 %v1426_v23 }
 0x9d0   : > { %v4905_v61 = vpop.eup %4904 }
 0x9d1   : > { %v4907_v28 = vpop.eup %4906 }
 0x9d2   : > { %v4909_v6 = vpop.eup %4908  ;;  %v1431_v15 = vadd.f32 %v4907_v28, %v4905_v61 }
 0x9d3   : > { %v4911_v11 = vpop.eup %4910 }
 0x9d4   : > { %v4913_v57 = vpop.eup %4912  ;;  %v1433_v52 = vadd.f32 %v4909_v6, %v1431_v15 }
 0x9d5   : > { %v4915_v55 = vpop.eup %4914 }
 0x9d6   : > { %v1435_v59 = vadd.f32 %v4911_v11, %v1433_v52  ;;  %v1430_v56 = vadd.f32 %v4915_v55, %v4913_v57  ;;  %v4917_v36 = vpop.eup %4916 }
 0x9d7   : > { %v4919_v31 = vpop.eup %4918 }
 0x9d8   : > { %4920 = vrcp.f32 %v1435_v59  ;;  %v1432_v2 = vadd.f32 %v4917_v36, %v1430_v56  ;;  %v7819_v56 = vld [vmem:[#allocation41_spill] sm:$0xff] }
 0x9da   : > { %v1434_v18 = vadd.f32 %v4919_v31, %v1432_v2 }
 0x9dc   : > { %4922 = vrcp.f32 %v1434_v18 }
 0x9e5   : > { %v4921_v58 = vpop.eup %4920 }
 0x9e6   : > { %v1439_v25 = vmul.f32 %v4921_v58, %v4905_v61  ;;  %v1443_v5 = vmul.f32 %v4921_v58, %v4907_v28  ;;  %v1449_v9 = vmul.f32 %v4921_v58, %v4909_v6  ;;  %v1455_v35 = vmul.f32 %v4921_v58, %v4911_v11  ;;  %v7817_v28 = vld [vmem:[#allocation22_spill] sm:$0xff]  ;;  %v7818_v6 = vld [vmem:[#allocation17_spill] sm:$0xff] }
 0x9e8   : > { %v1441_v24 = vmul.f32 %v1439_v25, %v5579_v45  ;;  %v1445_v10 = vmul.f32 %v5573_v44, %v1443_v5  ;;  %v1451_v34 = vmul.f32 %v1449_v9, %v5593_v49  ;;  %v1457_v62 = vmul.f32 %v5587_v48, %v1455_v35  ;;  %v7821_v9 = vld [vmem:[#allocation33_spill] sm:$0xff]  ;;  %v7822_v35 = vld [vmem:[#allocation34_spill] sm:$0xff] }
 0x9e9   : > { %v4923_v60 = vpop.eup %4922 }
 0x9ea   : > { %v1447_v8 = vadd.f32 %v1445_v10, %v1441_v24  ;;  %v1438_v37 = vmul.f32 %v4923_v60, %v4913_v57  ;;  %v1442_v32 = vmul.f32 %v4923_v60, %v4915_v55  ;;  %v1448_v53 = vmul.f32 %v4923_v60, %v4917_v36  ;;  %v7820_v36 = vld [vmem:[#allocation42_spill] sm:$0xff] }
 0x9eb   : > { %v1454_v26 = vmul.f32 %v4923_v60, %v4919_v31 }
 0x9ec   : > { %v1453_v41 = vadd.f32 %v1451_v34, %v1447_v8  ;;  %v1440_v1 = vmul.f32 %v1438_v37, %v5571_v43  ;;  %v1444_v54 = vmul.f32 %v5567_v42, %v1442_v32  ;;  %v1450_v0 = vmul.f32 %v1448_v53, %v5585_v47  ;;  %v7823_v32 = vld [vmem:[#allocation29_spill] sm:$0xff]  ;;  %v7824_v53 = vld [vmem:[#allocation23_spill] sm:$0xff] }
 0x9ed   : > { %v1456_v33 = vmul.f32 %v5581_v46, %v1454_v26 }
 0x9ee   : > { %v1459_v13 = vadd.f32 %v1457_v62, %v1453_v41  ;;  %v1446_v50 = vadd.f32 %v1444_v54, %v1440_v1 }
 0x9f0   : > { %v4410_v14 = vpack.c.bf16 %v1459_v13, %v1459_v13  ;;  %v1452_v63 = vadd.f32 %v1450_v0, %v1446_v50  ;;  %v7825_v50 = vld [vmem:[#allocation28_spill] sm:$0xff]  ;;  %v7826_v0 = vld [vmem:[#allocation19_spill] sm:$0xff] }
 0x9f2   : > { %1468 = vrot.lane.b32.xlu0 %v4410_v14, %s5363_s12  ;;  %v1458_v38 = vadd.f32 %v1456_v33, %v1452_v63 }
 0x9f4   : > { %v4409_v19 = vpack.c.bf16 %v1458_v38, %v1458_v38 }
 0x9f6   : > { %1466 = vrot.lane.b32.xlu1 %v4409_v19, %s5363_s12  ;;  %1476 = vrot.lane.b32.xlu0 %v7815_v39, %s5364_s13 }
 0x9fa   : > { %1474 = vrot.lane.b32.xlu1 %v7816_v21, %s5364_s13 }
 0xa64   : > { %v1469_v30 = vpop.permute.xlu0 %1468 }
 0xa65   : > { %1473 = vst.msk [vmem:[#allocation2 + $0x1c] sm:$0xf] %vm1249_vm3, %v1469_v30 }
 0xa68   : > { %v1467_v40 = vpop.permute.xlu1 %1466  ;;  %v1477_v23 = vpop.permute.xlu0 %1476 }
 0xa69   : > { %1472 = vst.msk [vmem:[#allocation2 + $0x18] sm:$0xf] %vm1249_vm3, %v1467_v40  ;;  %v1483_v7 = vsel %vm502_vm1, %v1477_v23, 0.0 }
 0xa6a   : > { %1484 = vadd.xlane.f32.xlu0 %v1483_v7 }
 0xa6c   : > { %v1475_v3 = vpop.permute.xlu1 %1474 }
 0xa6d   : > { %v1480_v61 = vsel %vm502_vm1, %v1475_v3, 0.0 }
 0xa6e   : > { %1481 = vadd.xlane.f32.xlu1 %v1480_v61 }
 0xa7f   : > { %1488 = vrot.lane.b32.xlu1 %v7817_v28, %s5364_s13 }
 0xa80   : > { %1486 = vrot.lane.b32.xlu0 %v7818_v6, %s5364_s13 }
 0xaf3   : > { %v6423_v15 = vpop.xlane.xlu0 %1484 }
 0xaf7   : > { %v6425_v11 = vpop.xlane.xlu1 %1481  ;;  %v1487_v57 = vpop.permute.xlu0 %1486 }
 0xaf8   : > { %v1492_v52 = vsel %vm502_vm1, %v1487_v57, 0.0 }
 0xaf9   : > { %1493 = vadd.xlane.f32.xlu1 %v1492_v52 }
 0xafb   : > { %v1489_v55 = vpop.permute.xlu1 %1488 }
 0xafc   : > { %v1495_v59 = vsel %vm502_vm1, %v1489_v55, 0.0 }
 0xafd   : > { %1496 = vadd.xlane.f32.xlu0 %v1495_v59 }
 0xb0a   : > { %1500 = vrot.lane.b32.xlu1 %v7819_v56, %s5364_s13 }
 0xb13   : > { %1498 = vrot.lane.b32.xlu0 %v7820_v36, %s5364_s13 }
 0xb82   : > { %v6433_v2 = vpop.xlane.xlu1 %1493 }
 0xb86   : > { %v6435_v31 = vpop.xlane.xlu0 %1496  ;;  %v1501_v18 = vpop.permute.xlu1 %1500 }
 0xb87   : > { %v1507_v58 = vsel %vm502_vm1, %v1501_v18, 0.0 }
 0xb88   : > { %1508 = vadd.xlane.f32.xlu0 %v1507_v58 }
 0xb8a   : > { %v1499_v25 = vpop.permute.xlu0 %1498 }
 0xb8b   : > { %v1504_v5 = vsel %vm502_vm1, %v1499_v25, 0.0 }
 0xb8c   : > { %1505 = vadd.xlane.f32.xlu1 %v1504_v5 }
 0xb9d   : > { %1512 = vrot.lane.b32.xlu1 %v7821_v9, %s5364_s13 }
 0xb9e   : > { %1510 = vrot.lane.b32.xlu0 %v7822_v35, %s5364_s13 }
 0xc11   : > { %v6443_v24 = vpop.xlane.xlu0 %1508 }
 0xc15   : > { %v6445_v10 = vpop.xlane.xlu1 %1505  ;;  %v1511_v60 = vpop.permute.xlu0 %1510 }
 0xc16   : > { %v1516_v34 = vsel %vm502_vm1, %v1511_v60, 0.0 }
 0xc17   : > { %1517 = vadd.xlane.f32.xlu1 %v1516_v34 }
 0xc19   : > { %v1513_v8 = vpop.permute.xlu1 %1512 }
 0xc1a   : > { %v1519_v37 = vsel %vm502_vm1, %v1513_v8, 0.0 }
 0xc1b   : > { %1520 = vadd.xlane.f32.xlu0 %v1519_v37 }
 0xc28   : > { %1524 = vrot.lane.b32.xlu1 %v7823_v32, %s5364_s13 }
 0xc31   : > { %1522 = vrot.lane.b32.xlu0 %v7824_v53, %s5364_s13 }
 0xca0   : > { %v6453_v62 = vpop.xlane.xlu1 %1517 }
 0xca4   : > { %v6455_v41 = vpop.xlane.xlu0 %1520  ;;  %v1525_v1 = vpop.permute.xlu1 %1524 }
 0xca5   : > { %v1531_v54 = vsel %vm502_vm1, %v1525_v1, 0.0 }
 0xca6   : > { %1532 = vadd.xlane.f32.xlu0 %v1531_v54 }
 0xca8   : > { %v1523_v26 = vpop.permute.xlu0 %1522 }
 0xca9   : > { %v1528_v13 = vsel %vm502_vm1, %v1523_v26, 0.0 }
 0xcaa   : > { %1529 = vadd.xlane.f32.xlu1 %v1528_v13 }
 0xcbb   : > { %1536 = vrot.lane.b32.xlu1 %v7825_v50, %s5364_s13 }
 0xcbc   : > { %1534 = vrot.lane.b32.xlu0 %v7826_v0, %s5364_s13 }
 0xd2f   : > { %v6463_v14 = vpop.xlane.xlu0 %1532 }
 0xd33   : > { %v6465_v63 = vpop.xlane.xlu1 %1529  ;;  %v1535_v33 = vpop.permute.xlu0 %1534 }
 0xd34   : > { %v1540_v38 = vsel %vm502_vm1, %v1535_v33, 0.0 }
 0xd35   : > { %1541 = vadd.xlane.f32.xlu1 %v1540_v38 }
 0xd37   : > { %v1537_v19 = vpop.permute.xlu1 %1536 }
 0xd38   : > { %v1543_v30 = vsel %vm502_vm1, %v1537_v19, 0.0 }
 0xd39   : > { %1544 = vadd.xlane.f32.xlu0 %v1543_v30  ;;  %v4747_v30 = vld [vmem:[%s7647_s3 + $0x8] sm:$0xff]  }
 0xd3a   : > { %4542 = vmatprep.subr.bf16.mxu1 %v4747_v30 }
 0xd3b   : > { %4543 = vmatpush3.bf16.msra.mxu1 %v4747_v30 }
 0xd46   : > { %1548 = vrot.lane.b32.xlu1 %v5771_v20, %s5364_s13 }
 0xd4f   : > { %1546 = vrot.lane.b32.xlu0 %v5766_v16, %s5364_s13 }
 0xdbe   : > { %v6473_v40 = vpop.xlane.xlu1 %1541 }
 0xdc2   : > { %v6475_v23 = vpop.xlane.xlu0 %1544  ;;  %v1549_v7 = vpop.permute.xlu1 %1548 }
 0xdc3   : > { %v1555_v3 = vsel %vm502_vm1, %v1549_v7, 0.0  ;;  %v4748_v7 = vld [vmem:[%s7647_s3] sm:$0xff]  }
 0xdc4   : > { %1556 = vadd.xlane.f32.xlu0 %v1555_v3  ;;  %4544 = vmatprep.subr.bf16.mxu1 %v4748_v7  ;;  %v5212_v3 = vld [vmem:[%s5541_s21] sm:$0xff]  }
 0xdc5   : > { %4545 = vmatpush3.bf16.msra.mxu1 %v4748_v7  ;;  %4546 = vmatprep.mubr.msk.bf16.mxu1 %vm369_vm0, %v5212_v3 }
 0xdc6   : > { %v1547_v61 = vpop.permute.xlu0 %1546 }
 0xdc7   : > { %v1552_v57 = vsel %vm502_vm1, %v1547_v61, 0.0  ;;  %v5213_v61 = vld [vmem:[%s5541_s21 + $0x8] sm:$0xff]  }
 0xdc8   : > { %1553 = vadd.xlane.f32.xlu1 %v1552_v57  ;;  %v5214_v57 = vld [vmem:[%s5541_s21 + $0x10] sm:$0xff]   ;;  %4547 = vmatmul.mubr.msk.bf16.vlgmr.msra.gmra.mxu1 %vm369_vm0, %v5213_v61 }
 0xdc9   : > { %4550 = vmatprep.mubr.msk.bf16.mxu1 %vm369_vm0, %v5214_v57 }
 0xdd9   : > { %1560 = vrot.lane.b32.xlu1 %v5709_v29, %s5364_s13 }
 0xdda   : > { %1558 = vrot.lane.b32.xlu0 %v5704_v27, %s5364_s13 }
 0xe4d   : > { %v6483_v52 = vpop.xlane.xlu0 %1556 }
 0xe51   : > { %v6485_v55 = vpop.xlane.xlu1 %1553  ;;  %v1559_v59 = vpop.permute.xlu0 %1558 }
 0xe52   : > { %v1564_v18 = vsel %vm502_vm1, %v1559_v59, 0.0  ;;  %v7827_v59 = vld [vmem:[#allocation45_spill] sm:$0xff] }
 0xe53   : > { %1565 = vadd.xlane.f32.xlu1 %v1564_v18  ;;  %v5215_v18 = vld [vmem:[%s5541_s21 + $0x18] sm:$0xff]   ;;  %s5366_s21 = smov 108  }
 0xe54   : > { %4551 = vmatmul.mubr.msk.bf16.gmra.mxu1 %vm369_vm0, %v5215_v18 }
 0xe55   : > { %v1561_v58 = vpop.permute.xlu1 %1560 }
 0xe56   : > { %v1567_v25 = vsel %vm502_vm1, %v1561_v58, 0.0 }
 0xe57   : > { %1568 = vadd.xlane.f32.xlu0 %v1567_v25 }
 0xe64   : > { %1572 = vrot.lane.b32.xlu1 %v5680_v17, %s5364_s13 }
 0xe6d   : > { %1570 = vrot.lane.b32.xlu0 %v5646_v4, %s5364_s13 }
 0xe88   : > { %v4548_v30 = vpop.f32.mrf.mxu1 }
 0xe8a   : > { %v2534_v7 = vpop.f32.mrf.mxu1 }
 0xe8c   : > { %v4549_v3 = vpop.f32.mrf.mxu1 }
 0xe8d   : > { %v2568_v18 = vpack.c.bf16 %v4549_v3, %v4548_v30 }
 0xe8e   : > { %v2537_v61 = vpop.f32.mrf.mxu1 }
 0xe8f   : > { %v6547_v57 = vpack.c.bf16 %v2537_v61, %v2534_v7 }
 0xe91   : > { %4556 = vmatprep.mubr.msk.bf16.mxu0 %vm502_vm1, %v6547_v57 }
 0xedc   : > { %v6493_v5 = vpop.xlane.xlu1 %1565 }
 0xee0   : > { %v6495_v60 = vpop.xlane.xlu0 %1568  ;;  %v1573_v34 = vpop.permute.xlu1 %1572 }
 0xee1   : > { %v1579_v8 = vsel %vm502_vm1, %v1573_v34, 0.0 }
 0xee2   : > { %1580 = vadd.xlane.f32.xlu0 %v1579_v8 }
 0xee4   : > { %v1571_v37 = vpop.permute.xlu0 %1570 }
 0xee5   : > { %v1576_v1 = vsel %vm502_vm1, %v1571_v37, 0.0 }
 0xee6   : > { %1577 = vadd.xlane.f32.xlu1 %v1576_v1 }
 0xef7   : > { %1584 = vrot.lane.b32.xlu1 %v7791_v22, %s5364_s13 }
 0xef8   : > { %1582 = vrot.lane.b32.xlu0 %v7792_v51, %s5364_s13 }
 0xf6b   : > { %v6503_v54 = vpop.xlane.xlu0 %1580 }
 0xf6f   : > { %v6505_v26 = vpop.xlane.xlu1 %1577  ;;  %v1583_v13 = vpop.permute.xlu0 %1582 }
 0xf70   : > { %v1588_v33 = vsel %vm502_vm1, %v1583_v13, 0.0  ;;  %v7828_v13 = vld [vmem:[#allocation38_spill] sm:$0xff] }
 0xf71   : > { %1589 = vadd.xlane.f32.xlu1 %v1588_v33  ;;  %v7829_v33 = vld [vmem:[#allocation37_spill] sm:$0xff] }
 0xf73   : > { %v1585_v38 = vpop.permute.xlu1 %1584 }
 0xf74   : > { %v1591_v19 = vsel %vm502_vm1, %v1585_v38, 0.0  ;;  %v4749_v38 = vld [vmem:[%s6542_s30] sm:$0xff]  }
 0xf75   : > { %1592 = vadd.xlane.f32.xlu0 %v1591_v19  ;;  %4654 = vmatprep.subr.msk.bf16.mxu0 %vm502_vm1, %v4749_v38  ;;  %v2589_v19 = vsel %vm502_vm1, %v4749_v38, 0 }
 0xf76   : > { %4555 = vmatpush3.bf16.xpose.msra.mxu0 %v2589_v19 }
 0xf7d   : > { %4557 = vmatmul.mubr.msk.bf16.vlgmr.msra.gmra.mxu0 %vm502_vm1, %v2568_v18 }
 0xf82   : > { %1596 = vrot.lane.b32.xlu1 %v7793_v12, %s5364_s13 }
 0xf8b   : > { %1594 = vrot.lane.b32.xlu0 %v7827_v59, %s5364_s13 }
 0xffa   : > { %v6527_v58 = vpop.xlane.xlu1 %1589 }
 0xffe   : > { %v6529_v25 = vpop.xlane.xlu0 %1592  ;;  %v1597_v34 = vpop.permute.xlu1 %1596 }
 0xfff   : > { %v1603_v8 = vsel %vm502_vm1, %v1597_v34, 0.0  ;;  %v4552_v34 = vpop.f32.mrf.mxu1 }
0x1000   : > { %1604 = vadd.xlane.f32.xlu0 %v1603_v8 }
0x1001   : > { %v2550_v8 = vpop.f32.mrf.mxu1 }
0x1002   : > { %v1595_v37 = vpop.permute.xlu0 %1594 }
0x1003   : > { %v1600_v1 = vsel %vm502_vm1, %v1595_v37, 0.0  ;;  %v4553_v37 = vpop.f32.mrf.mxu1 }
0x1004   : > { %1601 = vadd.xlane.f32.xlu1 %v1600_v1 }
0x1005   : > { %v2553_v1 = vpop.f32.mrf.mxu1 }
0x1015   : > { %1608 = vrot.lane.b32.xlu1 %v7828_v13, %s5364_s13  ;;  %v2569_v13 = vpack.c.bf16 %v2553_v1, %v2550_v8  ;;  %v7831_v8 = vld [vmem:[#allocation27_spill] sm:$0xff] }
0x1016   : > { %1606 = vrot.lane.b32.xlu0 %v7829_v33, %s5364_s13  ;;  %v2570_v33 = vpack.c.bf16 %v4553_v37, %v4552_v34  ;;  %v7830_v34 = vld [vmem:[#allocation32_spill] sm:$0xff] }
0x1017   : > { %4560 = vmatprep.mubr.msk.bf16.mxu0 %vm502_vm1, %v2569_v13 }
0x1018   : > { %4561 = vmatmul.mubr.msk.bf16.gmra.mxu0 %vm502_vm1, %v2570_v33 }
0x1089   : > { %v6554_v19 = vpop.xlane.xlu0 %1604 }
0x108d   : > { %v6556_v7 = vpop.xlane.xlu1 %1601  ;;  %v1607_v30 = vpop.permute.xlu0 %1606 }
0x108e   : > { %v1612_v3 = vsel %vm502_vm1, %v1607_v30, 0.0 }
0x108f   : > { %1613 = vadd.xlane.f32.xlu1 %v1612_v3 }
0x1091   : > { %v1609_v61 = vpop.permute.xlu1 %1608 }
0x1092   : > { %v1615_v12 = vsel %vm502_vm1, %v1609_v61, 0.0 }
0x1093   : > { %1616 = vadd.xlane.f32.xlu0 %v1615_v12 }
0x10a0   : > { %2881 = vrot.lane.b32.xlu1 %v4749_v38, %s5362_s11 }
0x10a4   : > { %1620 = vrot.lane.b32.xlu1 %v7830_v34, %s5364_s13 }
0x10a8   : > { %2875 = vrot.lane.b32.xlu1 %v2568_v18, %s5362_s11 }
0x10a9   : > { %1618 = vrot.lane.b32.xlu0 %v7831_v8, %s5364_s13  ;;  %v1667_v8 = vmax.f32 %v6423_v15, %v6435_v31 }
0x10ac   : > { %2877 = vrot.lane.b32.xlu1 %v2569_v13, %s5362_s11 }
0x10ad   : > { %2873 = vrot.lane.b32.xlu0 %v6547_v57, %s5362_s11 }
0x10b0   : > { %2879 = vrot.lane.b32.xlu1 %v2570_v33, %s5362_s11  ;;  %s5368_s11 = smov 100  }
0x10b4   : > { %3199 = vrot.lane.b32.xlu1 %v4749_v38, %s5364_s13 }
0x10b8   : > { %3191 = vrot.lane.b32.xlu1 %v6547_v57, %s5364_s13 }
0x10bc   : > { %3193 = vrot.lane.b32.xlu1 %v2568_v18, %s5364_s13 }
0x10c0   : > { %3195 = vrot.lane.b32.xlu1 %v2569_v13, %s5364_s13 }
0x10c4   : > { %3197 = vrot.lane.b32.xlu1 %v2570_v33, %s5364_s13 }
0x10c8   : > { %3517 = vrot.lane.b32.xlu1 %v4749_v38, %s5365_s16 }
0x10cc   : > { %3511 = vrot.lane.b32.xlu1 %v2568_v18, %s5365_s16 }
0x10d0   : > { %3513 = vrot.lane.b32.xlu1 %v2569_v13, %s5365_s16 }
0x10d4   : > { %3515 = vrot.lane.b32.xlu1 %v2570_v33, %s5365_s16 }
0x1118   : > { %v6580_v12 = vpop.xlane.xlu1 %1613 }
0x111c   : > { %v6582_v37 = vpop.xlane.xlu0 %1616  ;;  %v2882_v1 = vpop.permute.xlu1 %2881 }
0x111d   : > { %4655 = vmatprep.subr.msk.bf16.mxu0 %vm502_vm1, %v2882_v1  ;;  %v2896_v30 = vsel %vm502_vm1, %v2882_v1, 0 }
0x111e   : > { %4575 = vmatpush3.bf16.xpose.msra.mxu0 %v2896_v30 }
0x1120   : > { %v1619_v3 = vpop.permute.xlu0 %1618  ;;  %v1621_v61 = vpop.permute.xlu1 %1620 }
0x1121   : > { %v1624_v38 = vsel %vm502_vm1, %v1619_v3, 0.0  ;;  %v1627_v18 = vsel %vm502_vm1, %v1621_v61, 0.0 }
0x1122   : > { %1625 = vadd.xlane.f32.xlu0 %v1624_v38  ;;  %1628 = vadd.xlane.f32.xlu1 %v1627_v18  ;;  %v7833_v18 = vld [vmem:[#allocation26_spill] sm:$0xff] }
0x1124   : > { %v2876_v13 = vpop.permute.xlu1 %2875  ;;  %v2874_v33 = vpop.permute.xlu0 %2873 }
0x1125   : > { %4576 = vmatprep.mubr.msk.bf16.mxu0 %vm502_vm1, %v2874_v33 }
0x1126   : > { %4577 = vmatmul.mubr.msk.bf16.vlgmr.msra.gmra.mxu0 %vm502_vm1, %v2876_v13 }
0x1128   : > { %v2878_v59 = vpop.permute.xlu1 %2877 }
0x1129   : > { %4580 = vmatprep.mubr.msk.bf16.mxu0 %vm502_vm1, %v2878_v59  ;;  %v7832_v59 = vld [vmem:[#allocation21_spill] sm:$0xff] }
0x112c   : > { %v2880_v34 = vpop.permute.xlu1 %2879 }
0x112e   : > { %4581 = vmatmul.mubr.msk.bf16.gmra.mxu0 %vm502_vm1, %v2880_v34 }
0x1130   : > { %v3200_v1 = vpop.permute.xlu1 %3199 }
0x1131   : > { %4656 = vmatprep.subr.msk.bf16.mxu0 %vm502_vm1, %v3200_v1  ;;  %v3214_v30 = vsel %vm502_vm1, %v3200_v1, 0 }
0x1132   : > { %4595 = vmatpush3.bf16.xpose.msra.mxu0 %v3214_v30 }
0x1134   : > { %v3192_v3 = vpop.permute.xlu1 %3191 }
0x1135   : > { %4596 = vmatprep.mubr.msk.bf16.mxu0 %vm502_vm1, %v3192_v3 }
0x1138   : > { %v3194_v61 = vpop.permute.xlu1 %3193  ;;  %3509 = vrot.lane.b32.xlu0 %v6547_v57, %s5365_s16 }
0x1139   : > { %4597 = vmatmul.mubr.msk.bf16.vlgmr.msra.gmra.mxu0 %vm502_vm1, %v3194_v61 }
0x113c   : > { %v3196_v38 = vpop.permute.xlu1 %3195  ;;  %1630 = vrot.lane.b32.xlu0 %v7832_v59, %s5364_s13 }
0x113d   : > { %4600 = vmatprep.mubr.msk.bf16.mxu0 %vm502_vm1, %v3196_v38 }
0x1140   : > { %v3198_v34 = vpop.permute.xlu1 %3197  ;;  %1632 = vrot.lane.b32.xlu0 %v7833_v18, %s5364_s13 }
0x1141   : > { %4601 = vmatmul.mubr.msk.bf16.gmra.mxu0 %vm502_vm1, %v3198_v34 }
0x1144   : > { %v3518_v13 = vpop.permute.xlu1 %3517 }
0x1145   : > { %4657 = vmatprep.subr.msk.bf16.mxu0 %vm502_vm1, %v3518_v13  ;;  %v3532_v33 = vsel %vm502_vm1, %v3518_v13, 0 }
0x1146   : > { %4615 = vmatpush3.bf16.xpose.msra.mxu0 %v3532_v33  ;;  %v7834_v33 = vld [vmem:[#allocation47_spill] sm:$0xff] }
0x1148   : > { %v3512_v1 = vpop.permute.xlu1 %3511 }
0x114c   : > { %v3514_v3 = vpop.permute.xlu1 %3513 }
0x1150   : > { %v3516_v18 = vpop.permute.xlu1 %3515 }
0x11ab   : > { %v6606_v57 = vpop.xlane.xlu0 %1625 }
0x11af   : > { %v3510_v30 = vpop.permute.xlu0 %3509 }
0x11b0   : > { %4616 = vmatprep.mubr.msk.bf16.mxu0 %vm502_vm1, %v3510_v30  ;;  %v7835_v30 = vld [vmem:[#allocation48_spill] sm:$0xff] }
0x11b1   : > { %4617 = vmatmul.mubr.msk.bf16.vlgmr.msra.gmra.mxu0 %vm502_vm1, %v3512_v1  ;;  %v6618_v1 = vpop.xlane.xlu1 %1628 }
0x11b2   : > { %4620 = vmatprep.mubr.msk.bf16.mxu0 %vm502_vm1, %v3514_v3 }
0x11b3   : > { %v1631_v61 = vpop.permute.xlu0 %1630 }
0x11b4   : > { %v1636_v38 = vsel %vm502_vm1, %v1631_v61, 0.0 }
0x11b5   : > { %1637 = vadd.xlane.f32.xlu0 %v1636_v38 }
0x11b7   : > { %v1633_v34 = vpop.permute.xlu0 %1632 }
0x11b8   : > { %v1639_v13 = vsel %vm502_vm1, %v1633_v34, 0.0 }
0x11b9   : > { %1640 = vadd.xlane.f32.xlu1 %v1639_v13  ;;  %4621 = vmatmul.mubr.msk.bf16.gmra.mxu0 %vm502_vm1, %v3516_v18  ;;  %v7836_v18 = vld [vmem:[#allocation39_spill] sm:$0xff] }
0x11ca   : > { %1642 = vrot.lane.b32.xlu1 %v7834_v33, %s5364_s13  ;;  %v7837_v33 = vld [vmem:[#allocation40_spill] sm:$0xff] }
0x11cb   : > { %1644 = vrot.lane.b32.xlu0 %v7835_v30, %s5364_s13  ;;  %v1666_v30 = vmax.f32 %v6425_v11, %v6433_v2 }
0x11cd   : > { %v1668_v22 = vmax.f32 %v1666_v30, %v6445_v10  ;;  %v1816_v30 = vmax.f32 %v6503_v54, %v6529_v25 }
0x11cf   : > { %v1818_v17 = vmax.f32 %v1816_v30, %v6554_v19 }
0x11d1   : > { %v1820_v29 = vmax.f32 %v1818_v17, %v6582_v37 }
0x123e   : > { %v6620_v3 = vpop.xlane.xlu0 %1637 }
0x1242   : > { %v1645_v59 = vpop.permute.xlu0 %1644  ;;  %v6622_v61 = vpop.xlane.xlu1 %1640 }
0x1243   : > { %v1651_v38 = vsel %vm502_vm1, %v1645_v59, 0.0  ;;  %v1670_v59 = vmax.f32 %v1668_v22, %v6453_v62 }
0x1244   : > { %1652 = vadd.xlane.f32.xlu0 %v1651_v38  ;;  %v1669_v38 = vmax.f32 %v1667_v8, %v6443_v24 }
0x1245   : > { %v1684_v51 = vsub.f32 %v6445_v10, %v1670_v59  ;;  %v1690_v22 = vsub.f32 %v6453_v62, %v1670_v59 }
0x1246   : > { %v1643_v34 = vpop.permute.xlu1 %1642 }
0x1247   : > { %v1648_v13 = vsel %vm502_vm1, %v1643_v34, 0.0  ;;  %v1741_v34 = vmax.f32 %v6465_v63, %v6473_v40  ;;  %v1686_v9 = vmul.f32 1.442695, %v1684_v51  ;;  %v1822_v51 = vsub.f32 %v6503_v54, %v1820_v29 }
0x1248   : > { %1649 = vadd.xlane.f32.xlu1 %v1648_v13  ;;  %v1672_v13 = vsub.f32 %v6425_v11, %v1670_v59 }
0x1249   : > { %v1743_v27 = vmax.f32 %v1741_v34, %v6485_v55 }
0x124a   : > { %v1674_v4 = vmul.f32 1.442695, %v1672_v13  ;;  %v1815_v13 = vmax.f32 %v6505_v26, %v6527_v58 }
0x124b   : > { %v1745_v8 = vmax.f32 %v1743_v27, %v6493_v5 }
0x124c   : > { %4924 = vpow2.f32 %v1674_v4  ;;  %v1817_v17 = vmax.f32 %v1815_v13, %v6556_v7 }
0x124d   : > { %v1747_v27 = vsub.f32 %v6465_v63, %v1745_v8  ;;  %v1753_v30 = vsub.f32 %v6473_v40, %v1745_v8 }
0x124e   : > { %v1819_v4 = vmax.f32 %v1817_v17, %v6580_v12 }
0x124f   : > { %v1755_v40 = vmul.f32 1.442695, %v1753_v30 }
0x1259   : > { %1654 = vrot.lane.b32.xlu1 %v7836_v18, %s5364_s13  ;;  %v1671_v18 = vmax.f32 %v1669_v38, %v6455_v41  ;;  %v1742_v38 = vmax.f32 %v6463_v14, %v6475_v23 }
0x125a   : > { %1656 = vrot.lane.b32.xlu0 %v7837_v33, %s5364_s13  ;;  %v1678_v33 = vsub.f32 %v6433_v2, %v1670_v59  ;;  %v1692_v59 = vmul.f32 1.442695, %v1690_v22  ;;  %v1828_v22 = vsub.f32 %v6529_v25, %v1820_v29  ;;  %v1821_v25 = vsub.f32 %v6505_v26, %v1819_v4  ;;  %s5372_s13 = smov [#allocation9]  }
0x125b   : > { %v1673_v11 = vsub.f32 %v6423_v15, %v1671_v18  ;;  %v1679_v34 = vsub.f32 %v6435_v31, %v1671_v18  ;;  %v1685_v10 = vsub.f32 %v6443_v24, %v1671_v18  ;;  %v1744_v62 = vmax.f32 %v1742_v38, %v6483_v52  ;;  %s5275_s17 = sshll.u32 %s5372_s13, 4  ;;  %s5276_s17 = int_to_ptr.vmem [resolvable:$false] %s5275_s17 }
0x125c   : > { %v1680_v2 = vmul.f32 1.442695, %v1678_v33  ;;  %v1691_v63 = vsub.f32 %v6455_v41, %v1671_v18  ;;  %v1749_v38 = vmul.f32 1.442695, %v1747_v27  ;;  %v1831_v54 = vmul.f32 1.442695, %v1828_v22 }
0x125d   : > { %v1676_v15 = vmul.f32 1.442695, %v1673_v11  ;;  %v1746_v33 = vmax.f32 %v1744_v62, %v6495_v60  ;;  %v1682_v31 = vmul.f32 1.442695, %v1679_v34  ;;  %v1688_v24 = vmul.f32 1.442695, %v1685_v10 }
0x125e   : > { %4926 = vpow2.f32 %v1680_v2  ;;  %v1825_v34 = vmul.f32 1.442695, %v1822_v51  ;;  %v1694_v10 = vmul.f32 1.442695, %v1691_v63  ;;  %v1834_v18 = vsub.f32 %v6554_v19, %v1820_v29 }
0x125f   : > { %4928 = vpow2.f32 %v1686_v9  ;;  %v1748_v11 = vsub.f32 %v6463_v14, %v1746_v33  ;;  %v1754_v2 = vsub.f32 %v6475_v23, %v1746_v33  ;;  %v1759_v9 = vsub.f32 %v6485_v55, %v1745_v8 }
0x1260   : > { %4930 = vpow2.f32 %v1692_v59  ;;  %v1827_v59 = vsub.f32 %v6527_v58, %v1819_v4  ;;  %v1765_v23 = vsub.f32 %v6493_v5, %v1745_v8  ;;  %v1760_v55 = vsub.f32 %v6483_v52, %v1746_v33 }
0x1261   : > { %4932 = vpow2.f32 %v1676_v15  ;;  %v1751_v41 = vmul.f32 1.442695, %v1748_v11  ;;  %v1757_v62 = vmul.f32 1.442695, %v1754_v2  ;;  %v1761_v14 = vmul.f32 1.442695, %v1759_v9  ;;  %v6675_v15 = vpop.eup %4924 }
0x1262   : > { %4934 = vpow2.f32 %v1682_v31  ;;  %v1823_v27 = vmul.f32 1.442695, %v1821_v25  ;;  %v1837_v13 = vmul.f32 1.442695, %v1834_v18  ;;  %v1840_v26 = vsub.f32 %v6582_v37, %v1820_v29 }
0x1263   : > { %4936 = vpow2.f32 %v1688_v24  ;;  %v1829_v19 = vmul.f32 1.442695, %v1827_v59  ;;  %v1767_v58 = vmul.f32 1.442695, %v1765_v23  ;;  %v1766_v31 = vsub.f32 %v6495_v60, %v1746_v33 }
0x1264   : > { %4938 = vpow2.f32 %v1749_v38  ;;  %v1763_v8 = vmul.f32 1.442695, %v1760_v55  ;;  %v1833_v52 = vsub.f32 %v6556_v7, %v1819_v4  ;;  %v1843_v29 = vmul.f32 1.442695, %v1840_v26 }
0x1265   : > { %4940 = vpow2.f32 %v1755_v40  ;;  %v1769_v24 = vmul.f32 1.442695, %v1766_v31  ;;  %v1839_v33 = vsub.f32 %v6580_v12, %v1819_v4 }
0x1266   : > { %4942 = vpow2.f32 %v1825_v34  ;;  %v1835_v60 = vmul.f32 1.442695, %v1833_v52 }
0x1267   : > { %4944 = vpow2.f32 %v1831_v54  ;;  %v1841_v34 = vmul.f32 1.442695, %v1839_v33 }
0x1268   : > { %4946 = vpow2.f32 %v1694_v10 }
0x1269   : > { %4948 = vpow2.f32 %v1751_v41 }
0x126a   : > { %4950 = vpow2.f32 %v1757_v62 }
0x126b   : > { %v6677_v30 = vpop.eup %4926  ;;  %4952 = vpow2.f32 %v1761_v14 }
0x126c   : > { %v6680_v5 = vpop.eup %4928  ;;  %4954 = vpow2.f32 %v1823_v27  ;;  %v1696_v7 = vadd.f32 %v6677_v30, %v6675_v15 }
0x126d   : > { %v6683_v17 = vpop.eup %4930  ;;  %4956 = vpow2.f32 %v1837_v13 }
0x126e   : > { %v6685_v37 = vpop.eup %4932  ;;  %4958 = vpow2.f32 %v1829_v19  ;;  %v1698_v12 = vadd.f32 %v6680_v5, %v1696_v7 }
0x126f   : > { %v6687_v51 = vpop.eup %4934  ;;  %4960 = vpow2.f32 %v1767_v58 }
0x1270   : > { %v6689_v22 = vpop.eup %4936  ;;  %4962 = vpow2.f32 %v1763_v8  ;;  %v1697_v11 = vadd.f32 %v6687_v51, %v6685_v37  ;;  %v1700_v59 = vadd.f32 %v6683_v17, %v1698_v12 }
0x1271   : > { %v4939_v63 = vpop.eup %4938  ;;  %4964 = vpow2.f32 %v1843_v29 }
0x1272   : > { %v4941_v38 = vpop.eup %4940  ;;  %4966 = vpow2.f32 %v1769_v24  ;;  %v1699_v25 = vadd.f32 %v6689_v22, %v1697_v11 }
0x1273   : > { %v6694_v40 = vpop.eup %4942  ;;  %4968 = vpow2.f32 %v1835_v60  ;;  %v1771_v4 = vadd.f32 %v4941_v38, %v4939_v63 }
0x1274   : > { %v6698_v2 = vpop.eup %4944  ;;  %4970 = vpow2.f32 %v1841_v34 }
0x1275   : > { %v6700_v9 = vpop.eup %4946  ;;  %v1846_v41 = vadd.f32 %v6698_v2, %v6694_v40  ;;  %4972 = vrcp.f32 %v1700_v59 }
0x1276   : > { %v6703_v54 = vpop.eup %4948  ;;  %v1701_v13 = vadd.f32 %v6700_v9, %v1699_v25 }
0x1277   : > { %v6705_v10 = vpop.eup %4950 }
0x1278   : > { %v6710_v18 = vpop.eup %4952  ;;  %v1772_v55 = vadd.f32 %v6705_v10, %v6703_v54  ;;  %4974 = vrcp.f32 %v1701_v13 }
0x1279   : > { %v6712_v62 = vpop.eup %4954  ;;  %v1773_v14 = vadd.f32 %v6710_v18, %v1771_v4 }
0x127a   : > { %v6716_v23 = vpop.eup %4956 }
0x127b   : > { %v6720_v27 = vpop.eup %4958  ;;  %v1848_v26 = vadd.f32 %v6716_v23, %v1846_v41 }
0x127c   : > { %v6724_v19 = vpop.eup %4960  ;;  %v1845_v29 = vadd.f32 %v6720_v27, %v6712_v62 }
0x127d   : > { %v6726_v58 = vpop.eup %4962  ;;  %v1775_v31 = vadd.f32 %v6724_v19, %v1773_v14 }
0x127e   : > { %v6729_v8 = vpop.eup %4964  ;;  %v1774_v52 = vadd.f32 %v6726_v58, %v1772_v55 }
0x127f   : > { %v1850_v24 = vadd.f32 %v6729_v8, %v1848_v26  ;;  %v6735_v60 = vpop.eup %4966  ;;  %4976 = vrcp.f32 %v1775_v31 }
0x1280   : > { %v6737_v33 = vpop.eup %4968  ;;  %v1776_v7 = vadd.f32 %v6735_v60, %v1774_v52 }
0x1281   : > { %v1847_v11 = vadd.f32 %v6737_v33, %v1845_v29  ;;  %4978 = vrcp.f32 %v1850_v24  ;;  %v6741_v34 = vpop.eup %4970 }
0x1282   : > { %4980 = vrcp.f32 %v1776_v7  ;;  %v4973_v25 = vpop.eup %4972 }
0x1283   : > { %v1849_v12 = vadd.f32 %v6741_v34, %v1847_v11  ;;  %v1704_v55 = vmul.f32 %v4973_v25, %v6675_v15  ;;  %v1708_v13 = vmul.f32 %v4973_v25, %v6677_v30  ;;  %v1714_v30 = vmul.f32 %v4973_v25, %v6680_v5 }
0x1285   : > { %4982 = vrcp.f32 %v1849_v12  ;;  %v4975_v41 = vpop.eup %4974  ;;  %v1706_v11 = vmul.f32 %v1704_v55, %v5571_v43  ;;  %v1710_v12 = vmul.f32 %v5567_v42, %v1708_v13  ;;  %v1720_v13 = vmul.f32 %v4973_v25, %v6683_v17 }
0x1286   : > { %v1705_v52 = vmul.f32 %v4975_v41, %v6685_v37  ;;  %v1709_v29 = vmul.f32 %v4975_v41, %v6687_v51  ;;  %v1715_v55 = vmul.f32 %v4975_v41, %v6689_v22  ;;  %v1721_v22 = vmul.f32 %v4975_v41, %v6700_v9 }
0x1287   : > { %v1712_v50 = vadd.f32 %v1710_v12, %v1706_v11 }
0x1288   : > { %v1711_v37 = vmul.f32 %v5573_v44, %v1709_v29  ;;  %v1716_v29 = vmul.f32 %v1714_v30, %v5585_v47 }
0x128a   : > { %v1718_v11 = vadd.f32 %v1716_v29, %v1712_v50 }
0x128c   : > { %v4977_v26 = vpop.eup %4976 }
0x128d   : > { %v1779_v35 = vmul.f32 %v4977_v26, %v4939_v63  ;;  %v1783_v20 = vmul.f32 %v4977_v26, %v4941_v38  ;;  %v1795_v50 = vmul.f32 %v4977_v26, %v6724_v19 }
0x128e   : > { %v4979_v24 = vpop.eup %4978 }
0x128f   : > { %v4981_v16 = vpop.eup %4980  ;;  %v1854_v51 = vmul.f32 %v4979_v24, %v6694_v40  ;;  %v1781_v63 = vmul.f32 %v1779_v35, %v5571_v43  ;;  %v1785_v38 = vmul.f32 %v5567_v42, %v1783_v20  ;;  %v1789_v35 = vmul.f32 %v4977_v26, %v6710_v18 }
0x1290   : > { %v1780_v5 = vmul.f32 %v4981_v16, %v6703_v54  ;;  %v1717_v20 = vmul.f32 %v1715_v55, %v5593_v49  ;;  %v1864_v54 = vmul.f32 %v4979_v24, %v6716_v23  ;;  %v1790_v41 = vmul.f32 %v4981_v16, %v6726_v58 }
0x1291   : > { %v1856_v40 = vmul.f32 %v1854_v51, %v5579_v45  ;;  %v1787_v17 = vadd.f32 %v1785_v38, %v1781_v63  ;;  %v1791_v18 = vmul.f32 %v1789_v35, %v5585_v47  ;;  %v1723_v23 = vmul.f32 %v5587_v48, %v1721_v22 }
0x1292   : > { %v1870_v55 = vmul.f32 %v4979_v24, %v6729_v8  ;;  %v1792_v19 = vmul.f32 %v1790_v41, %v5593_v49  ;;  %v1796_v58 = vmul.f32 %v4981_v16, %v6735_v60 }
0x1294   : > { %v1872_v29 = vmul.f32 %v5587_v48, %v1870_v55  ;;  %v1798_v35 = vmul.f32 %v5587_v48, %v1796_v58 }
0x12cd   : > { %v6744_v4 = vpop.xlane.xlu0 %1652 }
0x12d1   : > { %v1657_v59 = vpop.permute.xlu0 %1656  ;;  %v6746_v14 = vpop.xlane.xlu1 %1649 }
0x12d2   : > { %v1663_v31 = vsel %vm502_vm1, %v1657_v59, 0.0  ;;  %v1707_v59 = vmul.f32 %v1705_v52, %v5579_v45  ;;  %v4983_v52 = vpop.eup %4982 }
0x12d3   : > { %1664 = vadd.xlane.f32.xlu0 %v1663_v31  ;;  %v1858_v31 = vmul.f32 %v4979_v24, %v6698_v2  ;;  %v1853_v12 = vmul.f32 %v4983_v52, %v6712_v62  ;;  %v1857_v30 = vmul.f32 %v4983_v52, %v6720_v27  ;;  %v1793_v62 = vadd.f32 %v1791_v18, %v1787_v17 }
0x12d4   : > { %v1863_v26 = vmul.f32 %v4983_v52, %v6737_v33 }
0x12d5   : > { %v1655_v7 = vpop.permute.xlu1 %1654  ;;  %v1860_v2 = vmul.f32 %v5573_v44, %v1858_v31  ;;  %v1866_v31 = vmul.f32 %v1864_v54, %v5593_v49  ;;  %v1855_v27 = vmul.f32 %v1853_v12, %v5571_v43  ;;  %v1859_v38 = vmul.f32 %v5567_v42, %v1857_v30 }
0x12d6   : > { %v1660_v15 = vsel %vm502_vm1, %v1655_v7, 0.0  ;;  %v1784_v7 = vmul.f32 %v4981_v16, %v6705_v10  ;;  %v1782_v10 = vmul.f32 %v1780_v5, %v5579_v45  ;;  %v1889_v30 = vmax.f32 %v6606_v57, %v6620_v3 }
0x12d7   : > { %1661 = vadd.xlane.f32.xlu1 %v1660_v15  ;;  %v1713_v15 = vadd.f32 %v1711_v37, %v1707_v59  ;;  %v1722_v59 = vmul.f32 %v5581_v46, %v1720_v13  ;;  %v1862_v9 = vadd.f32 %v1860_v2, %v1856_v40  ;;  %v1861_v40 = vadd.f32 %v1859_v38, %v1855_v27 }
0x12d8   : > { %v1786_v25 = vmul.f32 %v5573_v44, %v1784_v7  ;;  %v1797_v7 = vmul.f32 %v5581_v46, %v1795_v50 }
0x12d9   : > { %v1719_v37 = vadd.f32 %v1717_v20, %v1713_v15  ;;  %v1724_v51 = vadd.f32 %v1722_v59, %v1718_v11  ;;  %v1868_v5 = vadd.f32 %v1866_v31, %v1862_v9  ;;  %v1865_v11 = vmul.f32 %v1863_v26, %v5585_v47 }
0x12da   : > { %v1788_v63 = vadd.f32 %v1786_v25, %v1782_v10  ;;  %v1799_v8 = vadd.f32 %v1797_v7, %v1793_v62  ;;  %v1869_v20 = vmul.f32 %v4983_v52, %v6741_v34  ;;  %v1890_v34 = vmax.f32 %v6618_v1, %v6622_v61 }
0x12db   : > { %v1725_v13 = vadd.f32 %v1723_v23, %v1719_v37  ;;  %v4411_v15 = vpack.c.bf16 %v1724_v51, %v1724_v51  ;;  %v1874_v22 = vadd.f32 %v1872_v29, %v1868_v5  ;;  %v1867_v33 = vadd.f32 %v1865_v11, %v1861_v40 }
0x12dc   : > { %v1794_v24 = vadd.f32 %v1792_v19, %v1788_v63  ;;  %v4413_v16 = vpack.c.bf16 %v1799_v8, %v1799_v8  ;;  %v1871_v54 = vmul.f32 %v5581_v46, %v1869_v20  ;;  %v1892_v52 = vmax.f32 %v1890_v34, %v6744_v4 }
0x12dd   : > { %v4412_v2 = vpack.c.bf16 %v1725_v13, %v1725_v13  ;;  %v4416_v17 = vpack.c.bf16 %v1874_v22, %v1874_v22  ;;  %v1891_v9 = vmax.f32 %v1889_v30, %v6746_v14 }
0x12de   : > { %v1800_v60 = vadd.f32 %v1798_v35, %v1794_v24  ;;  %v1873_v25 = vadd.f32 %v1871_v54, %v1867_v33 }
0x12e0   : > { %v4414_v10 = vpack.c.bf16 %v1800_v60, %v1800_v60  ;;  %v4415_v12 = vpack.c.bf16 %v1873_v25, %v1873_v25 }
0x12e8   : > { %1732 = vrot.lane.b32.xlu1 %v4411_v15, %s5363_s12 }
0x12e9   : > { %1734 = vrot.lane.b32.xlu0 %v4412_v2, %s5363_s12 }
0x12ec   : > { %1807 = vrot.lane.b32.xlu1 %v4413_v16, %s5363_s12 }
0x12ed   : > { %1883 = vrot.lane.b32.xlu0 %v4416_v17, %s5363_s12 }
0x12f0   : > { %1809 = vrot.lane.b32.xlu1 %v4414_v10, %s5363_s12 }
0x12f4   : > { %1881 = vrot.lane.b32.xlu1 %v4415_v12, %s5363_s12 }
0x135c   : > { %v1665_v59 = vpop.xlane.xlu0 %1664 }
0x135d   : > { %v1894_v37 = vmax.f32 %v1892_v52, %v1665_v59 }
0x135f   : > { %v1896_v18 = vsub.f32 %v6618_v1, %v1894_v37  ;;  %v1902_v50 = vsub.f32 %v6622_v61, %v1894_v37  ;;  %v1908_v41 = vsub.f32 %v6744_v4, %v1894_v37  ;;  %v1914_v51 = vsub.f32 %v1665_v59, %v1894_v37 }
0x1360   : > { %v1735_v23 = vpop.permute.xlu0 %1734  ;;  %v1662_v31 = vpop.xlane.xlu1 %1661 }
0x1361   : > { %v1899_v55 = vmul.f32 1.442695, %v1896_v18  ;;  %v1905_v62 = vmul.f32 1.442695, %v1902_v50  ;;  %v1911_v63 = vmul.f32 1.442695, %v1908_v41  ;;  %v1893_v27 = vmax.f32 %v1891_v9, %v1662_v31 }
0x1362   : > { %1740 = vst.msk [vmem:[#allocation2 + $0x4] sm:$0xf] %vm1738_vm4, %v1735_v23  ;;  %v1917_v38 = vmul.f32 1.442695, %v1914_v51 }
0x1363   : > { %4984 = vpow2.f32 %v1899_v55  ;;  %v1895_v13 = vsub.f32 %v6606_v57, %v1893_v27  ;;  %v1901_v5 = vsub.f32 %v6620_v3, %v1893_v27  ;;  %v1907_v1 = vsub.f32 %v6746_v14, %v1893_v27 }
0x1364   : > { %4986 = vpow2.f32 %v1905_v62  ;;  %v1913_v61 = vsub.f32 %v1662_v31, %v1893_v27  ;;  %v1884_v4 = vpop.permute.xlu0 %1883  ;;  %v1733_v7 = vpop.permute.xlu1 %1732 }
0x1365   : > { %4988 = vpow2.f32 %v1911_v63  ;;  %v1897_v19 = vmul.f32 1.442695, %v1895_v13  ;;  %v1903_v58 = vmul.f32 1.442695, %v1901_v5  ;;  %1888 = vst.msk [vmem:[#allocation2 + $0x14] sm:$0xf] %vm1738_vm4, %v1884_v4 }
0x1366   : > { %1739 = vst.msk [vmem:[#allocation2] sm:$0xf] %vm1738_vm4, %v1733_v7  ;;  %4990 = vpow2.f32 %v1917_v38  ;;  %v1909_v26 = vmul.f32 1.442695, %v1907_v1  ;;  %v1915_v57 = vmul.f32 1.442695, %v1913_v61 }
0x1367   : > { %4992 = vpow2.f32 %v1897_v19 }
0x1368   : > { %4994 = vpow2.f32 %v1903_v58  ;;  %v1808_v29 = vpop.permute.xlu1 %1807 }
0x1369   : > { %1813 = vst.msk [vmem:[#allocation2 + $0x8] sm:$0xf] %vm1738_vm4, %v1808_v29  ;;  %4996 = vpow2.f32 %v1909_v26 }
0x136a   : > { %4998 = vpow2.f32 %v1915_v57 }
0x136c   : > { %v1810_v3 = vpop.permute.xlu1 %1809 }
0x136d   : > { %1814 = vst.msk [vmem:[#allocation2 + $0xc] sm:$0xf] %vm1738_vm4, %v1810_v3 }
0x1370   : > { %v4985_v14 = vpop.eup %4984  ;;  %v1882_v15 = vpop.permute.xlu1 %1881 }
0x1371   : > { %v4987_v8 = vpop.eup %4986  ;;  %1887 = vst.msk [vmem:[#allocation2 + $0x10] sm:$0xf] %vm1738_vm4, %v1882_v15 }
0x1372   : > { %v4989_v24 = vpop.eup %4988  ;;  %v1920_v40 = vadd.f32 %v4987_v8, %v4985_v14 }
0x1373   : > { %v4991_v2 = vpop.eup %4990 }
0x1374   : > { %v4993_v22 = vpop.eup %4992  ;;  %v1922_v35 = vadd.f32 %v4989_v24, %v1920_v40 }
0x1375   : > { %v4995_v11 = vpop.eup %4994 }
0x1376   : > { %v1924_v20 = vadd.f32 %v4991_v2, %v1922_v35  ;;  %v1919_v16 = vadd.f32 %v4995_v11, %v4993_v22  ;;  %v4997_v60 = vpop.eup %4996 }
0x1377   : > { %v4999_v17 = vpop.eup %4998 }
0x1378   : > { %5000 = vrcp.f32 %v1924_v20  ;;  %v1921_v33 = vadd.f32 %v4997_v60, %v1919_v16 }
0x137a   : > { %v1923_v54 = vadd.f32 %v4999_v17, %v1921_v33 }
0x137c   : > { %5002 = vrcp.f32 %v1923_v54 }
0x1385   : > { %v5001_v10 = vpop.eup %5000 }
0x1386   : > { %v1928_v25 = vmul.f32 %v5001_v10, %v4985_v14  ;;  %v1932_v12 = vmul.f32 %v5001_v10, %v4987_v8  ;;  %v1938_v34 = vmul.f32 %v5001_v10, %v4989_v24  ;;  %v1944_v52 = vmul.f32 %v5001_v10, %v4991_v2 }
0x1388   : > { %v1930_v30 = vmul.f32 %v1928_v25, %v5579_v45  ;;  %v1934_v59 = vmul.f32 %v5573_v44, %v1932_v12  ;;  %v1940_v9 = vmul.f32 %v1938_v34, %v5593_v49  ;;  %v1946_v23 = vmul.f32 %v5587_v48, %v1944_v52 }
0x1389   : > { %v5003_v37 = vpop.eup %5002 }
0x138a   : > { %v1936_v18 = vadd.f32 %v1934_v59, %v1930_v30  ;;  %v1927_v50 = vmul.f32 %v5003_v37, %v4993_v22  ;;  %v1931_v41 = vmul.f32 %v5003_v37, %v4995_v11  ;;  %v1937_v51 = vmul.f32 %v5003_v37, %v4997_v60 }
0x138b   : > { %v1943_v63 = vmul.f32 %v5003_v37, %v4999_v17 }
0x138c   : > { %v1942_v31 = vadd.f32 %v1940_v9, %v1936_v18  ;;  %v1929_v55 = vmul.f32 %v1927_v50, %v5571_v43  ;;  %v1933_v62 = vmul.f32 %v5567_v42, %v1931_v41  ;;  %v1939_v13 = vmul.f32 %v1937_v51, %v5585_v47 }
0x138d   : > { %v1945_v61 = vmul.f32 %v5581_v46, %v1943_v63 }
0x138e   : > { %v1948_v27 = vadd.f32 %v1946_v23, %v1942_v31  ;;  %v1935_v38 = vadd.f32 %v1933_v62, %v1929_v55 }
0x1390   : > { %v4418_v5 = vpack.c.bf16 %v1948_v27, %v1948_v27  ;;  %v1941_v1 = vadd.f32 %v1939_v13, %v1935_v38 }
0x1392   : > { %1957 = vrot.lane.b32.xlu0 %v4418_v5, %s5363_s12  ;;  %v1947_v4 = vadd.f32 %v1945_v61, %v1941_v1 }
0x1394   : > { %v4417_v7 = vpack.c.bf16 %v1947_v4, %v1947_v4 }
0x1396   : > { %1965 = vrot.lane.b32.xlu0 %v7815_v39, %s5365_s16  ;;  %1955 = vrot.lane.b32.xlu1 %v4417_v7, %s5363_s12  ;;  %v6842_v39 = vpop.f32.mrf.mxu0 }
0x1397   : > { %v2663_v12 = vsel %vm2656_vm5, %v6842_v39, -inf }
0x139a   : > { %1963 = vrot.lane.b32.xlu1 %v7816_v21, %s5365_s16  ;;  %v6844_v21 = vpop.f32.mrf.mxu0 }
0x139b   : > { %v2657_v33 = vsel %vm2656_vm5, %v6844_v21, -inf }
0x139c   : > { %v6846_v14 = vpop.f32.mrf.mxu0 }
0x139d   : > { %v2666_v52 = vsel %vm2656_vm5, %v6846_v14, -inf }
0x139e   : > { %v6848_v15 = vpop.f32.mrf.mxu0 }
0x139f   : > { %v2660_v10 = vsel %vm2656_vm5, %v6848_v15, -inf }
0x13a0   : > { %v6850_v8 = vpop.f32.mrf.mxu0 }
0x13a1   : > { %v2675_v7 = vsel %vm2656_vm5, %v6850_v8, -inf }
0x13a2   : > { %v6852_v24 = vpop.f32.mrf.mxu0 }
0x13a3   : > { %v2669_v59 = vsel %vm2656_vm5, %v6852_v24, -inf }
0x13a4   : > { %v6854_v40 = vpop.f32.mrf.mxu0 }
0x13a5   : > { %v2678_v50 = vsel %vm2656_vm5, %v6854_v40, -inf }
0x13a6   : > { %v6856_v2 = vpop.f32.mrf.mxu0 }
0x13a7   : > { %v2672_v9 = vsel %vm2656_vm5, %v6856_v2, -inf }
0x1404   : > { %v1958_v19 = vpop.permute.xlu0 %1957 }
0x1405   : > { %1962 = vst.msk [vmem:[#allocation2 + $0x1c] sm:$0xf] %vm1738_vm4, %v1958_v19 }
0x1408   : > { %v1966_v58 = vpop.permute.xlu0 %1965  ;;  %v1956_v26 = vpop.permute.xlu1 %1955 }
0x1409   : > { %1961 = vst.msk [vmem:[#allocation2 + $0x18] sm:$0xf] %vm1738_vm4, %v1956_v26  ;;  %v1972_v57 = vsel %vm502_vm1, %v1966_v58, 0.0 }
0x140a   : > { %1973 = vadd.xlane.f32.xlu0 %v1972_v57 }
0x140c   : > { %v1964_v29 = vpop.permute.xlu1 %1963 }
0x140d   : > { %v1969_v3 = vsel %vm502_vm1, %v1964_v29, 0.0 }
0x140e   : > { %1970 = vadd.xlane.f32.xlu1 %v1969_v3 }
0x141f   : > { %1977 = vrot.lane.b32.xlu1 %v7817_v28, %s5365_s16  ;;  %v6858_v28 = vpop.f32.mrf.mxu0 }
0x1420   : > { %1975 = vrot.lane.b32.xlu0 %v7818_v6, %s5365_s16 }
0x1421   : > { %v6862_v6 = vpop.f32.mrf.mxu0 }
0x1422   : > { %v2963_v51 = vsel %vm2656_vm5, %v6862_v6, -inf }
0x1423   : > { %v6867_v16 = vpop.f32.mrf.mxu0 }
0x1424   : > { %v2972_v27 = vsel %vm2656_vm5, %v6867_v16, -inf }
0x1425   : > { %v6872_v54 = vpop.f32.mrf.mxu0 }
0x1426   : > { %v2966_v31 = vsel %vm2656_vm5, %v6872_v54, -inf }
0x1427   : > { %v6876_v25 = vpop.f32.mrf.mxu0 }
0x1428   : > { %v2981_v26 = vsel %vm2656_vm5, %v6876_v25, -inf }
0x1429   : > { %v6880_v34 = vpop.f32.mrf.mxu0 }
0x142a   : > { %v2975_v13 = vsel %vm2656_vm5, %v6880_v34, -inf }
0x142b   : > { %v6884_v30 = vpop.f32.mrf.mxu0 }
0x142c   : > { %v2984_v4 = vsel %vm2656_vm5, %v6884_v30, -inf }
0x142d   : > { %v6888_v37 = vpop.f32.mrf.mxu0 }
0x142e   : > { %v2978_v1 = vsel %vm2656_vm5, %v6888_v37, -inf }
0x142f   : > { %v6892_v18 = vpop.f32.mrf.mxu0 }
0x1431   : > { %v6898_v41 = vpop.f32.mrf.mxu0 }
0x1432   : > { %v3281_v3 = vsel %vm2656_vm5, %v6898_v41, -inf }
0x1433   : > { %v6902_v23 = vpop.f32.mrf.mxu0 }
0x1434   : > { %v3290_v29 = vsel %vm2656_vm5, %v6902_v23, -inf }
0x1435   : > { %v6906_v55 = vpop.f32.mrf.mxu0 }
0x1436   : > { %v3284_v58 = vsel %vm2656_vm5, %v6906_v55, -inf }
0x1437   : > { %v6908_v62 = vpop.f32.mrf.mxu0 }
0x1439   : > { %v6912_v63 = vpop.f32.mrf.mxu0 }
0x143b   : > { %v6916_v38 = vpop.f32.mrf.mxu0 }
0x143d   : > { %v6920_v5 = vpop.f32.mrf.mxu0 }
0x143f   : > { %v6924_v61 = vpop.f32.mrf.mxu0 }
0x1441   : > { %v6930_v19 = vpop.f32.mrf.mxu0 }
0x1443   : > { %v6936_v57 = vpop.f32.mrf.mxu0 }
0x1493   : > { %v6860_v22 = vpop.xlane.xlu0 %1973 }
0x1497   : > { %v1976_v35 = vpop.permute.xlu0 %1975  ;;  %v6864_v11 = vpop.xlane.xlu1 %1970 }
0x1498   : > { %v1981_v20 = vsel %vm502_vm1, %v1976_v35, 0.0  ;;  %v6942_v35 = vpop.f32.mrf.mxu0 }
0x1499   : > { %1982 = vadd.xlane.f32.xlu1 %v1981_v20  ;;  %v3296_v20 = vsel %vm2656_vm5, %v6920_v5, -inf }
0x149b   : > { %v1978_v60 = vpop.permute.xlu1 %1977 }
0x149c   : > { %v1984_v17 = vsel %vm502_vm1, %v1978_v60, 0.0  ;;  %v6946_v60 = vpop.f32.mrf.mxu0 }
0x149d   : > { %2658 = vmax.xlane.f32.xlu1 %v2657_v33  ;;  %1985 = vadd.xlane.f32.xlu0 %v1984_v17  ;;  %v3287_v33 = vsel %vm2656_vm5, %v6892_v18, -inf  ;;  %v3302_v17 = vsel %vm2656_vm5, %v6916_v38, -inf }
0x14a1   : > { %2661 = vmax.xlane.f32.xlu1 %v2660_v10  ;;  %v6952_v10 = vpop.f32.mrf.mxu0 }
0x14a5   : > { %2664 = vmax.xlane.f32.xlu1 %v2663_v12  ;;  %v3293_v12 = vsel %vm2656_vm5, %v6912_v63, -inf }
0x14a9   : > { %2667 = vmax.xlane.f32.xlu1 %v2666_v52  ;;  %v3602_v52 = vsel %vm2656_vm5, %v6942_v35, -inf }
0x14ad   : > { %2670 = vmax.xlane.f32.xlu1 %v2669_v59  ;;  %v6958_v59 = vpop.f32.mrf.mxu0 }
0x14b1   : > { %2673 = vmax.xlane.f32.xlu1 %v2672_v9  ;;  %v3299_v9 = vsel %vm2656_vm5, %v6908_v62, -inf }
0x14b3   : > { %1987 = vrot.lane.b32.xlu0 %v7820_v36, %s5365_s16  ;;  %v2969_v36 = vsel %vm2656_vm5, %v6858_v28, -inf }
0x14b5   : > { %2679 = vmax.xlane.f32.xlu1 %v2678_v50  ;;  %v3608_v50 = vsel %vm2656_vm5, %v6936_v57, -inf }
0x14b9   : > { %2964 = vmax.xlane.f32.xlu1 %v2963_v51  ;;  %v6964_v51 = vpop.f32.mrf.mxu0 }
0x14bd   : > { %2967 = vmax.xlane.f32.xlu1 %v2966_v31  ;;  %v3599_v31 = vsel %vm2656_vm5, %v6930_v19, -inf }
0x14c1   : > { %2970 = vmax.xlane.f32.xlu1 %v2969_v36  ;;  %v3614_v36 = vsel %vm2656_vm5, %v6964_v51, -inf }
0x14c5   : > { %2973 = vmax.xlane.f32.xlu1 %v2972_v27  ;;  %v3605_v27 = vsel %vm2656_vm5, %v6924_v61, -inf }
0x14c9   : > { %2976 = vmax.xlane.f32.xlu1 %v2975_v13  ;;  %v3620_v13 = vsel %vm2656_vm5, %v6958_v59, -inf }
0x14cd   : > { %2979 = vmax.xlane.f32.xlu1 %v2978_v1  ;;  %v3611_v1 = vsel %vm2656_vm5, %v6952_v10, -inf }
0x14d1   : > { %2985 = vmax.xlane.f32.xlu1 %v2984_v4  ;;  %v3617_v4 = vsel %vm2656_vm5, %v6946_v60, -inf }
0x14d2   : > { %2676 = vmax.xlane.f32.xlu0 %v2675_v7 }
0x14d5   : > { %3285 = vmax.xlane.f32.xlu1 %v3284_v58 }
0x14d6   : > { %2982 = vmax.xlane.f32.xlu0 %v2981_v26 }
0x14d9   : > { %3291 = vmax.xlane.f32.xlu1 %v3290_v29 }
0x14da   : > { %3282 = vmax.xlane.f32.xlu0 %v3281_v3 }
0x14dd   : > { %3297 = vmax.xlane.f32.xlu1 %v3296_v20 }
0x14de   : > { %3288 = vmax.xlane.f32.xlu0 %v3287_v33 }
0x14e1   : > { %3303 = vmax.xlane.f32.xlu1 %v3302_v17 }
0x14e2   : > { %3294 = vmax.xlane.f32.xlu0 %v3293_v12 }
0x14e5   : > { %3603 = vmax.xlane.f32.xlu1 %v3602_v52 }
0x14e6   : > { %3300 = vmax.xlane.f32.xlu0 %v3299_v9 }
0x14e9   : > { %3609 = vmax.xlane.f32.xlu1 %v3608_v50 }
0x14ea   : > { %3600 = vmax.xlane.f32.xlu0 %v3599_v31 }
0x14ed   : > { %3615 = vmax.xlane.f32.xlu1 %v3614_v36 }
0x14ee   : > { %3606 = vmax.xlane.f32.xlu0 %v3605_v27 }
0x14f1   : > { %3621 = vmax.xlane.f32.xlu1 %v3620_v13 }
0x14f2   : > { %3612 = vmax.xlane.f32.xlu0 %v3611_v1 }
0x14f6   : > { %3618 = vmax.xlane.f32.xlu0 %v3617_v4 }
0x150c   : > { %1989 = vrot.lane.b32.xlu0 %v7819_v56, %s5365_s16 }
0x1522   : > { %v6980_v7 = vpop.xlane.xlu1 %1982 }
0x1526   : > { %v2659_v58 = vpop.xlane.xlu1 %2658 }
0x1527   : > { %v2681_v26 = vsub.f32 %v6844_v21, %v2659_v58 }
0x1529   : > { %v2689_v29 = vmul.f32 1.442695, %v2681_v26 }
0x152a   : > { %v2662_v3 = vpop.xlane.xlu1 %2661 }
0x152b   : > { %5004 = vpow2.f32 %v2689_v29  ;;  %v2682_v20 = vsub.f32 %v6848_v15, %v2662_v3 }
0x152d   : > { %v2691_v33 = vmul.f32 1.442695, %v2682_v20 }
0x152e   : > { %v2665_v17 = vpop.xlane.xlu1 %2664 }
0x152f   : > { %5006 = vpow2.f32 %v2691_v33  ;;  %v2683_v12 = vsub.f32 %v6842_v39, %v2665_v17 }
0x1531   : > { %v2693_v52 = vmul.f32 1.442695, %v2683_v12 }
0x1532   : > { %v2668_v9 = vpop.xlane.xlu1 %2667 }
0x1533   : > { %5008 = vpow2.f32 %v2693_v52  ;;  %v2684_v56 = vsub.f32 %v6846_v14, %v2668_v9 }
0x1535   : > { %v2695_v50 = vmul.f32 1.442695, %v2684_v56 }
0x1536   : > { %v2671_v31 = vpop.xlane.xlu1 %2670 }
0x1537   : > { %5010 = vpow2.f32 %v2695_v50  ;;  %v2685_v21 = vsub.f32 %v6852_v24, %v2671_v31 }
0x1538   : > { %v6987_v36 = vpop.eup %5004 }
0x1539   : > { %v2697_v27 = vmul.f32 1.442695, %v2685_v21  ;;  %v2705_v15 = vsel %vm2656_vm5, %v6987_v36, 0.0 }
0x153a   : > { %2706 = vadd.xlane.f32.xlu1 %v2705_v15  ;;  %v2674_v13 = vpop.xlane.xlu1 %2673 }
0x153b   : > { %5012 = vpow2.f32 %v2697_v27  ;;  %v2686_v39 = vsub.f32 %v6856_v2, %v2674_v13 }
0x153c   : > { %v6992_v1 = vpop.eup %5006 }
0x153d   : > { %v2699_v4 = vmul.f32 1.442695, %v2686_v39  ;;  %v2708_v14 = vsel %vm2656_vm5, %v6992_v1, 0.0 }
0x153e   : > { %2709 = vadd.xlane.f32.xlu1 %v2708_v14  ;;  %v2680_v58 = vpop.xlane.xlu1 %2679 }
0x153f   : > { %5014 = vpow2.f32 %v2699_v4  ;;  %v2688_v24 = vsub.f32 %v6854_v40, %v2680_v58  ;;  %v7019_v4 = vpop.xlane.xlu0 %1985 }
0x1540   : > { %v6997_v26 = vpop.eup %5008 }
0x1541   : > { %v2703_v29 = vmul.f32 1.442695, %v2688_v24  ;;  %v2711_v3 = vsel %vm2656_vm5, %v6997_v26, 0.0 }
0x1542   : > { %2712 = vadd.xlane.f32.xlu1 %v2711_v3  ;;  %v2965_v20 = vpop.xlane.xlu1 %2964 }
0x1543   : > { %5016 = vpow2.f32 %v2703_v29  ;;  %v2987_v2 = vsub.f32 %v6862_v6, %v2965_v20 }
0x1544   : > { %v7002_v33 = vpop.eup %5010 }
0x1545   : > { %v2995_v17 = vmul.f32 1.442695, %v2987_v2  ;;  %v2714_v12 = vsel %vm2656_vm5, %v7002_v33, 0.0  ;;  %v7028_v2 = vpop.permute.xlu0 %1987 }
0x1546   : > { %2715 = vadd.xlane.f32.xlu1 %v2714_v12  ;;  %v2968_v52 = vpop.xlane.xlu1 %2967 }
0x1547   : > { %5018 = vpow2.f32 %v2995_v17  ;;  %v2988_v40 = vsub.f32 %v6872_v54, %v2968_v52 }
0x1548   : > { %v7007_v9 = vpop.eup %5012 }
0x1549   : > { %v2997_v56 = vmul.f32 1.442695, %v2988_v40  ;;  %v2717_v50 = vsel %vm2656_vm5, %v7007_v9, 0.0 }
0x154a   : > { %2718 = vadd.xlane.f32.xlu1 %v2717_v50  ;;  %v2971_v31 = vpop.xlane.xlu1 %2970 }
0x154b   : > { %5020 = vpow2.f32 %v2997_v56  ;;  %v2989_v6 = vsub.f32 %v6858_v28, %v2971_v31 }
0x154c   : > { %v7012_v21 = vpop.eup %5014 }
0x154d   : > { %v2999_v27 = vmul.f32 1.442695, %v2989_v6  ;;  %v2720_v15 = vsel %vm2656_vm5, %v7012_v21, 0.0 }
0x154e   : > { %2721 = vadd.xlane.f32.xlu1 %v2720_v15  ;;  %v2974_v13 = vpop.xlane.xlu1 %2973 }
0x154f   : > { %5022 = vpow2.f32 %v2999_v27  ;;  %v2990_v54 = vsub.f32 %v6867_v16, %v2974_v13 }
0x1550   : > { %v7017_v39 = vpop.eup %5016 }
0x1551   : > { %v3001_v14 = vmul.f32 1.442695, %v2990_v54  ;;  %v2726_v58 = vsel %vm2656_vm5, %v7017_v39, 0.0 }
0x1552   : > { %2727 = vadd.xlane.f32.xlu1 %v2726_v58  ;;  %v2977_v28 = vpop.xlane.xlu1 %2976 }
0x1553   : > { %5024 = vpow2.f32 %v3001_v14  ;;  %v2991_v24 = vsub.f32 %v6880_v34, %v2977_v28 }
0x1554   : > { %v7024_v29 = vpop.eup %5018 }
0x1555   : > { %v3003_v3 = vmul.f32 1.442695, %v2991_v24  ;;  %v3011_v20 = vsel %vm2656_vm5, %v7024_v29, 0.0 }
0x1556   : > { %3012 = vadd.xlane.f32.xlu1 %v3011_v20  ;;  %v2980_v16 = vpop.xlane.xlu1 %2979 }
0x1557   : > { %5026 = vpow2.f32 %v3003_v3  ;;  %v2992_v17 = vsub.f32 %v6888_v37, %v2980_v16 }
0x1558   : > { %v7031_v12 = vpop.eup %5020 }
0x1559   : > { %v3005_v52 = vmul.f32 1.442695, %v2992_v17  ;;  %v3014_v40 = vsel %vm2656_vm5, %v7031_v12, 0.0 }
0x155a   : > { %3015 = vadd.xlane.f32.xlu1 %v3014_v40  ;;  %v2986_v34 = vpop.xlane.xlu1 %2985 }
0x155b   : > { %5028 = vpow2.f32 %v3005_v52  ;;  %v2994_v56 = vsub.f32 %v6884_v30, %v2986_v34  ;;  %v2677_v50 = vpop.xlane.xlu0 %2676 }
0x155c   : > { %v7036_v31 = vpop.eup %5022  ;;  %v2687_v6 = vsub.f32 %v6850_v8, %v2677_v50 }
0x155d   : > { %v3017_v27 = vsel %vm2656_vm5, %v7036_v31, 0.0  ;;  %v3009_v37 = vmul.f32 1.442695, %v2994_v56 }
0x155e   : > { %v2701_v15 = vmul.f32 1.442695, %v2687_v6  ;;  %3018 = vadd.xlane.f32.xlu1 %v3017_v27  ;;  %v3286_v13 = vpop.xlane.xlu1 %3285 }
0x155f   : > { %v2983_v54 = vpop.xlane.xlu0 %2982  ;;  %v3306_v28 = vsub.f32 %v6906_v55, %v3286_v13 }
0x1560   : > { %v7041_v14 = vpop.eup %5024  ;;  %5030 = vpow2.f32 %v2701_v15  ;;  %v2993_v58 = vsub.f32 %v6876_v25, %v2983_v54 }
0x1561   : > { %v3020_v30 = vsel %vm2656_vm5, %v7041_v14, 0.0  ;;  %5032 = vpow2.f32 %v3009_v37  ;;  %v3315_v17 = vmul.f32 1.442695, %v3306_v28 }
0x1562   : > { %v3007_v8 = vmul.f32 1.442695, %v2993_v58  ;;  %3021 = vadd.xlane.f32.xlu1 %v3020_v30  ;;  %v3292_v52 = vpop.xlane.xlu1 %3291 }
0x1563   : > { %v3283_v24 = vpop.xlane.xlu0 %3282  ;;  %v3308_v56 = vsub.f32 %v6902_v23, %v3292_v52 }
0x1564   : > { %v7047_v3 = vpop.eup %5026  ;;  %5034 = vpow2.f32 %v3007_v8  ;;  %v3305_v20 = vsub.f32 %v6898_v41, %v3283_v24 }
0x1565   : > { %v3023_v16 = vsel %vm2656_vm5, %v7047_v3, 0.0  ;;  %v3319_v37 = vmul.f32 1.442695, %v3308_v56 }
0x1566   : > { %v3313_v25 = vmul.f32 1.442695, %v3305_v20  ;;  %3024 = vadd.xlane.f32.xlu1 %v3023_v16  ;;  %v3298_v15 = vpop.xlane.xlu1 %3297 }
0x1567   : > { %v3289_v40 = vpop.xlane.xlu0 %3288 }
0x1568   : > { %v7052_v34 = vpop.eup %5028  ;;  %5036 = vpow2.f32 %v3313_v25  ;;  %v3307_v55 = vsub.f32 %v6892_v18, %v3289_v40 }
0x1569   : > { %v3026_v50 = vsel %vm2656_vm5, %v7052_v34, 0.0  ;;  %5038 = vpow2.f32 %v3315_v17 }
0x156a   : > { %v3317_v41 = vmul.f32 1.442695, %v3307_v55  ;;  %3027 = vadd.xlane.f32.xlu1 %v3026_v50 }
0x156b   : > { %v3295_v6 = vpop.xlane.xlu0 %3294 }
0x156c   : > { %5040 = vpow2.f32 %v3317_v41  ;;  %v3309_v13 = vsub.f32 %v6912_v63, %v3295_v6  ;;  %v3304_v63 = vpop.xlane.xlu1 %3303  ;;  %v7092_v6 = vld [vmem:[%s6542_s30] sm:$0xff]   ;;  %s4125_s30 = sshll.u32 %s7570_s2, 4  ;;  %s7593_s30 = int_to_ptr.vmem [resolvable:$true] %s4125_s30 }
0x156d   : > { %v7058_v27 = vpop.eup %5030  ;;  %5042 = vpow2.f32 %v3319_v37  ;;  %v3312_v16 = vsub.f32 %v6916_v38, %v3304_v63  ;;  %p5278_p2 = scmp.lt.s32.totalorder %s7593_s30, %s5276_s17 }
0x156e   : > { %v2723_v54 = vsel %vm2656_vm5, %v7058_v27, 0.0  ;;  %v7063_v18 = vpop.eup %5032  ;;  %v3321_v30 = vmul.f32 1.442695, %v3309_v13 }
0x156f   : > { %2724 = vadd.xlane.f32.xlu0 %v2723_v54  ;;  %v3301_v23 = vpop.xlane.xlu0 %3300  ;;  %v3032_v24 = vsel %vm2656_vm5, %v7063_v18, 0.0  ;;  %v3327_v25 = vmul.f32 1.442695, %v3312_v16 }
0x1570   : > { %v3311_v28 = vsub.f32 %v6908_v62, %v3301_v23  ;;  %5044 = vpow2.f32 %v3321_v30 }
0x1571   : > { %v7065_v58 = vpop.eup %5034 }
0x1572   : > { %v3029_v8 = vsel %vm2656_vm5, %v7065_v58, 0.0  ;;  %v3325_v17 = vmul.f32 1.442695, %v3311_v28 }
0x1573   : > { %3030 = vadd.xlane.f32.xlu1 %v3029_v8  ;;  %3033 = vadd.xlane.f32.xlu0 %v3032_v24  ;;  %v3601_v30 = vpop.xlane.xlu0 %3600  ;;  %v3310_v8 = vsub.f32 %v6920_v5, %v3298_v15  ;;  %v3604_v24 = vpop.xlane.xlu1 %3603 }
0x1574   : > { %5046 = vpow2.f32 %v3325_v17  ;;  %v3624_v16 = vsub.f32 %v6942_v35, %v3604_v24 }
0x1575   : > { %v7072_v20 = vpop.eup %5036  ;;  %5048 = vpow2.f32 %v3327_v25  ;;  %v3323_v63 = vmul.f32 1.442695, %v3310_v8 }
0x1576   : > { %v3329_v52 = vsel %vm2656_vm5, %v7072_v20, 0.0  ;;  %v7077_v62 = vpop.eup %5038 }
0x1577   : > { %3330 = vadd.xlane.f32.xlu0 %v3329_v52  ;;  %v3332_v40 = vsel %vm2656_vm5, %v7077_v62, 0.0  ;;  %v3607_v17 = vpop.xlane.xlu0 %3606  ;;  %5050 = vpow2.f32 %v3323_v63  ;;  %v3633_v52 = vmul.f32 1.442695, %v3624_v16 }
0x1578   : > { %v3625_v25 = vsub.f32 %v6924_v61, %v3607_v17 }
0x1579   : > { %v7081_v55 = vpop.eup %5040  ;;  %5052 = vpow2.f32 %v3633_v52 }
0x157a   : > { %v7083_v56 = vpop.eup %5042  ;;  %v3335_v38 = vsel %vm2656_vm5, %v7081_v55, 0.0 }
0x157b   : > { %3333 = vadd.xlane.f32.xlu0 %v3332_v40  ;;  %v3338_v50 = vsel %vm2656_vm5, %v7083_v56, 0.0  ;;  %v3610_v40 = vpop.xlane.xlu1 %3609 }
0x157d   : > { %v7089_v41 = vpop.eup %5044 }
0x157e   : > { %v3341_v37 = vsel %vm2656_vm5, %v7089_v41, 0.0 }
0x157f   : > { %3336 = vadd.xlane.f32.xlu0 %v3335_v38  ;;  %v3626_v38 = vsub.f32 %v6936_v57, %v3610_v40  ;;  %v3616_v15 = vpop.xlane.xlu1 %3615 }
0x1581   : > { %v7098_v13 = vpop.eup %5046 }
0x1582   : > { %v3347_v54 = vsel %vm2656_vm5, %v7098_v13, 0.0  ;;  %v7102_v23 = vpop.eup %5048 }
0x1583   : > { %3339 = vadd.xlane.f32.xlu0 %v3338_v50  ;;  %v3350_v28 = vsel %vm2656_vm5, %v7102_v23, 0.0  ;;  %v3635_v50 = vmul.f32 1.442695, %v3625_v25 }
0x1584   : > { %2749 = vrot.lane.b32.xlu1 %v7092_v6, %s5361_s9  ;;  %v7112_v8 = vpop.eup %5050  ;;  %s5367_s9 = smov 104  }
0x1585   : > { %5054 = vpow2.f32 %v3635_v50  ;;  %v3344_v63 = vsel %vm2656_vm5, %v7112_v8, 0.0 }
0x1586   : > { %v7118_v16 = vpop.eup %5052 }
0x1587   : > { %3342 = vadd.xlane.f32.xlu0 %v3341_v37  ;;  %v3613_v37 = vpop.xlane.xlu0 %3612  ;;  %v3650_v25 = vsel %vm2656_vm5, %v7118_v16, 0.0 }
0x1588   : > { %v3627_v5 = vsub.f32 %v6952_v10, %v3613_v37  ;;  %v3622_v10 = vpop.xlane.xlu1 %3621 }
0x1589   : > { %v3630_v17 = vsub.f32 %v6958_v59, %v3622_v10 }
0x158a   : > { %v3639_v35 = vmul.f32 1.442695, %v3627_v5 }
0x158b   : > { %3348 = vadd.xlane.f32.xlu0 %v3347_v54  ;;  %v3637_v54 = vmul.f32 1.442695, %v3626_v38  ;;  %v3619_v24 = vpop.xlane.xlu0 %3618  ;;  %v3645_v38 = vmul.f32 1.442695, %v3630_v17 }
0x158c   : > { %v3629_v57 = vsub.f32 %v6946_v60, %v3619_v24 }
0x158d   : > { %5056 = vpow2.f32 %v3637_v54 }
0x158e   : > { %5058 = vpow2.f32 %v3639_v35  ;;  %v3643_v52 = vmul.f32 1.442695, %v3629_v57 }
0x158f   : > { %3351 = vadd.xlane.f32.xlu0 %v3350_v28  ;;  %v3628_v28 = vsub.f32 %v6964_v51, %v3616_v15  ;;  %v3623_v51 = vsub.f32 %v6930_v19, %v3601_v30 }
0x1591   : > { %v3641_v61 = vmul.f32 1.442695, %v3628_v28  ;;  %v3631_v60 = vmul.f32 1.442695, %v3623_v51 }
0x1592   : > { %v7124_v40 = vpop.eup %5054 }
0x1593   : > { %5060 = vpow2.f32 %v3641_v61  ;;  %v3653_v50 = vsel %vm2656_vm5, %v7124_v40, 0.0 }
0x1594   : > { %5062 = vpow2.f32 %v3643_v52 }
0x1595   : > { %5064 = vpow2.f32 %v3631_v60 }
0x1596   : > { %5066 = vpow2.f32 %v3645_v38 }
0x159a   : > { %v7128_v37 = vpop.eup %5056 }
0x159b   : > { %v3656_v19 = vsel %vm2656_vm5, %v7128_v37, 0.0  ;;  %v7132_v59 = vpop.eup %5058 }
0x159c   : > { %v3659_v30 = vsel %vm2656_vm5, %v7132_v59, 0.0 }
0x15a0   : > { %v7136_v54 = vpop.eup %5060 }
0x15a1   : > { %v3662_v5 = vsel %vm2656_vm5, %v7136_v54, 0.0  ;;  %v7140_v15 = vpop.eup %5062 }
0x15a2   : > { %v7142_v28 = vpop.eup %5064  ;;  %v3665_v35 = vsel %vm2656_vm5, %v7140_v15, 0.0 }
0x15a3   : > { %v7146_v24 = vpop.eup %5066  ;;  %v3647_v57 = vsel %vm2656_vm5, %v7142_v28, 0.0 }
0x15a5   : > { %3055 = vrot.lane.b32.xlu0 %v7092_v6, %s5366_s21 }
0x15a8   : > { %3345 = vadd.xlane.f32.xlu1 %v3344_v63  ;;  %v3668_v63 = vsel %vm2656_vm5, %v7146_v24, 0.0 }
0x15ac   : > { %3651 = vadd.xlane.f32.xlu1 %v3650_v25 }
0x15b0   : > { %3654 = vadd.xlane.f32.xlu1 %v3653_v50 }
0x15b4   : > { %3657 = vadd.xlane.f32.xlu1 %v3656_v19 }
0x15b8   : > { %3660 = vadd.xlane.f32.xlu1 %v3659_v30 }
0x15bc   : > { %3663 = vadd.xlane.f32.xlu1 %v3662_v5 }
0x15c0   : > { %3666 = vadd.xlane.f32.xlu1 %v3665_v35 }
0x15c3   : > { %v2707_v61 = vpop.xlane.xlu1 %2706 }
0x15c4   : > { %3648 = vadd.xlane.f32.xlu0 %v3647_v57  ;;  %3669 = vadd.xlane.f32.xlu1 %v3668_v63  ;;  %5068 = vrcp.f32 %v2707_v61  ;;  %v7840_v63 = vld [vmem:[#allocation44_spill] sm:$0xff] }
0x15c7   : > { %v2710_v10 = vpop.xlane.xlu1 %2709 }
0x15c8   : > { %5070 = vrcp.f32 %v2710_v10 }
0x15cb   : > { %v2713_v51 = vpop.xlane.xlu1 %2712 }
0x15cf   : > { %v2716_v17 = vpop.xlane.xlu1 %2715 }
0x15d0   : > { %5072 = vrcp.f32 %v2716_v17 }
0x15d1   : > { %v5069_v52 = vpop.eup %5068 }
0x15d2   : > { %v2737_v38 = vmul.f32 %v5069_v52, %v6987_v36 }
0x15d3   : > { %v2719_v25 = vpop.xlane.xlu1 %2718 }
0x15d5   : > { %v5071_v60 = vpop.eup %5070  ;;  %3373 = vrot.lane.b32.xlu1 %v7092_v6, %s5367_s9  ;;  %s7589_s9 = scalar_lea.hbm %s7651_s7, %s4467_s28 }
0x15d6   : > { %v2738_v50 = vmul.f32 %v5071_v60, %v6992_v1  ;;  %v7838_v1 = vld [vmem:[#allocation28_spill] sm:$0xff]  ;;  %v1993_v60 = vsel %vm502_vm1, %v7028_v2, 0.0 }
0x15d7   : > { %v2722_v19 = vpop.xlane.xlu1 %2721 }
0x15d8   : > { %v2745_v30 = vpack.c.bf16 %v2738_v50, %v2737_v38  ;;  %5074 = vrcp.f32 %v2722_v19 }
0x15d9   : > { %5076 = vrcp.f32 %v2713_v51  ;;  %v7842_v51 = vld [vmem:[#allocation33_spill] sm:$0xff] }
0x15da   : > { %3691 = vrot.lane.b32.xlu0 %v7092_v6, %s5368_s11  ;;  %4566 = vmatprep.mubr.msk.bf16.mxu1 %vm2656_vm5, %v2745_v30  ;;  %v7839_v6 = vld [vmem:[#allocation43_spill] sm:$0xff]  ;;  %5078 = vrcp.f32 %v2719_v25  ;;  %v7843_v30 = vld [vmem:[#allocation36_spill] sm:$0xff]  ;;  %s5271_s11 = scalar_lea.vmem %s7593_s30, 512 }
0x15db   : > { %v2728_v5 = vpop.xlane.xlu1 %2727  ;;  %p5272_p8 = scmp.ne.s32.totalorder %s7593_s30, %s5271_s11 }
0x15dc   : > { %5080 = vrcp.f32 %v2728_v5 }
0x15dd   : > { %v5073_v17 = vpop.eup %5072  ;;  %p5273_p12 = pnand %p5272_p8, %p5504_p13 }
0x15de   : > { %2011 = vrot.lane.b32.xlu0 %v7824_v53, %s5365_s16 }
0x15df   : > { %v3013_v35 = vpop.xlane.xlu1 %3012  ;;  %p5274_p0 = pneg %p5273_p12 }
0x15e2   : > { %2013 = vrot.lane.b32.xlu0 %v7823_v32, %s5365_s16  ;;  %v7169_v32 = vpop.permute.xlu0 %1989 }
0x15e3   : > { %v3016_v61 = vpop.xlane.xlu1 %3015 }
0x15e4   : > { %5082 = vrcp.f32 %v3016_v61  ;;  %v2740_v61 = vmul.f32 %v5073_v17, %v7002_v33  ;;  %v7845_v17 = vld [vmem:[#allocation31_spill] sm:$0xff] }
0x15e5   : > { %v5075_v50 = vpop.eup %5074 }
0x15e6   : > { %2023 = vrot.lane.b32.xlu0 %v7826_v0, %s5365_s16  ;;  %v7841_v0 = vld [vmem:[#allocation34_spill] sm:$0xff]  ;;  %v5077_v19 = vpop.eup %5076  ;;  %v2742_v2 = vmul.f32 %v5075_v50, %v7012_v21 }
0x15e7   : > { %v3019_v36 = vpop.xlane.xlu1 %3018  ;;  %v5079_v5 = vpop.eup %5078 }
0x15ea   : > { %2025 = vrot.lane.b32.xlu0 %v7838_v1, %s5365_s16 }
0x15eb   : > { %v3022_v57 = vpop.xlane.xlu1 %3021 }
0x15ee   : > { %2035 = vrot.lane.b32.xlu0 %v7839_v6, %s5365_s16 }
0x15ef   : > { %v3025_v53 = vpop.xlane.xlu1 %3024 }
0x15f2   : > { %2037 = vrot.lane.b32.xlu0 %v7840_v63, %s5365_s16  ;;  %v2739_v63 = vmul.f32 %v5077_v19, %v6997_v26 }
0x15f3   : > { %v3028_v10 = vpop.xlane.xlu1 %3027 }
0x15f6   : > { %1999 = vrot.lane.b32.xlu0 %v7841_v0, %s5365_s16  ;;  %v2741_v0 = vmul.f32 %v5079_v5, %v7007_v9  ;;  %v7846_v5 = vld [vmem:[#allocation20_spill] sm:$0xff] }
0x15f8   : > { %v2725_v52 = vpop.xlane.xlu0 %2724 }
0x15f9   : > { %5084 = vrcp.f32 %v2725_v52  ;;  %1994 = vadd.xlane.f32.xlu1 %v1993_v60  ;;  %v2746_v52 = vpack.c.bf16 %v2740_v61, %v2739_v63  ;;  %v5081_v60 = vpop.eup %5080  ;;  %v7847_v61 = vld [vmem:[#allocation35_spill] sm:$0xff] }
0x15fa   : > { %2001 = vrot.lane.b32.xlu0 %v7842_v51, %s5365_s16  ;;  %5086 = vrcp.f32 %v3013_v35  ;;  %v7844_v35 = vld [vmem:[#allocation25_spill] sm:$0xff]  ;;  %v5083_v48 = vpop.eup %5082  ;;  %v2744_v9 = vmul.f32 %v5081_v60, %v7017_v39  ;;  %v7848_v39 = vld [vmem:[#allocation27_spill] sm:$0xff] }
0x15fb   : > { %v3044_v19 = vmul.f32 %v5083_v48, %v7031_v12  ;;  %5088 = vrcp.f32 %v3022_v57  ;;  %v7849_v48 = vld [vmem:[#allocation24_spill] sm:$0xff]  ;;  %v7854_v60 = vld [vmem:[#allocation47_spill] sm:$0xff] }
0x15fc   : > { %v3034_v25 = vpop.xlane.xlu0 %3033  ;;  %v3031_v38 = vpop.xlane.xlu1 %3030  ;;  %5090 = vrcp.f32 %v3028_v10  ;;  %v7853_v10 = vld [vmem:[#allocation26_spill] sm:$0xff] }
0x15fd   : > { %5092 = vrcp.f32 %v3019_v36  ;;  %v7852_v36 = vld [vmem:[#allocation45_spill] sm:$0xff] }
0x15fe   : > { %2049 = vrot.lane.b32.xlu0 %v7843_v30, %s5365_s16  ;;  %v2747_v30 = vpack.c.bf16 %v2742_v2, %v2741_v0  ;;  %5094 = vrcp.f32 %v3025_v53 }
0x15ff   : > { %5096 = vrcp.f32 %v3034_v25 }
0x1600   : > { %v3331_v1 = vpop.xlane.xlu0 %3330  ;;  %v2750_v6 = vpop.permute.xlu1 %2749  ;;  %5098 = vrcp.f32 %v3031_v38 }
0x1601   : > { %4564 = vmatprep.subr.bf16.mxu1 %v2750_v6 }
0x1602   : > { %2059 = vrot.lane.b32.xlu0 %v7844_v35, %s5365_s16  ;;  %4565 = vmatpush3.bf16.msra.mxu1 %v2750_v6  ;;  %v7850_v35 = vld [vmem:[#allocation21_spill] sm:$0xff] }
0x1604   : > { %v3334_v51 = vpop.xlane.xlu0 %3333 }
0x1605   : > { %4567 = vmatmul.mubr.msk.bf16.vlgmr.msra.gmra.mxu1 %vm2656_vm5, %v2746_v52  ;;  %5100 = vrcp.f32 %v3334_v51 }
0x1606   : > { %v5085_v33 = vpop.eup %5084  ;;  %2061 = vrot.lane.b32.xlu0 %v7845_v17, %s5365_s16  ;;  %4570 = vmatprep.mubr.msk.bf16.mxu1 %vm2656_vm5, %v2747_v30  ;;  %5102 = vrcp.f32 %v3331_v1  ;;  %v7855_v30 = vld [vmem:[#allocation46_spill] sm:$0xff]  ;;  %v7856_v1 = vld [vmem:[#allocation37_spill] sm:$0xff] }
0x1607   : > { %v2743_v26 = vmul.f32 %v5085_v33, %v7058_v27  ;;  %v5087_v21 = vpop.eup %5086 }
0x1608   : > { %v7190_v50 = vpop.xlane.xlu0 %3336  ;;  %v3043_v2 = vmul.f32 %v5087_v21, %v7024_v29  ;;  %v7851_v29 = vld [vmem:[#allocation32_spill] sm:$0xff]  ;;  %v5089_v0 = vpop.eup %5088 }
0x1609   : > { %v2748_v6 = vpack.c.bf16 %v2744_v9, %v2743_v26  ;;  %v5091_v52 = vpop.eup %5090  ;;  %v3046_v51 = vmul.f32 %v5089_v0, %v7041_v14  ;;  %v7857_v21 = vld [vmem:[#allocation48_spill] sm:$0xff] }
0x160a   : > { %2071 = vrot.lane.b32.xlu0 %v7846_v5, %s5365_s16  ;;  %2047 = vrot.lane.b32.xlu1 %v7847_v61, %s5365_s16  ;;  %v3051_v27 = vpack.c.bf16 %v3044_v19, %v3043_v2  ;;  %v5093_v25 = vpop.eup %5092  ;;  %v3048_v17 = vmul.f32 %v5091_v52, %v7052_v34  ;;  %v7858_v34 = vld [vmem:[#allocation39_spill] sm:$0xff] }
0x160b   : > { %v5095_v38 = vpop.eup %5094  ;;  %v3045_v26 = vmul.f32 %v5093_v25, %v7036_v31  ;;  %v7859_v31 = vld [vmem:[#allocation38_spill] sm:$0xff] }
0x160c   : > { %v3340_v63 = vpop.xlane.xlu0 %3339  ;;  %v3047_v9 = vmul.f32 %v5095_v38, %v7047_v3  ;;  %v5097_v19 = vpop.eup %5096 }
0x160d   : > { %4571 = vmatmul.mubr.msk.bf16.gmra.mxu1 %vm2656_vm5, %v2748_v6  ;;  %v3052_v5 = vpack.c.bf16 %v3046_v51, %v3045_v26  ;;  %v5099_v61 = vpop.eup %5098  ;;  %v3050_v3 = vmul.f32 %v5097_v19, %v7063_v18  ;;  %5104 = vrcp.f32 %v3340_v63 }
0x160e   : > { %2107 = vrot.lane.b32.xlu0 %v7848_v39, %s5365_s16  ;;  %2073 = vrot.lane.b32.xlu1 %v7849_v48, %s5365_s16  ;;  %v3053_v6 = vpack.c.bf16 %v3048_v17, %v3047_v9  ;;  %v7860_v48 = vld [vmem:[#allocation40_spill] sm:$0xff] }
0x160f   : > { %4586 = vmatprep.mubr.msk.bf16.mxu1 %vm2656_vm5, %v3051_v27  ;;  %v3049_v27 = vmul.f32 %v5099_v61, %v7065_v58 }
0x1610   : > { %v3343_v12 = vpop.xlane.xlu0 %3342 }
0x1612   : > { %2119 = vrot.lane.b32.xlu0 %v7850_v35, %s5365_s16  ;;  %2109 = vrot.lane.b32.xlu1 %v7851_v29, %s5365_s16  ;;  %v5101_v14 = vpop.eup %5100  ;;  %v3054_v29 = vpack.c.bf16 %v3050_v3, %v3049_v27 }
0x1613   : > { %v5103_v2 = vpop.eup %5102  ;;  %v3362_v39 = vmul.f32 %v5101_v14, %v7077_v62 }
0x1614   : > { %v3349_v57 = vpop.xlane.xlu0 %3348  ;;  %v3361_v35 = vmul.f32 %v5103_v2, %v7072_v20 }
0x1616   : > { %2083 = vrot.lane.b32.xlu0 %v7852_v36, %s5365_s16  ;;  %2121 = vrot.lane.b32.xlu1 %v7853_v10, %s5365_s16  ;;  %v3369_v36 = vpack.c.bf16 %v3362_v39, %v3361_v35 }
0x1618   : > { %v3352_v53 = vpop.xlane.xlu0 %3351 }
0x161a   : > { %2131 = vrot.lane.b32.xlu0 %v7854_v60, %s5365_s16  ;;  %2085 = vrot.lane.b32.xlu1 %v7855_v30, %s5365_s16  ;;  %v5105_v20 = vpop.eup %5104 }
0x161b   : > { %v3364_v17 = vmul.f32 %v5105_v20, %v7083_v56 }
0x161c   : > { %v3056_v33 = vpop.permute.xlu0 %3055 }
0x161d   : > { %4584 = vmatprep.subr.bf16.mxu1 %v3056_v33 }
0x161e   : > { %2095 = vrot.lane.b32.xlu0 %v7856_v1, %s5365_s16  ;;  %2133 = vrot.lane.b32.xlu1 %v7857_v21, %s5365_s16 }
0x161f   : > { %4585 = vmatpush3.bf16.msra.mxu1 %v3056_v33 }
0x1622   : > { %4587 = vmatmul.mubr.msk.bf16.vlgmr.msra.gmra.mxu1 %vm2656_vm5, %v3052_v5  ;;  %2143 = vrot.lane.b32.xlu0 %v7858_v34, %s5365_s16 }
0x1623   : > { %2097 = vrot.lane.b32.xlu1 %v7859_v31, %s5365_s16  ;;  %4590 = vmatprep.mubr.msk.bf16.mxu1 %vm2656_vm5, %v3053_v6 }
0x1627   : > { %2145 = vrot.lane.b32.xlu1 %v7860_v48, %s5365_s16 }
0x162a   : > { %4591 = vmatmul.mubr.msk.bf16.gmra.mxu1 %vm2656_vm5, %v3054_v29 }
0x162b   : > { %4606 = vmatprep.mubr.msk.bf16.mxu1 %vm2656_vm5, %v3369_v36 }
0x1631   : > { %v3346_v10 = vpop.xlane.xlu1 %3345 }
0x1632   : > { %5106 = vrcp.f32 %v3346_v10 }
0x1633   : > { %5108 = vrcp.f32 %v7190_v50 }
0x1634   : > { %5110 = vrcp.f32 %v3343_v12 }
0x1635   : > { %v3652_v0 = vpop.xlane.xlu1 %3651  ;;  %5112 = vrcp.f32 %v3352_v53 }
0x1636   : > { %5114 = vrcp.f32 %v3349_v57 }
0x1637   : > { %5116 = vrcp.f32 %v3652_v0 }
0x1639   : > { %v3655_v52 = vpop.xlane.xlu1 %3654 }
0x163d   : > { %v3658_v60 = vpop.xlane.xlu1 %3657 }
0x163f   : > { %v5107_v38 = vpop.eup %5106 }
0x1640   : > { %v5109_v51 = vpop.eup %5108  ;;  %v3366_v50 = vmul.f32 %v5107_v38, %v7112_v8 }
0x1641   : > { %v3661_v18 = vpop.xlane.xlu1 %3660  ;;  %v5111_v33 = vpop.eup %5110  ;;  %v3363_v12 = vmul.f32 %v5109_v51, %v7081_v55 }
0x1642   : > { %v3365_v57 = vmul.f32 %v5111_v33, %v7089_v41  ;;  %v5113_v1 = vpop.eup %5112 }
0x1643   : > { %v3370_v53 = vpack.c.bf16 %v3364_v17, %v3363_v12  ;;  %v5115_v19 = vpop.eup %5114  ;;  %v3368_v55 = vmul.f32 %v5113_v1, %v7102_v23 }
0x1644   : > { %v3371_v9 = vpack.c.bf16 %v3366_v50, %v3365_v57  ;;  %v5117_v8 = vpop.eup %5116  ;;  %v3367_v61 = vmul.f32 %v5115_v19, %v7098_v13 }
0x1645   : > { %v3664_v58 = vpop.xlane.xlu1 %3663  ;;  %v3680_v31 = vmul.f32 %v5117_v8, %v7118_v16 }
0x1646   : > { %v3372_v14 = vpack.c.bf16 %v3368_v55, %v3367_v61 }
0x1649   : > { %v3667_v62 = vpop.xlane.xlu1 %3666 }
0x164d   : > { %v3649_v30 = vpop.xlane.xlu0 %3648  ;;  %v3670_v25 = vpop.xlane.xlu1 %3669 }
0x164e   : > { %5118 = vrcp.f32 %v3649_v30 }
0x164f   : > { %5120 = vrcp.f32 %v3658_v60 }
0x1650   : > { %5122 = vrcp.f32 %v3655_v52 }
0x1651   : > { %v3692_v63 = vpop.permute.xlu0 %3691  ;;  %v3374_v26 = vpop.permute.xlu1 %3373  ;;  %5124 = vrcp.f32 %v3664_v58 }
0x1652   : > { %4604 = vmatprep.subr.bf16.mxu1 %v3374_v26  ;;  %5126 = vrcp.f32 %v3661_v18 }
0x1653   : > { %4605 = vmatpush3.bf16.msra.mxu1 %v3374_v26  ;;  %5128 = vrcp.f32 %v3670_v25 }
0x1654   : > { %4624 = vmatprep.subr.bf16.mxu1 %v3692_v63  ;;  %5130 = vrcp.f32 %v3667_v62 }
0x1655   : > { %v2012_v21 = vpop.permute.xlu0 %2011 }
0x1656   : > { %v2017_v56 = vsel %vm502_vm1, %v2012_v21, 0.0  ;;  %4607 = vmatmul.mubr.msk.bf16.vlgmr.msra.gmra.mxu1 %vm2656_vm5, %v3370_v53 }
0x1657   : > { %2018 = vadd.xlane.f32.xlu0 %v2017_v56  ;;  %4610 = vmatprep.mubr.msk.bf16.mxu1 %vm2656_vm5, %v3371_v9 }
0x1658   : > { %4625 = vmatpush3.bf16.msra.mxu1 %v3692_v63 }
0x1659   : > { %v2014_v41 = vpop.permute.xlu0 %2013 }
0x165a   : > { %v2020_v5 = vsel %vm502_vm1, %v2014_v41, 0.0 }
0x165b   : > { %v5119_v6 = vpop.eup %5118  ;;  %2021 = vadd.xlane.f32.xlu1 %v2020_v5 }
0x165c   : > { %v3679_v34 = vmul.f32 %v5119_v6, %v7142_v28  ;;  %v5121_v2 = vpop.eup %5120 }
0x165d   : > { %v2024_v27 = vpop.permute.xlu0 %2023  ;;  %v5123_v3 = vpop.eup %5122  ;;  %v3682_v35 = vmul.f32 %v5121_v2, %v7128_v37  ;;  %v1996_v37 = vsel %vm502_vm1, %v7169_v32, 0.0 }
0x165e   : > { %v2029_v23 = vsel %vm502_vm1, %v2024_v27, 0.0  ;;  %4611 = vmatmul.mubr.msk.bf16.gmra.mxu1 %vm2656_vm5, %v3372_v14  ;;  %v3687_v39 = vpack.c.bf16 %v3680_v31, %v3679_v34  ;;  %v5125_v48 = vpop.eup %5124  ;;  %v3681_v28 = vmul.f32 %v5123_v3, %v7124_v40 }
0x165f   : > { %2030 = vadd.xlane.f32.xlu0 %v2029_v23  ;;  %v5127_v13 = vpop.eup %5126  ;;  %v3684_v36 = vmul.f32 %v5125_v48, %v7136_v54 }
0x1660   : > { %4626 = vmatprep.mubr.msk.bf16.mxu1 %vm2656_vm5, %v3687_v39  ;;  %v3688_v10 = vpack.c.bf16 %v3682_v35, %v3681_v28  ;;  %v3683_v0 = vmul.f32 %v5127_v13, %v7132_v59  ;;  %v5129_v52 = vpop.eup %5128 }
0x1661   : > { %v2026_v29 = vpop.permute.xlu0 %2025  ;;  %v5131_v62 = vpop.eup %5130  ;;  %v3686_v40 = vmul.f32 %v5129_v52, %v7146_v24 }
0x1662   : > { %v2032_v16 = vsel %vm502_vm1, %v2026_v29, 0.0  ;;  %v3689_v58 = vpack.c.bf16 %v3684_v36, %v3683_v0  ;;  %v3685_v20 = vmul.f32 %v5131_v62, %v7140_v15 }
0x1663   : > { %2033 = vadd.xlane.f32.xlu0 %v2032_v16 }
0x1664   : > { %v3690_v30 = vpack.c.bf16 %v3686_v40, %v3685_v20 }
0x1665   : > { %v2036_v60 = vpop.permute.xlu0 %2035 }
0x1666   : > { %v2041_v18 = vsel %vm502_vm1, %v2036_v60, 0.0  ;;  %4627 = vmatmul.mubr.msk.bf16.vlgmr.msra.gmra.mxu1 %vm2656_vm5, %v3688_v10 }
0x1667   : > { %1997 = vadd.xlane.f32.xlu0 %v1996_v37  ;;  %2042 = vadd.xlane.f32.xlu1 %v2041_v18 }
0x1668   : > { %4630 = vmatprep.mubr.msk.bf16.mxu1 %vm2656_vm5, %v3689_v58 }
0x1669   : > { %v2038_v54 = vpop.permute.xlu0 %2037 }
0x166a   : > { %v2044_v59 = vsel %vm502_vm1, %v2038_v54, 0.0 }
0x166b   : > { %2045 = vadd.xlane.f32.xlu0 %v2044_v59 }
0x166d   : > { %v2000_v25 = vpop.permute.xlu0 %1999 }
0x166e   : > { %v2005_v38 = vsel %vm502_vm1, %v2000_v25, 0.0  ;;  %4631 = vmatmul.mubr.msk.bf16.gmra.mxu1 %vm2656_vm5, %v3690_v30 }
0x166f   : > { %2006 = vadd.xlane.f32.xlu1 %v2005_v38 }
0x1671   : > { %v2002_v32 = vpop.permute.xlu0 %2001 }
0x1672   : > { %v2008_v51 = vsel %vm502_vm1, %v2002_v32, 0.0 }
0x1673   : > { %2009 = vadd.xlane.f32.xlu0 %v2008_v51 }
0x1675   : > { %v2050_v33 = vpop.permute.xlu0 %2049 }
0x1676   : > { %v2056_v24 = vsel %vm502_vm1, %v2050_v33, 0.0 }
0x1677   : > { %2057 = vadd.xlane.f32.xlu0 %v2056_v24 }
0x1679   : > { %v2060_v17 = vpop.permute.xlu0 %2059 }
0x167a   : > { %v2065_v21 = vsel %vm502_vm1, %v2060_v17, 0.0 }
0x167d   : > { %v2062_v63 = vpop.permute.xlu0 %2061 }
0x167e   : > { %v2068_v15 = vsel %vm502_vm1, %v2062_v63, 0.0 }
0x167f   : > { %2069 = vadd.xlane.f32.xlu0 %v2068_v15 }
0x1681   : > { %v2072_v26 = vpop.permute.xlu0 %2071 }
0x1682   : > { %v7273_v50 = vpop.xlane.xlu1 %1994  ;;  %v2077_v55 = vsel %vm502_vm1, %v2072_v26, 0.0 }
0x1685   : > { %v2108_v12 = vpop.permute.xlu0 %2107 }
0x1686   : > { %v2048_v57 = vpop.permute.xlu1 %2047  ;;  %v2113_v61 = vsel %vm502_vm1, %v2108_v12, 0.0  ;;  %v2155_v12 = vmax.f32 %v6864_v11, %v6980_v7 }
0x1687   : > { %v2053_v53 = vsel %vm502_vm1, %v2048_v57, 0.0 }
0x1688   : > { %2054 = vadd.xlane.f32.xlu1 %v2053_v53  ;;  %v2157_v57 = vmax.f32 %v2155_v12, %v7273_v50  ;;  %v2156_v53 = vmax.f32 %v6860_v22, %v7019_v4 }
0x1689   : > { %v2120_v56 = vpop.permute.xlu0 %2119 }
0x168a   : > { %v2074_v1 = vpop.permute.xlu1 %2073  ;;  %v2125_v34 = vsel %vm502_vm1, %v2120_v56, 0.0 }
0x168b   : > { %v2080_v9 = vsel %vm502_vm1, %v2074_v1, 0.0 }
0x168c   : > { %2066 = vadd.xlane.f32.xlu1 %v2065_v21  ;;  %2081 = vadd.xlane.f32.xlu0 %v2080_v9 }
0x168d   : > { %v2084_v41 = vpop.permute.xlu0 %2083 }
0x168e   : > { %v2110_v19 = vpop.permute.xlu1 %2109  ;;  %v2089_v3 = vsel %vm502_vm1, %v2084_v41, 0.0 }
0x168f   : > { %v2116_v8 = vsel %vm502_vm1, %v2110_v19, 0.0 }
0x1690   : > { %2078 = vadd.xlane.f32.xlu1 %v2077_v55  ;;  %2117 = vadd.xlane.f32.xlu0 %v2116_v8 }
0x1691   : > { %v2132_v2 = vpop.permute.xlu0 %2131 }
0x1692   : > { %v2122_v5 = vpop.permute.xlu1 %2121  ;;  %v2137_v35 = vsel %vm502_vm1, %v2132_v2, 0.0 }
0x1693   : > { %v2128_v6 = vsel %vm502_vm1, %v2122_v5, 0.0 }
0x1694   : > { %2114 = vadd.xlane.f32.xlu1 %v2113_v61  ;;  %2129 = vadd.xlane.f32.xlu0 %v2128_v6 }
0x1695   : > { %v2096_v39 = vpop.permute.xlu0 %2095 }
0x1696   : > { %v2086_v14 = vpop.permute.xlu1 %2085  ;;  %v2101_v28 = vsel %vm502_vm1, %v2096_v39, 0.0 }
0x1697   : > { %v2092_v31 = vsel %vm502_vm1, %v2086_v14, 0.0 }
0x1698   : > { %2126 = vadd.xlane.f32.xlu1 %v2125_v34  ;;  %2093 = vadd.xlane.f32.xlu0 %v2092_v31 }
0x1699   : > { %v2144_v36 = vpop.permute.xlu0 %2143 }
0x169a   : > { %v2134_v27 = vpop.permute.xlu1 %2133  ;;  %v2149_v10 = vsel %vm502_vm1, %v2144_v36, 0.0 }
0x169b   : > { %v2140_v23 = vsel %vm502_vm1, %v2134_v27, 0.0 }
0x169c   : > { %2090 = vadd.xlane.f32.xlu1 %v2089_v3  ;;  %2141 = vadd.xlane.f32.xlu0 %v2140_v23 }
0x169e   : > { %v2098_v48 = vpop.permute.xlu1 %2097 }
0x169f   : > { %v2104_v13 = vsel %vm502_vm1, %v2098_v48, 0.0 }
0x16a0   : > { %2138 = vadd.xlane.f32.xlu1 %v2137_v35  ;;  %2105 = vadd.xlane.f32.xlu0 %v2104_v13 }
0x16a2   : > { %v2146_v29 = vpop.permute.xlu1 %2145 }
0x16a3   : > { %v2152_v16 = vsel %vm502_vm1, %v2146_v29, 0.0 }
0x16a4   : > { %2102 = vadd.xlane.f32.xlu1 %v2101_v28  ;;  %2153 = vadd.xlane.f32.xlu0 %v2152_v16 }
0x16a8   : > { %2150 = vadd.xlane.f32.xlu1 %v2149_v10 }
0x16c5   : > { %v4568_v0 = vpop.f32.mrf.mxu1 }
0x16c6   : > { %v4429_v52 = vpack.c.bf16 %v4568_v0, %v4568_v0 }
0x16c7   : > { %v2798_v60 = vpop.f32.mrf.mxu1 }
0x16c8   : > { %2863 = vst.msk [vmem:[#allocation3 + $0x8] sm:$0xf] %vm725_vm2, %v4429_v52  ;;  %v4427_v18 = vpack.c.bf16 %v2798_v60, %v2798_v60 }
0x16c9   : > { %v4569_v37 = vpop.f32.mrf.mxu1 }
0x16ca   : > { %2861 = vst.msk [vmem:[#allocation3] sm:$0xf] %vm725_vm2, %v4427_v18  ;;  %v4430_v58 = vpack.c.bf16 %v4569_v37, %v4569_v37 }
0x16cb   : > { %v2801_v62 = vpop.f32.mrf.mxu1 }
0x16cc   : > { %2864 = vst.msk [vmem:[#allocation3 + $0xc] sm:$0xf] %vm725_vm2, %v4430_v58  ;;  %v4428_v40 = vpack.c.bf16 %v2801_v62, %v2801_v62 }
0x16cd   : > { %v4572_v54 = vpop.f32.mrf.mxu1 }
0x16ce   : > { %2862 = vst.msk [vmem:[#allocation3 + $0x4] sm:$0xf] %vm725_vm2, %v4428_v40  ;;  %v4433_v59 = vpack.c.bf16 %v4572_v54, %v4572_v54 }
0x16cf   : > { %v2814_v20 = vpop.f32.mrf.mxu1 }
0x16d0   : > { %2867 = vst.msk [vmem:[#allocation3 + $0x18] sm:$0xf] %vm725_vm2, %v4433_v59  ;;  %v4431_v30 = vpack.c.bf16 %v2814_v20, %v2814_v20 }
0x16d1   : > { %v4573_v25 = vpop.f32.mrf.mxu1 }
0x16d2   : > { %2865 = vst.msk [vmem:[#allocation3 + $0x10] sm:$0xf] %vm725_vm2, %v4431_v30  ;;  %v4434_v38 = vpack.c.bf16 %v4573_v25, %v4573_v25 }
0x16d3   : > { %v2817_v32 = vpop.f32.mrf.mxu1 }
0x16d4   : > { %2868 = vst.msk [vmem:[#allocation3 + $0x1c] sm:$0xf] %vm725_vm2, %v4434_v38  ;;  %v4432_v51 = vpack.c.bf16 %v2817_v32, %v2817_v32 }
0x16d6   : > { %2866 = vst.msk [vmem:[#allocation3 + $0x14] sm:$0xf] %vm725_vm2, %v4432_v51 }
0x16e0   : > { %v7299_v33 = vpop.xlane.xlu0 %2018 }
0x16e4   : > { %v2022_v63 = vpop.xlane.xlu1 %2021 }
0x16e8   : > { %v7301_v24 = vpop.xlane.xlu0 %2030 }
0x16e9   : > { %v2230_v58 = vmax.f32 %v7299_v33, %v7301_v24 }
0x16ec   : > { %v2034_v17 = vpop.xlane.xlu0 %2033 }
0x16ed   : > { %v2231_v31 = vmax.f32 %v2022_v63, %v2034_v17 }
0x16f0   : > { %v1998_v15 = vpop.xlane.xlu0 %1997  ;;  %v7303_v26 = vpop.xlane.xlu1 %2042 }
0x16f1   : > { %v2158_v56 = vmax.f32 %v2156_v53, %v1998_v15  ;;  %v2232_v59 = vmax.f32 %v2230_v58, %v7303_v26 }
0x16f4   : > { %v2046_v1 = vpop.xlane.xlu0 %2045 }
0x16f5   : > { %v2233_v39 = vmax.f32 %v2231_v31, %v2046_v1 }
0x16f8   : > { %v2007_v21 = vpop.xlane.xlu1 %2006 }
0x16f9   : > { %v2159_v9 = vmax.f32 %v2157_v57, %v2007_v21 }
0x16fb   : > { %v2161_v19 = vsub.f32 %v6864_v11, %v2159_v9  ;;  %v2167_v55 = vsub.f32 %v6980_v7, %v2159_v9  ;;  %v2173_v8 = vsub.f32 %v7273_v50, %v2159_v9  ;;  %v2179_v41 = vsub.f32 %v2007_v21, %v2159_v9 }
0x16fc   : > { %v2010_v5 = vpop.xlane.xlu0 %2009 }
0x16fd   : > { %v2163_v61 = vmul.f32 1.442695, %v2161_v19  ;;  %v2169_v6 = vmul.f32 1.442695, %v2167_v55  ;;  %v2175_v14 = vmul.f32 1.442695, %v2173_v8  ;;  %v2160_v34 = vmax.f32 %v2158_v56, %v2010_v5 }
0x16fe   : > { %v2181_v2 = vmul.f32 1.442695, %v2179_v41 }
0x16ff   : > { %5132 = vpow2.f32 %v2163_v61  ;;  %v2162_v27 = vsub.f32 %v6860_v22, %v2160_v34  ;;  %v2168_v3 = vsub.f32 %v7019_v4, %v2160_v34  ;;  %v2174_v23 = vsub.f32 %v1998_v15, %v2160_v34 }
0x1700   : > { %5134 = vpow2.f32 %v2169_v6  ;;  %v2180_v11 = vsub.f32 %v2010_v5, %v2160_v34  ;;  %v2058_v7 = vpop.xlane.xlu0 %2057 }
0x1701   : > { %5136 = vpow2.f32 %v2175_v14  ;;  %v2165_v50 = vmul.f32 1.442695, %v2162_v27  ;;  %v2171_v48 = vmul.f32 1.442695, %v2168_v3  ;;  %v2177_v35 = vmul.f32 1.442695, %v2174_v23 }
0x1702   : > { %5138 = vpow2.f32 %v2181_v2  ;;  %v2235_v13 = vmax.f32 %v2233_v39, %v2058_v7  ;;  %v2183_v29 = vmul.f32 1.442695, %v2180_v11 }
0x1703   : > { %5140 = vpow2.f32 %v2165_v50 }
0x1704   : > { %5142 = vpow2.f32 %v2171_v48  ;;  %v2237_v28 = vsub.f32 %v2022_v63, %v2235_v13  ;;  %v2243_v16 = vsub.f32 %v2034_v17, %v2235_v13  ;;  %v2249_v36 = vsub.f32 %v2046_v1, %v2235_v13 }
0x1705   : > { %5144 = vpow2.f32 %v2177_v35  ;;  %v2255_v0 = vsub.f32 %v2058_v7, %v2235_v13 }
0x1706   : > { %v2240_v22 = vmul.f32 1.442695, %v2237_v28  ;;  %v2246_v4 = vmul.f32 1.442695, %v2243_v16  ;;  %5146 = vpow2.f32 %v2183_v29  ;;  %v2252_v10 = vmul.f32 1.442695, %v2249_v36 }
0x1707   : > { %v2258_v60 = vmul.f32 1.442695, %v2255_v0 }
0x1708   : > { %5148 = vpow2.f32 %v2240_v22  ;;  %v7318_v25 = vpop.xlane.xlu0 %2069 }
0x1709   : > { %5150 = vpow2.f32 %v2246_v4 }
0x170a   : > { %5152 = vpow2.f32 %v2252_v10 }
0x170b   : > { %5154 = vpow2.f32 %v2258_v60 }
0x170c   : > { %v5133_v52 = vpop.eup %5132 }
0x170d   : > { %v5135_v18 = vpop.eup %5134 }
0x170e   : > { %v5137_v37 = vpop.eup %5136  ;;  %v2185_v62 = vadd.f32 %v5135_v18, %v5133_v52 }
0x170f   : > { %v5139_v40 = vpop.eup %5138 }
0x1710   : > { %v5141_v54 = vpop.eup %5140  ;;  %v2187_v20 = vadd.f32 %v5137_v37, %v2185_v62 }
0x1711   : > { %v5143_v30 = vpop.eup %5142  ;;  %v2055_v38 = vpop.xlane.xlu1 %2054 }
0x1712   : > { %v2189_v32 = vadd.f32 %v5139_v40, %v2187_v20  ;;  %v2186_v51 = vadd.f32 %v5143_v30, %v5141_v54  ;;  %v2234_v17 = vmax.f32 %v2232_v59, %v2055_v38  ;;  %v5145_v63 = vpop.eup %5144 }
0x1713   : > { %v7320_v15 = vpop.eup %5146 }
0x1714   : > { %5156 = vrcp.f32 %v2189_v32  ;;  %v2188_v12 = vadd.f32 %v5145_v63, %v2186_v51  ;;  %v2236_v57 = vsub.f32 %v7299_v33, %v2234_v17  ;;  %v2242_v53 = vsub.f32 %v7301_v24, %v2234_v17 }
0x1715   : > { %v7324_v1 = vpop.eup %5148  ;;  %v2248_v21 = vsub.f32 %v7303_v26, %v2234_v17  ;;  %v7327_v9 = vpop.xlane.xlu0 %2081  ;;  %v2254_v5 = vsub.f32 %v2055_v38, %v2234_v17 }
0x1716   : > { %v7329_v56 = vpop.xlane.xlu1 %2066  ;;  %v7331_v19 = vpop.eup %5150  ;;  %v2190_v55 = vadd.f32 %v7320_v15, %v2188_v12  ;;  %v2238_v8 = vmul.f32 1.442695, %v2236_v57  ;;  %v2244_v41 = vmul.f32 1.442695, %v2242_v53  ;;  %v2305_v16 = vmax.f32 %v7318_v25, %v7327_v9 }
0x1717   : > { %v2261_v33 = vadd.f32 %v7331_v19, %v7324_v1  ;;  %v2250_v24 = vmul.f32 1.442695, %v2248_v21  ;;  %v7336_v61 = vpop.eup %5152  ;;  %v2256_v34 = vmul.f32 1.442695, %v2254_v5 }
0x1718   : > { %5158 = vrcp.f32 %v2190_v55  ;;  %v7343_v31 = vpop.eup %5154 }
0x1719   : > { %5160 = vpow2.f32 %v2238_v8  ;;  %v7338_v26 = vpop.xlane.xlu0 %2117  ;;  %v2263_v14 = vadd.f32 %v7336_v61, %v2261_v33 }
0x171a   : > { %v7340_v6 = vpop.xlane.xlu1 %2078  ;;  %5162 = vpow2.f32 %v2244_v41 }
0x171b   : > { %5164 = vpow2.f32 %v2250_v24  ;;  %v2265_v3 = vadd.f32 %v7343_v31, %v2263_v14  ;;  %v2304_v32 = vmax.f32 %v7329_v56, %v7340_v6 }
0x171c   : > { %5166 = vpow2.f32 %v2256_v34 }
0x171d   : > { %v7345_v2 = vpop.xlane.xlu0 %2129  ;;  %5168 = vrcp.f32 %v2265_v3 }
0x171e   : > { %v7347_v27 = vpop.xlane.xlu1 %2114 }
0x1721   : > { %v5157_v23 = vpop.eup %5156  ;;  %v2094_v39 = vpop.xlane.xlu0 %2093 }
0x1722   : > { %v7350_v11 = vpop.xlane.xlu1 %2126  ;;  %v2193_v7 = vmul.f32 %v5157_v23, %v5133_v52  ;;  %v2197_v50 = vmul.f32 %v5157_v23, %v5135_v18  ;;  %v2203_v48 = vmul.f32 %v5157_v23, %v5137_v37  ;;  %v2209_v29 = vmul.f32 %v5157_v23, %v5139_v40 }
0x1723   : > { %v2307_v18 = vmax.f32 %v2305_v16, %v2094_v39  ;;  %v2378_v55 = vmax.f32 %v7347_v27, %v7350_v11 }
0x1724   : > { %v2195_v35 = vmul.f32 %v2193_v7, %v5571_v43  ;;  %v2199_v13 = vmul.f32 %v5567_v42, %v2197_v50  ;;  %v2205_v0 = vmul.f32 %v2203_v48, %v5585_v47  ;;  %v2211_v59 = vmul.f32 %v5581_v46, %v2209_v29  ;;  %v7861_v29 = vld [vmem:[#allocation16_spill] sm:$0xff] }
0x1725   : > { %v5159_v28 = vpop.eup %5158  ;;  %v7356_v36 = vpop.xlane.xlu0 %2141 }
0x1726   : > { %v7358_v22 = vpop.xlane.xlu1 %2090  ;;  %v7360_v4 = vpop.eup %5160  ;;  %v2201_v10 = vadd.f32 %v2199_v13, %v2195_v35  ;;  %v2194_v52 = vmul.f32 %v5159_v28, %v5141_v54  ;;  %v2198_v37 = vmul.f32 %v5159_v28, %v5143_v30  ;;  %v2204_v58 = vmul.f32 %v5159_v28, %v5145_v63 }
0x1727   : > { %v7363_v60 = vpop.eup %5162  ;;  %v2379_v54 = vmax.f32 %v7338_v26, %v7345_v2  ;;  %v2210_v53 = vmul.f32 %v5159_v28, %v7320_v15  ;;  %v2306_v3 = vmax.f32 %v2304_v32, %v7358_v22 }
0x1728   : > { %v2260_v62 = vadd.f32 %v7363_v60, %v7360_v4  ;;  %v2207_v40 = vadd.f32 %v2205_v0, %v2201_v10  ;;  %v2196_v20 = vmul.f32 %v2194_v52, %v5579_v45  ;;  %v7369_v38 = vpop.eup %5164  ;;  %v2200_v30 = vmul.f32 %v5573_v44, %v2198_v37 }
0x1729   : > { %v2106_v51 = vpop.xlane.xlu0 %2105  ;;  %v7380_v21 = vpop.eup %5166  ;;  %v2381_v8 = vmax.f32 %v2379_v54, %v7356_v36  ;;  %v2206_v5 = vmul.f32 %v2204_v58, %v5593_v49  ;;  %v2212_v28 = vmul.f32 %v7861_v29, %v2210_v53 }
0x172a   : > { %v7375_v17 = vpop.xlane.xlu1 %2138  ;;  %v2262_v63 = vadd.f32 %v7369_v38, %v2260_v62  ;;  %v2309_v12 = vmax.f32 %v2307_v18, %v2106_v51  ;;  %v2213_v57 = vadd.f32 %v2211_v59, %v2207_v40  ;;  %v2202_v41 = vadd.f32 %v2200_v30, %v2196_v20  ;;  %v7391_v16 = vpop.eup %5168 }
0x172b   : > { %v7395_v18 = vpop.f32.mrf.mxu1  ;;  %v2269_v32 = vmul.f32 %v7391_v16, %v7324_v1 }
0x172c   : > { %v2264_v33 = vadd.f32 %v7380_v21, %v2262_v63  ;;  %v2311_v24 = vsub.f32 %v7318_v25, %v2309_v12  ;;  %v2317_v14 = vsub.f32 %v7327_v9, %v2309_v12  ;;  %v2323_v34 = vsub.f32 %v2094_v39, %v2309_v12 }
0x172d   : > { %v2329_v15 = vsub.f32 %v2106_v51, %v2309_v12  ;;  %v2154_v23 = vpop.xlane.xlu0 %2153  ;;  %v4419_v7 = vpack.c.bf16 %v2213_v57, %v2213_v57  ;;  %v2208_v48 = vadd.f32 %v2206_v5, %v2202_v41  ;;  %v2380_v39 = vmax.f32 %v2378_v55, %v7375_v17 }
0x172e   : > { %v2103_v50 = vpop.xlane.xlu1 %2102  ;;  %5170 = vrcp.f32 %v2264_v33  ;;  %v2314_v35 = vmul.f32 1.442695, %v2311_v24  ;;  %v2320_v13 = vmul.f32 1.442695, %v2317_v14  ;;  %v2326_v10 = vmul.f32 1.442695, %v2323_v34 }
0x172f   : > { %v2383_v0 = vmax.f32 %v2381_v8, %v2154_v23  ;;  %2221 = vrot.lane.b32.xlu1 %v4419_v7, %s5363_s12  ;;  %v2308_v25 = vmax.f32 %v2306_v3, %v2103_v50  ;;  %v2332_v9 = vmul.f32 1.442695, %v2329_v15  ;;  %v2214_v52 = vadd.f32 %v2212_v28, %v2208_v48 }
0x1730   : > { %5172 = vpow2.f32 %v2314_v35  ;;  %v2271_v24 = vmul.f32 %v2269_v32, %v5579_v45 }
0x1731   : > { %5174 = vpow2.f32 %v2320_v13  ;;  %v2385_v37 = vsub.f32 %v7338_v26, %v2383_v0  ;;  %v2391_v58 = vsub.f32 %v7345_v2, %v2383_v0  ;;  %v2397_v62 = vsub.f32 %v7356_v36, %v2383_v0  ;;  %v7407_v36 = vpop.f32.mrf.mxu1 }
0x1732   : > { %v2403_v40 = vsub.f32 %v2154_v23, %v2383_v0  ;;  %v2310_v59 = vsub.f32 %v7329_v56, %v2308_v25  ;;  %v2316_v20 = vsub.f32 %v7340_v6, %v2308_v25  ;;  %5176 = vpow2.f32 %v2326_v10  ;;  %v2151_v63 = vpop.xlane.xlu1 %2150 }
0x1733   : > { %v2388_v54 = vmul.f32 1.442695, %v2385_v37  ;;  %v2394_v51 = vmul.f32 1.442695, %v2391_v58  ;;  %v2400_v30 = vmul.f32 1.442695, %v2397_v62  ;;  %5178 = vpow2.f32 %v2332_v9  ;;  %v7413_v5 = vpop.f32.mrf.mxu1 }
0x1734   : > { %v2406_v12 = vmul.f32 1.442695, %v2403_v40  ;;  %v2322_v26 = vsub.f32 %v7358_v22, %v2308_v25  ;;  %v2273_v2 = vmul.f32 %v7391_v16, %v7331_v19  ;;  %v2312_v56 = vmul.f32 1.442695, %v2310_v59 }
0x1735   : > { %5180 = vpow2.f32 %v2388_v54  ;;  %v2328_v6 = vsub.f32 %v2103_v50, %v2308_v25  ;;  %v4420_v57 = vpack.c.bf16 %v2214_v52, %v2214_v52  ;;  %v2318_v1 = vmul.f32 1.442695, %v2316_v20  ;;  %v7424_v48 = vpop.f32.mrf.mxu1 }
0x1736   : > { %5182 = vpow2.f32 %v2394_v51  ;;  %v2382_v53 = vmax.f32 %v2380_v39, %v2151_v63  ;;  %v2324_v55 = vmul.f32 1.442695, %v2322_v26  ;;  %v2275_v14 = vmul.f32 %v5573_v44, %v2273_v2 }
0x1737   : > { %5184 = vpow2.f32 %v2400_v30  ;;  %v2330_v8 = vmul.f32 1.442695, %v2328_v6  ;;  %2223 = vrot.lane.b32.xlu0 %v4420_v57, %s5363_s12  ;;  %v7437_v58 = vpop.f32.mrf.mxu1 }
0x1738   : > { %5186 = vpow2.f32 %v2406_v12  ;;  %v2384_v22 = vsub.f32 %v7347_v27, %v2382_v53  ;;  %v2390_v41 = vsub.f32 %v7350_v11, %v2382_v53  ;;  %v2396_v19 = vsub.f32 %v7375_v17, %v2382_v53 }
0x1739   : > { %5188 = vpow2.f32 %v2312_v56  ;;  %v2402_v33 = vsub.f32 %v2151_v63, %v2382_v53  ;;  %v2279_v27 = vmul.f32 %v7391_v16, %v7336_v61  ;;  %v2277_v13 = vadd.f32 %v2275_v14, %v2271_v24  ;;  %v7441_v12 = vpop.f32.mrf.mxu1 }
0x173a   : > { %5190 = vpow2.f32 %v2318_v1  ;;  %v2386_v34 = vmul.f32 1.442695, %v2384_v22  ;;  %v2392_v3 = vmul.f32 1.442695, %v2390_v41  ;;  %v2398_v23 = vmul.f32 1.442695, %v2396_v19 }
0x173b   : > { %v5171_v15 = vpop.eup %5170  ;;  %5192 = vpow2.f32 %v2324_v55  ;;  %v2404_v35 = vmul.f32 1.442695, %v2402_v33  ;;  %v2281_v52 = vmul.f32 %v2279_v27, %v5593_v49  ;;  %v7444_v22 = vpop.f32.mrf.mxu1 }
0x173c   : > { %5194 = vpow2.f32 %v2330_v8  ;;  %v2268_v11 = vmul.f32 %v5171_v15, %v7360_v4  ;;  %v2272_v17 = vmul.f32 %v5171_v15, %v7363_v60  ;;  %v2278_v7 = vmul.f32 %v5171_v15, %v7369_v38  ;;  %v4751_v38 = vld [vmem:[%s7648_s4] sm:$0xff]  }
0x173d   : > { %v7422_v50 = vpop.eup %5172  ;;  %5196 = vpow2.f32 %v2386_v34  ;;  %v2284_v0 = vmul.f32 %v5171_v15, %v7380_v21  ;;  %v2285_v60 = vmul.f32 %v7391_v16, %v7343_v31  ;;  %4644 = vmatprep.subr.bf16.mxu1 %v4751_v38  ;;  %v2283_v16 = vadd.f32 %v2281_v52, %v2277_v13  ;;  %v7447_v15 = vpop.f32.mrf.mxu1 }
0x173e   : > { %v5175_v28 = vpop.eup %5174  ;;  %5198 = vpow2.f32 %v2392_v3  ;;  %v2270_v10 = vmul.f32 %v2268_v11, %v5571_v43  ;;  %v2274_v61 = vmul.f32 %v5567_v42, %v2272_v17  ;;  %v2280_v39 = vmul.f32 %v2278_v7, %v5585_v47  ;;  %4645 = vmatpush3.bf16.msra.mxu1 %v4751_v38 }
0x173f   : > { %v2335_v4 = vadd.f32 %v5175_v28, %v7422_v50  ;;  %v5177_v25 = vpop.eup %5176  ;;  %5200 = vpow2.f32 %v2398_v23  ;;  %v2286_v31 = vmul.f32 %v5581_v46, %v2284_v0  ;;  %v2287_v30 = vmul.f32 %v7861_v29, %v2285_v60  ;;  %v7449_v11 = vpop.f32.mrf.mxu1 }
0x1740   : > { %v2276_v9 = vadd.f32 %v2274_v61, %v2270_v10  ;;  %v5179_v37 = vpop.eup %5178  ;;  %5202 = vpow2.f32 %v2404_v35 }
0x1741   : > { %v2337_v21 = vadd.f32 %v5177_v25, %v2335_v4  ;;  %v2289_v6 = vadd.f32 %v2287_v30, %v2283_v16  ;;  %v7451_v35 = vpop.f32.mrf.mxu1 }
0x1742   : > { %v5181_v62 = vpop.eup %5180  ;;  %v2282_v40 = vadd.f32 %v2280_v39, %v2276_v9 }
0x1743   : > { %v5183_v59 = vpop.eup %5182  ;;  %v2339_v20 = vadd.f32 %v5179_v37, %v2337_v21  ;;  %v4422_v33 = vpack.c.bf16 %v2289_v6, %v2289_v6  ;;  %v7456_v9 = vpop.f32.mrf.mxu1 }
0x1744   : > { %v5185_v32 = vpop.eup %5184  ;;  %v2409_v54 = vadd.f32 %v5183_v59, %v5181_v62  ;;  %v2288_v51 = vadd.f32 %v2286_v31, %v2282_v40 }
0x1745   : > { %v5187_v63 = vpop.eup %5186  ;;  %5204 = vrcp.f32 %v2339_v20 }
0x1746   : > { %v5189_v26 = vpop.eup %5188  ;;  %v2411_v2 = vadd.f32 %v5185_v32, %v2409_v54  ;;  %v4421_v56 = vpack.c.bf16 %v2288_v51, %v2288_v51  ;;  %v3425_v51 = vpop.f32.mrf.mxu1 }
0x1747   : > { %v5191_v57 = vpop.eup %5190 }
0x1748   : > { %v5193_v1 = vpop.eup %5192  ;;  %v2413_v53 = vadd.f32 %v5187_v63, %v2411_v2  ;;  %v2334_v55 = vadd.f32 %v5191_v57, %v5189_v26  ;;  %2296 = vrot.lane.b32.xlu1 %v4421_v56, %s5363_s12 }
0x1749   : > { %v5195_v8 = vpop.eup %5194 }
0x174a   : > { %v5197_v41 = vpop.eup %5196  ;;  %5206 = vrcp.f32 %v2413_v53  ;;  %v2336_v19 = vadd.f32 %v5193_v1, %v2334_v55 }
0x174b   : > { %v5199_v24 = vpop.eup %5198 }
0x174c   : > { %v2338_v14 = vadd.f32 %v5195_v8, %v2336_v19  ;;  %v2408_v34 = vadd.f32 %v5199_v24, %v5197_v41  ;;  %2298 = vrot.lane.b32.xlu1 %v4422_v33, %s5363_s12  ;;  %v5201_v3 = vpop.eup %5200 }
0x174d   : > { %v5203_v27 = vpop.eup %5202 }
0x174e   : > { %5208 = vrcp.f32 %v2338_v14  ;;  %v2410_v23 = vadd.f32 %v5201_v3, %v2408_v34 }
0x1750   : > { %v2412_v17 = vadd.f32 %v5203_v27, %v2410_v23 }
0x1752   : > { %v5205_v7 = vpop.eup %5204  ;;  %5210 = vrcp.f32 %v2412_v17 }
0x1753   : > { %v2343_v13 = vmul.f32 %v5205_v7, %v7422_v50  ;;  %v2347_v10 = vmul.f32 %v5205_v7, %v5175_v28  ;;  %v2353_v61 = vmul.f32 %v5205_v7, %v5177_v25  ;;  %v2359_v60 = vmul.f32 %v5205_v7, %v5179_v37 }
0x1755   : > { %v2345_v0 = vmul.f32 %v2343_v13, %v5579_v45  ;;  %v2349_v4 = vmul.f32 %v5573_v44, %v2347_v10  ;;  %v2355_v52 = vmul.f32 %v2353_v61, %v5593_v49  ;;  %v2361_v20 = vmul.f32 %v7861_v29, %v2359_v60 }
0x1757   : > { %v5207_v38 = vpop.eup %5206  ;;  %v2351_v39 = vadd.f32 %v2349_v4, %v2345_v0 }
0x1758   : > { %v2417_v21 = vmul.f32 %v5207_v38, %v5181_v62  ;;  %v2421_v40 = vmul.f32 %v5207_v38, %v5183_v59  ;;  %v2427_v31 = vmul.f32 %v5207_v38, %v5185_v32  ;;  %v2433_v25 = vmul.f32 %v5207_v38, %v5187_v63  ;;  %v7466_v63 = vpop.f32.mrf.mxu1 }
0x1759   : > { %v2357_v16 = vadd.f32 %v2355_v52, %v2351_v39  ;;  %v4442_v39 = vpack.c.bf16 %v7444_v22, %v7444_v22  ;;  %v4446_v22 = vpack.c.bf16 %v7456_v9, %v7456_v9 }
0x175a   : > { %v2419_v50 = vmul.f32 %v2417_v21, %v5579_v45  ;;  %v2423_v28 = vmul.f32 %v5573_v44, %v2421_v40  ;;  %v2429_v30 = vmul.f32 %v2427_v31, %v5593_v49  ;;  %v2435_v55 = vmul.f32 %v7861_v29, %v2433_v25  ;;  %v7473_v13 = vpop.f32.mrf.mxu1 }
0x175b   : > { %v5209_v54 = vpop.eup %5208  ;;  %v2363_v37 = vadd.f32 %v2361_v20, %v2357_v16  ;;  %v4755_v20 = vld [vmem:[%s7649_s5] sm:$0xff]  }
0x175c   : > { %v2425_v2 = vadd.f32 %v2423_v28, %v2419_v50  ;;  %v2342_v56 = vmul.f32 %v5209_v54, %v5189_v26  ;;  %v2346_v6 = vmul.f32 %v5209_v54, %v5191_v57  ;;  %v2352_v53 = vmul.f32 %v5209_v54, %v5193_v1  ;;  %v4613_v4 = vpop.f32.mrf.mxu1  ;;  %4634 = vmatprep.subr.bf16.mxu0 %v4755_v20 }
0x175d   : > { %v4424_v62 = vpack.c.bf16 %v2363_v37, %v2363_v37  ;;  %v2358_v59 = vmul.f32 %v5209_v54, %v5195_v8  ;;  %4635 = vmatpush3.bf16.msra.mxu0 %v4755_v20  ;;  %v4450_v54 = vpack.c.bf16 %v4613_v4, %v4613_v4 }
0x175e   : > { %v2431_v32 = vadd.f32 %v2429_v30, %v2425_v2  ;;  %v2344_v19 = vmul.f32 %v2342_v56, %v5571_v43  ;;  %v2348_v45 = vmul.f32 %v5567_v42, %v2346_v6  ;;  %v2354_v49 = vmul.f32 %v2352_v53, %v5585_v47  ;;  %v3441_v38 = vpop.f32.mrf.mxu1 }
0x175f   : > { %v5211_v44 = vpop.eup %5210  ;;  %2372 = vrot.lane.b32.xlu0 %v4424_v62, %s5363_s12  ;;  %v2360_v8 = vmul.f32 %v5581_v46, %v2358_v59  ;;  %v4449_v2 = vpack.c.bf16 %v7466_v63, %v7466_v63 }
0x1760   : > { %v2437_v33 = vadd.f32 %v2435_v55, %v2431_v32  ;;  %v2350_v26 = vadd.f32 %v2348_v45, %v2344_v19  ;;  %v2416_v57 = vmul.f32 %v5211_v44, %v5197_v41  ;;  %v2420_v1 = vmul.f32 %v5211_v44, %v5199_v24 }
0x1761   : > { %v2426_v14 = vmul.f32 %v5211_v44, %v5201_v3  ;;  %v2432_v34 = vmul.f32 %v5211_v44, %v5203_v27  ;;  %v4436_v41 = vpack.c.bf16 %v7424_v48, %v7424_v48  ;;  %v4628_v48 = vpop.f32.mrf.mxu1 }
0x1762   : > { %v4426_v29 = vpack.c.bf16 %v2437_v33, %v2437_v33  ;;  %v2356_v23 = vadd.f32 %v2354_v49, %v2350_v26  ;;  %v2418_v17 = vmul.f32 %v2416_v57, %v5571_v43  ;;  %v2422_v7 = vmul.f32 %v5567_v42, %v2420_v1 }
0x1763   : > { %v2428_v0 = vmul.f32 %v2426_v14, %v5585_v47  ;;  %v2434_v27 = vmul.f32 %v5581_v46, %v2432_v34  ;;  %v4438_v43 = vpack.c.bf16 %v7413_v5, %v7413_v5  ;;  %v4435_v47 = vpack.c.bf16 %v7407_v36, %v7407_v36  ;;  %v3740_v52 = vpop.f32.mrf.mxu1 }
0x1764   : > { %2446 = vrot.lane.b32.xlu0 %v4426_v29, %s5363_s12  ;;  %v2362_v10 = vadd.f32 %v2360_v8, %v2356_v23  ;;  %v2424_v61 = vadd.f32 %v2422_v7, %v2418_v17  ;;  %v4440_v46 = vpack.c.bf16 %v7447_v15, %v7447_v15  ;;  %v4437_v5 = vpack.c.bf16 %v7395_v18, %v7395_v18 }
0x1765   : > { %v4439_v36 = vpack.c.bf16 %v7441_v12, %v7441_v12  ;;  %v4444_v15 = vpack.c.bf16 %v3425_v51, %v3425_v51  ;;  %v4629_v21 = vpop.f32.mrf.mxu1  ;;  %v4441_v18 = vpack.c.bf16 %v7437_v58, %v7437_v58  ;;  %v4443_v12 = vpack.c.bf16 %v7451_v35, %v7451_v35 }
0x1766   : > { %v4423_v24 = vpack.c.bf16 %v2362_v10, %v2362_v10  ;;  %v2430_v3 = vadd.f32 %v2428_v0, %v2424_v61  ;;  %v4445_v58 = vpack.c.bf16 %v7449_v11, %v7449_v11  ;;  %v4454_v9 = vpack.c.bf16 %v4629_v21, %v4629_v21 }
0x1767   : > { %v3743_v40 = vpop.f32.mrf.mxu1  ;;  %v4448_v35 = vpack.c.bf16 %v3441_v38, %v3441_v38  ;;  %v4451_v28 = vpack.c.bf16 %v3740_v52, %v3740_v52  ;;  %v4453_v51 = vpack.c.bf16 %v4628_v48, %v4628_v48  ;;  %v4447_v11 = vpack.c.bf16 %v7473_v13, %v7473_v13 }
0x1768   : > { %2370 = vrot.lane.b32.xlu1 %v4423_v24, %s5363_s12  ;;  %3161 = vrot.lane.b32.xlu0 %v4436_v41, %s5369_s20  ;;  %v2436_v42 = vadd.f32 %v2434_v27, %v2430_v3  ;;  %v4452_v31 = vpack.c.bf16 %v3743_v40, %v3743_v40 }
0x1769   : > { %v4632_v16 = vpop.f32.mrf.mxu1 }
0x176a   : > { %v4425_v60 = vpack.c.bf16 %v2436_v42, %v2436_v42  ;;  %v4457_v53 = vpack.c.bf16 %v4632_v16, %v4632_v16 }
0x176b   : > { %v3756_v50 = vpop.f32.mrf.mxu1 }
0x176c   : > { %2444 = vrot.lane.b32.xlu1 %v4425_v60, %s5363_s12  ;;  %3165 = vrot.lane.b32.xlu0 %v4438_v43, %s5369_s20  ;;  %s5370_s12 = smov 8   ;;  %v4455_v6 = vpack.c.bf16 %v3756_v50, %v3756_v50 }
0x176d   : > { %v4633_v25 = vpop.f32.mrf.mxu1 }
0x176e   : > { %v4458_v56 = vpack.c.bf16 %v4633_v25, %v4633_v25 }
0x176f   : > { %v3759_v37 = vpop.f32.mrf.mxu1 }
0x1770   : > { %3159 = vrot.lane.b32.xlu1 %v4435_v47, %s5369_s20  ;;  %3169 = vrot.lane.b32.xlu0 %v4440_v46, %s5369_s20  ;;  %v4456_v30 = vpack.c.bf16 %v3759_v37, %v3759_v37 }
0x1774   : > { %3163 = vrot.lane.b32.xlu1 %v4437_v5, %s5369_s20  ;;  %3173 = vrot.lane.b32.xlu0 %v4442_v39, %s5369_s20 }
0x1778   : > { %3167 = vrot.lane.b32.xlu1 %v4439_v36, %s5369_s20  ;;  %3479 = vrot.lane.b32.xlu0 %v4444_v15, %s5370_s12 }
0x177c   : > { %3171 = vrot.lane.b32.xlu1 %v4441_v18, %s5369_s20  ;;  %3483 = vrot.lane.b32.xlu0 %v4446_v22, %s5370_s12  ;;  %v4379_v22 = vld [vmem:[%s7650_s6] ss:$0 sm:$0xff] }
0x1780   : > { %3477 = vrot.lane.b32.xlu1 %v4443_v12, %s5370_s12  ;;  %3797 = vrot.lane.b32.xlu0 %v4452_v31, %s5371_s14 }
0x1784   : > { %3481 = vrot.lane.b32.xlu1 %v4445_v58, %s5370_s12  ;;  %3801 = vrot.lane.b32.xlu0 %v4454_v9, %s5371_s14 }
0x1788   : > { %3795 = vrot.lane.b32.xlu1 %v4451_v28, %s5371_s14  ;;  %3487 = vrot.lane.b32.xlu0 %v4448_v35, %s5370_s12 }
0x178c   : > { %3799 = vrot.lane.b32.xlu1 %v4453_v51, %s5371_s14  ;;  %3491 = vrot.lane.b32.xlu0 %v4450_v54, %s5370_s12 }
0x1790   : > { %3485 = vrot.lane.b32.xlu1 %v4447_v11, %s5370_s12  ;;  %3805 = vrot.lane.b32.xlu0 %v4456_v30, %s5371_s14 }
0x1794   : > { %3489 = vrot.lane.b32.xlu1 %v4449_v2, %s5370_s12  ;;  %3809 = vrot.lane.b32.xlu0 %v4458_v56, %s5371_s14  ;;  %s5277_s12 = scalar_lea.vmem %s5276_s17, 1024 }
0x1795   : > { %p5279_p3 = scmp.lt.s32.totalorder %s5277_s12, %s5271_s11 }
0x1797   : > { %p5280_p5 = por %p5279_p3, %p5278_p2 }
0x1798   : > { %3803 = vrot.lane.b32.xlu1 %v4455_v6, %s5371_s14 }
0x1799   : > { %p5281_p7 = pnand %p5280_p5, %p5274_p0 }
0x179c   : > { %3807 = vrot.lane.b32.xlu1 %v4457_v53, %s5371_s14 }
0x17a1   : > { %v2222_v62 = vpop.permute.xlu1 %2221 }
0x17a2   : > { %2228 = vst.msk [vmem:[#allocation2] sm:$0xf] %vm2227_vm6, %v2222_v62 }
0x17a9   : > { %v2224_v59 = vpop.permute.xlu0 %2223 }
0x17aa   : > { %2229 = vst.msk [vmem:[#allocation2 + $0x4] sm:$0xf] %vm2227_vm6, %v2224_v59 }
0x17b1   : > { %v4750_v32 = vld [vmem:[#allocation2] sm:$0xff]  }
0x17b2   : > { %4646 = vmatprep.mubr.msk.bf16.mxu1 %vm2656_vm5, %v4750_v32 }
0x17ba   : > { %v2297_v55 = vpop.permute.xlu1 %2296 }
0x17bb   : > { %2302 = vst.msk [vmem:[#allocation2 + $0x8] sm:$0xf] %vm2227_vm6, %v2297_v55 }
0x17be   : > { %v2299_v19 = vpop.permute.xlu1 %2298 }
0x17bf   : > { %2303 = vst.msk [vmem:[#allocation2 + $0xc] sm:$0xf] %vm2227_vm6, %v2299_v19 }
0x17c6   : > { %v4752_v45 = vld [vmem:[#allocation2 + $0x8] sm:$0xff]  }
0x17c7   : > { %4647 = vmatmul.mubr.msk.bf16.vlgmr.msra.gmra.mxu1 %vm2656_vm5, %v4752_v45 }
0x17d1   : > { %v2373_v44 = vpop.permute.xlu0 %2372 }
0x17d2   : > { %2377 = vst.msk [vmem:[#allocation2 + $0x14] sm:$0xf] %vm2227_vm6, %v2373_v44 }
0x17d6   : > { %v2447_v63 = vpop.permute.xlu0 %2446 }
0x17d7   : > { %2451 = vst.msk [vmem:[#allocation2 + $0x1c] sm:$0xf] %vm2227_vm6, %v2447_v63 }
0x17da   : > { %v2371_v49 = vpop.permute.xlu1 %2370  ;;  %v3162_v33 = vpop.permute.xlu0 %3161 }
0x17db   : > { %2376 = vst.msk [vmem:[#allocation2 + $0x10] sm:$0xf] %vm2227_vm6, %v2371_v49 }
0x17dc   : > { %3184 = vst.msk [vmem:[#allocation3 + $0x4] sm:$0xf] %vm1249_vm3, %v3162_v33 }
0x17de   : > { %v2445_v26 = vpop.permute.xlu1 %2444  ;;  %v3166_v57 = vpop.permute.xlu0 %3165 }
0x17df   : > { %2450 = vst.msk [vmem:[#allocation2 + $0x18] sm:$0xf] %vm2227_vm6, %v2445_v26 }
0x17e0   : > { %3186 = vst.msk [vmem:[#allocation3 + $0xc] sm:$0xf] %vm1249_vm3, %v3166_v57 }
0x17e2   : > { %v3160_v1 = vpop.permute.xlu1 %3159  ;;  %v4753_v8 = vld [vmem:[#allocation2 + $0x10] sm:$0xff]   ;;  %v3170_v14 = vpop.permute.xlu0 %3169 }
0x17e3   : > { %3183 = vst.msk [vmem:[#allocation3] sm:$0xf] %vm1249_vm3, %v3160_v1  ;;  %3188 = vst.msk [vmem:[#allocation3 + $0x14] sm:$0xf] %vm1249_vm3, %v3170_v14  ;;  %4650 = vmatprep.mubr.msk.bf16.mxu1 %vm2656_vm5, %v4753_v8 }
0x17e6   : > { %v3164_v34 = vpop.permute.xlu1 %3163  ;;  %v4754_v29 = vld [vmem:[#allocation2 + $0x18] sm:$0xff]   ;;  %v3174_v23 = vpop.permute.xlu0 %3173 }
0x17e7   : > { %3185 = vst.msk [vmem:[#allocation3 + $0x8] sm:$0xf] %vm1249_vm3, %v3164_v34  ;;  %3190 = vst.msk [vmem:[#allocation3 + $0x1c] sm:$0xf] %vm1249_vm3, %v3174_v23  ;;  %4651 = vmatmul.mubr.msk.bf16.gmra.mxu1 %vm2656_vm5, %v4754_v29 }
0x17ea   : > { %v3168_v17 = vpop.permute.xlu1 %3167  ;;  %v3480_v7 = vpop.permute.xlu0 %3479 }
0x17eb   : > { %3187 = vst.msk [vmem:[#allocation3 + $0x10] sm:$0xf] %vm1249_vm3, %v3168_v17 }
0x17ec   : > { %3502 = vst.msk [vmem:[#allocation3 + $0x4] sm:$0xf] %vm1738_vm4, %v3480_v7 }
0x17ee   : > { %v3172_v13 = vpop.permute.xlu1 %3171  ;;  %v3484_v10 = vpop.permute.xlu0 %3483 }
0x17ef   : > { %3189 = vst.msk [vmem:[#allocation3 + $0x18] sm:$0xf] %vm1249_vm3, %v3172_v13 }
0x17f0   : > { %3504 = vst.msk [vmem:[#allocation3 + $0xc] sm:$0xf] %vm1738_vm4, %v3484_v10 }
0x17f2   : > { %v3478_v61 = vpop.permute.xlu1 %3477  ;;  %v3798_v0 = vpop.permute.xlu0 %3797 }
0x17f3   : > { %3501 = vst.msk [vmem:[#allocation3] sm:$0xf] %vm1738_vm4, %v3478_v61 }
0x17f4   : > { %3820 = vst.msk [vmem:[#allocation3 + $0x4] sm:$0xf] %vm2227_vm6, %v3798_v0 }
0x17f6   : > { %v3482_v41 = vpop.permute.xlu1 %3481  ;;  %v3802_v24 = vpop.permute.xlu0 %3801 }
0x17f7   : > { %3503 = vst.msk [vmem:[#allocation3 + $0x8] sm:$0xf] %vm1738_vm4, %v3482_v41 }
0x17f8   : > { %3822 = vst.msk [vmem:[#allocation3 + $0xc] sm:$0xf] %vm2227_vm6, %v3802_v24 }
0x17fa   : > { %v3796_v3 = vpop.permute.xlu1 %3795  ;;  %v3488_v27 = vpop.permute.xlu0 %3487 }
0x17fb   : > { %3819 = vst.msk [vmem:[#allocation3] sm:$0xf] %vm2227_vm6, %v3796_v3 }
0x17fc   : > { %3506 = vst.msk [vmem:[#allocation3 + $0x14] sm:$0xf] %vm1738_vm4, %v3488_v27 }
0x17fe   : > { %v3800_v4 = vpop.permute.xlu1 %3799  ;;  %v3492_v42 = vpop.permute.xlu0 %3491 }
0x17ff   : > { %3821 = vst.msk [vmem:[#allocation3 + $0x8] sm:$0xf] %vm2227_vm6, %v3800_v4 }
0x1800   : > { %3508 = vst.msk [vmem:[#allocation3 + $0x1c] sm:$0xf] %vm1738_vm4, %v3492_v42 }
0x1802   : > { %v3486_v43 = vpop.permute.xlu1 %3485  ;;  %v4756_v60 = vld [vmem:[#allocation3] sm:$0xff]   ;;  %v3806_v38 = vpop.permute.xlu0 %3805 }
0x1803   : > { %3505 = vst.msk [vmem:[#allocation3 + $0x10] sm:$0xf] %vm1738_vm4, %v3486_v43  ;;  %4636 = vmatprep.mubr.msk.bf16.mxu0 %vm2656_vm5, %v4756_v60 }
0x1804   : > { %3824 = vst.msk [vmem:[#allocation3 + $0x14] sm:$0xf] %vm2227_vm6, %v3806_v38 }
0x1806   : > { %v3490_v47 = vpop.permute.xlu1 %3489  ;;  %v4757_v46 = vld [vmem:[#allocation3 + $0x8] sm:$0xff]   ;;  %v3810_v48 = vpop.permute.xlu0 %3809 }
0x1807   : > { %3507 = vst.msk [vmem:[#allocation3 + $0x18] sm:$0xf] %vm1738_vm4, %v3490_v47  ;;  %4637 = vmatmul.mubr.msk.bf16.vlgmr.msra.gmra.mxu0 %vm2656_vm5, %v4757_v46 }
0x1808   : > { %3826 = vst.msk [vmem:[#allocation3 + $0x1c] sm:$0xf] %vm2227_vm6, %v3810_v48 }
0x180a   : > { %v3804_v5 = vpop.permute.xlu1 %3803 }
0x180b   : > { %3823 = vst.msk [vmem:[#allocation3 + $0x10] sm:$0xf] %vm2227_vm6, %v3804_v5 }
0x180e   : > { %v3808_v39 = vpop.permute.xlu1 %3807 }
0x180f   : > { %3825 = vst.msk [vmem:[#allocation3 + $0x18] sm:$0xf] %vm2227_vm6, %v3808_v39 }
0x1812   : > { %v4758_v52 = vld [vmem:[#allocation3 + $0x10] sm:$0xff]  }
0x1813   : > { %4640 = vmatprep.mubr.msk.bf16.mxu0 %vm2656_vm5, %v4758_v52 }
0x1816   : > { %v4759_v36 = vld [vmem:[#allocation3 + $0x18] sm:$0xff]  }
0x1817   : > { %4641 = vmatmul.mubr.msk.bf16.gmra.mxu0 %vm2656_vm5, %v4759_v36 }
0x1887   : > { %v4648_v15 = vpop.f32.mrf.mxu1 }
0x1889   : > { %v4022_v21 = vpop.f32.mrf.mxu1 }
0x188b   : > { %v4649_v12 = vpop.f32.mrf.mxu1 }
0x188d   : > { %v4025_v28 = vpop.f32.mrf.mxu1 }
0x18a7   : > { %v4652_v2 = vpop.f32.mrf.mxu1 }
0x18a9   : > { %v4038_v6 = vpop.f32.mrf.mxu1 }
0x18ab   : > { %v4653_v59 = vpop.f32.mrf.mxu1 }
0x18ad   : > { %v4041_v33 = vpop.f32.mrf.mxu1 }
0x18c7   : > { %v4638_v18 = vpop.f32.mrf.mxu0 }
0x18c8   : > { %v4031_v40 = vadd.f32 %v4648_v15, %v4638_v18 }
0x18c9   : > { %v3919_v31 = vpop.f32.mrf.mxu0 }
0x18ca   : > { %v4062_v16 = vadd.f32 %v4379_v22, %v4031_v40  ;;  %v4023_v20 = vadd.f32 %v4022_v21, %v3919_v31 }
0x18cb   : > { %v4639_v58 = vpop.f32.mrf.mxu0 }
0x18cc   : > { %v4461_v9 = vpack.c.bf16 %v4062_v16, %v4062_v16  ;;  %v4060_v50 = vadd.f32 %v4379_v22, %v4023_v20  ;;  %v4034_v35 = vadd.f32 %v4649_v12, %v4639_v58 }
0x18cd   : > { %v3922_v25 = vpop.f32.mrf.mxu0 }
0x18ce   : > { %4103 = vst.msk [vmem:[%s7570_s2 + $0x8] sm:$0xf] %vm4100_vm7, %v4461_v9  ;;  %v4459_v54 = vpack.c.bf16 %v4060_v50, %v4060_v50  ;;  %v4063_v51 = vadd.f32 %v4379_v22, %v4034_v35  ;;  %v4026_v37 = vadd.f32 %v4025_v28, %v3922_v25 }
0x18d0   : > { %4101 = vst.msk [vmem:[%s7570_s2] sm:$0xf] %vm4100_vm7, %v4459_v54  ;;  %v4462_v11 = vpack.c.bf16 %v4063_v51, %v4063_v51  ;;  %v4061_v30 = vadd.f32 %v4379_v22, %v4026_v37 }
0x18d2   : > { %4104 = vst.msk [vmem:[%s7570_s2 + $0xc] sm:$0xf] %vm4100_vm7, %v4462_v11  ;;  %v4460_v56 = vpack.c.bf16 %v4061_v30, %v4061_v30 }
0x18d4   : > { %4102 = vst.msk [vmem:[%s7570_s2 + $0x4] sm:$0xf] %vm4100_vm7, %v4460_v56 }
0x18d7   : > { %v4642_v53 = vpop.f32.mrf.mxu0 }
0x18d8   : > { %v4047_v62 = vadd.f32 %v4652_v2, %v4642_v53 }
0x18d9   : > { %v3935_v32 = vpop.f32.mrf.mxu0 }
0x18da   : > { %v4066_v55 = vadd.f32 %v4379_v22, %v4047_v62  ;;  %v4039_v19 = vadd.f32 %v4038_v6, %v3935_v32 }
0x18db   : > { %v4643_v45 = vpop.f32.mrf.mxu0 }
0x18dc   : > { %v4465_v44 = vpack.c.bf16 %v4066_v55, %v4066_v55  ;;  %v4064_v63 = vadd.f32 %v4379_v22, %v4039_v19  ;;  %v4050_v49 = vadd.f32 %v4653_v59, %v4643_v45 }
0x18dd   : > { %v3938_v26 = vpop.f32.mrf.mxu0 }
0x18de   : > { %4107 = vst.msk [vmem:[%s7570_s2 + $0x18] sm:$0xf] %vm4100_vm7, %v4465_v44  ;;  %v4463_v57 = vpack.c.bf16 %v4064_v63, %v4064_v63  ;;  %v4067_v1 = vadd.f32 %v4379_v22, %v4050_v49  ;;  %v4042_v8 = vadd.f32 %v4041_v33, %v3938_v26 }
0x18e0   : > { %4105 = vst.msk [vmem:[%s7570_s2 + $0x10] sm:$0xf] %vm4100_vm7, %v4463_v57  ;;  %v4466_v14 = vpack.c.bf16 %v4067_v1, %v4067_v1  ;;  %v4065_v34 = vadd.f32 %v4379_v22, %v4042_v8 }
0x18e2   : > { %4108 = vst.msk [vmem:[%s7570_s2 + $0x1c] sm:$0xf] %vm4100_vm7, %v4466_v14  ;;  %v4464_v29 = vpack.c.bf16 %v4065_v34, %v4065_v34 }
0x18e4   : > { %4106 = vst.msk [vmem:[%s7570_s2 + $0x14] sm:$0xf] %vm4100_vm7, %v4464_v29 }
0x18e5   : > { %5284 = shalt.err (!%p5281_p7)
}
0x18e6   : > { %s5285_s22 = scalar_lea.hbm %s7589_s9, 512  ;;  %s5289_s23 = scalar_lea.hbm %s7651_s7, 1024 }
0x18e7   : > { %p5286_p4 = scmp.ne.s32.totalorder %s7589_s9, %s5285_s22  ;;  %p5290_p11 = scmp.lt.s32.totalorder %s7589_s9, %s7651_s7 }
0x18e8   : > { %p5291_p10 = scmp.lt.s32.totalorder %s5289_s23, %s5285_s22 }
0x18e9   : > { %p5287_p6 = pnand %p5286_p4, %p5504_p13 }
0x18ea   : > { %p5292_p1 = por %p5291_p10, %p5290_p11 }
0x18eb   : > { %p5288_p9 = pneg %p5287_p6 }
0x18ed   : > { %p5293_p8 = pnand %p5292_p1, %p5288_p9 }
0x18ef   : > { %5296 = shalt.err (!%p5293_p8)
}
0x18f0   : > { %s5373_s28 = smov 64  }
0x18f1   : > { %4664 = dma.vmem_to_hbm [thread:$0]  (%p5504_p13), %s7593_s30, 512, %s7589_s9, %s4110_s27, %s5373_s28, %s5373_s28, %s5369_s20  }
0x18f2 PF: > { %s7862_s16 = sld [smem:[#allocation14_spill]]  ;;  %s4140_s21 = sand.u32 1, %s5335_s24  }
0x18f3   : > { %p7864_p0 = scmp.ge.s32.totalorder %s5355_s29, 2  ;;  %s4141_s11 = scalar_lea.sflag [#allocation6], %s4140_s21 }
0x18f8   : > { %p7863_p12 = scmp.ne.s32.totalorder %s7862_s16, 0 }
0x18fa   : > { %p4675_p2 = pnand %p7864_p0, %p7863_p12 }
0x18fc   : > { %p4676_p3 = pneg %p4675_p2 }
0x18fe   : > { %5330 = dma.done.wait (%p4676_p3), %s4141_s11, 512  }
0x18ff   : > { %5332 = vsyncadd (%p4676_p3), %s4141_s11, 4294966784  ;;  %s24_s29 = sadd.s32 1, %s5355_s29   ;;  %s7865_s27 = sld [smem:[#allocation13_spill]] }
0x1900   : > { %p21_p5 = scmp.ge.s32.totalorder %s24_s29, 4   ;;  %s7866_s28 = sld [smem:[#allocation15_spill]] }
0x1901   : > { %s7867_s24 = smov %s5339_s25  ;;  %s7868_s25 = smov %s5343_s26 }
0x1902   : > { %s7869_s26 = smov %s5513_s18  ;;  %23 = sbr.rel (!%p21_p5) target bundleno = 9 (0x9), region = 103 }
0x1907   :  { %4146 = vsyncpa [#allocation5], 1 }
0x1908   :  { %4148 = vsyncpa [#allocation5 + $0x1], 1 }
0x1909   :  { %4149 = vsyncpa [#allocation8], 1 }
0x190a   :  { %4150 = vsyncpa [#allocation6], 1 }
0x190b   :  { %4152 = vsyncpa [#allocation6 + $0x1], 1 }

</bundles_post_ra>
